<compile_context>
chip_gen: v7x
topology: tpu7x:2x2x1
jax: 0.10.0
libtpu: 0.0.40
codegen_flags: <defaults>
</compile_context>

<pallas_src>
import math

import numpy as np
import jax
import jax.numpy as jnp
from jax.experimental import pallas as pl
from jax.experimental.pallas import tpu as pltpu

EPS = 1e-5


def _interp_pad_matrix(n_in, pad_before, n_total):
    """(n_total, n_in) constant matrix: 2x bilinear upsample (align_corners=True)
    of a length-n_in axis, placed at offset `pad_before` inside a zero-padded
    length-n_total axis (folds F.pad into the interpolation matmul)."""
    n_up = 2 * n_in
    m = np.zeros((n_total, n_in), np.float32)
    for o in range(n_up):
        src = 0.0 if (n_in == 1 or n_up == 1) else o * (n_in - 1) / (n_up - 1)
        i0 = max(0, min(int(math.floor(src)), n_in - 2)) if n_in > 1 else 0
        i1 = min(i0 + 1, n_in - 1)
        f = float(src - i0)
        m[pad_before + o, i0] += 1.0 - f
        m[pad_before + o, i1] += f
    return m


def _make_up_concat_conv1_kernel(C1, C2, H1, W1, H2, W2, Cmid):
    Ctot = C1 + C2
    Hp, Wp = H2 + 2, W2 + 2
    S = H2 * W2

    def kernel(x1_ref, x2_ref, ph_ref, pwt_ref, w1_ref, b1_ref,
               y1_ref, s1_ref, q1_ref, xp_ref, col_ref):
        # Zero-halo concat buffer; channel concat == writes to adjacent channel
        # ranges.  Re-zeroed each step (see header: "parallel" batch axis makes
        # a program_id==0 one-shot init unsafe across megacores).
        xp_ref[...] = jnp.zeros((Ctot, Hp, Wp), jnp.float32)
        xp_ref[0:C2, 1:1 + H2, 1:1 + W2] = x2_ref[...]

        # Bilinear x2 upsample + F.pad as two constant batched MXU matmuls.
        ph = jnp.broadcast_to(ph_ref[...], (C1, H2, H1))
        pwt = jnp.broadcast_to(pwt_ref[...], (C1, W1, W2))
        t = jnp.einsum("coh,chw->cow", ph, x1_ref[...],
                       preferred_element_type=jnp.float32)        # (C1, H2, W1)
        up = jnp.einsum("cow,cwp->cop", t, pwt,
                        preferred_element_type=jnp.float32)       # (C1, H2, W2)
        xp_ref[C2:C2 + C1, 1:1 + H2, 1:1 + W2] = up

        # conv1 (3x3, pad=1): stack the 9 shifted slabs into one (9*Ctot, S)
        # im2col block -> a single MXU matmul with contracting dim 9*Ctot
        # (vs. nine K=Ctot matmuls), spatial on the lane axis.
        for dy in range(3):
            for dx in range(3):
                tap = 3 * dy + dx
                col_ref[tap * Ctot:(tap + 1) * Ctot, :] = (
                    xp_ref[:, dy:dy + H2, dx:dx + W2].reshape(Ctot, S))
        y = jnp.dot(w1_ref[...], col_ref[...],
                    preferred_element_type=jnp.float32) + b1_ref[...]   # (Cmid, S)

        y1_ref[...] = y                                           # lane-dense store
        s1_ref[...] = jnp.sum(y, axis=1, keepdims=True)           # partial BN1 sums
        q1_ref[...] = jnp.sum(y * y, axis=1, keepdims=True)

    return kernel


def _make_bnrelu_conv2_kernel(Cmid, H2, W2, Cout):
    Hp, Wp = H2 + 2, W2 + 2
    S = H2 * W2

    def kernel(y1_ref, sc1_ref, sh1_ref, w2_ref, b2_ref,
               y2_ref, s2_ref, q2_ref, hp_ref, col_ref):
        # BN1 (pre-folded per-channel scale/shift) + ReLU, written straight into
        # the zero-halo conv buffer (no pad concatenates).
        hp_ref[...] = jnp.zeros((Cmid, Hp, Wp), jnp.float32)
        hp_ref[:, 1:1 + H2, 1:1 + W2] = jnp.maximum(
            y1_ref[...] * sc1_ref[...] + sh1_ref[...], 0.0)       # (Cmid, H2, W2)

        # conv2 (3x3, pad=1): one stacked-tap MXU matmul with K = 9*Cmid.
        for dy in range(3):
            for dx in range(3):
                tap = 3 * dy + dx
                col_ref[tap * Cmid:(tap + 1) * Cmid, :] = (
                    hp_ref[:, dy:dy + H2, dx:dx + W2].reshape(Cmid, S))
        y = jnp.dot(w2_ref[...], col_ref[...],
                    preferred_element_type=jnp.float32) + b2_ref[...]   # (Cout, S)

        y2_ref[...] = y
        s2_ref[...] = jnp.sum(y, axis=1, keepdims=True)           # partial BN2 sums
        q2_ref[...] = jnp.sum(y * y, axis=1, keepdims=True)

    return kernel


def _bnrelu_kernel(y2_ref, sc2_ref, sh2_ref, out_ref):
    # BN2 (folded scale/shift) + ReLU, lane-dense elementwise.
    out_ref[...] = jnp.maximum(y2_ref[...] * sc2_ref[...] + sh2_ref[...], 0.0)


def up_forward_pallas(x1_nchw, x2_nchw, params):
    """Forward of `Up` (bilinear=True). Inputs/outputs are NCHW like PyTorch."""
    B, C1, H1, W1 = x1_nchw.shape
    Bx, C2, H2, W2 = x2_nchw.shape
    assert B == Bx
    w1, b1, g1, be1 = params["w1"], params["b1"], params["g1"], params["be1"]
    w2, b2, g2, be2 = params["w2"], params["b2"], params["g2"], params["be2"]
    Cmid, Ctot = w1.shape[0], w1.shape[1]
    Cout = w2.shape[0]
    assert Ctot == C1 + C2
    diffY, diffX = H2 - 2 * H1, W2 - 2 * W1
    assert diffY >= 0 and diffX >= 0
    Hp, Wp = H2 + 2, W2 + 2
    S = H2 * W2
    n = B * S
    f32 = jnp.float32

    x1 = x1_nchw.astype(f32)
    x2 = x2_nchw.astype(f32)
    ph = jnp.asarray(_interp_pad_matrix(H1, diffY // 2, H2))        # (H2, H1)
    pwt = jnp.asarray(_interp_pad_matrix(W1, diffX // 2, W2).T)     # (W1, W2)
    # PyTorch (O, I, kh, kw) -> stacked-tap weight matrices (O, 9*I), ordered
    # tap-major to match the im2col row layout built in-kernel.
    w1f = jnp.transpose(w1, (2, 3, 1, 0)).reshape(9 * Ctot, Cmid).T.astype(f32)
    w2f = jnp.transpose(w2, (2, 3, 1, 0)).reshape(9 * Cmid, Cout).T.astype(f32)
    b1c = b1.reshape(Cmid, 1).astype(f32)
    b2c = b2.reshape(Cout, 1).astype(f32)

    cparams = pltpu.CompilerParams(
        dimension_semantics=("parallel",),      # megacore sharding on v7x
        vmem_limit_bytes=32 * 1024 * 1024)

    # ---- pass 1: upsample + pad + concat + conv1 (+ partial BN1 stats) ----
    y1, s1, q1 = pl.pallas_call(
        _make_up_concat_conv1_kernel(C1, C2, H1, W1, H2, W2, Cmid),
        grid=(B,),
        in_specs=[
            pl.BlockSpec((None, C1, H1, W1), lambda b: (b, 0, 0, 0)),
            pl.BlockSpec((None, C2, H2, W2), lambda b: (b, 0, 0, 0)),
            pl.BlockSpec((H2, H1), lambda b: (0, 0)),
            pl.BlockSpec((W1, W2), lambda b: (0, 0)),
            pl.BlockSpec((Cmid, 9 * Ctot), lambda b: (0, 0)),
            pl.BlockSpec((Cmid, 1), lambda b: (0, 0)),
        ],
        out_specs=(
            pl.BlockSpec((None, Cmid, S), lambda b: (b, 0, 0)),
            pl.BlockSpec((None, Cmid, 1), lambda b: (b, 0, 0)),
            pl.BlockSpec((None, Cmid, 1), lambda b: (b, 0, 0)),
        ),
        out_shape=(
            jax.ShapeDtypeStruct((B, Cmid, S), f32),
            jax.ShapeDtypeStruct((B, Cmid, 1), f32),
            jax.ShapeDtypeStruct((B, Cmid, 1), f32),
        ),
        scratch_shapes=[pltpu.VMEM((Ctot, Hp, Wp), f32),
                        pltpu.VMEM((9 * Ctot, S), f32)],
        compiler_params=cparams,
    )(x1, x2, ph, pwt, w1f, b1c)

    # Fold global batch stats + affine into a per-channel scale/shift (tiny glue).
    mean1 = jnp.sum(s1, axis=0) / n
    var1 = jnp.maximum(jnp.sum(q1, axis=0) / n - mean1 * mean1, 0.0)
    sc1 = g1.astype(f32).reshape(Cmid, 1) * jax.lax.rsqrt(var1 + EPS)
    sh1 = be1.astype(f32).reshape(Cmid, 1) - mean1 * sc1

    # ---- pass 2: BN1 + ReLU + conv2 (+ partial BN2 stats) ----
    y2, s2, q2 = pl.pallas_call(
        _make_bnrelu_conv2_kernel(Cmid, H2, W2, Cout),
        grid=(B,),
        in_specs=[
            pl.BlockSpec((None, Cmid, H2, W2), lambda b: (b, 0, 0, 0)),
            pl.BlockSpec((Cmid, 1, 1), lambda b: (0, 0, 0)),
            pl.BlockSpec((Cmid, 1, 1), lambda b: (0, 0, 0)),
            pl.BlockSpec((Cout, 9 * Cmid), lambda b: (0, 0)),
            pl.BlockSpec((Cout, 1), lambda b: (0, 0)),
        ],
        out_specs=(
            pl.BlockSpec((None, Cout, S), lambda b: (b, 0, 0)),
            pl.BlockSpec((None, Cout, 1), lambda b: (b, 0, 0)),
            pl.BlockSpec((None, Cout, 1), lambda b: (b, 0, 0)),
        ),
        out_shape=(
            jax.ShapeDtypeStruct((B, Cout, S), f32),
            jax.ShapeDtypeStruct((B, Cout, 1), f32),
            jax.ShapeDtypeStruct((B, Cout, 1), f32),
        ),
        scratch_shapes=[pltpu.VMEM((Cmid, Hp, Wp), f32),
                        pltpu.VMEM((9 * Cmid, S), f32)],
        compiler_params=cparams,
    )(y1.reshape(B, Cmid, H2, W2), sc1.reshape(Cmid, 1, 1),
      sh1.reshape(Cmid, 1, 1), w2f, b2c)

    mean2 = jnp.sum(s2, axis=0) / n
    var2 = jnp.maximum(jnp.sum(q2, axis=0) / n - mean2 * mean2, 0.0)
    sc2 = g2.astype(f32).reshape(Cout, 1) * jax.lax.rsqrt(var2 + EPS)
    sh2 = be2.astype(f32).reshape(Cout, 1) - mean2 * sc2

    # ---- pass 3: BN2 + ReLU ----
    out = pl.pallas_call(
        _bnrelu_kernel,
        grid=(B,),
        in_specs=[
            pl.BlockSpec((None, Cout, S), lambda b: (b, 0, 0)),
            pl.BlockSpec((Cout, 1), lambda b: (0, 0)),
            pl.BlockSpec((Cout, 1), lambda b: (0, 0)),
        ],
        out_specs=pl.BlockSpec((None, Cout, S), lambda b: (b, 0, 0)),
        out_shape=jax.ShapeDtypeStruct((B, Cout, S), f32),
        compiler_params=cparams,
    )(y2, sc2, sh2)

    return out.reshape(B, Cout, H2, W2)


def up_forward_ref(x1, x2, params):
    """Pure-JAX reference (NCHW) for validation."""
    B, C1, H1, W1 = x1.shape
    _, C2, H2, W2 = x2.shape
    ph = jnp.asarray(_interp_pad_matrix(H1, (H2 - 2 * H1) // 2, H2))
    pw = jnp.asarray(_interp_pad_matrix(W1, (W2 - 2 * W1) // 2, W2))
    up = jnp.einsum("oh,bchw->bcow", ph, x1)
    up = jnp.einsum("pw,bcow->bcop", pw, up)
    x = jnp.concatenate([x2, up], axis=1)

    def conv_bn_relu(x, w, b, g, be):
        y = jax.lax.conv_general_dilated(
            x, w, (1, 1), ((1, 1), (1, 1)),
            dimension_numbers=("NCHW", "OIHW", "NCHW")) + b[None, :, None, None]
        mean = y.mean(axis=(0, 2, 3), keepdims=True)
        var = ((y - mean) ** 2).mean(axis=(0, 2, 3), keepdims=True)
        yn = (y - mean) * jax.lax.rsqrt(var + EPS)
        return jnp.maximum(yn * g[None, :, None, None] + be[None, :, None, None], 0.0)

    h = conv_bn_relu(x, params["w1"], params["b1"], params["g1"], params["be1"])
    return conv_bn_relu(h, params["w2"], params["b2"], params["g2"], params["be2"])


if __name__ == "__main__":
    # Up(in_channels=8, out_channels=4, bilinear=True)
    in_channels, out_channels = 8, 4
    mid_channels = in_channels // 2          # DoubleConv mid channels
    B, H1, W1 = 2, 16, 16
    C1 = in_channels // 2                    # decoder-stream channels (x1)
    C2 = in_channels - C1                    # skip-connection channels (x2)
    H2, W2 = 2 * H1, 2 * W1

    key = jax.random.PRNGKey(0)
    ks = jax.random.split(key, 10)
    x1 = jax.random.normal(ks[0], (B, C1, H1, W1), jnp.float32)
    x2 = jax.random.normal(ks[1], (B, C2, H2, W2), jnp.float32)

    params = {
        "w1": 0.1 * jax.random.normal(ks[2], (mid_channels, in_channels, 3, 3), jnp.float32),
        "b1": 0.1 * jax.random.normal(ks[3], (mid_channels,), jnp.float32),
        "g1": 1.0 + 0.1 * jax.random.normal(ks[4], (mid_channels,), jnp.float32),
        "be1": 0.1 * jax.random.normal(ks[5], (mid_channels,), jnp.float32),
        "w2": 0.1 * jax.random.normal(ks[6], (out_channels, mid_channels, 3, 3), jnp.float32),
        "b2": 0.1 * jax.random.normal(ks[7], (out_channels,), jnp.float32),
        "g2": 1.0 + 0.1 * jax.random.normal(ks[8], (out_channels,), jnp.float32),
        "be2": 0.1 * jax.random.normal(ks[9], (out_channels,), jnp.float32),
    }

    out = jax.block_until_ready(up_forward_pallas(x1, x2, params))
    ref = jax.block_until_ready(up_forward_ref(x1, x2, params))

    err = float(jnp.max(jnp.abs(out - ref)))
    assert out.shape == (B, out_channels, H2, W2), out.shape
    # Default (bf16-pass) MXU precision in-kernel vs XLA's conv in the reference:
    # a few 1e-3 of noise is expected; 2e-2 still cleanly separates precision
    # noise from real indexing / BN-statistics bugs.
    assert err < 2e-2, f"max abs diff vs reference: {err}"
    print("KERNEL_OK")
</pallas_src>

<mosaic_0001>
module attributes {stable_mosaic.version = 11 : i64} {
  func.func @kernel(%arg0: i32, %arg1: memref<1x4x16x16xf32, #tpu.memory_space<vmem>>, %arg2: memref<1x4x32x32xf32, #tpu.memory_space<vmem>>, %arg3: memref<32x16xf32, #tpu.memory_space<vmem>>, %arg4: memref<16x32xf32, #tpu.memory_space<vmem>>, %arg5: memref<4x72xf32, #tpu.memory_space<vmem>>, %arg6: memref<4x1xf32, #tpu.memory_space<vmem>>, %arg7: memref<1x4x1024xf32, #tpu.memory_space<vmem>>, %arg8: memref<1x4x1xf32, #tpu.memory_space<vmem>>, %arg9: memref<1x4x1xf32, #tpu.memory_space<vmem>>, %arg10: memref<8x34x34xf32, #tpu.memory_space<vmem>>, %arg11: memref<72x1024xf32, #tpu.memory_space<vmem>>) attributes {dimension_semantics = [#tpu.dimension_semantics<parallel>], iteration_bounds = array<i64: 2>, scalar_prefetch = 0 : i64, scratch_operands = 2 : i64, tpu.core_type = #tpu.core_type<tc>, window_params = [{transform_indices = @transform_0, window_bounds = array<i64: 1, 4, 16, 16>}, {transform_indices = @transform_1, window_bounds = array<i64: 1, 4, 32, 32>}, {pipeline_mode = #tpu.pipeline_mode<synchronous>, transform_indices = @transform_2, window_bounds = array<i64: 32, 16>}, {pipeline_mode = #tpu.pipeline_mode<synchronous>, transform_indices = @transform_3, window_bounds = array<i64: 16, 32>}, {pipeline_mode = #tpu.pipeline_mode<synchronous>, transform_indices = @transform_4, window_bounds = array<i64: 4, 72>}, {pipeline_mode = #tpu.pipeline_mode<synchronous>, transform_indices = @transform_5, window_bounds = array<i64: 4, 1>}, {transform_indices = @transform_6, window_bounds = array<i64: 1, 4, 1024>}, {transform_indices = @transform_7, window_bounds = array<i64: 1, 4, 1>}, {transform_indices = @transform_8, window_bounds = array<i64: 1, 4, 1>}]} {
    %cst = arith.constant 0.000000e+00 : f32
    %0 = vector.broadcast %cst : f32 to vector<8x34x34xf32>
    %c0 = arith.constant 0 : index
    %c0_0 = arith.constant 0 : index
    %c0_1 = arith.constant 0 : index
    %1 = vector.load %arg10[%c0, %c0_0, %c0_1] : memref<8x34x34xf32, #tpu.memory_space<vmem>>, vector<8x34x34xf32>
    tpu.vector_store %arg10[%c0, %c0_0, %c0_1], %0 {strides = array<i32>} : memref<8x34x34xf32, #tpu.memory_space<vmem>>, vector<8x34x34xf32>,
    %c0_2 = arith.constant 0 : index
    %c0_3 = arith.constant 0 : index
    %c0_4 = arith.constant 0 : index
    %c0_5 = arith.constant 0 : index
    %2 = vector.load %arg2[%c0_2, %c0_3, %c0_4, %c0_5] : memref<1x4x32x32xf32, #tpu.memory_space<vmem>>, vector<1x4x32x32xf32>
    %3 = vector.shape_cast %2 : vector<1x4x32x32xf32> to vector<4x32x32xf32>
    %c0_6 = arith.constant 0 : index
    %c1 = arith.constant 1 : index
    %c1_7 = arith.constant 1 : index
    %4 = vector.load %arg10[%c0_6, %c1, %c1_7] : memref<8x34x34xf32, #tpu.memory_space<vmem>>, vector<4x32x32xf32>
    tpu.vector_store %arg10[%c0_6, %c1, %c1_7], %3 {strides = array<i32>} : memref<8x34x34xf32, #tpu.memory_space<vmem>>, vector<4x32x32xf32>,
    %c0_8 = arith.constant 0 : index
    %c0_9 = arith.constant 0 : index
    %5 = vector.load %arg3[%c0_8, %c0_9] : memref<32x16xf32, #tpu.memory_space<vmem>>, vector<32x16xf32>
    %6 = vector.shape_cast %5 : vector<32x16xf32> to vector<1x32x16xf32>
    %7 = vector.broadcast %6 : vector<1x32x16xf32> to vector<4x32x16xf32>
    %c0_10 = arith.constant 0 : index
    %c0_11 = arith.constant 0 : index
    %8 = vector.load %arg4[%c0_10, %c0_11] : memref<16x32xf32, #tpu.memory_space<vmem>>, vector<16x32xf32>
    %9 = vector.shape_cast %8 : vector<16x32xf32> to vector<1x16x32xf32>
    %10 = vector.broadcast %9 : vector<1x16x32xf32> to vector<4x16x32xf32>
    %c0_12 = arith.constant 0 : index
    %c0_13 = arith.constant 0 : index
    %c0_14 = arith.constant 0 : index
    %c0_15 = arith.constant 0 : index
    %11 = vector.load %arg1[%c0_12, %c0_13, %c0_14, %c0_15] : memref<1x4x16x16xf32, #tpu.memory_space<vmem>>, vector<1x4x16x16xf32>
    %12 = vector.shape_cast %11 : vector<1x4x16x16xf32> to vector<4x16x16xf32>
    "tpu.trace_start"() <{level = 10 : i32, message = "coh,chw->cow"}> : () -> ()
    %cst_16 = arith.constant dense<0.000000e+00> : vector<4x32x16xf32>
    %13 = tpu.matmul %7, %12, %cst_16 {dimension_numbers = #tpu.dot_dimension_numbers<[2], [1], [1], [2], [0, 0, 0, 1, 1, 2], [0], [0]>} : vector<4x32x16xf32>, vector<4x16x16xf32>, vector<4x32x16xf32> -> vector<4x32x16xf32>
    "tpu.trace_stop"() : () -> ()
    "tpu.trace_start"() <{level = 10 : i32, message = "cow,cwp->cop"}> : () -> ()
    %cst_17 = arith.constant dense<0.000000e+00> : vector<4x32x32xf32>
    %14 = tpu.matmul %13, %10, %cst_17 {dimension_numbers = #tpu.dot_dimension_numbers<[2], [1], [1], [2], [0, 0, 0, 1, 1, 2], [0], [0]>} : vector<4x32x16xf32>, vector<4x16x32xf32>, vector<4x32x32xf32> -> vector<4x32x32xf32>
    "tpu.trace_stop"() : () -> ()
    %c4 = arith.constant 4 : index
    %c1_18 = arith.constant 1 : index
    %c1_19 = arith.constant 1 : index
    %15 = vector.load %arg10[%c4, %c1_18, %c1_19] : memref<8x34x34xf32, #tpu.memory_space<vmem>>, vector<4x32x32xf32>
    tpu.vector_store %arg10[%c4, %c1_18, %c1_19], %14 {strides = array<i32>} : memref<8x34x34xf32, #tpu.memory_space<vmem>>, vector<4x32x32xf32>,
    %c0_20 = arith.constant 0 : index
    %c0_21 = arith.constant 0 : index
    %c0_22 = arith.constant 0 : index
    %16 = vector.load %arg10[%c0_20, %c0_21, %c0_22] : memref<8x34x34xf32, #tpu.memory_space<vmem>>, vector<8x32x32xf32>
    %17 = vector.shape_cast %16 : vector<8x32x32xf32> to vector<8x1024xf32>
    %c0_23 = arith.constant 0 : index
    %c0_24 = arith.constant 0 : index
    %18 = vector.load %arg11[%c0_23, %c0_24] : memref<72x1024xf32, #tpu.memory_space<vmem>>, vector<8x1024xf32>
    tpu.vector_store %arg11[%c0_23, %c0_24], %17 {strides = array<i32>} : memref<72x1024xf32, #tpu.memory_space<vmem>>, vector<8x1024xf32>,
    %c0_25 = arith.constant 0 : index
    %c0_26 = arith.constant 0 : index
    %c1_27 = arith.constant 1 : index
    %19 = vector.load %arg10[%c0_25, %c0_26, %c1_27] : memref<8x34x34xf32, #tpu.memory_space<vmem>>, vector<8x32x32xf32>
    %20 = vector.shape_cast %19 : vector<8x32x32xf32> to vector<8x1024xf32>
    %c8 = arith.constant 8 : index
    %c0_28 = arith.constant 0 : index
    %21 = vector.load %arg11[%c8, %c0_28] : memref<72x1024xf32, #tpu.memory_space<vmem>>, vector<8x1024xf32>
    tpu.vector_store %arg11[%c8, %c0_28], %20 {strides = array<i32>} : memref<72x1024xf32, #tpu.memory_space<vmem>>, vector<8x1024xf32>,
    %c0_29 = arith.constant 0 : index
    %c0_30 = arith.constant 0 : index
    %c2 = arith.constant 2 : index
    %22 = vector.load %arg10[%c0_29, %c0_30, %c2] : memref<8x34x34xf32, #tpu.memory_space<vmem>>, vector<8x32x32xf32>
    %23 = vector.shape_cast %22 : vector<8x32x32xf32> to vector<8x1024xf32>
    %c16 = arith.constant 16 : index
    %c0_31 = arith.constant 0 : index
    %24 = vector.load %arg11[%c16, %c0_31] : memref<72x1024xf32, #tpu.memory_space<vmem>>, vector<8x1024xf32>
    tpu.vector_store %arg11[%c16, %c0_31], %23 {strides = array<i32>} : memref<72x1024xf32, #tpu.memory_space<vmem>>, vector<8x1024xf32>,
    %c0_32 = arith.constant 0 : index
    %c1_33 = arith.constant 1 : index
    %c0_34 = arith.constant 0 : index
    %25 = vector.load %arg10[%c0_32, %c1_33, %c0_34] : memref<8x34x34xf32, #tpu.memory_space<vmem>>, vector<8x32x32xf32>
    %26 = vector.shape_cast %25 : vector<8x32x32xf32> to vector<8x1024xf32>
    %c24 = arith.constant 24 : index
    %c0_35 = arith.constant 0 : index
    %27 = vector.load %arg11[%c24, %c0_35] : memref<72x1024xf32, #tpu.memory_space<vmem>>, vector<8x1024xf32>
    tpu.vector_store %arg11[%c24, %c0_35], %26 {strides = array<i32>} : memref<72x1024xf32, #tpu.memory_space<vmem>>, vector<8x1024xf32>,
    %c0_36 = arith.constant 0 : index
    %c1_37 = arith.constant 1 : index
    %c1_38 = arith.constant 1 : index
    %28 = vector.load %arg10[%c0_36, %c1_37, %c1_38] : memref<8x34x34xf32, #tpu.memory_space<vmem>>, vector<8x32x32xf32>
    %29 = vector.shape_cast %28 : vector<8x32x32xf32> to vector<8x1024xf32>
    %c32 = arith.constant 32 : index
    %c0_39 = arith.constant 0 : index
    %30 = vector.load %arg11[%c32, %c0_39] : memref<72x1024xf32, #tpu.memory_space<vmem>>, vector<8x1024xf32>
    tpu.vector_store %arg11[%c32, %c0_39], %29 {strides = array<i32>} : memref<72x1024xf32, #tpu.memory_space<vmem>>, vector<8x1024xf32>,
    %c0_40 = arith.constant 0 : index
    %c1_41 = arith.constant 1 : index
    %c2_42 = arith.constant 2 : index
    %31 = vector.load %arg10[%c0_40, %c1_41, %c2_42] : memref<8x34x34xf32, #tpu.memory_space<vmem>>, vector<8x32x32xf32>
    %32 = vector.shape_cast %31 : vector<8x32x32xf32> to vector<8x1024xf32>
    %c40 = arith.constant 40 : index
    %c0_43 = arith.constant 0 : index
    %33 = vector.load %arg11[%c40, %c0_43] : memref<72x1024xf32, #tpu.memory_space<vmem>>, vector<8x1024xf32>
    tpu.vector_store %arg11[%c40, %c0_43], %32 {strides = array<i32>} : memref<72x1024xf32, #tpu.memory_space<vmem>>, vector<8x1024xf32>,
    %c0_44 = arith.constant 0 : index
    %c2_45 = arith.constant 2 : index
    %c0_46 = arith.constant 0 : index
    %34 = vector.load %arg10[%c0_44, %c2_45, %c0_46] : memref<8x34x34xf32, #tpu.memory_space<vmem>>, vector<8x32x32xf32>
    %35 = vector.shape_cast %34 : vector<8x32x32xf32> to vector<8x1024xf32>
    %c48 = arith.constant 48 : index
    %c0_47 = arith.constant 0 : index
    %36 = vector.load %arg11[%c48, %c0_47] : memref<72x1024xf32, #tpu.memory_space<vmem>>, vector<8x1024xf32>
    tpu.vector_store %arg11[%c48, %c0_47], %35 {strides = array<i32>} : memref<72x1024xf32, #tpu.memory_space<vmem>>, vector<8x1024xf32>,
    %c0_48 = arith.constant 0 : index
    %c2_49 = arith.constant 2 : index
    %c1_50 = arith.constant 1 : index
    %37 = vector.load %arg10[%c0_48, %c2_49, %c1_50] : memref<8x34x34xf32, #tpu.memory_space<vmem>>, vector<8x32x32xf32>
    %38 = vector.shape_cast %37 : vector<8x32x32xf32> to vector<8x1024xf32>
    %c56 = arith.constant 56 : index
    %c0_51 = arith.constant 0 : index
    %39 = vector.load %arg11[%c56, %c0_51] : memref<72x1024xf32, #tpu.memory_space<vmem>>, vector<8x1024xf32>
    tpu.vector_store %arg11[%c56, %c0_51], %38 {strides = array<i32>} : memref<72x1024xf32, #tpu.memory_space<vmem>>, vector<8x1024xf32>,
    %c0_52 = arith.constant 0 : index
    %c2_53 = arith.constant 2 : index
    %c2_54 = arith.constant 2 : index
    %40 = vector.load %arg10[%c0_52, %c2_53, %c2_54] : memref<8x34x34xf32, #tpu.memory_space<vmem>>, vector<8x32x32xf32>
    %41 = vector.shape_cast %40 : vector<8x32x32xf32> to vector<8x1024xf32>
    %c64 = arith.constant 64 : index
    %c0_55 = arith.constant 0 : index
    %42 = vector.load %arg11[%c64, %c0_55] : memref<72x1024xf32, #tpu.memory_space<vmem>>, vector<8x1024xf32>
    tpu.vector_store %arg11[%c64, %c0_55], %41 {strides = array<i32>} : memref<72x1024xf32, #tpu.memory_space<vmem>>, vector<8x1024xf32>,
    %c0_56 = arith.constant 0 : index
    %c0_57 = arith.constant 0 : index
    %43 = vector.load %arg5[%c0_56, %c0_57] : memref<4x72xf32, #tpu.memory_space<vmem>>, vector<4x72xf32>
    %c0_58 = arith.constant 0 : index
    %c0_59 = arith.constant 0 : index
    %44 = vector.load %arg11[%c0_58, %c0_59] : memref<72x1024xf32, #tpu.memory_space<vmem>>, vector<72x1024xf32>
    %cst_60 = arith.constant dense<0.000000e+00> : vector<4x1024xf32>
    %45 = tpu.matmul %43, %44, %cst_60 {dimension_numbers = #tpu.dot_dimension_numbers<[1], [0], [0], [1], [0, 0, 1, 1], [], []>} : vector<4x72xf32>, vector<72x1024xf32>, vector<4x1024xf32> -> vector<4x1024xf32>
    %c0_61 = arith.constant 0 : index
    %c0_62 = arith.constant 0 : index
    %46 = vector.load %arg6[%c0_61, %c0_62] : memref<4x1xf32, #tpu.memory_space<vmem>>, vector<4x1xf32>
    %47 = vector.broadcast %46 : vector<4x1xf32> to vector<4x1024xf32>
    %48 = arith.addf %45, %47 : vector<4x1024xf32>
    %c0_63 = arith.constant 0 : index
    %c0_64 = arith.constant 0 : index
    %c0_65 = arith.constant 0 : index
    %49 = vector.load %arg7[%c0_63, %c0_64, %c0_65] : memref<1x4x1024xf32, #tpu.memory_space<vmem>>, vector<1x4x1024xf32>
    %50 = vector.shape_cast %49 : vector<1x4x1024xf32> to vector<4x1024xf32>
    %51 = vector.shape_cast %48 : vector<4x1024xf32> to vector<1x4x1024xf32>
    tpu.vector_store %arg7[%c0_63, %c0_64, %c0_65], %51 {strides = array<i32>} : memref<1x4x1024xf32, #tpu.memory_space<vmem>>, vector<1x4x1024xf32>,
    %cst_66 = arith.constant dense<0.000000e+00> : vector<4xf32>
    %52 = vector.multi_reduction <add>, %48, %cst_66 [1] : vector<4x1024xf32> to vector<4xf32>
    %53 = vector.shape_cast %52 : vector<4xf32> to vector<4x1xf32>
    %c0_67 = arith.constant 0 : index
    %c0_68 = arith.constant 0 : index
    %c0_69 = arith.constant 0 : index
    %54 = vector.load %arg8[%c0_67, %c0_68, %c0_69] : memref<1x4x1xf32, #tpu.memory_space<vmem>>, vector<1x4x1xf32>
    %55 = vector.shape_cast %54 : vector<1x4x1xf32> to vector<4x1xf32>
    %56 = vector.shape_cast %53 : vector<4x1xf32> to vector<1x4x1xf32>
    tpu.vector_store %arg8[%c0_67, %c0_68, %c0_69], %56 {strides = array<i32>} : memref<1x4x1xf32, #tpu.memory_space<vmem>>, vector<1x4x1xf32>,
    %57 = arith.mulf %48, %48 : vector<4x1024xf32>
    %cst_70 = arith.constant dense<0.000000e+00> : vector<4xf32>
    %58 = vector.multi_reduction <add>, %57, %cst_70 [1] : vector<4x1024xf32> to vector<4xf32>
    %59 = vector.shape_cast %58 : vector<4xf32> to vector<4x1xf32>
    %c0_71 = arith.constant 0 : index
    %c0_72 = arith.constant 0 : index
    %c0_73 = arith.constant 0 : index
    %60 = vector.load %arg9[%c0_71, %c0_72, %c0_73] : memref<1x4x1xf32, #tpu.memory_space<vmem>>, vector<1x4x1xf32>
    %61 = vector.shape_cast %60 : vector<1x4x1xf32> to vector<4x1xf32>
    %62 = vector.shape_cast %59 : vector<4x1xf32> to vector<1x4x1xf32>
    tpu.vector_store %arg9[%c0_71, %c0_72, %c0_73], %62 {strides = array<i32>} : memref<1x4x1xf32, #tpu.memory_space<vmem>>, vector<1x4x1xf32>,
    return
  }
  func.func @transform_0(%arg0: i32) -> (i32, i32, i32, i32) {
    %c0_i32 = arith.constant 0 : i32
    %c0_i32_0 = arith.constant 0 : i32
    %c0_i32_1 = arith.constant 0 : i32
    %c0_i32_2 = arith.constant 0 : i32
    return %arg0, %c0_i32, %c0_i32_0, %c0_i32_1 : i32, i32, i32, i32
  }
  func.func @transform_1(%arg0: i32) -> (i32, i32, i32, i32) {
    %c0_i32 = arith.constant 0 : i32
    %c0_i32_0 = arith.constant 0 : i32
    %c0_i32_1 = arith.constant 0 : i32
    %c0_i32_2 = arith.constant 0 : i32
    return %arg0, %c0_i32, %c0_i32_0, %c0_i32_1 : i32, i32, i32, i32
  }
  func.func @transform_2(%arg0: i32) -> (i32, i32) {
    %c0_i32 = arith.constant 0 : i32
    %c0_i32_0 = arith.constant 0 : i32
    %c0_i32_1 = arith.constant 0 : i32
    return %c0_i32, %c0_i32_0 : i32, i32
  }
  func.func @transform_3(%arg0: i32) -> (i32, i32) {
    %c0_i32 = arith.constant 0 : i32
    %c0_i32_0 = arith.constant 0 : i32
    %c0_i32_1 = arith.constant 0 : i32
    return %c0_i32, %c0_i32_0 : i32, i32
  }
  func.func @transform_4(%arg0: i32) -> (i32, i32) {
    %c0_i32 = arith.constant 0 : i32
    %c0_i32_0 = arith.constant 0 : i32
    %c0_i32_1 = arith.constant 0 : i32
    return %c0_i32, %c0_i32_0 : i32, i32
  }
  func.func @transform_5(%arg0: i32) -> (i32, i32) {
    %c0_i32 = arith.constant 0 : i32
    %c0_i32_0 = arith.constant 0 : i32
    %c0_i32_1 = arith.constant 0 : i32
    return %c0_i32, %c0_i32_0 : i32, i32
  }
  func.func @transform_6(%arg0: i32) -> (i32, i32, i32) {
    %c0_i32 = arith.constant 0 : i32
    %c0_i32_0 = arith.constant 0 : i32
    %c0_i32_1 = arith.constant 0 : i32
    return %arg0, %c0_i32, %c0_i32_0 : i32, i32, i32
  }
  func.func @transform_7(%arg0: i32) -> (i32, i32, i32) {
    %c0_i32 = arith.constant 0 : i32
    %c0_i32_0 = arith.constant 0 : i32
    %c0_i32_1 = arith.constant 0 : i32
    return %arg0, %c0_i32, %c0_i32_0 : i32, i32, i32
  }
  func.func @transform_8(%arg0: i32) -> (i32, i32, i32) {
    %c0_i32 = arith.constant 0 : i32
    %c0_i32_0 = arith.constant 0 : i32
    %c0_i32_1 = arith.constant 0 : i32
    return %arg0, %c0_i32, %c0_i32_0 : i32, i32, i32
  }
}

</mosaic_0001>

<bundles_post_ra>
// kernel: tpu_custom_call.1
= control target key start
LH: loop header
LB: loop body
LE: loop exit
PB: predicated region body
PF: predicated region fallthrough
CT: control target
= control target key end

     0   :  { %s14944_s0 = inlined_call_operand.hbm [shape: f32[2,4,16,16], index: 0, kind: input, shape index: {}]   ;;  %s14945_s1 = inlined_call_operand.hbm [shape: f32[2,4,32,32], index: 1, kind: input, shape index: {}]   ;;  %s14946_s2 = inlined_call_operand.vmem [shape: f32[32,16], index: 2, kind: input, shape index: {}]   ;;  %s14947_s3 = inlined_call_operand.vmem [shape: f32[16,32], index: 3, kind: input, shape index: {}]   ;;  %s14948_s4 = inlined_call_operand.vmem [shape: f32[4,72], index: 4, kind: input, shape index: {}]   ;;  %s14949_s5 = inlined_call_operand.vmem [shape: f32[4,1], index: 5, kind: input, shape index: {}]   ;;  %s14950_s6 = inlined_call_operand.hbm [shape: f32[2,4,1024], index: 6, kind: output, shape index: {0}]   ;;  %s14951_s7 = inlined_call_operand.vmem [shape: f32[2,4,1], index: 7, kind: output, shape index: {1}]   ;;  %s14952_s8 = inlined_call_operand.vmem [shape: f32[2,4,1], index: 8, kind: output, shape index: {2}]  }
   0x1   :  { %15443 = sst [smem:[#allocation228_spill]] %s14944_s0 }
   0x2   :  { %14 = vsyncpa [#allocation5], 0 }
   0x3   :  { %16 = vsyncpa [#allocation5 + $0x1], 0 }
   0x4   :  { %17 = vsyncpa [#allocation8], 0 }
   0x5   :  { %19 = vsyncpa [#allocation8 + $0x1], 0 }
   0x6   :  { %20 = vsyncpa [#allocation6], 0 }
   0x7   :  { %22 = vsyncpa [#allocation6 + $0x1], 0  ;;  %s10209_s27 = smov 0   ;;  %s10211_s28 = smov 0  }
   0x8   :  { %s10213_s29 = smov 0   ;;  %s10215_s30 = smov 0  }
   0x9 LB: > { %15444 = sst [smem:[#allocation13_spill]] %s10143_s29  ;;  %s10230_s9 = sadd.s32 4294967295, %s10147_s30   ;;  %s10147_s30 = sphi %s10215_s30, %s16580_s30   ;;  %s10143_s29 = sphi %s10213_s29, %s16579_s29   ;;  %s10139_s28 = sphi %s10211_s28, %s16578_s28   ;;  %s10135_s27 = sphi %s10209_s27, %s16577_s27  }
   0xa   : > { %s9070_s10 = sadd.s32 4294967294, %s10147_s30   ;;  %s10234_s11 = sadd.s32 1, %s10147_s30  }
   0xb   : > { %s35_s12 = sadd.s32 1, %s10143_s29  ;;  %s32_s13 = ssub.s32 %s10147_s30, %s10234_s11 }
   0xc   : > { %p42_p0 = scmp.ne.s32.totalorder %s10143_s29, %s10139_s28  ;;  %p33_p1 = scmp.eq.s32.totalorder %s32_s13, 0 }
   0xd   : > { %p43_p2 = scmp.eq.s32.totalorder %s10147_s30, 0  ;;  %p48_p3 = scmp.ne.s32.totalorder %s10139_s28, %s10135_s27 }
   0xe   : > { %p49_p4 = scmp.eq.s32.totalorder %s10230_s9, 0  ;;  %p182_p7 = scmp.eq.s32.totalorder %s10230_s9, 1 }
   0xf   : > { %s10246_s14 = scalar_select %p33_p1, %s10143_s29, %s35_s12  }
  0x10   : > { %p10248_p5 = por %p43_p2, %p42_p0  ;;  %p10252_p6 = por %p49_p4, %p48_p3 }
  0x11   : > { %15445 = sst [smem:[#allocation14_spill]] %s10246_s14  ;;  %p188_p8 = scmp.eq.s32.totalorder %s9070_s10, 1 }
  0x12   : > { %s15447_s16 = scalar_select %p10252_p6, 1, 0 }
  0x13   : > { %p9370_p10 = scmp.lt.s32.totalorder %s10147_s30, 2  ;;  %p10259_p11 = por %p182_p7, %p42_p0 }
  0x14   : > { %p10263_p12 = por %p188_p8, %p48_p3  ;;  %s10268_s19 = sand.u32 1, %s10143_s29  }
  0x15   : > { %s15448_s17 = scalar_select %p10259_p11, 1, 0 }
  0x16   : > { %s15449_s18 = scalar_select %p10263_p12, 1, 0 }
  0x17   : > { %s9126_s20 = sshll.u32 %s10147_s30, 10  ;;  %s9073_s21 = sshll.u32 %s10268_s19, 6 }
  0x18   : > { %s15450_s0 = sld [smem:[#allocation228_spill]]  ;;  %s276_s25 = scalar_lea.vmem [#allocation4], %s9073_s21 }
  0x19   : > { %s283_s26 = sshll.u32 %s276_s25, 4  ;;  %p10279_p13 = pnand %p9370_p10, %p10248_p5  ;;  %s10283_s26 = int_to_ptr.vmem [resolvable:$true] %s283_s26 }
  0x1a   : > { %s273_s12 = scalar_lea.sflag [#allocation5], %s10268_s19 }
  0x1b   : > { %p10019_p1 = pneg %p10279_p13 }
  0x1e   : > { %s10275_s24 = scalar_lea.hbm %s15450_s0, %s9126_s20  ;;  %s10022_s15 = scalar_lea.hbm %s15450_s0, 2048 }
  0x1f   : > { %s10017_s13 = scalar_lea.hbm %s10275_s24, 1024  ;;  %p10023_p4 = scmp.lt.u32.totalorder %s10275_s24, %s15450_s0 }
  0x20   : > { %p10018_p0 = scmp.ne.s32.totalorder %s10275_s24, %s10017_s13  ;;  %p10024_p5 = scmp.lt.u32.totalorder %s10022_s15, %s10017_s13 }
  0x21   : > { %p10026_p8 = scmp.lt.u32.totalorder %s10017_s13, %s10275_s24 }
  0x22   : > { %p10020_p2 = pnand %p10019_p1, %p10018_p0  ;;  %p10025_p7 = por %p10024_p5, %p10023_p4 }
  0x24   : > { %p10021_p3 = pneg %p10020_p2  ;;  %p10027_p10 = por %p10026_p8, %p10025_p7 }
  0x26   : > { %p10028_p9 = pnand %p10027_p10, %p10021_p3 }
  0x28   : > { %10031 = shalt.err (!%p10028_p9)
}
  0x29   : > { %s10032_s25 = scalar_lea.vmem %s10283_s26, 1024  ;;  %s10149_s20 = smov [#allocation4]  }
  0x2a   : > { %p10033_p0 = scmp.ne.s32.totalorder %s10283_s26, %s10032_s25  ;;  %s10037_s21 = sshll.u32 %s10149_s20, 4  ;;  %s10038_s21 = int_to_ptr.vmem [resolvable:$false] %s10037_s21 }
  0x2b   : > { %s10039_s22 = scalar_lea.vmem %s10038_s21, 2048  ;;  %p10040_p11 = scmp.lt.s32.totalorder %s10283_s26, %s10038_s21 }
  0x2c   : > { %p10035_p2 = pnand %p10033_p0, %p10019_p1  ;;  %p10041_p4 = scmp.lt.s32.totalorder %s10039_s22, %s10032_s25 }
  0x2e   : > { %p10036_p12 = pneg %p10035_p2  ;;  %p10042_p5 = por %p10041_p4, %p10040_p11 }
  0x30   : > { %p10043_p7 = pnand %p10042_p5, %p10036_p12 }
  0x32   : > { %10046 = shalt.err (!%p10043_p7)
}
  0x33   : > { %s10150_s13 = smov 128   ;;  %s10151_s15 = smov 8  }
  0x34   : > { %9362 = dma.hbm_to_vmem [thread:$0]  (!%p10279_p13), %s10275_s24, 1024, %s10283_s26, %s273_s12, %s10150_s13, %s10150_s13, %s10151_s15  }
  0x35   : > { %p9079_p9 = scmp.ge.s32.totalorder %s10147_s30, 1  ;;  %p312_p11 = scmp.lt.s32.totalorder %s10147_s30, 3 }
  0x36   : > { %s9076_s23 = sshll.u32 %s10268_s19, 7  ;;  %s9127_s20 = sshll.u32 %s10147_s30, 11 }
  0x37   : > { %p10319_p12 = pnand %p9079_p9, %p312_p11  ;;  %s297_s21 = scalar_lea.vmem [#allocation7], %s9076_s23 }
  0x38   : > { %s304_s22 = sshll.u32 %s297_s21, 4  ;;  %s10327_s29 = scalar_lea.hbm %s14945_s1, %s9127_s20  ;;  %s10329_s22 = int_to_ptr.vmem [resolvable:$true] %s304_s22 }
  0x39   : > { %s294_s24 = scalar_lea.sflag [#allocation8], %s10268_s19  ;;  %s10047_s26 = scalar_lea.hbm %s10327_s29, 2048 }
  0x3a   : > { %p10048_p3 = scmp.ne.s32.totalorder %s10327_s29, %s10047_s26  ;;  %s10052_s21 = scalar_lea.hbm %s14945_s1, 4096 }
  0x3b   : > { %p10053_p0 = scmp.lt.u32.totalorder %s10327_s29, %s14945_s1  ;;  %p10054_p2 = scmp.lt.u32.totalorder %s10052_s21, %s10047_s26 }
  0x3c   : > { %p10050_p8 = pnand %p10048_p3, %p10019_p1  ;;  %p10056_p5 = scmp.lt.u32.totalorder %s10047_s26, %s10327_s29 }
  0x3d   : > { %p10055_p4 = por %p10054_p2, %p10053_p0 }
  0x3e   : > { %p10051_p10 = pneg %p10050_p8 }
  0x3f   : > { %p10057_p7 = por %p10056_p5, %p10055_p4 }
  0x41   : > { %p10058_p9 = pnand %p10057_p7, %p10051_p10 }
  0x43   : > { %10061 = shalt.err (!%p10058_p9)
}
  0x44   : > { %s10062_s20 = scalar_lea.vmem %s10329_s22, 2048  ;;  %s10152_s12 = smov [#allocation7]  }
  0x45   : > { %p10063_p11 = scmp.ne.s32.totalorder %s10329_s22, %s10062_s20  ;;  %s10067_s23 = sshll.u32 %s10152_s12, 4  ;;  %s10068_s23 = int_to_ptr.vmem [resolvable:$false] %s10067_s23 }
  0x46   : > { %s10069_s0 = scalar_lea.vmem %s10068_s23, 4096  ;;  %p10070_p6 = scmp.lt.s32.totalorder %s10329_s22, %s10068_s23 }
  0x47   : > { %p10065_p3 = pnand %p10063_p11, %p10019_p1  ;;  %p10071_p0 = scmp.lt.s32.totalorder %s10069_s0, %s10062_s20 }
  0x49   : > { %p10066_p8 = pneg %p10065_p3  ;;  %p10072_p2 = por %p10071_p0, %p10070_p6 }
  0x4b   : > { %p10073_p4 = pnand %p10072_p2, %p10066_p8 }
  0x4d   : > { %10076 = shalt.err (!%p10073_p4)
}
  0x4e   : > { %9365 = dma.hbm_to_vmem [thread:$0]  (!%p10279_p13), %s10327_s29, 2048, %s10329_s22, %s294_s24, %s10150_s13, %s10150_s13, %s10151_s15  }
  0x4f   : > { %316 = sbr.rel (%p10319_p12) target bundleno = 1610 (0x64a), region = 44 }
  0x56   : > { %s10363_s26 = sand.u32 1, %s10139_s28   ;;  %p15453_p6 = scmp.ne.s32.totalorder %s15447_s16, 0 }
  0x57   : > { %s9080_s21 = sshll.u32 %s10363_s26, 6  ;;  %s319_s14 = scalar_lea.sflag [#allocation5], %s10363_s26 }
  0x58   : > { %s10367_s10 = scalar_lea.vmem [#allocation4], %s9080_s21 }
  0x59   : > { %10122 = dma.done.wait (%p15453_p6), %s319_s14, 1024  }
  0x5a   : > { %10124 = vsyncadd (%p15453_p6), %s319_s14, 4294966272  ;;  %s9081_s29 = sshll.u32 %s10363_s26, 7  ;;  %s328_s19 = scalar_lea.sflag [#allocation8], %s10363_s26 }
  0x5b   : > { %s10375_s13 = scalar_lea.vmem [#allocation7], %s9081_s29 }
  0x5c   : > { %10126 = dma.done.wait (%p15453_p6), %s328_s19, 2048  }
  0x5d   : > { %10128 = vsyncadd (%p15453_p6), %s328_s19, 4294965248  ;;  %vm385_vm0 = vcmask 277504   ;;  %v14956_v0 = vmov 0.0   ;;  %vm390_vm1 = vcmask 271360   ;;  %v427_v1 = vld [vmem:[%s10375_s13] sm:$0xff]  ;;  %v531_v3 = vld [vmem:[%s10367_s10 + $0x8] sm:$0xff] }
  0x5e   : > { %386 = vst.msk [vmem:[#allocation2] sm:$0xff] %vm385_vm0, %v14956_v0  ;;  %387 = vst.msk [vmem:[#allocation2 + $0x8] sm:$0xff] %vm385_vm0, %v14956_v0  ;;  %v530_v2 = vld [vmem:[%s10367_s10] sm:$0xff]  ;;  %vm538_vm2 = vcmask 130048   ;;  %s10154_s16 = smov 1   ;;  %v532_v5 = vld [vmem:[%s10367_s10 + $0x10] sm:$0xff] }
  0x5f   : > { %388 = vst.msk [vmem:[#allocation2 + $0x10] sm:$0xff] %vm385_vm0, %v14956_v0  ;;  %389 = vst.msk [vmem:[#allocation2 + $0x18] sm:$0xff] %vm385_vm0, %v14956_v0  ;;  %459 = vrot.lane.b32.xlu0 %v427_v1, %s10154_s16  ;;  %v9257_v4 = vpack.c.bf16 %v531_v3, %v530_v2  ;;  %v533_v6 = vld [vmem:[%s10367_s10 + $0x18] sm:$0xff]  ;;  %v429_v7 = vld [vmem:[%s10375_s13 + $0x10] sm:$0xff]  ;;  %vm507_vm3 = vcmask 269320   ;;  %s10155_s19 = smov 127  }
  0x60   : > { %392 = vst.msk [vmem:[#allocation2 + $0x28] sm:$0xff] %vm385_vm0, %v14956_v0  ;;  %393 = vst.msk [vmem:[#allocation2 + $0x30] sm:$0xff] %vm385_vm0, %v14956_v0  ;;  %v9261_v8 = vpack.c.bf16 %v533_v6, %v532_v5  ;;  %463 = vrot.lane.b32.xlu1 %v429_v7, %s10154_s16  ;;  %v428_v9 = vld [vmem:[%s10375_s13 + $0x8] sm:$0xff]  ;;  %v524_v10 = vld [vmem:[%s14946_s2] sm:$0xff]  ;;  %s10160_s15 = smov 96   ;;  %s10161_s25 = smov 64  }
  0x61   : > { %394 = vst.msk [vmem:[#allocation2 + $0x38] sm:$0xff] %vm385_vm0, %v14956_v0  ;;  %395 = vst.msk [vmem:[#allocation2 + $0x40] sm:$0xff] %vm385_vm0, %v14956_v0  ;;  %9258 = vmatprep.subr.bf16.mxu0 %v9257_v4  ;;  %9181 = vmatprep.mubr.msk.f32.mxu0 %vm538_vm2, %v524_v10  ;;  %v430_v11 = vld [vmem:[%s10375_s13 + $0x18] sm:$0xff]  ;;  %v525_v12 = vld [vmem:[%s14946_s2 + $0x8] sm:$0xff]  ;;  %vm2032_vm4 = vcmask 261120   ;;  %vm2034_vm5 = vcmask 523264  }
  0x62   : > { %397 = vst.msk [vmem:[#allocation2 + $0x50] sm:$0xff] %vm385_vm0, %v14956_v0  ;;  %398 = vst.msk [vmem:[#allocation2 + $0x58] sm:$0xff] %vm385_vm0, %v14956_v0  ;;  %9260 = vmatpush3.bf16.msra.mxu0 %v9257_v4  ;;  %9262 = vmatprep.subr.bf16.mxu1 %v9261_v8  ;;  %v526_v13 = vld [vmem:[%s14946_s2 + $0x10] sm:$0xff]  ;;  %v534_v14 = vld [vmem:[%s10367_s10 + $0x20] sm:$0xff]  ;;  %vm2036_vm6 = vcmask 785408   ;;  %vm8546_vm7 = vcmask 588800  }
  0x63   : > { %399 = vst.msk [vmem:[#allocation2 + $0x60] sm:$0xff] %vm385_vm0, %v14956_v0  ;;  %400 = vst.msk [vmem:[#allocation2 + $0x68] sm:$0xff] %vm385_vm0, %v14956_v0  ;;  %9264 = vmatpush3.bf16.msra.mxu1 %v9261_v8  ;;  %461 = vrot.lane.b32.xlu0 %v428_v9, %s10154_s16  ;;  %v431_v15 = vld [vmem:[%s10375_s13 + $0x20] sm:$0xff]  ;;  %v535_v16 = vld [vmem:[%s10367_s10 + $0x28] sm:$0xff]  ;;  %s9082_s23 = sshll.u32 %s10363_s26, 5  ;;  %vm8854_vm8 = vcmask 1043456  }
  0x64   : > { %402 = vst.msk [vmem:[#allocation2 + $0x78] sm:$0xff] %vm385_vm0, %v14956_v0  ;;  %403 = vst.msk [vmem:[#allocation2 + $0x80] sm:$0xff] %vm385_vm0, %v14956_v0  ;;  %9191 = vmatprep.mubr.msk.f32.mxu1 %vm538_vm2, %v524_v10  ;;  %465 = vrot.lane.b32.xlu1 %v430_v11, %s10154_s16  ;;  %v432_v17 = vld [vmem:[%s10375_s13 + $0x28] sm:$0xff]  ;;  %v9265_v18 = vpack.c.bf16 %v535_v16, %v534_v14  ;;  %v536_v19 = vld [vmem:[%s10367_s10 + $0x30] sm:$0xff]  ;;  %s14874_s0 = scalar_lea.vmem [#allocation9], %s9082_s23  ;;  %s9128_s21 = sshll.u32 %s10230_s9, 9 }
  0x65   : > { %404 = vst.msk [vmem:[#allocation2 + $0x88] sm:$0xff] %vm385_vm0, %v14956_v0  ;;  %405 = vst.msk [vmem:[#allocation2 + $0x90] sm:$0xff] %vm385_vm0, %v14956_v0  ;;  %9182 = vmatmul.mubr.msk.f32.vlgmr.msra.gmra.mrb[0].mxu0 %vm538_vm2, %v525_v12  ;;  %v537_v20 = vld [vmem:[%s10367_s10 + $0x38] sm:$0xff]  ;;  %v433_v23 = vld [vmem:[%s10375_s13 + $0x30] sm:$0xff]  ;;  %s14897_s29 = scalar_lea.hbm %s14950_s6, %s9128_s21  ;;  %p16572_p1 = scmp.ne.s32.totalorder %s15448_s17, 0 }
  0x66   : > { %407 = vst.msk [vmem:[#allocation2 + $0xa0] sm:$0xff] %vm385_vm0, %v14956_v0  ;;  %408 = vst.msk [vmem:[#allocation2 + $0xa8] sm:$0xff] %vm385_vm0, %v14956_v0  ;;  %9192 = vmatmul.mubr.msk.f32.vlgmr.msra.gmra.mrb[0].mxu1 %vm538_vm2, %v525_v12  ;;  %9184 = vmatprep.mubr.msk.f32.mxu0 %vm538_vm2, %v526_v13  ;;  %v527_v21 = vld [vmem:[%s14946_s2 + $0x18] sm:$0xff]  ;;  %v9269_v22 = vpack.c.bf16 %v537_v20, %v536_v19  ;;  %v435_v25 = vld [vmem:[%s10375_s13 + $0x40] sm:$0xff] }
  0x67   : > { %409 = vst.msk [vmem:[#allocation2 + $0xb0] sm:$0xff] %vm385_vm0, %v14956_v0  ;;  %410 = vst.msk [vmem:[#allocation2 + $0xb8] sm:$0xff] %vm385_vm0, %v14956_v0  ;;  %467 = vrot.lane.b32.xlu0 %v431_v15, %s10154_s16  ;;  %9194 = vmatprep.mubr.msk.f32.mxu1 %vm538_vm2, %v526_v13  ;;  %v434_v24 = vld [vmem:[%s10375_s13 + $0x38] sm:$0xff]  ;;  %v436_v26 = vld [vmem:[%s10375_s13 + $0x48] sm:$0xff] }
  0x68   : > { %412 = vst.msk [vmem:[#allocation2 + $0xc8] sm:$0xff] %vm385_vm0, %v14956_v0  ;;  %413 = vst.msk [vmem:[#allocation2 + $0xd0] sm:$0xff] %vm385_vm0, %v14956_v0  ;;  %469 = vrot.lane.b32.xlu1 %v432_v17, %s10154_s16  ;;  %9266 = vmatprep.subr.bf16.mxu0 %v9265_v18  ;;  %v437_v27 = vld [vmem:[%s10375_s13 + $0x50] sm:$0xff]  ;;  %v438_v28 = vld [vmem:[%s10375_s13 + $0x58] sm:$0xff] }
  0x69   : > { %414 = vst.msk [vmem:[#allocation2 + $0xd8] sm:$0xff] %vm385_vm0, %v14956_v0  ;;  %415 = vst.msk [vmem:[#allocation2 + $0xe0] sm:$0xff] %vm385_vm0, %v14956_v0  ;;  %9185 = vmatmul.mubr.msk.f32.gmra.mrb[2].mxu0 %vm538_vm2, %v527_v21  ;;  %9270 = vmatprep.subr.bf16.mxu1 %v9269_v22  ;;  %v439_v29 = vld [vmem:[%s10375_s13 + $0x60] sm:$0xff]  ;;  %v440_v30 = vld [vmem:[%s10375_s13 + $0x68] sm:$0xff] }
  0x6a   : > { %417 = vst.msk [vmem:[#allocation2 + $0xf0] sm:$0xff] %vm385_vm0, %v14956_v0  ;;  %418 = vst.msk [vmem:[#allocation2 + $0xf8] sm:$0xff] %vm385_vm0, %v14956_v0  ;;  %9195 = vmatmul.mubr.msk.f32.gmra.mrb[2].mxu1 %vm538_vm2, %v527_v21  ;;  %9268 = vmatpush3.bf16.msra.mxu0 %v9265_v18  ;;  %v441_v31 = vld [vmem:[%s10375_s13 + $0x70] sm:$0xff]  ;;  %v442_v32 = vld [vmem:[%s10375_s13 + $0x78] sm:$0xff]  ;;  %s10156_s13 = smov 126  }
  0x6b   : > { %419 = vst.msk [vmem:[#allocation2 + $0x100] sm:$0xff] %vm385_vm0, %v14956_v0  ;;  %420 = vst.msk [vmem:[#allocation2 + $0x108] sm:$0xff] %vm385_vm0, %v14956_v0  ;;  %471 = vrot.lane.b32.xlu0 %v433_v23, %s10154_s16  ;;  %9201 = vmatprep.mubr.msk.f32.mxu0 %vm538_vm2, %v524_v10  ;;  %v528_v33 = vld [vmem:[%s14947_s3] sm:$0xff]  ;;  %v529_v34 = vld [vmem:[%s14947_s3 + $0x8] sm:$0xff] }
  0x6c   : > { %422 = vst.msk [vmem:[#allocation2 + $0x118] sm:$0xff] %vm385_vm0, %v14956_v0  ;;  %423 = vst.msk [vmem:[#allocation2 + $0x120] sm:$0xff] %vm385_vm0, %v14956_v0  ;;  %473 = vrot.lane.b32.xlu1 %v434_v24, %s10154_s16  ;;  %9272 = vmatpush3.bf16.msra.mxu1 %v9269_v22  ;;  %v10527_v35 = vpack.c.bf16 %v529_v34, %v528_v33 }
  0x6d   : > { %424 = vst.msk [vmem:[#allocation2 + $0x128] sm:$0xff] %vm385_vm0, %v14956_v0  ;;  %425 = vst.msk [vmem:[#allocation2 + $0x130] sm:$0xff] %vm385_vm0, %v14956_v0  ;;  %9202 = vmatmul.mubr.msk.f32.vlgmr.msra.gmra.mrb[4].mxu0 %vm538_vm2, %v525_v12  ;;  %9211 = vmatprep.mubr.msk.f32.mxu1 %vm538_vm2, %v524_v10 }
  0x6e   : > { %391 = vst.msk [vmem:[#allocation2 + $0x20] sm:$0x3] %vm390_vm1, %v14956_v0  ;;  %396 = vst.msk [vmem:[#allocation2 + $0x48] sm:$0x3] %vm390_vm1, %v14956_v0  ;;  %9204 = vmatprep.mubr.msk.f32.mxu0 %vm538_vm2, %v526_v13  ;;  %9274 = vmatprep.subr.bf16.mxu0 %v10527_v35 }
  0x6f   : > { %401 = vst.msk [vmem:[#allocation2 + $0x70] sm:$0x3] %vm390_vm1, %v14956_v0  ;;  %406 = vst.msk [vmem:[#allocation2 + $0x98] sm:$0x3] %vm390_vm1, %v14956_v0  ;;  %475 = vrot.lane.b32.xlu0 %v435_v25, %s10154_s16  ;;  %9212 = vmatmul.mubr.msk.f32.vlgmr.msra.gmra.mrb[4].mxu1 %vm538_vm2, %v525_v12 }
  0x70   : > { %411 = vst.msk [vmem:[#allocation2 + $0xc0] sm:$0x3] %vm390_vm1, %v14956_v0  ;;  %416 = vst.msk [vmem:[#allocation2 + $0xe8] sm:$0x3] %vm390_vm1, %v14956_v0  ;;  %477 = vrot.lane.b32.xlu1 %v436_v26, %s10154_s16  ;;  %9214 = vmatprep.mubr.msk.f32.mxu1 %vm538_vm2, %v526_v13 }
  0x71   : > { %421 = vst.msk [vmem:[#allocation2 + $0x110] sm:$0x3] %vm390_vm1, %v14956_v0  ;;  %426 = vst.msk [vmem:[#allocation2 + $0x138] sm:$0x3] %vm390_vm1, %v14956_v0  ;;  %9205 = vmatmul.mubr.msk.f32.gmra.mrb[6].mxu0 %vm538_vm2, %v527_v21  ;;  %9278 = vmatprep.subr.bf16.mxu1 %v10527_v35 }
  0x72   : > { %9276 = vmatpush3.bf16.msra.mxu0 %v10527_v35  ;;  %9280 = vmatpush3.bf16.msra.mxu1 %v10527_v35 }
  0x73   : > { %479 = vrot.lane.b32.xlu0 %v437_v27, %s10154_s16  ;;  %9215 = vmatmul.mubr.msk.f32.gmra.mrb[6].mxu1 %vm538_vm2, %v527_v21 }
  0x74   : > { %481 = vrot.lane.b32.xlu1 %v438_v28, %s10154_s16  ;;  %9282 = vmatprep.subr.bf16.mxu0 %v10527_v35 }
  0x75   : > { %9286 = vmatprep.subr.bf16.mxu1 %v10527_v35 }
  0x77   : > { %483 = vrot.lane.b32.xlu0 %v439_v29, %s10154_s16 }
  0x78   : > { %485 = vrot.lane.b32.xlu1 %v440_v30, %s10154_s16 }
  0x7b   : > { %487 = vrot.lane.b32.xlu0 %v441_v31, %s10154_s16 }
  0x7c   : > { %489 = vrot.lane.b32.xlu1 %v442_v32, %s10154_s16 }
  0xd1   : > { %v460_v36 = vpop.permute.xlu0 %459 }
  0xd2   : > { %508 = vst.msk [vmem:[#allocation2 + $0x1] sm:$0xff] %vm507_vm3, %v460_v36  ;;  %v464_v37 = vpop.permute.xlu1 %463 }
  0xd3   : > { %510 = vst.msk [vmem:[#allocation2 + $0x11] sm:$0xff] %vm507_vm3, %v464_v37 }
  0xd5   : > { %v462_v38 = vpop.permute.xlu0 %461 }
  0xd6   : > { %509 = vst.msk [vmem:[#allocation2 + $0x9] sm:$0xff] %vm507_vm3, %v462_v38  ;;  %v466_v39 = vpop.permute.xlu1 %465 }
  0xd7   : > { %511 = vst.msk [vmem:[#allocation2 + $0x19] sm:$0xff] %vm507_vm3, %v466_v39 }
  0xd9   : > { %v468_v40 = vpop.permute.xlu0 %467  ;;  %v2067_v41 = vld [vmem:[#allocation2] sm:$0xff] }
  0xda   : > { %512 = vst.msk [vmem:[#allocation2 + $0x29] sm:$0xff] %vm507_vm3, %v468_v40  ;;  %2131 = vrot.lane.b32.xlu0 %v2067_v41, %s10155_s19  ;;  %v470_v42 = vpop.permute.xlu1 %469  ;;  %v4435_v5 = vld [vmem:[#allocation2 + $0x1] sm:$0xff]  ;;  %v10584_v7 = vld [vmem:[#allocation2 + $0x11] sm:$0xff] }
  0xdb   : > { %513 = vst.msk [vmem:[#allocation2 + $0x31] sm:$0xff] %vm507_vm3, %v470_v42 }
  0xdd   : > { %v472_v43 = vpop.permute.xlu0 %471  ;;  %v2068_v44 = vld [vmem:[#allocation2 + $0x8] sm:$0xff]  ;;  %v2069_v45 = vld [vmem:[#allocation2 + $0x10] sm:$0xff] }
  0xde   : > { %514 = vst.msk [vmem:[#allocation2 + $0x39] sm:$0xff] %vm507_vm3, %v472_v43  ;;  %2133 = vrot.lane.b32.xlu1 %v2068_v44, %s10155_s19  ;;  %2135 = vrot.lane.b32.xlu0 %v2069_v45, %s10155_s19  ;;  %v474_v46 = vpop.permute.xlu1 %473  ;;  %v2070_v47 = vld [vmem:[#allocation2 + $0x18] sm:$0xff]  ;;  %v4436_v6 = vld [vmem:[#allocation2 + $0x9] sm:$0xff] }
  0xdf   : > { %515 = vst.msk [vmem:[#allocation2 + $0x41] sm:$0xff] %vm507_vm3, %v474_v46  ;;  %v10589_v8 = vld [vmem:[#allocation2 + $0x19] sm:$0xff]  ;;  %v6803_v39 = vld [vmem:[#allocation2 + $0x2] sm:$0xff]  ;;  %v6804_v43 = vld [vmem:[#allocation2 + $0xa] sm:$0xff] }
  0xe1   : > { %v476_v48 = vpop.permute.xlu0 %475  ;;  %v2071_v49 = vld [vmem:[#allocation2 + $0x28] sm:$0xff] }
  0xe2   : > { %516 = vst.msk [vmem:[#allocation2 + $0x51] sm:$0xff] %vm507_vm3, %v476_v48  ;;  %2137 = vrot.lane.b32.xlu1 %v2070_v47, %s10155_s19  ;;  %2139 = vrot.lane.b32.xlu0 %v2071_v49, %s10155_s19  ;;  %v478_v50 = vpop.permute.xlu1 %477  ;;  %v2072_v51 = vld [vmem:[#allocation2 + $0x30] sm:$0xff] }
  0xe3   : > { %517 = vst.msk [vmem:[#allocation2 + $0x59] sm:$0xff] %vm507_vm3, %v478_v50  ;;  %v4439_v9 = vld [vmem:[#allocation2 + $0x29] sm:$0xff]  ;;  %v4440_v10 = vld [vmem:[#allocation2 + $0x31] sm:$0xff] }
  0xe4   : > { %v6807_v37 = vld [vmem:[#allocation2 + $0x2a] sm:$0xff] }
  0xe5   : > { %v480_v52 = vpop.permute.xlu0 %479  ;;  %v2073_v53 = vld [vmem:[#allocation2 + $0x38] sm:$0xff] }
  0xe6   : > { %518 = vst.msk [vmem:[#allocation2 + $0x61] sm:$0xff] %vm507_vm3, %v480_v52  ;;  %2141 = vrot.lane.b32.xlu1 %v2072_v51, %s10155_s19  ;;  %2143 = vrot.lane.b32.xlu0 %v2073_v53, %s10155_s19  ;;  %v482_v54 = vpop.permute.xlu1 %481  ;;  %v2074_v55 = vld [vmem:[#allocation2 + $0x40] sm:$0xff] }
  0xe7   : > { %519 = vst.msk [vmem:[#allocation2 + $0x69] sm:$0xff] %vm507_vm3, %v482_v54  ;;  %v10594_v11 = vld [vmem:[#allocation2 + $0x39] sm:$0xff]  ;;  %v10599_v12 = vld [vmem:[#allocation2 + $0x41] sm:$0xff] }
  0xe9   : > { %v484_v56 = vpop.permute.xlu0 %483  ;;  %v2075_v57 = vld [vmem:[#allocation2 + $0x50] sm:$0xff] }
  0xea   : > { %520 = vst.msk [vmem:[#allocation2 + $0x79] sm:$0xff] %vm507_vm3, %v484_v56  ;;  %2145 = vrot.lane.b32.xlu1 %v2074_v55, %s10155_s19  ;;  %2147 = vrot.lane.b32.xlu0 %v2075_v57, %s10155_s19  ;;  %v486_v58 = vpop.permute.xlu1 %485  ;;  %v2076_v59 = vld [vmem:[#allocation2 + $0x58] sm:$0xff] }
  0xeb   : > { %521 = vst.msk [vmem:[#allocation2 + $0x81] sm:$0xff] %vm507_vm3, %v486_v58  ;;  %v4443_v13 = vld [vmem:[#allocation2 + $0x51] sm:$0xff]  ;;  %v4444_v14 = vld [vmem:[#allocation2 + $0x59] sm:$0xff] }
  0xec   : > { %v6811_v40 = vld [vmem:[#allocation2 + $0x52] sm:$0xff]  ;;  %v6809_v56 = vld [vmem:[#allocation2 + $0x3a] sm:$0xff] }
  0xed   : > { %v488_v60 = vpop.permute.xlu0 %487  ;;  %v2077_v61 = vld [vmem:[#allocation2 + $0x60] sm:$0xff] }
  0xee   : > { %522 = vst.msk [vmem:[#allocation2 + $0x89] sm:$0xff] %vm507_vm3, %v488_v60  ;;  %2149 = vrot.lane.b32.xlu1 %v2076_v59, %s10155_s19  ;;  %2151 = vrot.lane.b32.xlu0 %v2077_v61, %s10155_s19  ;;  %v490_v62 = vpop.permute.xlu1 %489  ;;  %v2078_v63 = vld [vmem:[#allocation2 + $0x68] sm:$0xff] }
  0xef   : > { %523 = vst.msk [vmem:[#allocation2 + $0x91] sm:$0xff] %vm507_vm3, %v490_v62  ;;  %v10604_v15 = vld [vmem:[#allocation2 + $0x61] sm:$0xff]  ;;  %v10609_v16 = vld [vmem:[#allocation2 + $0x69] sm:$0xff] }
  0xf0   : > { %v6810_v62 = vld [vmem:[#allocation2 + $0x42] sm:$0xff] }
  0xf1   : > { %v2079_v1 = vld [vmem:[#allocation2 + $0x78] sm:$0xff] }
  0xf2   : > { %2153 = vrot.lane.b32.xlu1 %v2078_v63, %s10155_s19  ;;  %2155 = vrot.lane.b32.xlu0 %v2079_v1, %s10155_s19  ;;  %v2080_v2 = vld [vmem:[#allocation2 + $0x80] sm:$0xff] }
  0xf3   : > { %v4447_v17 = vld [vmem:[#allocation2 + $0x79] sm:$0xff]  ;;  %v4448_v18 = vld [vmem:[#allocation2 + $0x81] sm:$0xff] }
  0xf4   : > { %v6815_v38 = vld [vmem:[#allocation2 + $0x7a] sm:$0xff] }
  0xf5   : > { %v2081_v3 = vld [vmem:[#allocation2 + $0x88] sm:$0xff] }
  0xf6   : > { %2157 = vrot.lane.b32.xlu1 %v2080_v2, %s10155_s19  ;;  %2159 = vrot.lane.b32.xlu0 %v2081_v3, %s10155_s19  ;;  %v2082_v4 = vld [vmem:[#allocation2 + $0x90] sm:$0xff]  ;;  %v6816_v42 = vld [vmem:[#allocation2 + $0x82] sm:$0xff] }
  0xf7   : > { %v10614_v19 = vld [vmem:[#allocation2 + $0x89] sm:$0xff]  ;;  %v10619_v20 = vld [vmem:[#allocation2 + $0x91] sm:$0xff] }
  0xfa   : > { %2161 = vrot.lane.b32.xlu1 %v2082_v4, %s10155_s19  ;;  %2963 = vrot.lane.b32.xlu0 %v2067_v41, %s10156_s13  ;;  %v6808_v41 = vld [vmem:[#allocation2 + $0x32] sm:$0xff] }
  0xfe   : > { %2965 = vrot.lane.b32.xlu1 %v2068_v44, %s10156_s13  ;;  %2967 = vrot.lane.b32.xlu0 %v2069_v45, %s10156_s13  ;;  %v6812_v44 = vld [vmem:[#allocation2 + $0x5a] sm:$0xff] }
 0x102   : > { %2969 = vrot.lane.b32.xlu1 %v2070_v47, %s10156_s13  ;;  %2971 = vrot.lane.b32.xlu0 %v2071_v49, %s10156_s13 }
 0x106   : > { %2973 = vrot.lane.b32.xlu1 %v2072_v51, %s10156_s13  ;;  %2975 = vrot.lane.b32.xlu0 %v2073_v53, %s10156_s13  ;;  %v6805_v53 = vld [vmem:[#allocation2 + $0x12] sm:$0xff] }
 0x10a   : > { %2977 = vrot.lane.b32.xlu1 %v2074_v55, %s10156_s13  ;;  %2979 = vrot.lane.b32.xlu0 %v2075_v57, %s10156_s13  ;;  %v6813_v57 = vld [vmem:[#allocation2 + $0x62] sm:$0xff] }
 0x10e   : > { %2981 = vrot.lane.b32.xlu1 %v2076_v59, %s10156_s13  ;;  %2983 = vrot.lane.b32.xlu0 %v2077_v61, %s10156_s13  ;;  %v6817_v59 = vld [vmem:[#allocation2 + $0x8a] sm:$0xff]  ;;  %v6806_v61 = vld [vmem:[#allocation2 + $0x1a] sm:$0xff] }
 0x112   : > { %2985 = vrot.lane.b32.xlu1 %v2078_v63, %s10156_s13  ;;  %2987 = vrot.lane.b32.xlu0 %v2079_v1, %s10156_s13  ;;  %v6814_v63 = vld [vmem:[#allocation2 + $0x6a] sm:$0xff] }
 0x116   : > { %2989 = vrot.lane.b32.xlu1 %v2080_v2, %s10156_s13  ;;  %2991 = vrot.lane.b32.xlu0 %v2081_v3, %s10156_s13  ;;  %v6818_v3 = vld [vmem:[#allocation2 + $0x92] sm:$0xff] }
 0x11a   : > { %2993 = vrot.lane.b32.xlu1 %v2082_v4, %s10156_s13  ;;  %4499 = vrot.lane.b32.xlu0 %v4435_v5, %s10155_s19 }
 0x11e   : > { %4501 = vrot.lane.b32.xlu1 %v4436_v6, %s10155_s19  ;;  %4503 = vrot.lane.b32.xlu0 %v10584_v7, %s10155_s19 }
 0x122   : > { %4505 = vrot.lane.b32.xlu1 %v10589_v8, %s10155_s19  ;;  %4507 = vrot.lane.b32.xlu0 %v4439_v9, %s10155_s19 }
 0x126   : > { %4509 = vrot.lane.b32.xlu1 %v4440_v10, %s10155_s19  ;;  %4511 = vrot.lane.b32.xlu0 %v10594_v11, %s10155_s19 }
 0x12a   : > { %4513 = vrot.lane.b32.xlu1 %v10599_v12, %s10155_s19  ;;  %4515 = vrot.lane.b32.xlu0 %v4443_v13, %s10155_s19 }
 0x12e   : > { %4517 = vrot.lane.b32.xlu1 %v4444_v14, %s10155_s19  ;;  %4519 = vrot.lane.b32.xlu0 %v10604_v15, %s10155_s19 }
 0x132   : > { %4521 = vrot.lane.b32.xlu1 %v10609_v16, %s10155_s19  ;;  %4523 = vrot.lane.b32.xlu0 %v4447_v17, %s10155_s19 }
 0x136   : > { %4525 = vrot.lane.b32.xlu1 %v4448_v18, %s10155_s19  ;;  %4527 = vrot.lane.b32.xlu0 %v10614_v19, %s10155_s19 }
 0x138   : > { %v9183_v21 = vpop.f32.mrb[0].mxu0 }
 0x139   : > { %v617_v22 = vpop.f32.mrb[1].mxu0  ;;  %v9193_v23 = vpop.f32.mrb[0].mxu1 }
 0x13a   : > { %v702_v24 = vpop.f32.mrb[1].mxu1  ;;  %9221 = vmatprep.mubr.msk.f32.mxu0 %vm538_vm2, %v617_v22  ;;  %4529 = vrot.lane.b32.xlu1 %v10619_v20, %s10155_s19 }
 0x13b   : > { %5339 = vrot.lane.b32.xlu0 %v4439_v9, %s10156_s13  ;;  %9222 = vmatmul.mubr.msk.f32.vlgmr.msra.gmra.mrb[8].mxu0 %vm538_vm2, %v9183_v21 }
 0x13c   : > { %9231 = vmatprep.mubr.msk.f32.mxu1 %vm538_vm2, %v702_v24  ;;  %v9186_v25 = vpop.f32.mrb[2].mxu0  ;;  %9284 = vmatpush3.bf16.msra.mxu0 %v10527_v35 }
 0x13d   : > { %9232 = vmatmul.mubr.msk.f32.vlgmr.msra.gmra.mrb[8].mxu1 %vm538_vm2, %v9193_v23  ;;  %v627_v26 = vpop.f32.mrb[3].mxu0  ;;  %v9196_v27 = vpop.f32.mrb[2].mxu1 }
 0x13e   : > { %5331 = vrot.lane.b32.xlu1 %v4435_v5, %s10156_s13  ;;  %9224 = vmatprep.mubr.msk.f32.mxu0 %vm538_vm2, %v627_v26  ;;  %v712_v28 = vpop.f32.mrb[3].mxu1 }
 0x13f   : > { %5355 = vrot.lane.b32.xlu0 %v4447_v17, %s10156_s13  ;;  %9225 = vmatmul.mubr.msk.f32.gmra.mrb[10].mxu0 %vm538_vm2, %v9186_v25 }
 0x140   : > { %9234 = vmatprep.mubr.msk.f32.mxu1 %vm538_vm2, %v712_v28  ;;  %v9203_v29 = vpop.f32.mrb[4].mxu0  ;;  %9288 = vmatpush3.bf16.msra.mxu1 %v10527_v35 }
 0x141   : > { %9235 = vmatmul.mubr.msk.f32.gmra.mrb[10].mxu1 %vm538_vm2, %v9196_v27  ;;  %v787_v30 = vpop.f32.mrb[5].mxu0 }
 0x142   : > { %5347 = vrot.lane.b32.xlu1 %v4443_v13, %s10156_s13  ;;  %9241 = vmatprep.mubr.msk.f32.mxu0 %vm538_vm2, %v787_v30  ;;  %v9213_v31 = vpop.f32.mrb[4].mxu1 }
 0x143   : > { %5341 = vrot.lane.b32.xlu0 %v4440_v10, %s10156_s13  ;;  %9242 = vmatmul.mubr.msk.f32.vlgmr.msra.gmra.mrb[12].mxu0 %vm538_vm2, %v9203_v29  ;;  %v872_v32 = vpop.f32.mrb[5].mxu1 }
 0x144   : > { %9251 = vmatprep.mubr.msk.f32.mxu1 %vm538_vm2, %v872_v32  ;;  %v9206_v33 = vpop.f32.mrb[6].mxu0 }
 0x145   : > { %9252 = vmatmul.mubr.msk.f32.vlgmr.msra.gmra.mrb[12].mxu1 %vm538_vm2, %v9213_v31  ;;  %v797_v34 = vpop.f32.mrb[7].mxu0 }
 0x146   : > { %5333 = vrot.lane.b32.xlu1 %v4436_v6, %s10156_s13  ;;  %9244 = vmatprep.mubr.msk.f32.mxu0 %vm538_vm2, %v797_v34  ;;  %v9216_v35 = vpop.f32.mrb[6].mxu1 }
 0x147   : > { %5357 = vrot.lane.b32.xlu0 %v4448_v18, %s10156_s13  ;;  %9245 = vmatmul.mubr.msk.f32.gmra.mrb[14].mxu0 %vm538_vm2, %v9206_v33  ;;  %v882_v36 = vpop.f32.mrb[7].mxu1 }
 0x148   : > { %9254 = vmatprep.mubr.msk.f32.mxu1 %vm538_vm2, %v882_v36  ;;  %8614 = vmatprep.mubr.f32.mxu0 %v14956_v0 }
 0x149   : > { %9255 = vmatmul.mubr.msk.f32.gmra.mrb[14].mxu1 %vm538_vm2, %v9216_v35 }
 0x14a   : > { %5349 = vrot.lane.b32.xlu1 %v4444_v14, %s10156_s13  ;;  %8685 = vmatprep.mubr.f32.mxu1 %v14956_v0 }
 0x14b   : > { %6875 = vrot.lane.b32.xlu0 %v6807_v37, %s10155_s19 }
 0x14c   : > { %v10666_v46 = vpop.permute.xlu0 %2131 }
 0x14d   : > { %15455 = vst [vmem:[#allocation16_spill] sm:$0xff] %v10666_v46 }
 0x14e   : > { %6867 = vrot.lane.b32.xlu1 %v6803_v39, %s10155_s19 }
 0x14f   : > { %6891 = vrot.lane.b32.xlu0 %v6815_v38, %s10155_s19 }
 0x150   : > { %v10663_v45 = vpop.permute.xlu1 %2133  ;;  %v10672_v48 = vpop.permute.xlu0 %2135 }
 0x151   : > { %15454 = vst [vmem:[#allocation15_spill] sm:$0xff] %v10663_v45  ;;  %15457 = vst [vmem:[#allocation18_spill] sm:$0xff] %v10672_v48 }
 0x152   : > { %6883 = vrot.lane.b32.xlu1 %v6811_v40, %s10155_s19 }
 0x153   : > { %6877 = vrot.lane.b32.xlu0 %v6808_v41, %s10155_s19 }
 0x154   : > { %v10670_v47 = vpop.permute.xlu1 %2137  ;;  %v10683_v50 = vpop.permute.xlu0 %2139 }
 0x155   : > { %15456 = vst [vmem:[#allocation17_spill] sm:$0xff] %v10670_v47  ;;  %15459 = vst [vmem:[#allocation20_spill] sm:$0xff] %v10683_v50 }
 0x156   : > { %6869 = vrot.lane.b32.xlu1 %v6804_v43, %s10155_s19 }
 0x157   : > { %6893 = vrot.lane.b32.xlu0 %v6816_v42, %s10155_s19 }
 0x158   : > { %v10679_v49 = vpop.permute.xlu1 %2141  ;;  %v10691_v52 = vpop.permute.xlu0 %2143 }
 0x159   : > { %15458 = vst [vmem:[#allocation19_spill] sm:$0xff] %v10679_v49  ;;  %15461 = vst [vmem:[#allocation22_spill] sm:$0xff] %v10691_v52 }
 0x15a   : > { %6885 = vrot.lane.b32.xlu1 %v6812_v44, %s10155_s19 }
 0x15b   : > { %7707 = vrot.lane.b32.xlu0 %v6807_v37, %s10156_s13 }
 0x15c   : > { %v10689_v51 = vpop.permute.xlu1 %2145  ;;  %v10702_v55 = vpop.permute.xlu0 %2147 }
 0x15d   : > { %15460 = vst [vmem:[#allocation21_spill] sm:$0xff] %v10689_v51  ;;  %15463 = vst [vmem:[#allocation24_spill] sm:$0xff] %v10702_v55 }
 0x15e   : > { %7699 = vrot.lane.b32.xlu1 %v6803_v39, %s10156_s13 }
 0x15f   : > { %7723 = vrot.lane.b32.xlu0 %v6815_v38, %s10156_s13 }
 0x160   : > { %v10699_v54 = vpop.permute.xlu1 %2149  ;;  %v10708_v60 = vpop.permute.xlu0 %2151 }
 0x161   : > { %15462 = vst [vmem:[#allocation23_spill] sm:$0xff] %v10699_v54  ;;  %15465 = vst [vmem:[#allocation26_spill] sm:$0xff] %v10708_v60 }
 0x162   : > { %7715 = vrot.lane.b32.xlu1 %v6811_v40, %s10156_s13 }
 0x163   : > { %7709 = vrot.lane.b32.xlu0 %v6808_v41, %s10156_s13 }
 0x164   : > { %v10706_v58 = vpop.permute.xlu1 %2153  ;;  %v10716_v2 = vpop.permute.xlu0 %2155 }
 0x165   : > { %15464 = vst [vmem:[#allocation25_spill] sm:$0xff] %v10706_v58  ;;  %15467 = vst [vmem:[#allocation28_spill] sm:$0xff] %v10716_v2 }
 0x166   : > { %7701 = vrot.lane.b32.xlu1 %v6804_v43, %s10156_s13 }
 0x167   : > { %7725 = vrot.lane.b32.xlu0 %v6816_v42, %s10156_s13 }
 0x168   : > { %v10713_v1 = vpop.permute.xlu1 %2157  ;;  %v10722_v5 = vpop.permute.xlu0 %2159 }
 0x169   : > { %15466 = vst [vmem:[#allocation27_spill] sm:$0xff] %v10713_v1  ;;  %15469 = vst [vmem:[#allocation30_spill] sm:$0xff] %v10722_v5 }
 0x16a   : > { %7717 = vrot.lane.b32.xlu1 %v6812_v44, %s10156_s13 }
 0x16b   : > { %5343 = vrot.lane.b32.xlu0 %v10594_v11, %s10156_s13 }
 0x16c   : > { %v10720_v4 = vpop.permute.xlu1 %2161 }
 0x16d   : > { %15468 = vst [vmem:[#allocation29_spill] sm:$0xff] %v10720_v4 }
 0x16e   : > { %5335 = vrot.lane.b32.xlu1 %v10584_v7, %s10156_s13  ;;  %v10730_v7 = vpop.permute.xlu0 %2963 }
 0x16f   : > { %5359 = vrot.lane.b32.xlu0 %v10614_v19, %s10156_s13  ;;  %15471 = vst [vmem:[#allocation32_spill] sm:$0xff] %v10730_v7 }
 0x170   : > { %v10727_v6 = vpop.permute.xlu1 %2965 }
 0x171   : > { %15470 = vst [vmem:[#allocation31_spill] sm:$0xff] %v10727_v6 }
 0x172   : > { %5351 = vrot.lane.b32.xlu1 %v10604_v15, %s10156_s13  ;;  %v10736_v9 = vpop.permute.xlu0 %2967 }
 0x173   : > { %5337 = vrot.lane.b32.xlu0 %v10589_v8, %s10156_s13  ;;  %15473 = vst [vmem:[#allocation34_spill] sm:$0xff] %v10736_v9 }
 0x174   : > { %v10734_v8 = vpop.permute.xlu1 %2969 }
 0x175   : > { %15472 = vst [vmem:[#allocation33_spill] sm:$0xff] %v10734_v8 }
 0x176   : > { %5345 = vrot.lane.b32.xlu1 %v10599_v12, %s10156_s13  ;;  %v10741_v11 = vpop.permute.xlu0 %2971 }
 0x177   : > { %5353 = vrot.lane.b32.xlu0 %v10609_v16, %s10156_s13  ;;  %15475 = vst [vmem:[#allocation36_spill] sm:$0xff] %v10741_v11 }
 0x178   : > { %v10739_v10 = vpop.permute.xlu1 %2973 }
 0x179   : > { %15474 = vst [vmem:[#allocation35_spill] sm:$0xff] %v10739_v10 }
 0x17a   : > { %5361 = vrot.lane.b32.xlu1 %v10619_v20, %s10156_s13  ;;  %v10745_v13 = vpop.permute.xlu0 %2975 }
 0x17b   : > { %6871 = vrot.lane.b32.xlu0 %v6805_v53, %s10155_s19  ;;  %15477 = vst [vmem:[#allocation38_spill] sm:$0xff] %v10745_v13 }
 0x17c   : > { %v10743_v12 = vpop.permute.xlu1 %2977 }
 0x17d   : > { %15476 = vst [vmem:[#allocation37_spill] sm:$0xff] %v10743_v12  ;;  %v9935_v12 = vld [vmem:[#allocation2 + $0x10] ss:$80 sps:$4 sm:$0xff]  }
 0x17e   : > { %6879 = vrot.lane.b32.xlu1 %v6809_v56, %s10155_s19  ;;  %v10749_v15 = vpop.permute.xlu0 %2979 }
 0x17f   : > { %6887 = vrot.lane.b32.xlu0 %v6813_v57, %s10155_s19  ;;  %15479 = vst [vmem:[#allocation40_spill] sm:$0xff] %v10749_v15 }
 0x180   : > { %v10747_v14 = vpop.permute.xlu1 %2981 }
 0x181   : > { %15478 = vst [vmem:[#allocation39_spill] sm:$0xff] %v10747_v14 }
 0x182   : > { %6895 = vrot.lane.b32.xlu1 %v6817_v59, %s10155_s19  ;;  %v10753_v17 = vpop.permute.xlu0 %2983 }
 0x183   : > { %6873 = vrot.lane.b32.xlu0 %v6806_v61, %s10155_s19  ;;  %15481 = vst [vmem:[#allocation42_spill] sm:$0xff] %v10753_v17 }
 0x184   : > { %v10751_v16 = vpop.permute.xlu1 %2985 }
 0x185   : > { %15480 = vst [vmem:[#allocation41_spill] sm:$0xff] %v10751_v16 }
 0x186   : > { %6881 = vrot.lane.b32.xlu1 %v6810_v62, %s10155_s19  ;;  %v10757_v19 = vpop.permute.xlu0 %2987 }
 0x187   : > { %6889 = vrot.lane.b32.xlu0 %v6814_v63, %s10155_s19  ;;  %15483 = vst [vmem:[#allocation44_spill] sm:$0xff] %v10757_v19 }
 0x188   : > { %v10755_v18 = vpop.permute.xlu1 %2989 }
 0x189   : > { %15482 = vst [vmem:[#allocation43_spill] sm:$0xff] %v10755_v18 }
 0x18a   : > { %6897 = vrot.lane.b32.xlu1 %v6818_v3, %s10155_s19  ;;  %v10761_v21 = vpop.permute.xlu0 %2991 }
 0x18b   : > { %7703 = vrot.lane.b32.xlu0 %v6805_v53, %s10156_s13  ;;  %15485 = vst [vmem:[#allocation46_spill] sm:$0xff] %v10761_v21 }
 0x18c   : > { %v10759_v20 = vpop.permute.xlu1 %2993 }
 0x18d   : > { %15484 = vst [vmem:[#allocation45_spill] sm:$0xff] %v10759_v20 }
 0x18e   : > { %7711 = vrot.lane.b32.xlu1 %v6809_v56, %s10156_s13  ;;  %v10765_v23 = vpop.permute.xlu0 %4499 }
 0x18f   : > { %7719 = vrot.lane.b32.xlu0 %v6813_v57, %s10156_s13  ;;  %15487 = vst [vmem:[#allocation48_spill] sm:$0xff] %v10765_v23 }
 0x190   : > { %v10763_v22 = vpop.permute.xlu1 %4501 }
 0x191   : > { %15486 = vst [vmem:[#allocation47_spill] sm:$0xff] %v10763_v22 }
 0x192   : > { %7727 = vrot.lane.b32.xlu1 %v6817_v59, %s10156_s13  ;;  %v10769_v25 = vpop.permute.xlu0 %4503 }
 0x193   : > { %7705 = vrot.lane.b32.xlu0 %v6806_v61, %s10156_s13  ;;  %15489 = vst [vmem:[#allocation50_spill] sm:$0xff] %v10769_v25  ;;  %v9912_v25 = vld [vmem:[#allocation2 + $0x30] ss:$80 sps:$4 sm:$0xff]  }
 0x194   : > { %v10767_v24 = vpop.permute.xlu1 %4505 }
 0x195   : > { %15488 = vst [vmem:[#allocation49_spill] sm:$0xff] %v10767_v24  ;;  %v9909_v24 = vld [vmem:[#allocation2 + $0x8] ss:$80 sps:$4 sm:$0xff]  }
 0x196   : > { %7713 = vrot.lane.b32.xlu1 %v6810_v62, %s10156_s13  ;;  %v10773_v27 = vpop.permute.xlu0 %4507 }
 0x197   : > { %7721 = vrot.lane.b32.xlu0 %v6814_v63, %s10156_s13  ;;  %15491 = vst [vmem:[#allocation52_spill] sm:$0xff] %v10773_v27  ;;  %v9925_v27 = vld [vmem:[#allocation2 + $0x19] ss:$80 sps:$4 sm:$0xff]  }
 0x198   : > { %v10771_v26 = vpop.permute.xlu1 %4509 }
 0x199   : > { %15490 = vst [vmem:[#allocation51_spill] sm:$0xff] %v10771_v26  ;;  %v9918_v26 = vld [vmem:[#allocation2 + $0x29] ss:$80 sps:$4 sm:$0xff]  }
 0x19a   : > { %7729 = vrot.lane.b32.xlu1 %v6818_v3, %s10156_s13  ;;  %v10777_v29 = vpop.permute.xlu0 %4511 }
 0x19b   : > { %15493 = vst [vmem:[#allocation54_spill] sm:$0xff] %v10777_v29 }
 0x19c   : > { %v10775_v28 = vpop.permute.xlu1 %4513 }
 0x19d   : > { %15492 = vst [vmem:[#allocation53_spill] sm:$0xff] %v10775_v28  ;;  %v9905_v28 = vld [vmem:[#allocation2 + $0x4] ss:$80 sps:$4 sm:$0xff]  }
 0x19e   : > { %v10781_v31 = vpop.permute.xlu0 %4515 }
 0x19f   : > { %15495 = vst [vmem:[#allocation56_spill] sm:$0xff] %v10781_v31 }
 0x1a0   : > { %v10779_v30 = vpop.permute.xlu1 %4517 }
 0x1a1   : > { %15494 = vst [vmem:[#allocation55_spill] sm:$0xff] %v10779_v30 }
 0x1a2   : > { %v10785_v33 = vpop.permute.xlu0 %4519 }
 0x1a3   : > { %15497 = vst [vmem:[#allocation58_spill] sm:$0xff] %v10785_v33  ;;  %v9914_v33 = vld [vmem:[#allocation2 + $0x34] ss:$80 sps:$4 sm:$0xff]  }
 0x1a4   : > { %v10783_v32 = vpop.permute.xlu1 %4521 }
 0x1a5   : > { %15496 = vst [vmem:[#allocation57_spill] sm:$0xff] %v10783_v32  ;;  %v9917_v32 = vld [vmem:[#allocation2 + $0x5] ss:$80 sps:$4 sm:$0xff]  }
 0x1a6   : > { %v10789_v35 = vpop.permute.xlu0 %4523 }
 0x1a7   : > { %15499 = vst [vmem:[#allocation60_spill] sm:$0xff] %v10789_v35 }
 0x1a8   : > { %v10787_v34 = vpop.permute.xlu1 %4525 }
 0x1a9   : > { %15498 = vst [vmem:[#allocation59_spill] sm:$0xff] %v10787_v34 }
 0x1aa   : > { %v10793_v37 = vpop.permute.xlu0 %4527 }
 0x1ab   : > { %15501 = vst [vmem:[#allocation62_spill] sm:$0xff] %v10793_v37 }
 0x1ac   : > { %v10791_v36 = vpop.permute.xlu1 %4529 }
 0x1ad   : > { %15500 = vst [vmem:[#allocation61_spill] sm:$0xff] %v10791_v36 }
 0x1ae   : > { %v10797_v39 = vpop.permute.xlu0 %5339 }
 0x1af   : > { %15503 = vst [vmem:[#allocation64_spill] sm:$0xff] %v10797_v39 }
 0x1b0   : > { %v10795_v38 = vpop.permute.xlu1 %5331 }
 0x1b1   : > { %15502 = vst [vmem:[#allocation63_spill] sm:$0xff] %v10795_v38 }
 0x1b2   : > { %v10801_v41 = vpop.permute.xlu0 %5355 }
 0x1b3   : > { %15505 = vst [vmem:[#allocation66_spill] sm:$0xff] %v10801_v41 }
 0x1b4   : > { %v10799_v40 = vpop.permute.xlu1 %5347 }
 0x1b5   : > { %15504 = vst [vmem:[#allocation65_spill] sm:$0xff] %v10799_v40 }
 0x1b6   : > { %v10805_v43 = vpop.permute.xlu0 %5341 }
 0x1b7   : > { %15507 = vst [vmem:[#allocation68_spill] sm:$0xff] %v10805_v43 }
 0x1b8   : > { %v10803_v42 = vpop.permute.xlu1 %5333 }
 0x1b9   : > { %15506 = vst [vmem:[#allocation67_spill] sm:$0xff] %v10803_v42 }
 0x1ba   : > { %v10809_v53 = vpop.permute.xlu0 %5357 }
 0x1bb   : > { %15509 = vst [vmem:[#allocation70_spill] sm:$0xff] %v10809_v53 }
 0x1bc   : > { %v10807_v44 = vpop.permute.xlu1 %5349 }
 0x1bd   : > { %15508 = vst [vmem:[#allocation69_spill] sm:$0xff] %v10807_v44 }
 0x1be   : > { %v10813_v57 = vpop.permute.xlu0 %6875 }
 0x1bf   : > { %15511 = vst [vmem:[#allocation72_spill] sm:$0xff] %v10813_v57 }
 0x1c0   : > { %v10811_v56 = vpop.permute.xlu1 %6867 }
 0x1c1   : > { %15510 = vst [vmem:[#allocation71_spill] sm:$0xff] %v10811_v56 }
 0x1c2   : > { %v10819_v0 = vpop.permute.xlu0 %6891 }
 0x1c3   : > { %15513 = vst [vmem:[#allocation74_spill] sm:$0xff] %v10819_v0 }
 0x1c4   : > { %v10817_v63 = vpop.permute.xlu1 %6883 }
 0x1c5   : > { %15512 = vst [vmem:[#allocation73_spill] sm:$0xff] %v10817_v63 }
 0x1c8   : > { %v10823_v53 = vpop.permute.xlu1 %6869 }
 0x1c9   : > { %15514 = vst [vmem:[#allocation75_spill] sm:$0xff] %v10823_v53 }
 0x1cc   : > { %v10831_v40 = vpop.permute.xlu1 %6885 }
 0x1cd   : > { %15516 = vst [vmem:[#allocation77_spill] sm:$0xff] %v10831_v40  ;;  %v9902_v40 = vld [vmem:[#allocation2 + $0x35] ss:$80 sps:$4 sm:$0xff]  }
 0x20e   : > { %v9223_v59 = vpop.f32.mrb[8].mxu0 }
 0x20f   : > { %v969_v61 = vpop.f32.mrb[9].mxu0  ;;  %1297 = vrot.lane.b32.xlu1 %v9223_v59, %s10154_s16 }
 0x210   : > { %v9233_v62 = vpop.f32.mrb[8].mxu1  ;;  %1295 = vrot.lane.b32.xlu0 %v969_v61, %s10154_s16  ;;  %v10826_v61 = vpop.permute.xlu0 %6877 }
 0x211   : > { %v1066_v3 = vpop.f32.mrb[9].mxu1  ;;  %15515 = vst [vmem:[#allocation76_spill] sm:$0xff] %v10826_v61 }
 0x212   : > { %v9226_v42 = vpop.f32.mrb[10].mxu0 }
 0x213   : > { %1305 = vrot.lane.b32.xlu1 %v9233_v62, %s10154_s16  ;;  %v979_v44 = vpop.f32.mrb[11].mxu0 }
 0x214   : > { %1303 = vrot.lane.b32.xlu0 %v1066_v3, %s10154_s16  ;;  %v9236_v56 = vpop.f32.mrb[10].mxu1  ;;  %v10833_v53 = vpop.permute.xlu0 %6893 }
 0x215   : > { %v1076_v57 = vpop.f32.mrb[11].mxu1  ;;  %15517 = vst [vmem:[#allocation78_spill] sm:$0xff] %v10833_v53  ;;  %v9897_v53 = vld [vmem:[#allocation2 + $0x9] ss:$80 sps:$4 sm:$0xff]  }
 0x216   : > { %v9243_v43 = vpop.f32.mrb[12].mxu0 }
 0x217   : > { %1301 = vrot.lane.b32.xlu1 %v9226_v42, %s10154_s16  ;;  %v1163_v59 = vpop.f32.mrb[13].mxu0  ;;  %v10837_v42 = vpop.permute.xlu1 %7699 }
 0x218   : > { %1299 = vrot.lane.b32.xlu0 %v979_v44, %s10154_s16  ;;  %v9253_v63 = vpop.f32.mrb[12].mxu1  ;;  %15518 = vst [vmem:[#allocation79_spill] sm:$0xff] %v10837_v42  ;;  %v10840_v44 = vpop.permute.xlu0 %7707 }
 0x219   : > { %v1260_v0 = vpop.f32.mrb[13].mxu1  ;;  %15519 = vst [vmem:[#allocation80_spill] sm:$0xff] %v10840_v44 }
 0x21a   : > { %v9246_v38 = vpop.f32.mrb[14].mxu0 }
 0x21b   : > { %1309 = vrot.lane.b32.xlu1 %v9236_v56, %s10154_s16  ;;  %v1173_v62 = vpop.f32.mrb[15].mxu0  ;;  %v10845_v56 = vpop.permute.xlu1 %7715 }
 0x21c   : > { %1307 = vrot.lane.b32.xlu0 %v1076_v57, %s10154_s16  ;;  %v9256_v3 = vpop.f32.mrb[14].mxu1  ;;  %15520 = vst [vmem:[#allocation81_spill] sm:$0xff] %v10845_v56  ;;  %v10847_v57 = vpop.permute.xlu0 %7723  ;;  %v1397_v56 = vlaneseq }
 0x21d   : > { %v1270_v39 = vpop.f32.mrb[15].mxu1  ;;  %15521 = vst [vmem:[#allocation82_spill] sm:$0xff] %v10847_v57 }
 0x21e   : > { %v1398_v61 = vshrl.u32 %v1397_v56, 7 }
 0x21f   : > { %1313 = vrot.lane.b32.xlu1 %v9243_v43, %s10154_s16  ;;  %v10851_v43 = vpop.permute.xlu1 %7701 }
 0x220   : > { %1311 = vrot.lane.b32.xlu0 %v1163_v59, %s10154_s16  ;;  %15522 = vst [vmem:[#allocation83_spill] sm:$0xff] %v10851_v43  ;;  %v10853_v59 = vpop.permute.xlu0 %7709 }
 0x221   : > { %15523 = vst [vmem:[#allocation84_spill] sm:$0xff] %v10853_v59 }
 0x223   : > { %1321 = vrot.lane.b32.xlu1 %v9253_v63, %s10154_s16  ;;  %v10855_v63 = vpop.permute.xlu1 %7717 }
 0x224   : > { %1319 = vrot.lane.b32.xlu0 %v1260_v0, %s10154_s16  ;;  %15524 = vst [vmem:[#allocation85_spill] sm:$0xff] %v10855_v63  ;;  %v10857_v44 = vpop.permute.xlu0 %7725 }
 0x225   : > { %15525 = vst [vmem:[#allocation86_spill] sm:$0xff] %v10857_v44 }
 0x227   : > { %1317 = vrot.lane.b32.xlu1 %v9246_v38, %s10154_s16  ;;  %v10859_v0 = vpop.permute.xlu1 %5335 }
 0x228   : > { %1315 = vrot.lane.b32.xlu0 %v1173_v62, %s10154_s16  ;;  %15526 = vst [vmem:[#allocation87_spill] sm:$0xff] %v10859_v0  ;;  %v10861_v38 = vpop.permute.xlu0 %5343 }
 0x229   : > { %15527 = vst [vmem:[#allocation88_spill] sm:$0xff] %v10861_v38 }
 0x22b   : > { %1325 = vrot.lane.b32.xlu1 %v9256_v3, %s10154_s16  ;;  %v10863_v62 = vpop.permute.xlu1 %5351 }
 0x22c   : > { %1323 = vrot.lane.b32.xlu0 %v1270_v39, %s10154_s16  ;;  %15528 = vst [vmem:[#allocation89_spill] sm:$0xff] %v10863_v62  ;;  %v10865_v42 = vpop.permute.xlu0 %5359  ;;  %s10159_s16 = smov 32  }
 0x22d   : > { %15529 = vst [vmem:[#allocation90_spill] sm:$0xff] %v10865_v42 }
 0x22f   : > { %v10867_v57 = vpop.permute.xlu1 %5345 }
 0x230   : > { %15530 = vst [vmem:[#allocation91_spill] sm:$0xff] %v10867_v57  ;;  %v10869_v3 = vpop.permute.xlu0 %5337 }
 0x231   : > { %15531 = vst [vmem:[#allocation92_spill] sm:$0xff] %v10869_v3 }
 0x233   : > { %v10871_v39 = vpop.permute.xlu1 %5361 }
 0x234   : > { %15532 = vst [vmem:[#allocation93_spill] sm:$0xff] %v10871_v39  ;;  %v10873_v43 = vpop.permute.xlu0 %5353 }
 0x235   : > { %15533 = vst [vmem:[#allocation94_spill] sm:$0xff] %v10873_v43 }
 0x237   : > { %v10875_v59 = vpop.permute.xlu1 %6879 }
 0x238   : > { %15534 = vst [vmem:[#allocation95_spill] sm:$0xff] %v10875_v59  ;;  %v10877_v63 = vpop.permute.xlu0 %6871 }
 0x239   : > { %15535 = vst [vmem:[#allocation96_spill] sm:$0xff] %v10877_v63 }
 0x23b   : > { %v10879_v44 = vpop.permute.xlu1 %6895 }
 0x23c   : > { %15536 = vst [vmem:[#allocation97_spill] sm:$0xff] %v10879_v44  ;;  %v10881_v0 = vpop.permute.xlu0 %6887 }
 0x23d   : > { %15537 = vst [vmem:[#allocation98_spill] sm:$0xff] %v10881_v0  ;;  %v10157_v0 = vmov 1983009808  }
 0x23f   : > { %v10883_v38 = vpop.permute.xlu1 %6881 }
 0x240   : > { %15538 = vst [vmem:[#allocation99_spill] sm:$0xff] %v10883_v38  ;;  %v10885_v62 = vpop.permute.xlu0 %6873  ;;  %v1395_v38 = vunpack.c.l.s4 %v10157_v0  ;;  %v9903_v0 = vld [vmem:[#allocation2] ss:$80 sps:$4 sm:$0xff]  }
 0x241   : > { %15539 = vst [vmem:[#allocation100_spill] sm:$0xff] %v10885_v62 }
 0x243   : > { %v10887_v42 = vpop.permute.xlu1 %6897 }
 0x244   : > { %15540 = vst [vmem:[#allocation101_spill] sm:$0xff] %v10887_v42  ;;  %v10889_v57 = vpop.permute.xlu0 %6889 }
 0x245   : > { %15541 = vst [vmem:[#allocation102_spill] sm:$0xff] %v10889_v57  ;;  %v1396_v57 = vunpack.c.0.s8 %v1395_v38 }
 0x247   : > { %v10891_v3 = vpop.permute.xlu1 %7711 }
 0x248   : > { %15542 = vst [vmem:[#allocation103_spill] sm:$0xff] %v10891_v3  ;;  %v10893_v39 = vpop.permute.xlu0 %7703 }
 0x249   : > { %15543 = vst [vmem:[#allocation104_spill] sm:$0xff] %v10893_v39  ;;  %v9900_v39 = vld [vmem:[#allocation2 + $0x31] ss:$80 sps:$4 sm:$0xff]  }
 0x24b   : > { %v10895_v43 = vpop.permute.xlu1 %7727 }
 0x24c   : > { %15544 = vst [vmem:[#allocation105_spill] sm:$0xff] %v10895_v43  ;;  %v10897_v59 = vpop.permute.xlu0 %7719 }
 0x24d   : > { %15545 = vst [vmem:[#allocation106_spill] sm:$0xff] %v10897_v59  ;;  %v9899_v59 = vld [vmem:[#allocation2 + $0xd] ss:$80 sps:$4 sm:$0xff]  }
 0x24f   : > { %v10899_v63 = vpop.permute.xlu1 %7713 }
 0x250   : > { %15546 = vst [vmem:[#allocation107_spill] sm:$0xff] %v10899_v63  ;;  %v10901_v44 = vpop.permute.xlu0 %7705  ;;  %v10908_v63 = vsub.s32 %v1396_v57, %v1398_v61 }
 0x251   : > { %15547 = vst [vmem:[#allocation108_spill] sm:$0xff] %v10901_v44  ;;  %v10158_v44 = vmov 1934713408  }
 0x252   : > { %v1459_v41 = vunpack.c.l.s4 %v10158_v44  ;;  %v3907_v56 = vrot.slane %v9897_v53, %v10908_v63  ;;  %v3923_v36 = vrot.slane %v9900_v39, %v10908_v63  ;;  %v3914_v29 = vrot.slane %v9899_v59, %v10908_v63  ;;  %v9915_v59 = vld [vmem:[#allocation2 + $0x1] ss:$80 sps:$4 sm:$0xff]  }
 0x253   : > { %v10903_v62 = vpop.permute.xlu1 %7729  ;;  %v3930_v57 = vrot.slane %v9902_v40, %v10908_v63  ;;  %v10918_v44 = vrot.slane %v9903_v0, %v10908_v63  ;;  %v10924_v53 = vrot.slane %v9905_v28, %v10908_v63  ;;  %v10940_v30 = vrot.slane %v9909_v24, %v10908_v63 }
 0x254   : > { %15548 = vst [vmem:[#allocation109_spill] sm:$0xff] %v10903_v62  ;;  %v10905_v42 = vpop.permute.xlu0 %7721  ;;  %v9906_v62 = vld [vmem:[#allocation2 + $0x28] ss:$80 sps:$4 sm:$0xff]   ;;  %v1460_v37 = vunpack.c.0.s8 %v1459_v41  ;;  %v3964_v28 = vcombine.high %v3907_v56, %v3923_v36 }
 0x255   : > { %15549 = vst [vmem:[#allocation110_spill] sm:$0xff] %v10905_v42  ;;  %v9908_v42 = vld [vmem:[#allocation2 + $0x2c] ss:$80 sps:$4 sm:$0xff]   ;;  %v3979_v0 = vcombine.low %v3914_v29, %v3930_v57  ;;  %v3980_v34 = vcombine.high %v3914_v29, %v3930_v57  ;;  %v9930_v57 = vld [vmem:[#allocation2 + $0x45] ss:$80 sps:$4 sm:$0xff]  }
 0x256   : > { %v10927_v39 = vrot.slane %v9908_v42, %v10908_v63  ;;  %v10934_v42 = vsub.s32 %v1460_v37, %v1398_v61  ;;  %v10948_v37 = vrot.slane %v9915_v59, %v10908_v63  ;;  %v10951_v61 = vrot.slane %v9917_v32, %v10908_v63  ;;  %v9927_v29 = vld [vmem:[#allocation2 + $0x1d] ss:$80 sps:$4 sm:$0xff]   ;;  %v9938_v32 = vld [vmem:[#allocation2 + $0x38] ss:$80 sps:$4 sm:$0xff]  }
 0x257   : > { %v1552_v59 = vrot.slane %v9912_v25, %v10908_v63  ;;  %v4186_v8 = vrot.slane %v9927_v29, %v10908_v63 }
 0x258   : > { %v1473_v35 = vcombine.high %v10924_v53, %v10927_v39  ;;  %v10969_v20 = vrot.slane %v3979_v0, %v10934_v42  ;;  %v10977_v25 = vrot.slane %v3980_v34, %v10934_v42 }
 0x259   : > { %v1592_v34 = vcombine.low %v10940_v30, %v1552_v59 }
 0x25a   : > { %15551 = vst [vmem:[#allocation112_spill] sm:$0xff] %v10969_v20  ;;  %v10985_v0 = vrot.slane %v1473_v35, %v10934_v42 }
 0x281   : > { %v1298_v3 = vpop.permute.xlu1 %1297 }
 0x282   : > { %1345 = vst.msk [vmem:[#allocation2 + $0xa9] sm:$0xff] %vm507_vm3, %v1298_v3  ;;  %v1296_v43 = vpop.permute.xlu0 %1295 }
 0x283   : > { %1344 = vst.msk [vmem:[#allocation2 + $0xa1] sm:$0xff] %vm507_vm3, %v1296_v43  ;;  %v10921_v43 = vrot.slane %v9906_v62, %v10908_v63 }
 0x285   : > { %v1306_v38 = vpop.permute.xlu1 %1305  ;;  %v1457_v22 = vcombine.high %v10918_v44, %v10921_v43  ;;  %v1456_v31 = vcombine.low %v10918_v44, %v10921_v43  ;;  %v10972_v44 = vrot.slane %v3964_v28, %v10934_v42  ;;  %v1559_v43 = vrot.slane %v9914_v33, %v10908_v63 }
 0x286   : > { %1349 = vst.msk [vmem:[#allocation2 + $0xd1] sm:$0xff] %vm507_vm3, %v1306_v38  ;;  %v1304_v3 = vpop.permute.xlu0 %1303  ;;  %v9911_v38 = vld [vmem:[#allocation2 + $0xc] ss:$80 sps:$4 sm:$0xff]   ;;  %v4179_v28 = vrot.slane %v9925_v27, %v10908_v63 }
 0x287   : > { %1348 = vst.msk [vmem:[#allocation2 + $0xc9] sm:$0xff] %vm507_vm3, %v1304_v3  ;;  %v3963_v3 = vcombine.low %v3907_v56, %v3923_v36  ;;  %v10945_v36 = vrot.slane %v9911_v38, %v10908_v63  ;;  %v9928_v56 = vld [vmem:[#allocation2 + $0x41] ss:$80 sps:$4 sm:$0xff]   ;;  %v1472_v38 = vcombine.low %v10924_v53, %v10927_v39  ;;  %v10980_v53 = vrot.slane %v1457_v22, %v10934_v42 }
 0x288   : > { %v3787_v39 = vrot.slane %v9918_v26, %v10908_v63  ;;  %v4195_v33 = vrot.slane %v9928_v56, %v10908_v63  ;;  %v4202_v22 = vrot.slane %v9930_v57, %v10908_v63  ;;  %v10995_v26 = vrot.slane %v9935_v12, %v10908_v63  ;;  %v9937_v56 = vld [vmem:[#allocation2 + $0x14] ss:$80 sps:$4 sm:$0xff]   ;;  %v9940_v57 = vld [vmem:[#allocation2 + $0x3c] ss:$80 sps:$4 sm:$0xff]  }
 0x289   : > { %v1302_v40 = vpop.permute.xlu1 %1301  ;;  %v10929_v41 = vld [vmem:[#allocation2 + $0xa9] sm:$0xff]  ;;  %v10956_v23 = vrot.slane %v3963_v3, %v10934_v42  ;;  %v11006_v35 = vrot.slane %v1456_v31, %v10934_v42  ;;  %v11009_v29 = vrot.slane %v1472_v38, %v10934_v42  ;;  %v1608_v12 = vcombine.low %v10945_v36, %v1559_v43 }
 0x28a   : > { %1347 = vst.msk [vmem:[#allocation2 + $0xb9] sm:$0xff] %vm507_vm3, %v1302_v40  ;;  %4533 = vrot.lane.b32.xlu1 %v10929_v41, %s10155_s19  ;;  %v1300_v62 = vpop.permute.xlu0 %1299  ;;  %v9920_v40 = vld [vmem:[#allocation2 + $0x2d] ss:$80 sps:$4 sm:$0xff]   ;;  %v3828_v13 = vcombine.high %v10948_v37, %v3787_v39  ;;  %v3827_v31 = vcombine.low %v10948_v37, %v3787_v39  ;;  %v4235_v38 = vcombine.low %v4179_v28, %v4195_v33 }
 0x28b   : > { %1346 = vst.msk [vmem:[#allocation2 + $0xb1] sm:$0xff] %vm507_vm3, %v1300_v62  ;;  %15550 = vst [vmem:[#allocation111_spill] sm:$0xff] %v10956_v23  ;;  %v10990_v16 = vld [vmem:[#allocation2 + $0xa0] sm:$0xff]  ;;  %v4236_v17 = vcombine.high %v4179_v28, %v4195_v33  ;;  %v2084_v18 = vld [vmem:[#allocation2 + $0xa8] sm:$0xff]  ;;  %v11037_v39 = vrot.slane %v9940_v57, %v10908_v63 }
 0x28c   : > { %15552 = vst [vmem:[#allocation113_spill] sm:$0xff] %v11006_v35  ;;  %15553 = vst [vmem:[#allocation114_spill] sm:$0xff] %v11009_v29  ;;  %v11053_v33 = vrot.slane %v3827_v31, %v10934_v42 }
 0x28d   : > { %v1310_v62 = vpop.permute.xlu1 %1309  ;;  %v10953_v24 = vld [vmem:[#allocation2 + $0xd1] sm:$0xff] }
 0x28e   : > { %1351 = vst.msk [vmem:[#allocation2 + $0xe1] sm:$0xff] %vm507_vm3, %v1310_v62  ;;  %4541 = vrot.lane.b32.xlu1 %v10953_v24, %s10155_s19  ;;  %5373 = vrot.lane.b32.xlu0 %v10953_v24, %s10156_s13  ;;  %v1308_v3 = vpop.permute.xlu0 %1307  ;;  %v3794_v62 = vrot.slane %v9920_v40, %v10908_v63  ;;  %v10998_v40 = vrot.slane %v9938_v32, %v10908_v63  ;;  %v11019_v6 = vld [vmem:[#allocation2 + $0xc8] sm:$0xff]  ;;  %15556 = vst [vmem:[#allocation117_spill] sm:$0xff] %v11053_v33  ;;  %v2088_v57 = vld [vmem:[#allocation2 + $0xd0] sm:$0xff] }
 0x28f   : > { %1350 = vst.msk [vmem:[#allocation2 + $0xd9] sm:$0xff] %vm507_vm3, %v1308_v3  ;;  %v1593_v32 = vcombine.high %v10940_v30, %v1552_v59  ;;  %v4251_v30 = vcombine.low %v4186_v8, %v4202_v22  ;;  %v4252_v59 = vcombine.high %v4186_v8, %v4202_v22  ;;  %v11059_v22 = vrot.slane %v4235_v38, %v10934_v42 }
 0x290   : > { %v3844_v21 = vcombine.high %v10951_v61, %v3794_v62  ;;  %v3843_v9 = vcombine.low %v10951_v61, %v3794_v62  ;;  %v11031_v61 = vrot.slane %v1608_v12, %v10934_v42  ;;  %v11047_v62 = vrot.slane %v3828_v13, %v10934_v42 }
 0x291   : > { %v1314_v3 = vpop.permute.xlu1 %1313  ;;  %v11041_v8 = vrot.slane %v1593_v32, %v10934_v42  ;;  %15558 = vst [vmem:[#allocation119_spill] sm:$0xff] %v11059_v22  ;;  %v11062_v12 = vrot.slane %v4236_v17, %v10934_v42  ;;  %v11067_v13 = vrot.slane %v4251_v30, %v10934_v42 }
 0x292   : > { %1353 = vst.msk [vmem:[#allocation2 + $0xf9] sm:$0xff] %vm507_vm3, %v1314_v3  ;;  %5365 = vrot.lane.b32.xlu1 %v10929_v41, %s10156_s13  ;;  %2163 = vrot.lane.b32.xlu0 %v10990_v16, %s10155_s19  ;;  %v1312_v27 = vpop.permute.xlu0 %1311  ;;  %v1609_v3 = vcombine.high %v10945_v36, %v1559_v43  ;;  %v1729_v36 = vcombine.high %v10995_v26, %v10998_v40  ;;  %15555 = vst [vmem:[#allocation116_spill] sm:$0xff] %v11031_v61 }
 0x293   : > { %1352 = vst.msk [vmem:[#allocation2 + $0xf1] sm:$0xff] %vm507_vm3, %v1312_v27  ;;  %v11022_v27 = vrot.slane %v1592_v34, %v10934_v42  ;;  %v11034_v43 = vrot.slane %v9937_v56, %v10908_v63  ;;  %v11050_v28 = vrot.slane %v3844_v21, %v10934_v42  ;;  %v11056_v34 = vrot.slane %v3843_v9, %v10934_v42 }
 0x294   : > { %15559 = vst [vmem:[#allocation120_spill] sm:$0xff] %v11067_v13  ;;  %v11070_v21 = vrot.slane %v4252_v59, %v10934_v42 }
 0x295   : > { %v1322_v10 = vpop.permute.xlu1 %1321  ;;  %15554 = vst [vmem:[#allocation115_spill] sm:$0xff] %v11022_v27  ;;  %15557 = vst [vmem:[#allocation118_spill] sm:$0xff] %v11056_v34 }
 0x296   : > { %1357 = vst.msk [vmem:[#allocation2 + $0x121] sm:$0xff] %vm507_vm3, %v1322_v10  ;;  %2165 = vrot.lane.b32.xlu1 %v2084_v18, %s10155_s19  ;;  %2171 = vrot.lane.b32.xlu0 %v11019_v6, %s10155_s19  ;;  %v1320_v37 = vpop.permute.xlu0 %1319  ;;  %v11044_v10 = vrot.slane %v1609_v3, %v10934_v42  ;;  %v11073_v3 = vrot.slane %v1729_v36, %v10934_v42 }
 0x297   : > { %1356 = vst.msk [vmem:[#allocation2 + $0x119] sm:$0xff] %vm507_vm3, %v1320_v37 }
 0x299   : > { %v1318_v56 = vpop.permute.xlu1 %1317  ;;  %v11064_v32 = vld [vmem:[#allocation2 + $0xf9] sm:$0xff] }
 0x29a   : > { %1355 = vst.msk [vmem:[#allocation2 + $0x109] sm:$0xff] %vm507_vm3, %v1318_v56  ;;  %2173 = vrot.lane.b32.xlu1 %v2088_v57, %s10155_s19  ;;  %2995 = vrot.lane.b32.xlu0 %v10990_v16, %s10156_s13  ;;  %v1316_v17 = vpop.permute.xlu0 %1315  ;;  %v11081_v31 = vld [vmem:[#allocation2 + $0xf0] sm:$0xff]  ;;  %v11083_v38 = vld [vmem:[#allocation2 + $0xf8] sm:$0xff]  ;;  %v3931_v59 = vcombine.low %v10929_v41, %v11064_v32  ;;  %v3932_v36 = vcombine.high %v10929_v41, %v11064_v32  ;;  %v4451_v56 = vld [vmem:[#allocation2 + $0xa1] sm:$0xff] }
 0x29b   : > { %v11085_v30 = vld [vmem:[#allocation2 + $0xf1] sm:$0xff]  ;;  %1354 = vst.msk [vmem:[#allocation2 + $0x101] sm:$0xff] %vm507_vm3, %v1316_v17  ;;  %v1424_v9 = vcombine.low %v10990_v16, %v11081_v31  ;;  %v1425_v14 = vcombine.high %v10990_v16, %v11081_v31  ;;  %v1560_v11 = vcombine.low %v2084_v18, %v11083_v38  ;;  %v1561_v19 = vcombine.high %v2084_v18, %v11083_v38 }
 0x29c   : > { %15560 = vst [vmem:[#allocation121_spill] sm:$0xff] %v11085_v30  ;;  %v3939_v7 = vrot.slane %v3931_v59, %v10908_v63  ;;  %v3946_v41 = vrot.slane %v3932_v36, %v10908_v63  ;;  %v3795_v15 = vcombine.low %v4451_v56, %v11085_v30  ;;  %v3796_v37 = vcombine.high %v4451_v56, %v11085_v30 }
 0x29d   : > { %v1326_v17 = vpop.permute.xlu1 %1325  ;;  %v11104_v51 = vld [vmem:[#allocation2 + $0x121] sm:$0xff]  ;;  %v1432_v4 = vrot.slane %v1424_v9, %v10908_v63  ;;  %v1439_v47 = vrot.slane %v1425_v14, %v10908_v63  ;;  %v11109_v16 = vrot.slane %v1560_v11, %v10908_v63  ;;  %v11112_v58 = vrot.slane %v1561_v19, %v10908_v63 }
 0x29e   : > { %1359 = vst.msk [vmem:[#allocation2 + $0x131] sm:$0xff] %vm507_vm3, %v1326_v17  ;;  %2997 = vrot.lane.b32.xlu1 %v2084_v18, %s10156_s13  ;;  %3003 = vrot.lane.b32.xlu0 %v11019_v6, %s10156_s13  ;;  %v1324_v59 = vpop.permute.xlu0 %1323  ;;  %v11118_v36 = vld [vmem:[#allocation2 + $0x118] sm:$0xff]  ;;  %v11120_v30 = vld [vmem:[#allocation2 + $0x120] sm:$0xff]  ;;  %v3947_v11 = vcombine.low %v10953_v24, %v11104_v51  ;;  %v3948_v14 = vcombine.high %v10953_v24, %v11104_v51  ;;  %v11132_v18 = vld [vmem:[#allocation2 + $0xc9] sm:$0xff] }
 0x29f   : > { %15561 = vst [vmem:[#allocation122_spill] sm:$0xff] %v11120_v30  ;;  %v11122_v9 = vld [vmem:[#allocation2 + $0x119] sm:$0xff]  ;;  %v11129_v19 = vrot.slane %v3795_v15, %v10908_v63  ;;  %1358 = vst.msk [vmem:[#allocation2 + $0x129] sm:$0xff] %vm507_vm3, %v1324_v59  ;;  %v1440_v17 = vcombine.low %v11019_v6, %v11118_v36  ;;  %v1441_v52 = vcombine.high %v11019_v6, %v11118_v36 }
 0x2a0   : > { %15562 = vst [vmem:[#allocation123_spill] sm:$0xff] %v11122_v9  ;;  %v1576_v5 = vcombine.low %v2088_v57, %v11120_v30  ;;  %v1577_v49 = vcombine.high %v2088_v57, %v11120_v30  ;;  %v3955_v1 = vrot.slane %v3947_v11, %v10908_v63  ;;  %v3962_v24 = vrot.slane %v3948_v14, %v10908_v63 }
 0x2a1   : > { %v11143_v15 = vrot.slane %v3796_v37, %v10908_v63  ;;  %v3811_v59 = vcombine.low %v11132_v18, %v11122_v9  ;;  %v1448_v48 = vrot.slane %v1440_v17, %v10908_v63  ;;  %v1455_v60 = vrot.slane %v1441_v52, %v10908_v63 }
 0x2a2   : > { %v1584_v6 = vrot.slane %v1576_v5, %v10908_v63  ;;  %v1591_v50 = vrot.slane %v1577_v49, %v10908_v63  ;;  %3005 = vrot.lane.b32.xlu1 %v2088_v57, %s10156_s13  ;;  %4531 = vrot.lane.b32.xlu0 %v4451_v56, %s10155_s19  ;;  %v3995_v11 = vcombine.low %v3939_v7, %v3955_v1 }
 0x2a3   : > { %v4011_v14 = vcombine.low %v3946_v41, %v3962_v24  ;;  %v3996_v2 = vcombine.high %v3939_v7, %v3955_v1  ;;  %v4012_v37 = vcombine.high %v3946_v41, %v3962_v24  ;;  %v1489_v45 = vcombine.high %v1432_v4, %v1448_v48  ;;  %v6819_v24 = vld [vmem:[#allocation2 + $0xa2] sm:$0xff] }
 0x2a4   : > { %v1505_v54 = vcombine.high %v1439_v47, %v1455_v60  ;;  %v1488_v46 = vcombine.low %v1432_v4, %v1448_v48  ;;  %v11154_v55 = vrot.slane %v3995_v11, %v10934_v42  ;;  %v1504_v49 = vcombine.low %v1439_v47, %v1455_v60 }
 0x2a5   : > { %v11157_v52 = vrot.slane %v4011_v14, %v10934_v42  ;;  %v4010_v5 = vrot.slane %v3996_v2, %v10934_v42  ;;  %v4026_v57 = vrot.slane %v4012_v37, %v10934_v42  ;;  %v1503_v17 = vrot.slane %v1489_v45, %v10934_v42 }
 0x2a6   : > { %15563 = vst [vmem:[#allocation124_spill] sm:$0xff] %v11154_v55  ;;  %v1519_v30 = vrot.slane %v1505_v54, %v10934_v42  ;;  %v11164_v1 = vrot.slane %v1488_v46, %v10934_v42  ;;  %5363 = vrot.lane.b32.xlu1 %v4451_v56, %s10156_s13  ;;  %4539 = vrot.lane.b32.xlu0 %v11132_v18, %s10155_s19 }
 0x2a7   : > { %15564 = vst [vmem:[#allocation125_spill] sm:$0xff] %v11157_v52  ;;  %v4028_v48 = vcombine.high %v10956_v23, %v11154_v55  ;;  %v4032_v47 = vcombine.high %v10969_v20, %v11157_v52  ;;  %v4030_v60 = vcombine.high %v10972_v44, %v4010_v5  ;;  %v4034_v45 = vcombine.high %v10977_v25, %v4026_v57  ;;  %v11478_v55 = vld [vmem:[#allocation2 + $0xb1] sm:$0xff] }
 0x2a8   : > { %15565 = vst [vmem:[#allocation126_spill] sm:$0xff] %v11164_v1  ;;  %v4029_v54 = vcombine.low %v10972_v44, %v4010_v5  ;;  %v4033_v46 = vcombine.low %v10977_v25, %v4026_v57  ;;  %v1522_v2 = vcombine.low %v10980_v53, %v1503_v17  ;;  %v1526_v7 = vcombine.low %v10985_v0, %v1519_v30  ;;  %v9990_v52 = vld [vmem:[#allocation2 + $0xe6] ss:$80 sps:$4 sm:$0xff]  }
 0x2a9   : > { %v11178_v4 = vpack.i.bf16 %v4032_v47, %v4028_v48  ;;  %v11182_v56 = vrot.slane %v1504_v49, %v10934_v42  ;;  %v1521_v41 = vcombine.high %v11006_v35, %v11164_v1  ;;  %v11186_v11 = vpack.i.bf16 %v4034_v45, %v4030_v60  ;;  %v9985_v1 = vld [vmem:[#allocation2 + $0xe2] ss:$80 sps:$4 sm:$0xff]  }
 0x2aa   : > { %v11188_v14 = vpack.i.bf16 %v4033_v46, %v4029_v54  ;;  %v1624_v44 = vcombine.low %v11109_v16, %v1584_v6  ;;  %v1640_v25 = vcombine.low %v11112_v58, %v1591_v50  ;;  %6899 = vrot.lane.b32.xlu1 %v6819_v24, %s10155_s19  ;;  %5371 = vrot.lane.b32.xlu0 %v11132_v18, %s10156_s13 }
 0x2ab   : > { %15566 = vst [vmem:[#allocation127_spill] sm:$0xff] %v11178_v4  ;;  %15567 = vst [vmem:[#allocation128_spill] sm:$0xff] %v11182_v56  ;;  %v11195_v37 = vpack.i.bf16 %v1526_v7, %v1522_v2  ;;  %v1525_v5 = vcombine.high %v11009_v29, %v11182_v56  ;;  %v1523_v49 = vcombine.high %v10980_v53, %v1503_v17  ;;  %v6823_v53 = vld [vmem:[#allocation2 + $0xca] sm:$0xff] }
 0x2ac   : > { %15568 = vst [vmem:[#allocation129_spill] sm:$0xff] %v11186_v11  ;;  %15569 = vst [vmem:[#allocation130_spill] sm:$0xff] %v11188_v14  ;;  %v11201_v57 = vrot.slane %v1624_v44, %v10934_v42  ;;  %v11204_v48 = vrot.slane %v1640_v25, %v10934_v42  ;;  %v1527_v47 = vcombine.high %v10985_v0, %v1519_v30  ;;  %v9945_v11 = vld [vmem:[#allocation2 + $0x18] ss:$80 sps:$4 sm:$0xff]  }
 0x2ad   : > { %15570 = vst [vmem:[#allocation131_spill] sm:$0xff] %v11195_v37  ;;  %v1625_v60 = vcombine.high %v11109_v16, %v1584_v6  ;;  %v11208_v45 = vpack.i.bf16 %v1525_v5, %v1521_v41  ;;  %v1641_v54 = vcombine.high %v11112_v58, %v1591_v50  ;;  %v3812_v46 = vcombine.high %v11132_v18, %v11122_v9  ;;  %v4454_v50 = vld [vmem:[#allocation2 + $0xb9] sm:$0xff]  ;;  %v11223_v58 = vld [vmem:[#allocation2 + $0x109] sm:$0xff] }
 0x2ae   : > { %15571 = vst [vmem:[#allocation132_spill] sm:$0xff] %v11201_v57  ;;  %15572 = vst [vmem:[#allocation133_spill] sm:$0xff] %v11204_v48  ;;  %v3819_v2 = vrot.slane %v3811_v59, %v10908_v63  ;;  %v1657_v17 = vcombine.high %v11022_v27, %v11201_v57  ;;  %v1661_v7 = vcombine.high %v11031_v61, %v11204_v48  ;;  %7731 = vrot.lane.b32.xlu1 %v6819_v24, %s10156_s13  ;;  %v6820_v27 = vld [vmem:[#allocation2 + $0xaa] sm:$0xff]  ;;  %v9977_v48 = vld [vmem:[#allocation2 + $0xa2] ss:$80 sps:$4 sm:$0xff]  }
 0x2af   : > { %15573 = vst [vmem:[#allocation134_spill] sm:$0xff] %v11208_v45  ;;  %v11218_v44 = vpack.i.bf16 %v1527_v47, %v1523_v49  ;;  %v1639_v0 = vrot.slane %v1625_v60, %v10934_v42  ;;  %6907 = vrot.lane.b32.xlu0 %v6823_v53, %s10155_s19  ;;  %15575 = vst [vmem:[#allocation136_spill] sm:$0xff] %v11223_v58  ;;  %v1655_v30 = vrot.slane %v1641_v54, %v10934_v42  ;;  %v4458_v60 = vld [vmem:[#allocation2 + $0xe1] sm:$0xff]  ;;  %v11237_v54 = vld [vmem:[#allocation2 + $0x131] sm:$0xff] }
 0x2b0   : > { %v3826_v16 = vrot.slane %v3812_v46, %v10908_v63  ;;  %v3860_v18 = vcombine.high %v11129_v19, %v3819_v2  ;;  %v11228_v59 = vpack.i.bf16 %v1661_v7, %v1657_v17  ;;  %v3859_v25 = vcombine.low %v11129_v19, %v3819_v2  ;;  %15577 = vst [vmem:[#allocation138_spill] sm:$0xff] %v11237_v54  ;;  %v10003_v61 = vld [vmem:[#allocation2 + $0x16] ss:$80 sps:$4 sm:$0xff]  }
 0x2b1   : > { %15574 = vst [vmem:[#allocation135_spill] sm:$0xff] %v11218_v44  ;;  %v1659_v6 = vcombine.high %v11041_v8, %v1639_v0  ;;  %v1658_v41 = vcombine.low %v11041_v8, %v1639_v0  ;;  %v1663_v24 = vcombine.high %v11044_v10, %v1655_v30  ;;  %v1662_v5 = vcombine.low %v11044_v10, %v1655_v30  ;;  %v11247_v10 = vld [vmem:[#allocation2 + $0x100] sm:$0xff] }
 0x2b2   : > { %15576 = vst [vmem:[#allocation137_spill] sm:$0xff] %v11228_v59  ;;  %v3874_v49 = vrot.slane %v3860_v18, %v10934_v42  ;;  %v3876_v47 = vcombine.high %v11143_v15, %v3826_v16  ;;  %v11240_v46 = vrot.slane %v3859_v25, %v10934_v42  ;;  %v3875_v17 = vcombine.low %v11143_v15, %v3826_v16  ;;  %v11261_v25 = vld [vmem:[#allocation2 + $0xb0] sm:$0xff] }
 0x2b3   : > { %v4203_v8 = vcombine.low %v4454_v50, %v11223_v58  ;;  %v4204_v19 = vcombine.high %v4454_v50, %v11223_v58  ;;  %4537 = vrot.lane.b32.xlu1 %v4454_v50, %s10155_s19  ;;  %7739 = vrot.lane.b32.xlu0 %v6823_v53, %s10156_s13  ;;  %15579 = vst [vmem:[#allocation140_spill] sm:$0xff] %v11247_v10  ;;  %v9979_v58 = vld [vmem:[#allocation2 + $0x1a] ss:$80 sps:$4 sm:$0xff]  }
 0x2b4   : > { %15578 = vst [vmem:[#allocation139_spill] sm:$0xff] %v11240_v46  ;;  %v11249_v2 = vpack.i.bf16 %v1663_v24, %v1659_v6  ;;  %v11251_v7 = vpack.i.bf16 %v1662_v5, %v1658_v41  ;;  %v3890_v0 = vrot.slane %v3876_v47, %v10934_v42  ;;  %v3893_v30 = vcombine.low %v11047_v62, %v3874_v49 }
 0x2b5   : > { %v11256_v15 = vrot.slane %v3875_v17, %v10934_v42  ;;  %v3892_v16 = vcombine.high %v11053_v33, %v11240_v46  ;;  %v4211_v18 = vrot.slane %v4203_v8, %v10908_v63  ;;  %v4218_v6 = vrot.slane %v4204_v19, %v10908_v63  ;;  %v10007_v46 = vld [vmem:[#allocation2 + $0xb6] ss:$80 sps:$4 sm:$0xff]  }
 0x2b6   : > { %15580 = vst [vmem:[#allocation141_spill] sm:$0xff] %v11249_v2  ;;  %15581 = vst [vmem:[#allocation142_spill] sm:$0xff] %v11251_v7  ;;  %v3897_v53 = vcombine.low %v11050_v28, %v3890_v0  ;;  %v4219_v41 = vcombine.low %v4458_v60, %v11237_v54  ;;  %v4220_v24 = vcombine.high %v4458_v60, %v11237_v54  ;;  %v11275_v7 = vld [vmem:[#allocation2 + $0x128] sm:$0xff] }
 0x2b7   : > { %15582 = vst [vmem:[#allocation143_spill] sm:$0xff] %v11256_v15  ;;  %v3896_v5 = vcombine.high %v11056_v34, %v11256_v15  ;;  %v3894_v47 = vcombine.high %v11047_v62, %v3874_v49  ;;  %v3898_v17 = vcombine.high %v11050_v28, %v3890_v0  ;;  %v1696_v8 = vcombine.low %v11261_v25, %v11247_v10  ;;  %v11289_v0 = vld [vmem:[#allocation2 + $0xd8] sm:$0xff]  ;;  %v9997_v15 = vld [vmem:[#allocation2 + $0xd2] ss:$80 sps:$4 sm:$0xff]  }
 0x2b8   : > { %4545 = vrot.lane.b32.xlu1 %v4458_v60, %s10155_s19  ;;  %5369 = vrot.lane.b32.xlu0 %v4454_v50, %s10156_s13  ;;  %15583 = vst [vmem:[#allocation144_spill] sm:$0xff] %v11275_v7  ;;  %v11277_v19 = vpack.i.bf16 %v3897_v53, %v3893_v30  ;;  %v4227_v2 = vrot.slane %v4219_v41, %v10908_v63  ;;  %v9966_v54 = vld [vmem:[#allocation2 + $0xdd] ss:$80 sps:$4 sm:$0xff]   ;;  %v10002_v34 = vld [vmem:[#allocation2 + $0xd6] ss:$80 sps:$4 sm:$0xff]  }
 0x2b9   : > { %v4234_v44 = vrot.slane %v4220_v24, %v10908_v63  ;;  %v11281_v59 = vpack.i.bf16 %v3896_v5, %v3892_v16  ;;  %v11283_v62 = vpack.i.bf16 %v3898_v17, %v3894_v47  ;;  %v1697_v28 = vcombine.high %v11261_v25, %v11247_v10  ;;  %v9964_v10 = vld [vmem:[#allocation2 + $0xd9] ss:$80 sps:$4 sm:$0xff]  }
 0x2ba   : > { %15584 = vst [vmem:[#allocation145_spill] sm:$0xff] %v11277_v19  ;;  %v1744_v49 = vcombine.low %v11034_v43, %v11037_v39  ;;  %v4267_v50 = vcombine.low %v4211_v18, %v4227_v2  ;;  %v4268_v30 = vcombine.high %v4211_v18, %v4227_v2  ;;  %v6822_v19 = vld [vmem:[#allocation2 + $0xba] sm:$0xff]  ;;  %v1704_v41 = vrot.slane %v1696_v8, %v10908_v63 }
 0x2bb   : > { %15585 = vst [vmem:[#allocation146_spill] sm:$0xff] %v11281_v59  ;;  %15586 = vst [vmem:[#allocation147_spill] sm:$0xff] %v11283_v62  ;;  %v4283_v45 = vcombine.low %v4218_v6, %v4234_v44  ;;  %v4284_v53 = vcombine.high %v4218_v6, %v4234_v44  ;;  %v1712_v16 = vcombine.low %v11289_v0, %v11275_v7 }
 0x2bc   : > { %v1713_v24 = vcombine.high %v11289_v0, %v11275_v7  ;;  %v15587_v5 = vcombine.high %v11034_v43, %v11037_v39  ;;  %5377 = vrot.lane.b32.xlu1 %v4458_v60, %s10156_s13  ;;  %6905 = vrot.lane.b32.xlu0 %v6822_v19, %s10155_s19  ;;  %v11303_v44 = vrot.slane %v4267_v50, %v10934_v42  ;;  %v11365_v7 = vld [vmem:[#allocation2 + $0x108] sm:$0xff] }
 0x2bd   : > { %v11306_v2 = vrot.slane %v4283_v45, %v10934_v42  ;;  %v4282_v18 = vrot.slane %v4268_v30, %v10934_v42  ;;  %v4298_v6 = vrot.slane %v4284_v53, %v10934_v42  ;;  %v1711_v17 = vrot.slane %v1697_v28, %v10908_v63  ;;  %15600 = vst [vmem:[#allocation159_spill] sm:$0xff] %v11365_v7 }
 0x2be   : > { %v1759_v47 = vrot.slane %v15587_v5, %v10934_v42  ;;  %15588 = vst [vmem:[#allocation148_spill] sm:$0xff] %v11303_v44  ;;  %v1720_v8 = vrot.slane %v1712_v16, %v10908_v63  ;;  %v1727_v43 = vrot.slane %v1713_v24, %v10908_v63  ;;  %v4300_v39 = vcombine.high %v11059_v22, %v11303_v44  ;;  %v6826_v5 = vld [vmem:[#allocation2 + $0xe2] sm:$0xff]  ;;  %v6824_v44 = vld [vmem:[#allocation2 + $0xd2] sm:$0xff] }
 0x2bf   : > { %15589 = vst [vmem:[#allocation149_spill] sm:$0xff] %v11306_v2  ;;  %v4304_v60 = vcombine.high %v11067_v13, %v11306_v2  ;;  %v4302_v50 = vcombine.high %v11062_v12, %v4282_v18  ;;  %v4301_v45 = vcombine.low %v11062_v12, %v4282_v18  ;;  %v4306_v30 = vcombine.high %v11070_v21, %v4298_v6  ;;  %v10011_v13 = vld [vmem:[#allocation2 + $0x12] ss:$80 sps:$4 sm:$0xff]  }
 0x2c0   : > { %v4305_v53 = vcombine.low %v11070_v21, %v4298_v6  ;;  %v1761_v28 = vcombine.high %v1704_v41, %v1720_v8  ;;  %v1777_v62 = vcombine.high %v1711_v17, %v1727_v43  ;;  %6913 = vrot.lane.b32.xlu1 %v6826_v5, %s10155_s19  ;;  %7737 = vrot.lane.b32.xlu0 %v6822_v19, %s10156_s13  ;;  %v9948_v21 = vld [vmem:[#allocation2 + $0x40] ss:$80 sps:$4 sm:$0xff]  }
 0x2c1   : > { %v11323_v16 = vpack.i.bf16 %v4304_v60, %v4300_v39  ;;  %v1760_v24 = vcombine.low %v1704_v41, %v1720_v8  ;;  %v1776_v59 = vcombine.low %v1711_v17, %v1727_v43  ;;  %v11325_v37 = vpack.i.bf16 %v4306_v30, %v4302_v50  ;;  %v9947_v43 = vld [vmem:[#allocation2 + $0x1c] ss:$80 sps:$4 sm:$0xff]   ;;  %v9950_v39 = vld [vmem:[#allocation2 + $0x44] ss:$80 sps:$4 sm:$0xff]  }
 0x2c2   : > { %v11327_v14 = vpack.i.bf16 %v4305_v53, %v4301_v45  ;;  %v1775_v12 = vrot.slane %v1761_v28, %v10934_v42  ;;  %v1791_v18 = vrot.slane %v1777_v62, %v10934_v42  ;;  %v15593_v6 = vcombine.low %v10995_v26, %v10998_v40  ;;  %v9955_v60 = vld [vmem:[#allocation2 + $0x11] ss:$80 sps:$4 sm:$0xff]   ;;  %v9958_v50 = vld [vmem:[#allocation2 + $0x39] ss:$80 sps:$4 sm:$0xff]   ;;  %v9960_v45 = vld [vmem:[#allocation2 + $0x3d] ss:$80 sps:$4 sm:$0xff]  }
 0x2c3   : > { %15590 = vst [vmem:[#allocation150_spill] sm:$0xff] %v11323_v16  ;;  %15591 = vst [vmem:[#allocation151_spill] sm:$0xff] %v11325_v37  ;;  %v11338_v19 = vrot.slane %v1744_v49, %v10934_v42  ;;  %v11341_v41 = vrot.slane %v1760_v24, %v10934_v42  ;;  %v11344_v17 = vrot.slane %v1776_v59, %v10934_v42  ;;  %v9957_v49 = vld [vmem:[#allocation2 + $0x15] ss:$80 sps:$4 sm:$0xff]  }
 0x2c4   : > { %15592 = vst [vmem:[#allocation152_spill] sm:$0xff] %v11327_v14  ;;  %v11335_v4 = vrot.slane %v15593_v6, %v10934_v42  ;;  %v1794_v8 = vcombine.low %v11073_v3, %v1775_v12  ;;  %v1798_v62 = vcombine.low %v1759_v47, %v1791_v18  ;;  %7745 = vrot.lane.b32.xlu1 %v6826_v5, %s10156_s13  ;;  %v9967_v24 = vld [vmem:[#allocation2 + $0x6] ss:$80 sps:$4 sm:$0xff]   ;;  %v9969_v6 = vld [vmem:[#allocation2 + $0x2e] ss:$80 sps:$4 sm:$0xff]  }
 0x2c5   : > { %15595 = vst [vmem:[#allocation154_spill] sm:$0xff] %v11338_v19  ;;  %15596 = vst [vmem:[#allocation155_spill] sm:$0xff] %v11341_v41  ;;  %2167 = vrot.lane.b32.xlu0 %v11261_v25, %s10155_s19  ;;  %v1797_v40 = vcombine.high %v11338_v19, %v11344_v17  ;;  %v1795_v59 = vcombine.high %v11073_v3, %v1775_v12  ;;  %v11358_v53 = vrot.slane %v9945_v11, %v10908_v63  ;;  %v2086_v14 = vld [vmem:[#allocation2 + $0xb8] sm:$0xff]  ;;  %v11367_v3 = vld [vmem:[#allocation2 + $0x130] sm:$0xff] }
 0x2c6   : > { %15594 = vst [vmem:[#allocation153_spill] sm:$0xff] %v11335_v4  ;;  %15597 = vst [vmem:[#allocation156_spill] sm:$0xff] %v11344_v17  ;;  %v1793_v26 = vcombine.high %v11335_v4, %v11341_v41  ;;  %v11355_v30 = vpack.i.bf16 %v1798_v62, %v1794_v8  ;;  %v11361_v5 = vrot.slane %v9948_v21, %v10908_v63  ;;  %v1379_v16 = vld [vmem:[#allocation2 + $0xb8] sm:$0xff]  ;;  %v1383_v12 = vld [vmem:[#allocation2 + $0xe0] sm:$0xff] }
 0x2c7   : > { %v1799_v28 = vcombine.high %v1759_v47, %v1791_v18  ;;  %15601 = vst [vmem:[#allocation160_spill] sm:$0xff] %v11367_v3  ;;  %v11370_v8 = vrot.slane %v9947_v43, %v10908_v63  ;;  %v11373_v11 = vrot.slane %v9950_v39, %v10908_v63  ;;  %v11378_v47 = vrot.slane %v9955_v60, %v10908_v63  ;;  %v10012_v17 = vld [vmem:[#allocation2 + $0x3a] ss:$80 sps:$4 sm:$0xff]  }
 0x2c8   : > { %15598 = vst [vmem:[#allocation157_spill] sm:$0xff] %v11355_v30  ;;  %v11363_v37 = vpack.i.bf16 %v1797_v40, %v1793_v26  ;;  %2169 = vrot.lane.b32.xlu1 %v2086_v14, %s10155_s19  ;;  %v11384_v18 = vrot.slane %v9957_v49, %v10908_v63  ;;  %v11387_v62 = vrot.slane %v9958_v50, %v10908_v63  ;;  %v9975_v40 = vld [vmem:[#allocation2 + $0x2] ss:$80 sps:$4 sm:$0xff]   ;;  %v10014_v4 = vld [vmem:[#allocation2 + $0xda] ss:$80 sps:$4 sm:$0xff]  }
 0x2c9   : > { %15602 = vst [vmem:[#allocation161_spill] sm:$0xff] %v11370_v8  ;;  %v11375_v21 = vpack.i.bf16 %v1799_v28, %v1795_v59  ;;  %15604 = vst [vmem:[#allocation163_spill] sm:$0xff] %v11378_v47  ;;  %2175 = vrot.lane.b32.xlu0 %v11289_v0, %s10155_s19  ;;  %v11390_v43 = vrot.slane %v9960_v45, %v10908_v63  ;;  %v1864_v39 = vcombine.low %v11358_v53, %v11361_v5  ;;  %v9976_v59 = vld [vmem:[#allocation2 + $0x2a] ss:$80 sps:$4 sm:$0xff]   ;;  %v2090_v28 = vld [vmem:[#allocation2 + $0xe0] sm:$0xff] }
 0x2ca   : > { %15599 = vst [vmem:[#allocation158_spill] sm:$0xff] %v11363_v37  ;;  %15605 = vst [vmem:[#allocation164_spill] sm:$0xff] %v11384_v18  ;;  %v11395_v60 = vrot.slane %v9967_v24, %v10908_v63  ;;  %v11398_v26 = vrot.slane %v9969_v6, %v10908_v63  ;;  %v1832_v49 = vcombine.low %v1379_v16, %v11365_v7  ;;  %v9961_v37 = vld [vmem:[#allocation2 + $0xb1] ss:$80 sps:$4 sm:$0xff]   ;;  %v9963_v30 = vld [vmem:[#allocation2 + $0xb5] ss:$80 sps:$4 sm:$0xff]  }
 0x2cb   : > { %15603 = vst [vmem:[#allocation162_spill] sm:$0xff] %v11375_v21  ;;  %15606 = vst [vmem:[#allocation165_spill] sm:$0xff] %v11387_v62  ;;  %v1833_v50 = vcombine.high %v1379_v16, %v11365_v7  ;;  %v1848_v21 = vcombine.low %v1383_v12, %v11367_v3  ;;  %v1849_v45 = vcombine.high %v1383_v12, %v11367_v3 }
 0x2cc   : > { %15607 = vst [vmem:[#allocation166_spill] sm:$0xff] %v11390_v43  ;;  %15608 = vst [vmem:[#allocation167_spill] sm:$0xff] %v11395_v60  ;;  %2177 = vrot.lane.b32.xlu1 %v2090_v28, %s10155_s19  ;;  %v1880_v24 = vcombine.low %v11370_v8, %v11373_v11  ;;  %v4099_v6 = vcombine.low %v11378_v47, %v11387_v62  ;;  %v4115_v16 = vcombine.low %v11384_v18, %v11390_v43  ;;  %v9993_v43 = vld [vmem:[#allocation2 + $0x32] ss:$80 sps:$4 sm:$0xff]   ;;  %v9978_v8 = vld [vmem:[#allocation2 + $0xca] ss:$80 sps:$4 sm:$0xff]  }
 0x2cd   : > { %15609 = vst [vmem:[#allocation168_spill] sm:$0xff] %v11398_v26  ;;  %2999 = vrot.lane.b32.xlu0 %v11261_v25, %s10156_s13  ;;  %v11414_v12 = vrot.slane %v1864_v39, %v10934_v42  ;;  %v6211_v3 = vcombine.low %v11395_v60, %v11398_v26  ;;  %v11419_v7 = vrot.slane %v9975_v40, %v10908_v63  ;;  %v9991_v26 = vld [vmem:[#allocation2 + $0xa] ss:$80 sps:$4 sm:$0xff]  }
 0x2ce   : > { %v11422_v25 = vrot.slane %v9976_v59, %v10908_v63  ;;  %v11425_v9 = vrot.slane %v1832_v49, %v10908_v63  ;;  %v11428_v47 = vrot.slane %v1833_v50, %v10908_v63  ;;  %v11431_v18 = vrot.slane %v1848_v21, %v10908_v63  ;;  %v9973_v50 = vld [vmem:[#allocation2 + $0xce] ss:$80 sps:$4 sm:$0xff]  }
 0x2cf   : > { %15610 = vst [vmem:[#allocation169_spill] sm:$0xff] %v11414_v12  ;;  %v11434_v39 = vrot.slane %v1849_v45, %v10908_v63  ;;  %v11437_v60 = vrot.slane %v9961_v37, %v10908_v63  ;;  %v11440_v40 = vrot.slane %v9963_v30, %v10908_v63  ;;  %v11443_v59 = vrot.slane %v9964_v10, %v10908_v63  ;;  %v9981_v10 = vld [vmem:[#allocation2 + $0x42] ss:$80 sps:$4 sm:$0xff]   ;;  %v9987_v45 = vld [vmem:[#allocation2 + $0x1e] ss:$80 sps:$4 sm:$0xff]  }
 0x2d0   : > { %15611 = vst [vmem:[#allocation170_spill] sm:$0xff] %v11425_v9  ;;  %15612 = vst [vmem:[#allocation171_spill] sm:$0xff] %v11428_v47  ;;  %v11446_v49 = vrot.slane %v9966_v54, %v10908_v63  ;;  %3001 = vrot.lane.b32.xlu1 %v2086_v14, %s10156_s13  ;;  %v11452_v21 = vrot.slane %v1880_v24, %v10934_v42  ;;  %v11455_v37 = vrot.slane %v4099_v6, %v10934_v42  ;;  %v9988_v6 = vld [vmem:[#allocation2 + $0x46] ss:$80 sps:$4 sm:$0xff]  }
 0x2d1   : > { %15613 = vst [vmem:[#allocation172_spill] sm:$0xff] %v11434_v39  ;;  %3007 = vrot.lane.b32.xlu0 %v11289_v0, %s10156_s13  ;;  %v11458_v30 = vrot.slane %v4115_v16, %v10934_v42  ;;  %v11461_v54 = vrot.slane %v6211_v3, %v10934_v42  ;;  %v11468_v24 = vrot.slane %v9979_v58, %v10908_v63  ;;  %v9971_v3 = vld [vmem:[#allocation2 + $0xa6] ss:$80 sps:$4 sm:$0xff]   ;;  %v9999_v0 = vld [vmem:[#allocation2 + $0xe] ss:$80 sps:$4 sm:$0xff]  }
 0x2d2   : > { %15614 = vst [vmem:[#allocation173_spill] sm:$0xff] %v11452_v21  ;;  %15615 = vst [vmem:[#allocation174_spill] sm:$0xff] %v11455_v37  ;;  %v1896_v16 = vcombine.low %v11425_v9, %v11431_v18  ;;  %v1912_v62 = vcombine.low %v11428_v47, %v11434_v39  ;;  %v4131_v58 = vcombine.low %v11437_v60, %v11443_v59  ;;  %v10000_v39 = vld [vmem:[#allocation2 + $0x36] ss:$80 sps:$4 sm:$0xff]   ;;  %v9983_v9 = vld [vmem:[#allocation2 + $0xba] ss:$80 sps:$4 sm:$0xff]  }
 0x2d3   : > { %15616 = vst [vmem:[#allocation175_spill] sm:$0xff] %v11458_v30  ;;  %15617 = vst [vmem:[#allocation176_spill] sm:$0xff] %v11461_v54  ;;  %v4147_v23 = vcombine.low %v11440_v40, %v11446_v49  ;;  %v11492_v14 = vrot.slane %v9973_v50, %v10908_v63  ;;  %v11497_v29 = vrot.slane %v9981_v10, %v10908_v63 }
 0x2d4   : > { %3009 = vrot.lane.b32.xlu1 %v2090_v28, %s10156_s13  ;;  %v11500_v47 = vrot.slane %v9987_v45, %v10908_v63  ;;  %v11503_v28 = vrot.slane %v9988_v6, %v10908_v63  ;;  %v11506_v57 = vrot.slane %v9991_v26, %v10908_v63  ;;  %v11509_v50 = vrot.slane %v9993_v43, %v10908_v63  ;;  %v11522_v26 = vld [vmem:[#allocation2 + $0xd9] sm:$0xff] }
 0x2d5   : > { %4535 = vrot.lane.b32.xlu0 %v11478_v55, %s10155_s19  ;;  %15618 = vst [vmem:[#allocation177_spill] sm:$0xff] %v11492_v14  ;;  %v11512_v56 = vrot.slane %v1896_v16, %v10934_v42  ;;  %v11515_v10 = vrot.slane %v9971_v3, %v10908_v63  ;;  %v11520_v6 = vrot.slane %v9999_v0, %v10908_v63  ;;  %v9989_v3 = vld [vmem:[#allocation2 + $0xbe] ss:$80 sps:$4 sm:$0xff]  }
 0x2d6   : > { %v11525_v43 = vrot.slane %v1912_v62, %v10934_v42  ;;  %v11528_v35 = vrot.slane %v4131_v58, %v10934_v42  ;;  %v11531_v16 = vrot.slane %v4147_v23, %v10934_v42  ;;  %v11534_v20 = vrot.slane %v10000_v39, %v10908_v63  ;;  %v10005_v58 = vld [vmem:[#allocation2 + $0x3e] ss:$80 sps:$4 sm:$0xff]  }
 0x2d7   : > { %15619 = vst [vmem:[#allocation178_spill] sm:$0xff] %v11512_v56  ;;  %15620 = vst [vmem:[#allocation179_spill] sm:$0xff] %v11515_v10  ;;  %v6243_v62 = vcombine.low %v11515_v10, %v11492_v14  ;;  %v11542_v0 = vrot.slane %v9978_v8, %v10908_v63  ;;  %v11547_v45 = vrot.slane %v9983_v9, %v10908_v63  ;;  %v9995_v10 = vld [vmem:[#allocation2 + $0xaa] ss:$80 sps:$4 sm:$0xff]   ;;  %v10001_v14 = vld [vmem:[#allocation2 + $0xae] ss:$80 sps:$4 sm:$0xff]  }
 0x2d8   : > { %15621 = vst [vmem:[#allocation180_spill] sm:$0xff] %v11525_v43  ;;  %15622 = vst [vmem:[#allocation181_spill] sm:$0xff] %v11528_v35  ;;  %6901 = vrot.lane.b32.xlu1 %v6820_v27, %s10155_s19  ;;  %v11550_v39 = vrot.slane %v9985_v1, %v10908_v63  ;;  %v11557_v8 = vrot.slane %v9977_v48, %v10908_v63  ;;  %v11566_v33 = vrot.slane %v9989_v3, %v10908_v63  ;;  %v10009_v9 = vld [vmem:[#allocation2 + $0xde] ss:$80 sps:$4 sm:$0xff]  }
 0x2d9   : > { %15623 = vst [vmem:[#allocation182_spill] sm:$0xff] %v11531_v16  ;;  %4543 = vrot.lane.b32.xlu0 %v11522_v26, %s10155_s19  ;;  %15624 = vst [vmem:[#allocation183_spill] sm:$0xff] %v11547_v45  ;;  %v11569_v22 = vrot.slane %v9990_v52, %v10908_v63  ;;  %v11574_v23 = vrot.slane %v10003_v61, %v10908_v63  ;;  %v11583_v52 = vrot.slane %v10005_v58, %v10908_v63 }
 0x2da   : > { %15625 = vst [vmem:[#allocation184_spill] sm:$0xff] %v11566_v33  ;;  %v6227_v1 = vcombine.low %v11557_v8, %v11542_v0  ;;  %v11586_v2 = vrot.slane %v6243_v62, %v10934_v42  ;;  %v6635_v61 = vcombine.low %v11547_v45, %v11550_v39  ;;  %v11593_v48 = vrot.slane %v9995_v10, %v10908_v63 }
 0x2db   : > { %15626 = vst [vmem:[#allocation185_spill] sm:$0xff] %v11569_v22  ;;  %v11596_v19 = vrot.slane %v9997_v15, %v10908_v63  ;;  %v11599_v58 = vrot.slane %v10001_v14, %v10908_v63  ;;  %v11602_v62 = vrot.slane %v10002_v34, %v10908_v63  ;;  %v11605_v3 = vrot.slane %v10007_v46, %v10908_v63  ;;  %v10013_v14 = vld [vmem:[#allocation2 + $0xb2] ss:$80 sps:$4 sm:$0xff]  }
 0x2dc   : > { %7733 = vrot.lane.b32.xlu1 %v6820_v27, %s10156_s13  ;;  %15627 = vst [vmem:[#allocation186_spill] sm:$0xff] %v11586_v2  ;;  %15628 = vst [vmem:[#allocation187_spill] sm:$0xff] %v11593_v48  ;;  %v6603_v27 = vcombine.low %v11468_v24, %v11497_v29  ;;  %v6619_v10 = vcombine.low %v11500_v47, %v11503_v28  ;;  %v6651_v41 = vcombine.low %v11566_v33, %v11569_v22 }
 0x2dd   : > { %6909 = vrot.lane.b32.xlu0 %v6824_v44, %s10155_s19  ;;  %15629 = vst [vmem:[#allocation188_spill] sm:$0xff] %v11596_v19  ;;  %15630 = vst [vmem:[#allocation189_spill] sm:$0xff] %v11599_v58  ;;  %v11614_v15 = vrot.slane %v10009_v9, %v10908_v63  ;;  %v6331_v34 = vcombine.low %v11506_v57, %v11509_v50  ;;  %v6363_v46 = vcombine.low %v11593_v48, %v11596_v19 }
 0x2de   : > { %15631 = vst [vmem:[#allocation190_spill] sm:$0xff] %v11602_v62  ;;  %15632 = vst [vmem:[#allocation191_spill] sm:$0xff] %v11605_v3  ;;  %v6379_v45 = vcombine.low %v11599_v58, %v11602_v62  ;;  %v11630_v22 = vrot.slane %v10011_v13, %v10908_v63  ;;  %v11639_v48 = vrot.slane %v6635_v61, %v10934_v42 }
 0x2df   : > { %15633 = vst [vmem:[#allocation192_spill] sm:$0xff] %v11614_v15  ;;  %v6515_v9 = vcombine.low %v11605_v3, %v11614_v15  ;;  %v6347_v58 = vcombine.low %v11520_v6, %v11534_v20  ;;  %v6483_v3 = vcombine.low %v11574_v23, %v11583_v52  ;;  %v6825_v15 = vld [vmem:[#allocation2 + $0xda] sm:$0xff]  ;;  %v11646_v33 = vrot.slane %v6651_v41, %v10934_v42 }
 0x2e0   : > { %5367 = vrot.lane.b32.xlu1 %v11478_v55, %s10156_s13  ;;  %v11633_v55 = vrot.slane %v10012_v17, %v10908_v63  ;;  %15635 = vst [vmem:[#allocation194_spill] sm:$0xff] %v11639_v48  ;;  %v11649_v13 = vrot.slane %v6363_v46, %v10934_v42  ;;  %v11652_v17 = vrot.slane %v10013_v14, %v10908_v63 }
 0x2e1   : > { %7741 = vrot.lane.b32.xlu0 %v6824_v44, %s10156_s13  ;;  %v11636_v44 = vrot.slane %v6227_v1, %v10934_v42  ;;  %15636 = vst [vmem:[#allocation195_spill] sm:$0xff] %v11646_v33  ;;  %v11655_v1 = vrot.slane %v10014_v4, %v10908_v63  ;;  %v15640_v61 = vcombine.low %v11419_v7, %v11422_v25 }
 0x2e2   : > { %15637 = vst [vmem:[#allocation196_spill] sm:$0xff] %v11649_v13  ;;  %15638 = vst [vmem:[#allocation197_spill] sm:$0xff] %v11652_v17  ;;  %v11667_v46 = vrot.slane %v6379_v45, %v10934_v42  ;;  %v11670_v14 = vrot.slane %v6515_v9, %v10934_v42  ;;  %v11673_v4 = vrot.slane %v6603_v27, %v10934_v42  ;;  %v6821_v27 = vld [vmem:[#allocation2 + $0xb2] sm:$0xff] }
 0x2e3   : > { %15634 = vst [vmem:[#allocation193_spill] sm:$0xff] %v11636_v44  ;;  %15639 = vst [vmem:[#allocation198_spill] sm:$0xff] %v11655_v1  ;;  %v11664_v41 = vrot.slane %v15640_v61, %v10934_v42  ;;  %v11676_v62 = vrot.slane %v6619_v10, %v10934_v42  ;;  %v6467_v19 = vcombine.low %v11630_v22, %v11633_v55  ;;  %v15654_v9 = vld [vmem:[#allocation166_spill] sm:$0xff] }
 0x2e4   : > { %6911 = vrot.lane.b32.xlu1 %v6825_v15, %s10155_s19  ;;  %15642 = vst [vmem:[#allocation200_spill] sm:$0xff] %v11667_v46  ;;  %15643 = vst [vmem:[#allocation201_spill] sm:$0xff] %v11670_v14  ;;  %v11684_v61 = vrot.slane %v6347_v58, %v10934_v42  ;;  %v11687_v45 = vrot.slane %v6483_v3, %v10934_v42  ;;  %v6499_v10 = vcombine.low %v11652_v17, %v11655_v1  ;;  %v15656_v3 = vld [vmem:[#allocation168_spill] sm:$0xff]  ;;  %v15666_v14 = vld [vmem:[#allocation18_spill] sm:$0xff] }
 0x2e5   : > { %5375 = vrot.lane.b32.xlu0 %v11522_v26, %s10156_s13  ;;  %15641 = vst [vmem:[#allocation199_spill] sm:$0xff] %v11664_v41  ;;  %15644 = vst [vmem:[#allocation202_spill] sm:$0xff] %v11673_v4  ;;  %v11679_v26 = vrot.slane %v6331_v34, %v10934_v42  ;;  %v11706_v17 = vrot.slane %v6467_v19, %v10934_v42  ;;  %v1865_v19 = vcombine.high %v11358_v53, %v11361_v5  ;;  %v15659_v5 = vld [vmem:[#allocation24_spill] sm:$0xff] }
 0x2e6   : > { %15645 = vst [vmem:[#allocation203_spill] sm:$0xff] %v11676_v62  ;;  %15647 = vst [vmem:[#allocation205_spill] sm:$0xff] %v11684_v61  ;;  %v11709_v34 = vrot.slane %v6499_v10, %v10934_v42  ;;  %v15652_v10 = vld [vmem:[#allocation165_spill] sm:$0xff]  ;;  %v6196_v53 = vcombine.high %v11419_v7, %v11422_v25 }
 0x2e7   : > { %15646 = vst [vmem:[#allocation204_spill] sm:$0xff] %v11679_v26  ;;  %15648 = vst [vmem:[#allocation206_spill] sm:$0xff] %v11687_v45  ;;  %v15658_v45 = vld [vmem:[#allocation122_spill] sm:$0xff] }
 0x2e8   : > { %7743 = vrot.lane.b32.xlu1 %v6825_v15, %s10156_s13  ;;  %15649 = vst [vmem:[#allocation207_spill] sm:$0xff] %v11706_v17  ;;  %15650 = vst [vmem:[#allocation208_spill] sm:$0xff] %v11709_v34  ;;  %v15651_v15 = vld [vmem:[#allocation161_spill] sm:$0xff]  ;;  %v15657_v17 = vld [vmem:[#allocation167_spill] sm:$0xff] }
 0x2e9   : > { %6903 = vrot.lane.b32.xlu0 %v6821_v27, %s10155_s19  ;;  %v6212_v34 = vcombine.high %v15657_v17, %v15656_v3  ;;  %v6620_v17 = vcombine.high %v11500_v47, %v11503_v28  ;;  %v15664_v28 = vld [vmem:[#allocation20_spill] sm:$0xff] }
 0x2eb   : > { %v11793_v13 = vrot.slane %v6620_v17, %v10934_v42 }
 0x2ec   : > { %4549 = vrot.lane.b32.xlu1 %v11064_v32, %s10155_s19 }
 0x2ed   : > { %7735 = vrot.lane.b32.xlu0 %v6821_v27, %s10156_s13  ;;  %v1881_v27 = vcombine.high %v15651_v15, %v11373_v11  ;;  %v15660_v11 = vld [vmem:[#allocation16_spill] sm:$0xff] }
 0x2ee   : > { %v2227_v15 = vcombine.low %v15660_v11, %v15659_v5  ;;  %v2228_v3 = vcombine.high %v15660_v11, %v15659_v5  ;;  %v11773_v11 = vrot.slane %v6212_v34, %v10934_v42  ;;  %v15669_v34 = vld [vmem:[#allocation19_spill] sm:$0xff] }
 0x2f0   : > { %4557 = vrot.lane.b32.xlu1 %v11104_v51, %s10155_s19 }
 0x2f1   : > { %5389 = vrot.lane.b32.xlu0 %v11104_v51, %s10156_s13  ;;  %v15653_v51 = vld [vmem:[#allocation163_spill] sm:$0xff] }
 0x2f2   : > { %v4100_v54 = vcombine.high %v15653_v51, %v15652_v10  ;;  %v11747_v10 = vrot.slane %v1865_v19, %v10934_v42  ;;  %v15661_v19 = vld [vmem:[#allocation23_spill] sm:$0xff]  ;;  %15671 = vst [vmem:[#allocation163_spill] sm:$0xff] %v11793_v13  ;;  %v15673_v13 = vld [vmem:[#allocation22_spill] sm:$0xff] }
 0x2f4   : > { %5381 = vrot.lane.b32.xlu1 %v11064_v32, %s10156_s13  ;;  %v15655_v32 = vld [vmem:[#allocation164_spill] sm:$0xff]  ;;  %v11761_v7 = vrot.slane %v4100_v54, %v10934_v42 }
 0x2f5   : > { %2179 = vrot.lane.b32.xlu0 %v11081_v31, %s10155_s19  ;;  %v4116_v58 = vcombine.high %v15655_v32, %v15654_v9  ;;  %v6604_v9 = vcombine.high %v11468_v24, %v11497_v29  ;;  %v15662_v32 = vld [vmem:[#allocation15_spill] sm:$0xff]  ;;  %v15663_v24 = vld [vmem:[#allocation28_spill] sm:$0xff] }
 0x2f6   : > { %v2363_v29 = vcombine.low %v15662_v32, %v15661_v19  ;;  %v2364_v47 = vcombine.high %v15662_v32, %v15661_v19  ;;  %v2243_v5 = vcombine.low %v15664_v28, %v15663_v24  ;;  %v2244_v54 = vcombine.high %v15664_v28, %v15663_v24  ;;  %v15668_v32 = vld [vmem:[#allocation27_spill] sm:$0xff] }
 0x2f7   : > { %v11764_v25 = vrot.slane %v4116_v58, %v10934_v42  ;;  %v11784_v58 = vrot.slane %v6196_v53, %v10934_v42  ;;  %v2235_v19 = vrot.slane %v2227_v15, %v10908_v63  ;;  %v2379_v46 = vcombine.low %v15669_v34, %v15668_v32 }
 0x2f8   : > { %2181 = vrot.lane.b32.xlu1 %v11083_v38, %s10155_s19  ;;  %v11790_v26 = vrot.slane %v6604_v9, %v10934_v42  ;;  %v2242_v24 = vrot.slane %v2228_v3, %v10908_v63  ;;  %v6332_v28 = vcombine.high %v11506_v57, %v11509_v50  ;;  %v2371_v9 = vrot.slane %v2363_v29, %v10908_v63  ;;  %v15672_v3 = vld [vmem:[#allocation30_spill] sm:$0xff]  ;;  %v15676_v57 = vld [vmem:[#allocation121_spill] sm:$0xff] }
 0x2f9   : > { %2187 = vrot.lane.b32.xlu0 %v11118_v36, %s10155_s19  ;;  %15667 = vst [vmem:[#allocation161_spill] sm:$0xff] %v11784_v58  ;;  %v2378_v17 = vrot.slane %v2364_v47, %v10908_v63  ;;  %v2251_v1 = vrot.slane %v2243_v5, %v10908_v63  ;;  %v2515_v62 = vcombine.low %v15673_v13, %v15672_v3 }
 0x2fa   : > { %15670 = vst [vmem:[#allocation165_spill] sm:$0xff] %v11790_v26  ;;  %v2258_v33 = vrot.slane %v2244_v54, %v10908_v63  ;;  %v2387_v29 = vrot.slane %v2379_v46, %v10908_v63  ;;  %v6348_v47 = vcombine.high %v11520_v6, %v11534_v20  ;;  %v15677_v26 = vld [vmem:[#allocation29_spill] sm:$0xff] }
 0x2fb   : > { %v2291_v46 = vcombine.low %v2235_v19, %v2251_v1 }
 0x2fc   : > { %2189 = vrot.lane.b32.xlu1 %v15658_v45, %s10155_s19  ;;  %v11755_v51 = vpop.permute.xlu1 %4533 }
 0x2fd   : > { %3011 = vrot.lane.b32.xlu0 %v11081_v31, %s10156_s13  ;;  %v11758_v31 = vrot.slane %v1881_v27, %v10934_v42  ;;  %v15665_v27 = vld [vmem:[#allocation26_spill] sm:$0xff] }
 0x2fe   : > { %v2499_v61 = vcombine.low %v15666_v14, %v15665_v27 }
 0x300   : > { %3013 = vrot.lane.b32.xlu1 %v11083_v38, %s10156_s13  ;;  %v2500_v38 = vcombine.high %v15666_v14, %v15665_v27  ;;  %v11800_v53 = vpop.permute.xlu1 %4541  ;;  %v11802_v15 = vpop.permute.xlu0 %5373  ;;  %v11812_v14 = vrot.slane %v2499_v61, %v10908_v63  ;;  %v15674_v27 = vld [vmem:[#allocation25_spill] sm:$0xff]  ;;  %v2516_v61 = vcombine.high %v15673_v13, %v15672_v3  ;;  %v2523_v13 = vrot.slane %v2515_v62, %v10908_v63  ;;  %v15681_v3 = vld [vmem:[#allocation123_spill] sm:$0xff] }
 0x301   : > { %3019 = vrot.lane.b32.xlu0 %v11118_v36, %s10156_s13  ;;  %v2380_v36 = vcombine.high %v15669_v34, %v15668_v32  ;;  %v15675_v32 = vld [vmem:[#allocation17_spill] sm:$0xff]  ;;  %v11850_v62 = vrot.slane %v6348_v47, %v10934_v42 }
 0x302   : > { %v2635_v34 = vcombine.low %v15675_v32, %v15674_v27  ;;  %v2636_v50 = vcombine.high %v15675_v32, %v15674_v27  ;;  %v2514_v5 = vrot.slane %v2500_v38, %v10908_v63  ;;  %v11837_v27 = vrot.slane %v6332_v28, %v10934_v42 }
 0x303   : > { %v2394_v54 = vrot.slane %v2380_v36, %v10908_v63  ;;  %v2292_v32 = vcombine.high %v2235_v19, %v2251_v1  ;;  %v2307_v38 = vcombine.low %v2242_v24, %v2258_v33  ;;  %v2308_v36 = vcombine.high %v2242_v24, %v2258_v33  ;;  %15682 = vst [vmem:[#allocation168_spill] sm:$0xff] %v11850_v62  ;;  %v6827_v62 = vld [vmem:[#allocation2 + $0xf2] sm:$0xff] }
 0x304   : > { %3021 = vrot.lane.b32.xlu1 %v15658_v45, %s10156_s13  ;;  %v15678_v45 = vld [vmem:[#allocation21_spill] sm:$0xff]  ;;  %v11832_v48 = vpop.permute.xlu1 %5365  ;;  %v11834_v41 = vpop.permute.xlu0 %2163  ;;  %15680 = vst [vmem:[#allocation164_spill] sm:$0xff] %v11837_v27  ;;  %v2643_v6 = vrot.slane %v2635_v34, %v10908_v63  ;;  %v2650_v28 = vrot.slane %v2636_v50, %v10908_v63  ;;  %v2427_v27 = vcombine.low %v2371_v9, %v2387_v29 }
 0x305   : > { %4547 = vrot.lane.b32.xlu0 %v15676_v57, %s10155_s19  ;;  %v2651_v4 = vcombine.low %v15678_v45, %v15677_v26  ;;  %15679 = vst [vmem:[#allocation166_spill] sm:$0xff] %v11834_v41  ;;  %v2652_v20 = vcombine.high %v15678_v45, %v15677_v26  ;;  %v2530_v1 = vrot.slane %v2516_v61, %v10908_v63 }
 0x306   : > { %v2428_v19 = vcombine.high %v2371_v9, %v2387_v29  ;;  %v2443_v26 = vcombine.low %v2378_v17, %v2394_v54  ;;  %v2444_v45 = vcombine.high %v2378_v17, %v2394_v54  ;;  %v11861_v50 = vrot.slane %v2292_v32, %v10934_v42 }
 0x307   : > { %v2659_v34 = vrot.slane %v2651_v4, %v10908_v63  ;;  %v2563_v61 = vcombine.low %v11812_v14, %v2523_v13  ;;  %v2666_v47 = vrot.slane %v2652_v20, %v10908_v63  ;;  %v11866_v9 = vrot.slane %v2307_v38, %v10934_v42 }
 0x308   : > { %5379 = vrot.lane.b32.xlu1 %v15676_v57, %s10156_s13  ;;  %v11853_v33 = vpop.permute.xlu1 %2165  ;;  %v11855_v24 = vpop.permute.xlu0 %2171  ;;  %v11858_v57 = vrot.slane %v2291_v46, %v10934_v42  ;;  %15685 = vst [vmem:[#allocation24_spill] sm:$0xff] %v11861_v50  ;;  %v11869_v4 = vrot.slane %v2308_v36, %v10934_v42  ;;  %v6484_v17 = vcombine.high %v11574_v23, %v11583_v52 }
 0x309   : > { %4555 = vrot.lane.b32.xlu0 %v15681_v3, %s10155_s19  ;;  %15683 = vst [vmem:[#allocation167_spill] sm:$0xff] %v11853_v33  ;;  %15686 = vst [vmem:[#allocation16_spill] sm:$0xff] %v11866_v9  ;;  %v11877_v29 = vrot.slane %v2427_v27, %v10934_v42  ;;  %v2564_v54 = vcombine.high %v11812_v14, %v2523_v13  ;;  %v2579_v46 = vcombine.low %v2514_v5, %v2530_v1  ;;  %v6831_v13 = vld [vmem:[#allocation2 + $0x11a] sm:$0xff] }
 0x30a   : > { %15684 = vst [vmem:[#allocation122_spill] sm:$0xff] %v11858_v57  ;;  %15687 = vst [vmem:[#allocation23_spill] sm:$0xff] %v11869_v4  ;;  %v2580_v32 = vcombine.high %v2514_v5, %v2530_v1  ;;  %v11881_v20 = vrot.slane %v2428_v19, %v10934_v42  ;;  %v11884_v38 = vrot.slane %v2443_v26, %v10934_v42  ;;  %v15695_v1 = vld [vmem:[#allocation40_spill] sm:$0xff]  ;;  %v15724_v4 = vld [vmem:[#allocation37_spill] sm:$0xff] }
 0x30b   : > { %15688 = vst [vmem:[#allocation15_spill] sm:$0xff] %v11877_v29  ;;  %v11887_v36 = vrot.slane %v2444_v45, %v10934_v42  ;;  %v11894_v52 = vrot.slane %v2563_v61, %v10934_v42  ;;  %v2700_v14 = vcombine.high %v2643_v6, %v2659_v34  ;;  %v2715_v27 = vcombine.low %v2650_v28, %v2666_v47  ;;  %v15696_v19 = vld [vmem:[#allocation32_spill] sm:$0xff] }
 0x30c   : > { %6915 = vrot.lane.b32.xlu1 %v6827_v62, %s10155_s19  ;;  %15689 = vst [vmem:[#allocation28_spill] sm:$0xff] %v11881_v20  ;;  %15690 = vst [vmem:[#allocation20_spill] sm:$0xff] %v11884_v38  ;;  %v11889_v9 = vpop.permute.xlu1 %2173  ;;  %v11891_v23 = vpop.permute.xlu0 %2995  ;;  %v2716_v5 = vcombine.high %v2650_v28, %v2666_v47  ;;  %v3059_v57 = vcombine.low %v15696_v19, %v15695_v1  ;;  %v15697_v26 = vld [vmem:[#allocation44_spill] sm:$0xff]  ;;  %v6468_v45 = vcombine.high %v11630_v22, %v11633_v55  ;;  %v15704_v22 = vld [vmem:[#allocation31_spill] sm:$0xff] }
 0x30d   : > { %5387 = vrot.lane.b32.xlu0 %v15681_v3, %s10156_s13  ;;  %15691 = vst [vmem:[#allocation26_spill] sm:$0xff] %v11887_v36  ;;  %v2699_v3 = vcombine.low %v2643_v6, %v2659_v34  ;;  %15692 = vst [vmem:[#allocation18_spill] sm:$0xff] %v11889_v9  ;;  %v15698_v20 = vld [vmem:[#allocation36_spill] sm:$0xff]  ;;  %v11905_v61 = vrot.slane %v2564_v54, %v10934_v42  ;;  %v11908_v6 = vrot.slane %v2579_v46, %v10934_v42  ;;  %v15718_v36 = vld [vmem:[#allocation38_spill] sm:$0xff] }
 0x30e   : > { %15693 = vst [vmem:[#allocation27_spill] sm:$0xff] %v11891_v23  ;;  %15694 = vst [vmem:[#allocation19_spill] sm:$0xff] %v11894_v52  ;;  %v3075_v38 = vcombine.low %v15698_v20, %v15697_v26  ;;  %v3060_v28 = vcombine.high %v15696_v19, %v15695_v1  ;;  %v3076_v34 = vcombine.high %v15698_v20, %v15697_v26  ;;  %v15703_v52 = vld [vmem:[#allocation39_spill] sm:$0xff] }
 0x30f   : > { %15699 = vst [vmem:[#allocation30_spill] sm:$0xff] %v11905_v61  ;;  %15700 = vst [vmem:[#allocation22_spill] sm:$0xff] %v11908_v6  ;;  %v11915_v47 = vrot.slane %v2580_v32, %v10934_v42  ;;  %v3195_v55 = vcombine.low %v15704_v22, %v15703_v52  ;;  %v11927_v46 = vrot.slane %v6484_v17, %v10934_v42  ;;  %v15712_v19 = vld [vmem:[#allocation35_spill] sm:$0xff] }
 0x310   : > { %7747 = vrot.lane.b32.xlu1 %v6827_v62, %s10156_s13  ;;  %v11918_v62 = vrot.slane %v2699_v3, %v10934_v42  ;;  %v11922_v54 = vpop.permute.xlu1 %2997  ;;  %v11924_v61 = vpop.permute.xlu0 %3003  ;;  %v11930_v1 = vrot.slane %v2700_v14, %v10934_v42  ;;  %v11933_v20 = vrot.slane %v2715_v27, %v10934_v42  ;;  %v11936_v32 = vrot.slane %v2716_v5, %v10934_v42  ;;  %v15711_v3 = vld [vmem:[#allocation43_spill] sm:$0xff] }
 0x311   : > { %6923 = vrot.lane.b32.xlu0 %v6831_v13, %s10155_s19  ;;  %15701 = vst [vmem:[#allocation25_spill] sm:$0xff] %v11915_v47  ;;  %15705 = vst [vmem:[#allocation121_spill] sm:$0xff] %v11922_v54  ;;  %v3211_v26 = vcombine.low %v15712_v19, %v15711_v3  ;;  %v3067_v6 = vrot.slane %v3059_v57, %v10908_v63  ;;  %v15713_v47 = vld [vmem:[#allocation136_spill] sm:$0xff]  ;;  %v11946_v17 = vrot.slane %v6468_v45, %v10934_v42  ;;  %v15717_v45 = vld [vmem:[#allocation46_spill] sm:$0xff] }
 0x312   : > { %15702 = vst [vmem:[#allocation17_spill] sm:$0xff] %v11918_v62  ;;  %15706 = vst [vmem:[#allocation29_spill] sm:$0xff] %v11924_v61  ;;  %v3083_v62 = vrot.slane %v3075_v38, %v10908_v63  ;;  %v3074_v14 = vrot.slane %v3060_v28, %v10908_v63  ;;  %v3196_v27 = vcombine.high %v15704_v22, %v15703_v52  ;;  %v15721_v52 = vld [vmem:[#allocation41_spill] sm:$0xff] }
 0x313   : > { %15707 = vst [vmem:[#allocation21_spill] sm:$0xff] %v11927_v46  ;;  %15708 = vst [vmem:[#allocation123_spill] sm:$0xff] %v11930_v1  ;;  %v3090_v5 = vrot.slane %v3076_v34, %v10908_v63  ;;  %v3212_v57 = vcombine.high %v15712_v19, %v15711_v3  ;;  %v3203_v38 = vrot.slane %v3195_v55, %v10908_v63  ;;  %v15716_v1 = vld [vmem:[#allocation34_spill] sm:$0xff]  ;;  %v15722_v34 = vld [vmem:[#allocation33_spill] sm:$0xff] }
 0x314   : > { %15709 = vst [vmem:[#allocation40_spill] sm:$0xff] %v11933_v20  ;;  %15710 = vst [vmem:[#allocation32_spill] sm:$0xff] %v11936_v32  ;;  %4553 = vrot.lane.b32.xlu1 %v15713_v47, %s10155_s19  ;;  %v15715_v32 = vld [vmem:[#allocation42_spill] sm:$0xff]  ;;  %v3347_v29 = vcombine.low %v15718_v36, %v15717_v45  ;;  %v11961_v28 = vpop.permute.xlu1 %3005  ;;  %v11963_v54 = vpop.permute.xlu0 %4531  ;;  %v3467_v22 = vcombine.low %v15722_v34, %v15721_v52  ;;  %v3219_v3 = vrot.slane %v3211_v26, %v10908_v63  ;;  %v15723_v19 = vld [vmem:[#allocation45_spill] sm:$0xff] }
 0x315   : > { %7755 = vrot.lane.b32.xlu0 %v6831_v13, %s10156_s13  ;;  %15714 = vst [vmem:[#allocation44_spill] sm:$0xff] %v11946_v17  ;;  %v3331_v20 = vcombine.low %v15716_v1, %v15715_v32  ;;  %v3332_v13 = vcombine.high %v15716_v1, %v15715_v32  ;;  %15719 = vst [vmem:[#allocation36_spill] sm:$0xff] %v11961_v28  ;;  %v3348_v55 = vcombine.high %v15718_v36, %v15717_v45  ;;  %v15725_v28 = vld [vmem:[#allocation138_spill] sm:$0xff] }
 0x316   : > { %15720 = vst [vmem:[#allocation39_spill] sm:$0xff] %v11963_v54  ;;  %v3483_v50 = vcombine.low %v15724_v4, %v15723_v19  ;;  %v3468_v1 = vcombine.high %v15722_v34, %v15721_v52  ;;  %v3123_v32 = vcombine.low %v3067_v6, %v3083_v62  ;;  %v3124_v23 = vcombine.high %v3067_v6, %v3083_v62 }
 0x317   : > { %v3210_v54 = vrot.slane %v3196_v27, %v10908_v63  ;;  %v3139_v26 = vcombine.low %v3074_v14, %v3090_v5  ;;  %v3140_v61 = vcombine.high %v3074_v14, %v3090_v5  ;;  %v3226_v36 = vrot.slane %v3212_v57, %v10908_v63  ;;  %v6830_v57 = vld [vmem:[#allocation2 + $0x10a] sm:$0xff] }
 0x318   : > { %4561 = vrot.lane.b32.xlu1 %v15725_v28, %s10155_s19  ;;  %v3339_v45 = vrot.slane %v3331_v20, %v10908_v63  ;;  %v3346_v17 = vrot.slane %v3332_v13, %v10908_v63  ;;  %v3355_v52 = vrot.slane %v3347_v29, %v10908_v63  ;;  %v3484_v6 = vcombine.high %v15724_v4, %v15723_v19  ;;  %v11985_v62 = vpop.permute.xlu1 %5363  ;;  %v11987_v34 = vpop.permute.xlu0 %4539 }
 0x319   : > { %5385 = vrot.lane.b32.xlu0 %v15713_v47, %s10156_s13  ;;  %15726 = vst [vmem:[#allocation31_spill] sm:$0xff] %v11985_v62  ;;  %15727 = vst [vmem:[#allocation43_spill] sm:$0xff] %v11987_v34  ;;  %v3475_v47 = vrot.slane %v3467_v22, %v10908_v63  ;;  %v3259_v27 = vcombine.low %v3203_v38, %v3219_v3  ;;  %v3362_v14 = vrot.slane %v3348_v55, %v10908_v63  ;;  %v6834_v34 = vld [vmem:[#allocation2 + $0x132] sm:$0xff] }
 0x31a   : > { %v3491_v5 = vrot.slane %v3483_v50, %v10908_v63  ;;  %v3482_v20 = vrot.slane %v3468_v1, %v10908_v63  ;;  %v11994_v13 = vrot.slane %v3123_v32, %v10934_v42  ;;  %v11997_v29 = vrot.slane %v3124_v23, %v10934_v42 }
 0x31b   : > { %v12003_v4 = vrot.slane %v3139_v26, %v10934_v42  ;;  %v12006_v22 = vrot.slane %v3140_v61, %v10934_v42  ;;  %v3260_v50 = vcombine.high %v3203_v38, %v3219_v3  ;;  %v3275_v55 = vcombine.low %v3210_v54, %v3226_v36  ;;  %v15736_v38 = vld [vmem:[#allocation48_spill] sm:$0xff] }
 0x31c   : > { %15728 = vst [vmem:[#allocation35_spill] sm:$0xff] %v11994_v13  ;;  %15729 = vst [vmem:[#allocation136_spill] sm:$0xff] %v11997_v29  ;;  %5393 = vrot.lane.b32.xlu1 %v15725_v28, %s10156_s13  ;;  %v3276_v19 = vcombine.high %v3210_v54, %v3226_v36  ;;  %v3395_v1 = vcombine.low %v3339_v45, %v3355_v52  ;;  %v3396_v32 = vcombine.high %v3339_v45, %v3355_v52  ;;  %v12009_v23 = vpop.permute.xlu1 %6899  ;;  %v12011_v29 = vpop.permute.xlu0 %5371  ;;  %v15737_v54 = vld [vmem:[#allocation60_spill] sm:$0xff] }
 0x31d   : > { %6921 = vrot.lane.b32.xlu0 %v6830_v57, %s10155_s19  ;;  %15730 = vst [vmem:[#allocation42_spill] sm:$0xff] %v12003_v4  ;;  %15731 = vst [vmem:[#allocation34_spill] sm:$0xff] %v12006_v22  ;;  %v3498_v13 = vrot.slane %v3484_v6, %v10908_v63  ;;  %v12014_v28 = vrot.slane %v3259_v27, %v10934_v42  ;;  %v3411_v62 = vcombine.low %v3346_v17, %v3362_v14  ;;  %v15735_v22 = vld [vmem:[#allocation56_spill] sm:$0xff] }
 0x31e   : > { %15732 = vst [vmem:[#allocation46_spill] sm:$0xff] %v12009_v23  ;;  %15733 = vst [vmem:[#allocation38_spill] sm:$0xff] %v12011_v29  ;;  %v3412_v26 = vcombine.high %v3346_v17, %v3362_v14  ;;  %v3531_v4 = vcombine.low %v3475_v47, %v3491_v5  ;;  %v3532_v61 = vcombine.high %v3475_v47, %v3491_v5  ;;  %v15738_v36 = vld [vmem:[#allocation52_spill] sm:$0xff]  ;;  %v15778_v29 = vld [vmem:[#allocation63_spill] sm:$0xff] }
 0x31f   : > { %15734 = vst [vmem:[#allocation41_spill] sm:$0xff] %v12014_v28  ;;  %v4595_v3 = vcombine.low %v15736_v38, %v15735_v22  ;;  %v4611_v45 = vcombine.low %v15738_v36, %v15737_v54  ;;  %v12023_v52 = vrot.slane %v3260_v50, %v10934_v42  ;;  %v12026_v6 = vrot.slane %v3275_v55, %v10934_v42 }
 0x320   : > { %6929 = vrot.lane.b32.xlu1 %v6834_v34, %s10155_s19  ;;  %v4596_v17 = vcombine.high %v15736_v38, %v15735_v22  ;;  %v4612_v47 = vcombine.high %v15738_v36, %v15737_v54  ;;  %v12033_v27 = vrot.slane %v3276_v19, %v10934_v42  ;;  %v12036_v14 = vrot.slane %v3395_v1, %v10934_v42  ;;  %v12041_v50 = vpop.permute.xlu1 %7731  ;;  %v15750_v36 = vld [vmem:[#allocation140_spill] sm:$0xff] }
 0x321   : > { %7753 = vrot.lane.b32.xlu0 %v6830_v57, %s10156_s13  ;;  %15739 = vst [vmem:[#allocation33_spill] sm:$0xff] %v12023_v52  ;;  %15740 = vst [vmem:[#allocation45_spill] sm:$0xff] %v12026_v6  ;;  %v12039_v5 = vrot.slane %v3396_v32, %v10934_v42  ;;  %v3547_v57 = vcombine.low %v3482_v20, %v3498_v13  ;;  %v12043_v55 = vpop.permute.xlu0 %6907  ;;  %v12046_v52 = vrot.slane %v3411_v62, %v10934_v42  ;;  %v15763_v6 = vld [vmem:[#allocation62_spill] sm:$0xff] }
 0x322   : > { %15741 = vst [vmem:[#allocation37_spill] sm:$0xff] %v12033_v27  ;;  %15742 = vst [vmem:[#allocation138_spill] sm:$0xff] %v12036_v14  ;;  %v12049_v22 = vrot.slane %v3412_v26, %v10934_v42  ;;  %v12052_v19 = vrot.slane %v3531_v4, %v10934_v42  ;;  %v3548_v38 = vcombine.high %v3482_v20, %v3498_v13  ;;  %v15751_v26 = vld [vmem:[#allocation55_spill] sm:$0xff]  ;;  %v15762_v27 = vld [vmem:[#allocation49_spill] sm:$0xff] }
 0x323   : > { %15743 = vst [vmem:[#allocation56_spill] sm:$0xff] %v12039_v5  ;;  %15744 = vst [vmem:[#allocation48_spill] sm:$0xff] %v12041_v50  ;;  %v12055_v1 = vrot.slane %v3532_v61, %v10934_v42  ;;  %v4603_v32 = vrot.slane %v4595_v3, %v10908_v63  ;;  %v4619_v54 = vrot.slane %v4611_v45, %v10908_v63  ;;  %v15753_v20 = vld [vmem:[#allocation59_spill] sm:$0xff]  ;;  %v15757_v45 = vld [vmem:[#allocation50_spill] sm:$0xff] }
 0x324   : > { %15745 = vst [vmem:[#allocation60_spill] sm:$0xff] %v12043_v55  ;;  %15746 = vst [vmem:[#allocation52_spill] sm:$0xff] %v12046_v52  ;;  %7761 = vrot.lane.b32.xlu1 %v6834_v34, %s10156_s13  ;;  %v4610_v62 = vrot.slane %v4596_v17, %v10908_v63  ;;  %v15752_v52 = vld [vmem:[#allocation47_spill] sm:$0xff]  ;;  %v4626_v4 = vrot.slane %v4612_v47, %v10908_v63  ;;  %v15756_v34 = vld [vmem:[#allocation58_spill] sm:$0xff]  ;;  %v12082_v47 = vrot.slane %v3548_v38, %v10934_v42 }
 0x325   : > { %15747 = vst [vmem:[#allocation209_spill] sm:$0xff] %v12049_v22  ;;  %15748 = vst [vmem:[#allocation210_spill] sm:$0xff] %v12052_v19  ;;  %2183 = vrot.lane.b32.xlu0 %v15750_v36, %s10155_s19  ;;  %v4731_v14 = vcombine.low %v15752_v52, %v15751_v26  ;;  %v15754_v13 = vld [vmem:[#allocation51_spill] sm:$0xff]  ;;  %v4732_v3 = vcombine.high %v15752_v52, %v15751_v26  ;;  %v4867_v19 = vcombine.low %v15757_v45, %v15756_v34  ;;  %v12077_v36 = vpop.permute.xlu1 %4537  ;;  %v12079_v22 = vpop.permute.xlu0 %7739  ;;  %v15761_v5 = vld [vmem:[#allocation57_spill] sm:$0xff] }
 0x326   : > { %15749 = vst [vmem:[#allocation211_spill] sm:$0xff] %v12055_v1  ;;  %v4747_v61 = vcombine.low %v15754_v13, %v15753_v20  ;;  %v12069_v1 = vrot.slane %v3547_v57, %v10934_v42  ;;  %v4868_v17 = vcombine.high %v15757_v45, %v15756_v34  ;;  %15758 = vst [vmem:[#allocation55_spill] sm:$0xff] %v12077_v36  ;;  %v15764_v34 = vld [vmem:[#allocation54_spill] sm:$0xff]  ;;  %v15765_v36 = vld [vmem:[#allocation159_spill] sm:$0xff] }
 0x327   : > { %15759 = vst [vmem:[#allocation47_spill] sm:$0xff] %v12079_v22  ;;  %15760 = vst [vmem:[#allocation59_spill] sm:$0xff] %v12082_v47  ;;  %v5003_v57 = vcombine.low %v15762_v27, %v15761_v5  ;;  %v4748_v52 = vcombine.high %v15754_v13, %v15753_v20  ;;  %v4659_v26 = vcombine.low %v4603_v32, %v4619_v54  ;;  %v15766_v38 = vld [vmem:[#allocation144_spill] sm:$0xff]  ;;  %v15767_v20 = vld [vmem:[#allocation61_spill] sm:$0xff] }
 0x328   : > { %15755 = vst [vmem:[#allocation140_spill] sm:$0xff] %v12069_v1  ;;  %v5004_v1 = vcombine.high %v15762_v27, %v15761_v5  ;;  %v4660_v50 = vcombine.high %v4603_v32, %v4619_v54  ;;  %v4883_v45 = vcombine.low %v15764_v34, %v15763_v6  ;;  %2185 = vrot.lane.b32.xlu1 %v15765_v36, %s10155_s19  ;;  %v15768_v13 = vld [vmem:[#allocation53_spill] sm:$0xff] }
 0x329   : > { %2191 = vrot.lane.b32.xlu0 %v15766_v38, %s10155_s19  ;;  %v4739_v47 = vrot.slane %v4731_v14, %v10908_v63  ;;  %v4675_v22 = vcombine.low %v4610_v62, %v4626_v4  ;;  %v4755_v28 = vrot.slane %v4747_v61, %v10908_v63  ;;  %v4884_v27 = vcombine.high %v15764_v34, %v15763_v6 }
 0x32a   : > { %v4746_v5 = vrot.slane %v4732_v3, %v10908_v63  ;;  %v4875_v32 = vrot.slane %v4867_v19, %v10908_v63  ;;  %v4882_v54 = vrot.slane %v4868_v17, %v10908_v63  ;;  %v5019_v55 = vcombine.low %v15768_v13, %v15767_v20  ;;  %v12105_v23 = vpop.permute.xlu1 %4545  ;;  %v12107_v38 = vpop.permute.xlu0 %5369 }
 0x32b   : > { %15769 = vst [vmem:[#allocation51_spill] sm:$0xff] %v12105_v23  ;;  %15770 = vst [vmem:[#allocation58_spill] sm:$0xff] %v12107_v38  ;;  %v12110_v14 = vrot.slane %v5003_v57, %v10908_v63  ;;  %v12113_v61 = vrot.slane %v5004_v1, %v10908_v63  ;;  %v4676_v6 = vcombine.high %v4610_v62, %v4626_v4  ;;  %v15773_v23 = vld [vmem:[#allocation160_spill] sm:$0xff]  ;;  %v10015_v38 = vld [vmem:[#allocation2 + $0x100] sm:$0xff] }
 0x32c   : > { %v4762_v3 = vrot.slane %v4748_v52, %v10908_v63  ;;  %v12117_v19 = vrot.slane %v4659_v26, %v10934_v42  ;;  %v12120_v17 = vrot.slane %v4660_v50, %v10934_v42  ;;  %v4891_v34 = vrot.slane %v4883_v45, %v10908_v63  ;;  %2193 = vrot.lane.b32.xlu1 %v15773_v23, %s10155_s19  ;;  %v15775_v26 = vld [vmem:[#allocation66_spill] sm:$0xff]  ;;  %v15776_v45 = vld [vmem:[#allocation64_spill] sm:$0xff] }
 0x32d   : > { %3015 = vrot.lane.b32.xlu0 %v10015_v38, %s10156_s13  ;;  %v12127_v1 = vrot.slane %v4675_v22, %v10934_v42  ;;  %v4795_v62 = vcombine.low %v4739_v47, %v4755_v28  ;;  %v4898_v4 = vrot.slane %v4884_v27, %v10908_v63  ;;  %v5020_v57 = vcombine.high %v15768_v13, %v15767_v20  ;;  %v10016_v13 = vld [vmem:[#allocation2 + $0x128] sm:$0xff] }
 0x32e   : > { %15771 = vst [vmem:[#allocation50_spill] sm:$0xff] %v12117_v19  ;;  %15772 = vst [vmem:[#allocation57_spill] sm:$0xff] %v12120_v17  ;;  %v4796_v52 = vcombine.high %v4739_v47, %v4755_v28  ;;  %v5027_v50 = vrot.slane %v5019_v55, %v10908_v63  ;;  %v5443_v17 = vcombine.low %v15776_v45, %v15775_v26  ;;  %v15777_v19 = vld [vmem:[#allocation65_spill] sm:$0xff]  ;;  %v12137_v33 = vpop.permute.xlu1 %5377  ;;  %v12139_v38 = vpop.permute.xlu0 %6905 }
 0x32f   : > { %15774 = vst [vmem:[#allocation49_spill] sm:$0xff] %v12127_v1  ;;  %v5427_v46 = vcombine.low %v15778_v29, %v15777_v19  ;;  %15779 = vst [vmem:[#allocation62_spill] sm:$0xff] %v12137_v33  ;;  %v4811_v22 = vcombine.low %v4746_v5, %v4762_v3  ;;  %v4812_v1 = vcombine.high %v4746_v5, %v4762_v3 }
 0x330   : > { %15780 = vst [vmem:[#allocation54_spill] sm:$0xff] %v12139_v38  ;;  %v5444_v27 = vcombine.high %v15776_v45, %v15775_v26  ;;  %v5428_v28 = vcombine.high %v15778_v29, %v15777_v19  ;;  %v12146_v55 = vrot.slane %v4676_v6, %v10934_v42  ;;  %v4931_v47 = vcombine.low %v4875_v32, %v4891_v34  ;;  %v15788_v45 = vld [vmem:[#allocation70_spill] sm:$0xff] }
 0x331   : > { %v4932_v20 = vcombine.high %v4875_v32, %v4891_v34  ;;  %3017 = vrot.lane.b32.xlu1 %v15765_v36, %s10156_s13  ;;  %3023 = vrot.lane.b32.xlu0 %v10016_v13, %s10156_s13  ;;  %v12152_v38 = vrot.slane %v4795_v62, %v10934_v42  ;;  %v4947_v5 = vcombine.low %v4882_v54, %v4898_v4 }
 0x332   : > { %15781 = vst [vmem:[#allocation159_spill] sm:$0xff] %v12146_v55  ;;  %v4948_v3 = vcombine.high %v4882_v54, %v4898_v4  ;;  %v5034_v26 = vrot.slane %v5020_v57, %v10908_v63  ;;  %v12156_v29 = vrot.slane %v4796_v52, %v10934_v42  ;;  %v5067_v6 = vcombine.low %v12110_v14, %v5027_v50  ;;  %v12161_v36 = vpop.permute.xlu1 %6913  ;;  %v12163_v34 = vpop.permute.xlu0 %7737  ;;  %v12173_v52 = vld [vmem:[#allocation2 + $0x101] sm:$0xff]  ;;  %v15790_v55 = vld [vmem:[#allocation69_spill] sm:$0xff] }
 0x333   : > { %15782 = vst [vmem:[#allocation144_spill] sm:$0xff] %v12152_v38  ;;  %v5451_v32 = vrot.slane %v5443_v17, %v10908_v63  ;;  %v5435_v19 = vrot.slane %v5427_v46, %v10908_v63  ;;  %15784 = vst [vmem:[#allocation53_spill] sm:$0xff] %v12161_v36  ;;  %v12166_v62 = vrot.slane %v4811_v22, %v10934_v42  ;;  %v15789_v46 = vld [vmem:[#allocation68_spill] sm:$0xff]  ;;  %v15791_v36 = vld [vmem:[#allocation67_spill] sm:$0xff] }
 0x334   : > { %15783 = vst [vmem:[#allocation61_spill] sm:$0xff] %v12156_v29  ;;  %15785 = vst [vmem:[#allocation160_spill] sm:$0xff] %v12163_v34  ;;  %v12169_v54 = vrot.slane %v4812_v1, %v10934_v42  ;;  %v5458_v4 = vrot.slane %v5444_v27, %v10908_v63  ;;  %v5442_v57 = vrot.slane %v5428_v28, %v10908_v63 }
 0x335   : > { %15786 = vst [vmem:[#allocation66_spill] sm:$0xff] %v12166_v62  ;;  %v5068_v17 = vcombine.high %v12110_v14, %v5027_v50  ;;  %v5579_v13 = vcombine.low %v15789_v46, %v15788_v45  ;;  %v5563_v34 = vcombine.low %v15791_v36, %v15790_v55  ;;  %3025 = vrot.lane.b32.xlu1 %v15773_v23, %s10156_s13 }
 0x336   : > { %15787 = vst [vmem:[#allocation64_spill] sm:$0xff] %v12169_v54  ;;  %4551 = vrot.lane.b32.xlu0 %v12173_v52, %s10155_s19  ;;  %v12185_v1 = vrot.slane %v4931_v47, %v10934_v42  ;;  %v12188_v22 = vrot.slane %v4932_v20, %v10934_v42  ;;  %v12191_v14 = vrot.slane %v4947_v5, %v10934_v42  ;;  %v12201_v29 = vpop.permute.xlu1 %7745  ;;  %v15867_v54 = vld [vmem:[#allocation96_spill] sm:$0xff] }
 0x337   : > { %v5083_v50 = vcombine.low %v12113_v61, %v5034_v26  ;;  %v12195_v27 = vrot.slane %v4948_v3, %v10934_v42  ;;  %v12198_v28 = vrot.slane %v5067_v6, %v10934_v42  ;;  %v5084_v23 = vcombine.high %v12113_v61, %v5034_v26  ;;  %15797 = vst [vmem:[#allocation67_spill] sm:$0xff] %v12201_v29  ;;  %v12203_v47 = vpop.permute.xlu0 %2167  ;;  %v6828_v3 = vld [vmem:[#allocation2 + $0xfa] sm:$0xff] }
 0x338   : > { %15792 = vst [vmem:[#allocation65_spill] sm:$0xff] %v12185_v1  ;;  %15793 = vst [vmem:[#allocation63_spill] sm:$0xff] %v12188_v22  ;;  %v5491_v33 = vcombine.low %v5435_v19, %v5451_v32  ;;  %v5492_v20 = vcombine.high %v5435_v19, %v5451_v32  ;;  %v5507_v22 = vcombine.low %v5442_v57, %v5458_v4  ;;  %v15804_v1 = vld [vmem:[#allocation71_spill] sm:$0xff] }
 0x339   : > { %15794 = vst [vmem:[#allocation70_spill] sm:$0xff] %v12191_v14  ;;  %15795 = vst [vmem:[#allocation68_spill] sm:$0xff] %v12195_v27  ;;  %v5580_v5 = vcombine.high %v15789_v46, %v15788_v45  ;;  %v5564_v14 = vcombine.high %v15791_v36, %v15790_v55  ;;  %v12209_v27 = vld [vmem:[#allocation2 + $0x129] sm:$0xff]  ;;  %v12212_v6 = vrot.slane %v5068_v17, %v10934_v42  ;;  %6917 = vrot.lane.b32.xlu1 %v6828_v3, %s10155_s19  ;;  %v15801_v55 = vld [vmem:[#allocation74_spill] sm:$0xff] }
 0x33a   : > { %15796 = vst [vmem:[#allocation69_spill] sm:$0xff] %v12198_v28  ;;  %15798 = vst [vmem:[#allocation212_spill] sm:$0xff] %v12203_v47  ;;  %v5587_v61 = vrot.slane %v5579_v13, %v10908_v63  ;;  %v5571_v26 = vrot.slane %v5563_v34, %v10908_v63  ;;  %4559 = vrot.lane.b32.xlu0 %v12209_v27, %s10155_s19  ;;  %v12220_v32 = vrot.slane %v5083_v50, %v10934_v42  ;;  %v15802_v36 = vld [vmem:[#allocation72_spill] sm:$0xff]  ;;  %v15803_v46 = vld [vmem:[#allocation73_spill] sm:$0xff]  ;;  %v12236_v28 = vpop.permute.xlu1 %2169 }
 0x33b   : > { %15799 = vst [vmem:[#allocation213_spill] sm:$0xff] %v12212_v6  ;;  %v5508_v19 = vcombine.high %v5442_v57, %v5458_v4  ;;  %v6979_v45 = vcombine.low %v15802_v36, %v15801_v55  ;;  %v6963_v17 = vcombine.low %v15804_v1, %v15803_v46  ;;  %v12227_v6 = vrot.slane %v5084_v23, %v10934_v42  ;;  %v12238_v4 = vpop.permute.xlu0 %2175 }
 0x33c   : > { %15800 = vst [vmem:[#allocation214_spill] sm:$0xff] %v12220_v32  ;;  %v12230_v34 = vrot.slane %v5491_v33, %v10934_v42  ;;  %v6980_v13 = vcombine.high %v15802_v36, %v15801_v55  ;;  %v6964_v50 = vcombine.high %v15804_v1, %v15803_v46  ;;  %15807 = vst [vmem:[#allocation73_spill] sm:$0xff] %v12236_v28  ;;  %v15811_v55 = vld [vmem:[#allocation77_spill] sm:$0xff]  ;;  %v15812_v36 = vld [vmem:[#allocation75_spill] sm:$0xff] }
 0x33d   : > { %15805 = vst [vmem:[#allocation74_spill] sm:$0xff] %v12227_v6  ;;  %15808 = vst [vmem:[#allocation71_spill] sm:$0xff] %v12238_v4  ;;  %v12241_v57 = vrot.slane %v5492_v20, %v10934_v42  ;;  %v12244_v32 = vrot.slane %v5507_v22, %v10934_v42  ;;  %v5594_v23 = vrot.slane %v5580_v5, %v10908_v63  ;;  %v6832_v6 = vld [vmem:[#allocation2 + $0x122] sm:$0xff]  ;;  %7749 = vrot.lane.b32.xlu1 %v6828_v3, %s10156_s13 }
 0x33e   : > { %15806 = vst [vmem:[#allocation72_spill] sm:$0xff] %v12230_v34  ;;  %v5578_v33 = vrot.slane %v5564_v14, %v10908_v63  ;;  %v5627_v47 = vcombine.low %v5571_v26, %v5587_v61  ;;  %v7099_v29 = vcombine.low %v15812_v36, %v15811_v55  ;;  %v7100_v1 = vcombine.high %v15812_v36, %v15811_v55  ;;  %v15815_v4 = vld [vmem:[#allocation76_spill] sm:$0xff]  ;;  %v12265_v55 = vpop.permute.xlu1 %2177 }
 0x33f   : > { %15809 = vst [vmem:[#allocation215_spill] sm:$0xff] %v12241_v57  ;;  %15810 = vst [vmem:[#allocation216_spill] sm:$0xff] %v12244_v32  ;;  %6925 = vrot.lane.b32.xlu0 %v6832_v6, %s10155_s19  ;;  %v12255_v20 = vrot.slane %v5508_v19, %v10934_v42  ;;  %v5628_v22 = vcombine.high %v5571_v26, %v5587_v61  ;;  %v6987_v5 = vrot.slane %v6979_v45, %v10908_v63  ;;  %v15814_v32 = vld [vmem:[#allocation78_spill] sm:$0xff]  ;;  %v12267_v36 = vpop.permute.xlu0 %2999  ;;  %v15818_v26 = vld [vmem:[#allocation81_spill] sm:$0xff] }
 0x340   : > { %v6971_v14 = vrot.slane %v6963_v17, %v10908_v63  ;;  %v6994_v46 = vrot.slane %v6980_v13, %v10908_v63  ;;  %v6978_v28 = vrot.slane %v6964_v50, %v10908_v63  ;;  %v7115_v57 = vcombine.low %v15815_v4, %v15814_v32  ;;  %15816 = vst [vmem:[#allocation75_spill] sm:$0xff] %v12265_v55  ;;  %v15819_v45 = vld [vmem:[#allocation79_spill] sm:$0xff] }
 0x341   : > { %15813 = vst [vmem:[#allocation77_spill] sm:$0xff] %v12255_v20  ;;  %v7116_v3 = vcombine.high %v15815_v4, %v15814_v32  ;;  %15817 = vst [vmem:[#allocation78_spill] sm:$0xff] %v12267_v36  ;;  %v5643_v19 = vcombine.low %v5578_v33, %v5594_v23  ;;  %v5644_v61 = vcombine.high %v5578_v33, %v5594_v23  ;;  %5383 = vrot.lane.b32.xlu1 %v12173_v52, %s10156_s13  ;;  %v15821_v23 = vld [vmem:[#allocation82_spill] sm:$0xff]  ;;  %v15822_v33 = vld [vmem:[#allocation80_spill] sm:$0xff] }
 0x342   : > { %v7795_v20 = vcombine.low %v15819_v45, %v15818_v26  ;;  %v7796_v17 = vcombine.high %v15819_v45, %v15818_v26  ;;  %v12274_v13 = vrot.slane %v5627_v47, %v10934_v42  ;;  %v7107_v50 = vrot.slane %v7099_v29, %v10908_v63 }
 0x343   : > { %v7114_v34 = vrot.slane %v7100_v1, %v10908_v63  ;;  %7757 = vrot.lane.b32.xlu0 %v6832_v6, %s10156_s13  ;;  %v7027_v32 = vcombine.low %v6971_v14, %v6987_v5  ;;  %v7028_v4 = vcombine.high %v6971_v14, %v6987_v5  ;;  %v7811_v36 = vcombine.low %v15822_v33, %v15821_v23  ;;  %v12287_v1 = vpop.permute.xlu1 %3001  ;;  %v12289_v38 = vpop.permute.xlu0 %3007 }
 0x344   : > { %15820 = vst [vmem:[#allocation76_spill] sm:$0xff] %v12274_v13  ;;  %v7812_v26 = vcombine.high %v15822_v33, %v15821_v23  ;;  %v7043_v45 = vcombine.low %v6978_v28, %v6994_v46  ;;  %v7044_v47 = vcombine.high %v6978_v28, %v6994_v46  ;;  %v7123_v55 = vrot.slane %v7115_v57, %v10908_v63  ;;  %v6833_v23 = vld [vmem:[#allocation2 + $0x12a] sm:$0xff]  ;;  %v15843_v13 = vld [vmem:[#allocation90_spill] sm:$0xff] }
 0x345   : > { %v7130_v29 = vrot.slane %v7116_v3, %v10908_v63  ;;  %15823 = vst [vmem:[#allocation81_spill] sm:$0xff] %v12287_v1  ;;  %15824 = vst [vmem:[#allocation79_spill] sm:$0xff] %v12289_v38  ;;  %v12292_v52 = vrot.slane %v5628_v22, %v10934_v42  ;;  %v12295_v6 = vrot.slane %v5643_v19, %v10934_v42  ;;  %6927 = vrot.lane.b32.xlu1 %v6833_v23, %s10155_s19 }
 0x346   : > { %v7803_v5 = vrot.slane %v7795_v20, %v10908_v63  ;;  %v7810_v14 = vrot.slane %v7796_v17, %v10908_v63  ;;  %v7163_v28 = vcombine.low %v7107_v50, %v7123_v55  ;;  %v7164_v46 = vcombine.high %v7107_v50, %v7123_v55 }
 0x347   : > { %15825 = vst [vmem:[#allocation82_spill] sm:$0xff] %v12292_v52  ;;  %15826 = vst [vmem:[#allocation80_spill] sm:$0xff] %v12295_v6  ;;  %v7179_v57 = vcombine.low %v7114_v34, %v7130_v29  ;;  %5391 = vrot.lane.b32.xlu0 %v12209_v27, %s10156_s13  ;;  %v12303_v3 = vrot.slane %v5644_v61, %v10934_v42  ;;  %v12306_v22 = vrot.slane %v7027_v32, %v10934_v42  ;;  %v12319_v33 = vpop.permute.xlu1 %3009  ;;  %v12321_v61 = vpop.permute.xlu0 %4535  ;;  %v15837_v52 = vld [vmem:[#allocation87_spill] sm:$0xff] }
 0x348   : > { %v7819_v19 = vrot.slane %v7811_v36, %v10908_v63  ;;  %v7826_v20 = vrot.slane %v7812_v26, %v10908_v63  ;;  %v12311_v17 = vrot.slane %v7028_v4, %v10934_v42  ;;  %v12314_v55 = vrot.slane %v7043_v45, %v10934_v42  ;;  %15832 = vst [vmem:[#allocation222_spill] sm:$0xff] %v12319_v33  ;;  %v15835_v36 = vld [vmem:[#allocation83_spill] sm:$0xff]  ;;  %v15836_v26 = vld [vmem:[#allocation89_spill] sm:$0xff]  ;;  %v15842_v33 = vld [vmem:[#allocation84_spill] sm:$0xff] }
 0x349   : > { %15827 = vst [vmem:[#allocation217_spill] sm:$0xff] %v12303_v3  ;;  %15828 = vst [vmem:[#allocation218_spill] sm:$0xff] %v12306_v22  ;;  %v12317_v50 = vrot.slane %v7044_v47, %v10934_v42  ;;  %v7180_v27 = vcombine.high %v7114_v34, %v7130_v29  ;;  %v15834_v22 = vld [vmem:[#allocation85_spill] sm:$0xff]  ;;  %v5699_v4 = vcombine.low %v15837_v52, %v15836_v26  ;;  %7759 = vrot.lane.b32.xlu1 %v6833_v23, %s10156_s13  ;;  %v15873_v3 = vld [vmem:[#allocation100_spill] sm:$0xff] }
 0x34a   : > { %15829 = vst [vmem:[#allocation219_spill] sm:$0xff] %v12311_v17  ;;  %15830 = vst [vmem:[#allocation220_spill] sm:$0xff] %v12314_v55  ;;  %v7859_v32 = vcombine.low %v7803_v5, %v7819_v19  ;;  %v7875_v1 = vcombine.low %v7810_v14, %v7826_v20  ;;  %v7931_v38 = vcombine.low %v15835_v36, %v15834_v22  ;;  %v6829_v17 = vld [vmem:[#allocation2 + $0x102] sm:$0xff] }
 0x34b   : > { %15831 = vst [vmem:[#allocation221_spill] sm:$0xff] %v12317_v50  ;;  %15833 = vst [vmem:[#allocation223_spill] sm:$0xff] %v12321_v61  ;;  %v12328_v45 = vrot.slane %v7163_v28, %v10934_v42  ;;  %v12331_v47 = vrot.slane %v7164_v46, %v10934_v42  ;;  %v12334_v34 = vrot.slane %v7179_v57, %v10934_v42  ;;  %6919 = vrot.lane.b32.xlu0 %v6829_v17, %s10155_s19  ;;  %v15841_v61 = vld [vmem:[#allocation86_spill] sm:$0xff]  ;;  %v15844_v28 = vld [vmem:[#allocation88_spill] sm:$0xff]  ;;  %s8923_s19 = sshll.u32 %s14874_s0, 4  ;;  %s8924_s19 = int_to_ptr.vmem [resolvable:$true] %s8923_s19 }
 0x34c   : > { %v7876_v29 = vcombine.high %v7810_v14, %v7826_v20  ;;  %v7947_v50 = vcombine.low %v15842_v33, %v15841_v61  ;;  %v7932_v55 = vcombine.high %v15835_v36, %v15834_v22  ;;  %v12345_v46 = vrot.slane %v7180_v27, %v10934_v42  ;;  %v12351_v14 = vpop.permute.xlu1 %6901  ;;  %v12353_v20 = vpop.permute.xlu0 %4543  ;;  %v15850_v27 = vld [vmem:[#allocation93_spill] sm:$0xff] }
 0x34d   : > { %15838 = vst [vmem:[#allocation85_spill] sm:$0xff] %v12328_v45  ;;  %15839 = vst [vmem:[#allocation83_spill] sm:$0xff] %v12331_v47  ;;  %v5715_v45 = vcombine.low %v15844_v28, %v15843_v13  ;;  %v7860_v47 = vcombine.high %v7803_v5, %v7819_v19  ;;  %v7948_v57 = vcombine.high %v15842_v33, %v15841_v61 }
 0x34e   : > { %15840 = vst [vmem:[#allocation89_spill] sm:$0xff] %v12334_v34  ;;  %15845 = vst [vmem:[#allocation87_spill] sm:$0xff] %v12345_v46  ;;  %v5700_v23 = vcombine.high %v15837_v52, %v15836_v26  ;;  %v12356_v34 = vrot.slane %v7931_v38, %v10908_v63  ;;  %v5707_v22 = vrot.slane %v5699_v4, %v10908_v63  ;;  %v15851_v52 = vld [vmem:[#allocation91_spill] sm:$0xff] }
 0x34f   : > { %15846 = vst [vmem:[#allocation86_spill] sm:$0xff] %v12351_v14  ;;  %15847 = vst [vmem:[#allocation84_spill] sm:$0xff] %v12353_v20  ;;  %v12360_v36 = vrot.slane %v7875_v1, %v10934_v42  ;;  %v12363_v5 = vrot.slane %v7859_v32, %v10934_v42  ;;  %v5716_v19 = vcombine.high %v15844_v28, %v15843_v13  ;;  %v15852_v38 = vld [vmem:[#allocation127_spill] sm:$0xff]  ;;  %7751 = vrot.lane.b32.xlu0 %v6829_v17, %s10156_s13  ;;  %v15854_v28 = vld [vmem:[#allocation94_spill] sm:$0xff]  ;;  %s8901_s13 = scalar_lea.sflag [#allocation6], %s10363_s26 }
 0x350   : > { %v5851_v33 = vcombine.low %v15851_v52, %v15850_v27  ;;  %v5852_v61 = vcombine.high %v15851_v52, %v15850_v27  ;;  %9417 = vrot.lane.b32.xlu1 %v15852_v38, %s10159_s16  ;;  %v12375_v1 = vrot.slane %v7947_v50, %v10908_v63  ;;  %v12378_v32 = vrot.slane %v7932_v55, %v10908_v63  ;;  %v15855_v27 = vld [vmem:[#allocation92_spill] sm:$0xff]  ;;  %v12389_v17 = vpop.permute.xlu1 %7733  ;;  %v12391_v50 = vpop.permute.xlu0 %6909 }
 0x351   : > { %15848 = vst [vmem:[#allocation90_spill] sm:$0xff] %v12360_v36  ;;  %15849 = vst [vmem:[#allocation88_spill] sm:$0xff] %v12363_v5  ;;  %v5723_v13 = vrot.slane %v5715_v45, %v10908_v63  ;;  %v12382_v26 = vrot.slane %v7876_v29, %v10934_v42  ;;  %v5714_v4 = vrot.slane %v5700_v23, %v10908_v63  ;;  %v15866_v36 = vld [vmem:[#allocation98_spill] sm:$0xff] }
 0x352   : > { %v5835_v52 = vcombine.low %v15855_v27, %v15854_v28  ;;  %v5836_v38 = vcombine.high %v15855_v27, %v15854_v28  ;;  %15856 = vst [vmem:[#allocation91_spill] sm:$0xff] %v12389_v17  ;;  %15857 = vst [vmem:[#allocation127_spill] sm:$0xff] %v12391_v50  ;;  %v12394_v55 = vrot.slane %v7860_v47, %v10934_v42  ;;  %v15859_v47 = vld [vmem:[#allocation129_spill] sm:$0xff]  ;;  %v15862_v17 = vld [vmem:[#allocation95_spill] sm:$0xff] }
 0x353   : > { %15853 = vst [vmem:[#allocation93_spill] sm:$0xff] %v12382_v26  ;;  %v12397_v45 = vrot.slane %v7948_v57, %v10908_v63  ;;  %v7995_v29 = vcombine.low %v12356_v34, %v12375_v1  ;;  %v7996_v23 = vcombine.high %v12356_v34, %v12375_v1  ;;  %v5763_v46 = vcombine.low %v5707_v22, %v5723_v13  ;;  %v15860_v57 = vld [vmem:[#allocation130_spill] sm:$0xff] }
 0x354   : > { %15858 = vst [vmem:[#allocation94_spill] sm:$0xff] %v12394_v55  ;;  %v5730_v26 = vrot.slane %v5716_v19, %v10908_v63  ;;  %v5859_v28 = vrot.slane %v5851_v33, %v10908_v63  ;;  %v5866_v27 = vrot.slane %v5852_v61, %v10908_v63  ;;  %9427 = vrot.lane.b32.xlu1 %v15859_v47, %s10160_s15  ;;  %v15861_v19 = vld [vmem:[#allocation97_spill] sm:$0xff]  ;;  %v12418_v5 = vpop.permute.xlu1 %5367  ;;  %v12420_v20 = vpop.permute.xlu0 %7741 }
 0x355   : > { %9422 = vrot.lane.b32.xlu0 %v15860_v57, %s10161_s25  ;;  %v8011_v55 = vcombine.low %v12378_v32, %v12397_v45  ;;  %v8012_v34 = vcombine.high %v12378_v32, %v12397_v45  ;;  %v5764_v1 = vcombine.high %v5707_v22, %v5723_v13  ;;  %v7251_v33 = vcombine.low %v15862_v17, %v15861_v19  ;;  %v15868_v13 = vld [vmem:[#allocation101_spill] sm:$0xff]  ;;  %v15869_v45 = vld [vmem:[#allocation99_spill] sm:$0xff] }
 0x356   : > { %v5779_v50 = vcombine.low %v5714_v4, %v5730_v26  ;;  %v5780_v61 = vcombine.high %v5714_v4, %v5730_v26  ;;  %v5843_v14 = vrot.slane %v5835_v52, %v10908_v63  ;;  %v5850_v47 = vrot.slane %v5836_v38, %v10908_v63  ;;  %15863 = vst [vmem:[#allocation92_spill] sm:$0xff] %v12418_v5  ;;  %v15870_v38 = vld [vmem:[#allocation131_spill] sm:$0xff]  ;;  %v15872_v5 = vld [vmem:[#allocation102_spill] sm:$0xff] }
 0x357   : > { %15864 = vst [vmem:[#allocation129_spill] sm:$0xff] %v12420_v20  ;;  %v12423_v57 = vrot.slane %v5763_v46, %v10934_v42  ;;  %v7235_v32 = vcombine.low %v15867_v54, %v15866_v36  ;;  %v7252_v22 = vcombine.high %v15862_v17, %v15861_v19  ;;  %v7387_v26 = vcombine.low %v15869_v45, %v15868_v13  ;;  %v15871_v20 = vld [vmem:[#allocation134_spill] sm:$0xff] }
 0x358   : > { %v5899_v4 = vcombine.low %v5843_v14, %v5859_v28  ;;  %v5900_v52 = vcombine.high %v5843_v14, %v5859_v28  ;;  %v5915_v9 = vcombine.low %v5850_v47, %v5866_v27  ;;  %9437 = vrot.lane.b32.xlu1 %v15870_v38, %s10161_s25  ;;  %v7236_v46 = vcombine.high %v15867_v54, %v15866_v36  ;;  %v12451_v41 = vpop.permute.xlu1 %6911  ;;  %v12453_v54 = vpop.permute.xlu0 %5375 }
 0x359   : > { %15865 = vst [vmem:[#allocation130_spill] sm:$0xff] %v12423_v57  ;;  %9432 = vrot.lane.b32.xlu0 %v15871_v20, %s10159_s16  ;;  %v7259_v57 = vrot.slane %v7251_v33, %v10908_v63  ;;  %v7371_v17 = vcombine.low %v15873_v3, %v15872_v5  ;;  %v7388_v19 = vcombine.high %v15869_v45, %v15868_v13  ;;  %15877 = vst [vmem:[#allocation96_spill] sm:$0xff] %v12451_v41  ;;  %v15923_v41 = vld [vmem:[#allocation152_spill] sm:$0xff] }
 0x35a   : > { %v12443_v14 = vrot.slane %v5764_v1, %v10934_v42  ;;  %v12446_v28 = vrot.slane %v5779_v50, %v10934_v42  ;;  %v12449_v38 = vrot.slane %v5780_v61, %v10934_v42  ;;  %v5916_v20 = vcombine.high %v5850_v47, %v5866_v27  ;;  %15878 = vst [vmem:[#allocation101_spill] sm:$0xff] %v12453_v54  ;;  %v15882_v47 = vld [vmem:[#allocation137_spill] sm:$0xff] }
 0x35b   : > { %v7243_v36 = vrot.slane %v7235_v32, %v10908_v63  ;;  %v7266_v33 = vrot.slane %v7252_v22, %v10908_v63  ;;  %v7372_v13 = vcombine.high %v15873_v3, %v15872_v5  ;;  %v7395_v1 = vrot.slane %v7387_v26, %v10908_v63  ;;  %v15883_v32 = vld [vmem:[#allocation135_spill] sm:$0xff] }
 0x35c   : > { %15874 = vst [vmem:[#allocation97_spill] sm:$0xff] %v12443_v14  ;;  %15875 = vst [vmem:[#allocation95_spill] sm:$0xff] %v12446_v28  ;;  %v12461_v50 = vrot.slane %v5899_v4, %v10934_v42  ;;  %v12464_v61 = vrot.slane %v5900_v52, %v10934_v42  ;;  %v12467_v27 = vrot.slane %v5915_v9, %v10934_v42  ;;  %9447 = vrot.lane.b32.xlu1 %v15882_v47, %s10159_s16  ;;  %v12479_v52 = vpop.permute.xlu1 %7743  ;;  %v12481_v9 = vpop.permute.xlu0 %6903  ;;  %v15890_v14 = vld [vmem:[#allocation103_spill] sm:$0xff] }
 0x35d   : > { %15876 = vst [vmem:[#allocation98_spill] sm:$0xff] %v12449_v38  ;;  %9442 = vrot.lane.b32.xlu0 %v15883_v32, %s10160_s15  ;;  %v7250_v22 = vrot.slane %v7236_v46, %v10908_v63  ;;  %v7299_v3 = vcombine.low %v7243_v36, %v7259_v57  ;;  %v7379_v5 = vrot.slane %v7371_v17, %v10908_v63  ;;  %15885 = vst [vmem:[#allocation100_spill] sm:$0xff] %v12479_v52  ;;  %v15897_v52 = vld [vmem:[#allocation106_spill] sm:$0xff] }
 0x35e   : > { %15879 = vst [vmem:[#allocation99_spill] sm:$0xff] %v12461_v50  ;;  %15880 = vst [vmem:[#allocation131_spill] sm:$0xff] %v12464_v61  ;;  %v7402_v45 = vrot.slane %v7388_v19, %v10908_v63  ;;  %v12477_v26 = vrot.slane %v5916_v20, %v10934_v42  ;;  %v7300_v4 = vcombine.high %v7243_v36, %v7259_v57  ;;  %v15889_v19 = vld [vmem:[#allocation105_spill] sm:$0xff]  ;;  %v15892_v36 = vld [vmem:[#allocation142_spill] sm:$0xff] }
 0x35f   : > { %15881 = vst [vmem:[#allocation134_spill] sm:$0xff] %v12467_v27  ;;  %15886 = vst [vmem:[#allocation137_spill] sm:$0xff] %v12481_v9  ;;  %v12484_v47 = vrot.slane %v7995_v29, %v10934_v42  ;;  %v12487_v32 = vrot.slane %v7996_v23, %v10934_v42  ;;  %v7315_v46 = vcombine.low %v7250_v22, %v7266_v33  ;;  %v15891_v57 = vld [vmem:[#allocation141_spill] sm:$0xff]  ;;  %v16003_v50 = vld [vmem:[#allocation38_spill] sm:$0xff] }
 0x360   : > { %15884 = vst [vmem:[#allocation102_spill] sm:$0xff] %v12477_v26  ;;  %v7316_v38 = vcombine.high %v7250_v22, %v7266_v33  ;;  %v7386_v17 = vrot.slane %v7372_v13, %v10908_v63  ;;  %v7435_v28 = vcombine.low %v7379_v5, %v7395_v1  ;;  %v8083_v20 = vcombine.low %v15890_v14, %v15889_v19 }
 0x361   : > { %15887 = vst [vmem:[#allocation135_spill] sm:$0xff] %v12484_v47  ;;  %15888 = vst [vmem:[#allocation224_spill] sm:$0xff] %v12487_v32  ;;  %9457 = vrot.lane.b32.xlu1 %v15891_v57, %s10160_s15  ;;  %9452 = vrot.lane.b32.xlu0 %v15892_v36, %s10161_s25  ;;  %v12497_v29 = vrot.slane %v8011_v55, %v10934_v42  ;;  %v12500_v23 = vrot.slane %v8012_v34, %v10934_v42  ;;  %v15898_v57 = vld [vmem:[#allocation104_spill] sm:$0xff]  ;;  %v12514_v34 = vpop.permute.xlu1 %4549 }
 0x362   : > { %v12503_v33 = vrot.slane %v7299_v3, %v10934_v42  ;;  %v7436_v13 = vcombine.high %v7379_v5, %v7395_v1  ;;  %v7451_v22 = vcombine.low %v7386_v17, %v7402_v45  ;;  %v7452_v32 = vcombine.high %v7386_v17, %v7402_v45  ;;  %v15903_v45 = vld [vmem:[#allocation109_spill] sm:$0xff] }
 0x363   : > { %15893 = vst [vmem:[#allocation105_spill] sm:$0xff] %v12497_v29  ;;  %15894 = vst [vmem:[#allocation103_spill] sm:$0xff] %v12500_v23  ;;  %v12506_v47 = vrot.slane %v7300_v4, %v10934_v42  ;;  %v8067_v9 = vcombine.low %v15898_v57, %v15897_v52  ;;  %v8068_v36 = vcombine.high %v15898_v57, %v15897_v52  ;;  %v12516_v23 = vpop.permute.xlu0 %7735  ;;  %v15904_v4 = vld [vmem:[#allocation107_spill] sm:$0xff] }
 0x364   : > { %15895 = vst [vmem:[#allocation141_spill] sm:$0xff] %v12503_v33  ;;  %v8084_v55 = vcombine.high %v15890_v14, %v15889_v19  ;;  %15899 = vst [vmem:[#allocation106_spill] sm:$0xff] %v12516_v23  ;;  %v12519_v1 = vrot.slane %v7315_v46, %v10934_v42  ;;  %v12522_v3 = vrot.slane %v7316_v38, %v10934_v42  ;;  %v15906_v14 = vld [vmem:[#allocation110_spill] sm:$0xff]  ;;  %v15907_v19 = vld [vmem:[#allocation108_spill] sm:$0xff] }
 0x365   : > { %15896 = vst [vmem:[#allocation142_spill] sm:$0xff] %v12506_v47  ;;  %v12525_v5 = vrot.slane %v7435_v28, %v10934_v42  ;;  %v8219_v17 = vcombine.low %v15904_v4, %v15903_v45  ;;  %v12530_v52 = vrot.slane %v8083_v20, %v10908_v63  ;;  %v8203_v57 = vcombine.low %v15907_v19, %v15906_v14  ;;  %v15908_v46 = vld [vmem:[#allocation145_spill] sm:$0xff]  ;;  %v15909_v38 = vld [vmem:[#allocation146_spill] sm:$0xff]  ;;  %v15918_v23 = vld [vmem:[#allocation171_spill] sm:$0xff] }
 0x366   : > { %15900 = vst [vmem:[#allocation104_spill] sm:$0xff] %v12519_v1  ;;  %15901 = vst [vmem:[#allocation225_spill] sm:$0xff] %v12522_v3  ;;  %v8220_v33 = vcombine.high %v15904_v4, %v15903_v45  ;;  %9467 = vrot.lane.b32.xlu1 %v15908_v46, %s10161_s25  ;;  %9462 = vrot.lane.b32.xlu0 %v15909_v38, %s10159_s16  ;;  %v12541_v28 = vrot.slane %v7436_v13, %v10934_v42  ;;  %v12560_v13 = vpop.permute.xlu1 %4557 }
 0x367   : > { %15902 = vst [vmem:[#allocation226_spill] sm:$0xff] %v12525_v5  ;;  %15905 = vst [vmem:[#allocation109_spill] sm:$0xff] %v12530_v52  ;;  %v12544_v47 = vrot.slane %v7451_v22, %v10934_v42  ;;  %v12547_v20 = vrot.slane %v7452_v32, %v10934_v42  ;;  %v4764_v3 = vcombine.high %v11755_v51, %v12514_v34  ;;  %v12562_v38 = vpop.permute.xlu0 %5389  ;;  %v15916_v22 = vld [vmem:[#allocation170_spill] sm:$0xff] }
 0x368   : > { %15910 = vst [vmem:[#allocation107_spill] sm:$0xff] %v12541_v28  ;;  %v12552_v45 = vrot.slane %v8067_v9, %v10908_v63  ;;  %v12555_v4 = vrot.slane %v8068_v36, %v10908_v63  ;;  %v12558_v46 = vrot.slane %v8084_v55, %v10908_v63  ;;  %v1897_v32 = vcombine.high %v15916_v22, %v11431_v18  ;;  %v15917_v36 = vld [vmem:[#allocation172_spill] sm:$0xff]  ;;  %v15919_v18 = vld [vmem:[#allocation150_spill] sm:$0xff]  ;;  %v15921_v55 = vld [vmem:[#allocation151_spill] sm:$0xff] }
 0x369   : > { %15911 = vst [vmem:[#allocation110_spill] sm:$0xff] %v12544_v47  ;;  %15912 = vst [vmem:[#allocation108_spill] sm:$0xff] %v12547_v20  ;;  %v8204_v29 = vcombine.high %v15907_v19, %v15906_v14  ;;  %v8227_v1 = vrot.slane %v8219_v17, %v10908_v63  ;;  %v4780_v9 = vcombine.high %v11800_v53, %v12560_v13  ;;  %v15920_v14 = vld [vmem:[#allocation147_spill] sm:$0xff] }
 0x36a   : > { %15913 = vst [vmem:[#allocation145_spill] sm:$0xff] %v12552_v45  ;;  %15914 = vst [vmem:[#allocation146_spill] sm:$0xff] %v12555_v4  ;;  %v1913_v20 = vcombine.high %v15918_v23, %v15917_v36  ;;  %v8211_v47 = vrot.slane %v8203_v57, %v10908_v63  ;;  %v8234_v28 = vrot.slane %v8220_v33, %v10908_v63  ;;  %9477 = vrot.lane.b32.xlu1 %v15919_v18, %s10159_s16 }
 0x36b   : > { %15915 = vst [vmem:[#allocation227_spill] sm:$0xff] %v12558_v46  ;;  %9472 = vrot.lane.b32.xlu0 %v15920_v14, %s10160_s15  ;;  %v12582_v17 = vrot.slane %v4764_v3, %v10908_v63  ;;  %v12585_v19 = vrot.slane %v4780_v9, %v10908_v63  ;;  %v4132_v23 = vcombine.high %v11437_v60, %v11443_v59  ;;  %v12597_v3 = vpop.permute.xlu1 %5381  ;;  %v12599_v18 = vpop.permute.xlu0 %2179 }
 0x36c   : > { %v4148_v57 = vcombine.high %v11440_v40, %v11446_v49  ;;  %v8147_v22 = vcombine.low %v12555_v4, %v12558_v46  ;;  %v5612_v36 = vcombine.high %v11802_v15, %v12562_v38  ;;  %v1911_v9 = vrot.slane %v1897_v32, %v10934_v42 }
 0x36d   : > { %v8218_v60 = vrot.slane %v8204_v29, %v10908_v63  ;;  %v8267_v59 = vcombine.low %v8211_v47, %v8227_v1  ;;  %v4843_v40 = vcombine.low %v12582_v17, %v12585_v19  ;;  %v1927_v49 = vrot.slane %v1913_v20, %v10934_v42 }
 0x36e   : > { %v8268_v14 = vcombine.high %v8211_v47, %v8227_v1  ;;  %v5596_v33 = vcombine.high %v11832_v48, %v12597_v3  ;;  %9487 = vrot.lane.b32.xlu1 %v15921_v55, %s10160_s15  ;;  %v1929_v4 = vcombine.high %v11414_v12, %v11512_v56  ;;  %v1933_v32 = vcombine.high %v11452_v21, %v11525_v43  ;;  %v15926_v21 = vld [vmem:[#allocation157_spill] sm:$0xff] }
 0x36f   : > { %v8283_v29 = vcombine.low %v8218_v60, %v8234_v28  ;;  %v12615_v46 = vrot.slane %v4843_v40, %v10934_v42  ;;  %9482 = vrot.lane.b32.xlu0 %v15923_v41, %s10161_s25  ;;  %v4146_v47 = vrot.slane %v4132_v23, %v10934_v42  ;;  %v4162_v1 = vrot.slane %v4148_v57, %v10934_v42  ;;  %v12627_v12 = vpop.permute.xlu1 %2181  ;;  %v12629_v43 = vpop.permute.xlu0 %2187  ;;  %v15927_v41 = vld [vmem:[#allocation158_spill] sm:$0xff] }
 0x370   : > { %v8284_v20 = vcombine.high %v8218_v60, %v8234_v28  ;;  %v12622_v55 = vrot.slane %v5612_v36, %v10908_v63  ;;  %v12625_v56 = vrot.slane %v5596_v33, %v10908_v63  ;;  %v1931_v40 = vcombine.high %v11747_v10, %v1911_v9  ;;  %v15924_v28 = vld [vmem:[#allocation177_spill] sm:$0xff]  ;;  %v15925_v60 = vld [vmem:[#allocation179_spill] sm:$0xff] }
 0x371   : > { %15922 = vst [vmem:[#allocation170_spill] sm:$0xff] %v12615_v46  ;;  %v1935_v23 = vcombine.high %v11758_v31, %v1927_v49  ;;  %v1930_v57 = vcombine.low %v11747_v10, %v1911_v9  ;;  %v6244_v36 = vcombine.high %v15925_v60, %v15924_v28  ;;  %v9506_v5 = vpack.i.bf16 %v1933_v32, %v1929_v4 }
 0x372   : > { %v5675_v33 = vcombine.low %v12625_v56, %v12622_v55  ;;  %9497 = vrot.lane.b32.xlu1 %v15926_v21, %s10161_s25  ;;  %v1934_v54 = vcombine.low %v11758_v31, %v1927_v49  ;;  %v6228_v61 = vcombine.high %v11557_v8, %v11542_v0  ;;  %v4165_v10 = vcombine.low %v11761_v7, %v4146_v47  ;;  %v15929_v49 = vld [vmem:[#allocation183_spill] sm:$0xff] }
 0x373   : > { %9492 = vrot.lane.b32.xlu0 %v15927_v41, %s10159_s16  ;;  %v4169_v9 = vcombine.low %v11764_v25, %v4162_v1  ;;  %v4164_v28 = vcombine.high %v11455_v37, %v11528_v35  ;;  %v4166_v60 = vcombine.high %v11761_v7, %v4146_v47  ;;  %v12655_v4 = vpop.permute.xlu1 %2189  ;;  %v12657_v31 = vpop.permute.xlu0 %3011  ;;  %v4168_v0 = vcombine.high %v11458_v30, %v11531_v16  ;;  %v15932_v47 = vld [vmem:[#allocation185_spill] sm:$0xff] }
 0x374   : > { %v12653_v21 = vrot.slane %v5675_v33, %v10934_v42  ;;  %v4170_v8 = vcombine.high %v11764_v25, %v4162_v1  ;;  %v6636_v32 = vcombine.high %v15929_v49, %v11550_v39  ;;  %v12665_v41 = vrot.slane %v6244_v36, %v10934_v42  ;;  %v15933_v33 = vld [vmem:[#allocation184_spill] sm:$0xff]  ;;  %v15938_v1 = vld [vmem:[#allocation162_spill] sm:$0xff] }
 0x375   : > { %v12668_v7 = vrot.slane %v8267_v59, %v10934_v42  ;;  %v6652_v35 = vcombine.high %v15933_v33, %v15932_v47  ;;  %v12673_v37 = vrot.slane %v8268_v14, %v10934_v42  ;;  %v12679_v25 = vrot.slane %v6228_v61, %v10934_v42 }
 0x376   : > { %15928 = vst [vmem:[#allocation172_spill] sm:$0xff] %v12653_v21  ;;  %15930 = vst [vmem:[#allocation171_spill] sm:$0xff] %v12665_v41  ;;  %9507 = vrot.lane.b32.xlu1 %v9506_v5, %s10159_s16  ;;  %v12682_v39 = vrot.slane %v8283_v29, %v10934_v42  ;;  %v12685_v59 = vrot.slane %v8284_v20, %v10934_v42  ;;  %v9516_v36 = vpack.i.bf16 %v1935_v23, %v1931_v40  ;;  %v15953_v40 = vld [vmem:[#allocation191_spill] sm:$0xff] }
 0x377   : > { %15931 = vst [vmem:[#allocation150_spill] sm:$0xff] %v12668_v7  ;;  %15934 = vst [vmem:[#allocation147_spill] sm:$0xff] %v12673_v37  ;;  %9502 = vrot.lane.b32.xlu0 %v15938_v1, %s10160_s15  ;;  %v9511_v14 = vpack.i.bf16 %v1934_v54, %v1930_v57  ;;  %v12690_v49 = vrot.slane %v8147_v22, %v10934_v42  ;;  %v15940_v5 = vcombine.low %v12552_v45, %v12530_v52  ;;  %v12698_v47 = vpop.permute.xlu1 %3013  ;;  %v12700_v29 = vpop.permute.xlu0 %3019  ;;  %v15943_v54 = vld [vmem:[#allocation176_spill] sm:$0xff]  ;;  %v15969_v37 = vld [vmem:[#allocation217_spill] sm:$0xff] }
 0x378   : > { %15935 = vst [vmem:[#allocation151_spill] sm:$0xff] %v12679_v25  ;;  %15936 = vst [vmem:[#allocation152_spill] sm:$0xff] %v12682_v39  ;;  %v9526_v20 = vpack.i.bf16 %v4169_v9, %v4165_v10  ;;  %v9521_v33 = vpack.i.bf16 %v4168_v0, %v4164_v28  ;;  %v9531_v16 = vpack.i.bf16 %v4170_v8, %v4166_v60  ;;  %v15945_v57 = vld [vmem:[#allocation188_spill] sm:$0xff]  ;;  %v15947_v60 = vld [vmem:[#allocation190_spill] sm:$0xff] }
 0x379   : > { %15937 = vst [vmem:[#allocation177_spill] sm:$0xff] %v12685_v59  ;;  %15939 = vst [vmem:[#allocation179_spill] sm:$0xff] %v12690_v49  ;;  %v12696_v61 = vrot.slane %v15940_v5, %v10934_v42  ;;  %v12703_v1 = vrot.slane %v6636_v32, %v10934_v42  ;;  %v12710_v23 = vrot.slane %v6652_v35, %v10934_v42  ;;  %v15946_v5 = vld [vmem:[#allocation187_spill] sm:$0xff]  ;;  %v15948_v0 = vld [vmem:[#allocation189_spill] sm:$0xff] }
 0x37a   : > { %v6364_v30 = vcombine.high %v15946_v5, %v15945_v57  ;;  %v5676_v10 = vcombine.high %v12625_v56, %v12622_v55  ;;  %9517 = vrot.lane.b32.xlu1 %v9516_v36, %s10160_s15  ;;  %v6380_v8 = vcombine.high %v15948_v0, %v15947_v60  ;;  %v15952_v5 = vld [vmem:[#allocation192_spill] sm:$0xff]  ;;  %v4844_v28 = vcombine.high %v12582_v17, %v12585_v19  ;;  %v15961_v17 = vld [vmem:[#allocation198_spill] sm:$0xff] }
 0x37b   : > { %15941 = vst [vmem:[#allocation157_spill] sm:$0xff] %v12696_v61  ;;  %15942 = vst [vmem:[#allocation158_spill] sm:$0xff] %v12703_v1  ;;  %9512 = vrot.lane.b32.xlu0 %v9511_v14, %s10161_s25  ;;  %v6516_v9 = vcombine.high %v15953_v40, %v15952_v5  ;;  %v12734_v22 = vpop.permute.xlu1 %3021  ;;  %v12736_v60 = vpop.permute.xlu0 %4547  ;;  %v4779_v36 = vcombine.low %v11800_v53, %v12560_v13  ;;  %v2275_v45 = vcombine.low %v11855_v24, %v12629_v43  ;;  %v15962_v5 = vld [vmem:[#allocation197_spill] sm:$0xff]  ;;  %v15989_v52 = vld [vmem:[#allocation144_spill] sm:$0xff] }
 0x37c   : > { %15944 = vst [vmem:[#allocation183_spill] sm:$0xff] %v12710_v23  ;;  %v12751_v19 = vrot.slane %v6364_v30, %v10934_v42  ;;  %v12754_v0 = vrot.slane %v5676_v10, %v10934_v42  ;;  %v2276_v57 = vcombine.high %v11855_v24, %v12629_v43  ;;  %v12762_v53 = vrot.slane %v6380_v8, %v10934_v42  ;;  %v15963_v24 = vld [vmem:[#allocation166_spill] sm:$0xff]  ;;  %v16010_v35 = vld [vmem:[#allocation16_spill] sm:$0xff] }
 0x37d   : > { %v4763_v13 = vcombine.low %v11755_v51, %v12514_v34  ;;  %v5595_v30 = vcombine.low %v11832_v48, %v12597_v3  ;;  %v12770_v10 = vrot.slane %v6516_v9, %v10934_v42  ;;  %v6500_v61 = vcombine.high %v15962_v5, %v15961_v17  ;;  %v15972_v17 = vld [vmem:[#allocation18_spill] sm:$0xff] }
 0x37e   : > { %15958 = vst [vmem:[#allocation185_spill] sm:$0xff] %v12751_v19  ;;  %9527 = vrot.lane.b32.xlu1 %v9526_v20, %s10161_s25  ;;  %15959 = vst [vmem:[#allocation184_spill] sm:$0xff] %v12762_v53  ;;  %v12775_v43 = vrot.slane %v4844_v28, %v10934_v42  ;;  %v2259_v20 = vcombine.low %v15963_v24, %v12599_v18  ;;  %v2260_v51 = vcombine.high %v15963_v24, %v12599_v18 }
 0x37f   : > { %9522 = vrot.lane.b32.xlu0 %v9521_v33, %s10159_s16  ;;  %15960 = vst [vmem:[#allocation162_spill] sm:$0xff] %v12770_v10  ;;  %v12781_v34 = vpop.permute.xlu1 %5379  ;;  %v12783_v48 = vpop.permute.xlu0 %4555  ;;  %v4787_v8 = vrot.slane %v4779_v36, %v10908_v63  ;;  %v5611_v5 = vcombine.low %v11802_v15, %v12562_v38  ;;  %v2283_v18 = vrot.slane %v2275_v45, %v10908_v63 }
 0x380   : > { %v12796_v24 = vrot.slane %v2276_v57, %v10908_v63  ;;  %v5697_v23 = vcombine.low %v15969_v37, %v12754_v0  ;;  %v4771_v3 = vrot.slane %v4763_v13, %v10908_v63  ;;  %v5603_v15 = vrot.slane %v5595_v30, %v10908_v63  ;;  %v15973_v13 = vld [vmem:[#allocation64_spill] sm:$0xff] }
 0x381   : > { %v12808_v45 = vrot.slane %v6500_v61, %v10934_v42  ;;  %v2267_v57 = vrot.slane %v2259_v20, %v10908_v63  ;;  %v12812_v39 = vrot.slane %v2260_v51, %v10908_v63  ;;  %v2411_v36 = vcombine.low %v15972_v17, %v12655_v4  ;;  %v15974_v61 = vld [vmem:[#allocation167_spill] sm:$0xff] }
 0x382   : > { %v4865_v49 = vcombine.low %v15973_v13, %v12775_v43  ;;  %v4827_v59 = vcombine.low %v4771_v3, %v4787_v8  ;;  %v5619_v38 = vrot.slane %v5611_v5, %v10908_v63  ;;  %v2395_v53 = vcombine.low %v15974_v61, %v12627_v12 }
 0x383   : > { %9532 = vrot.lane.b32.xlu0 %v9531_v16, %s10160_s15  ;;  %15971 = vst [vmem:[#allocation188_spill] sm:$0xff] %v12808_v45  ;;  %v12818_v30 = vpop.permute.xlu1 %6915  ;;  %v12820_v16 = vpop.permute.xlu0 %5387  ;;  %v2412_v20 = vcombine.high %v15972_v17, %v12655_v4  ;;  %v2396_v51 = vcombine.high %v15974_v61, %v12627_v12  ;;  %v2324_v9 = vcombine.high %v2267_v57, %v2283_v18 }
 0x384   : > { %v2340_v33 = vcombine.high %v12812_v39, %v12796_v24  ;;  %v9546_v40 = vpack.i.bf16 %v5697_v23, %v4865_v49  ;;  %v4828_v17 = vcombine.high %v4771_v3, %v4787_v8  ;;  %v5659_v56 = vcombine.low %v5603_v15, %v5619_v38 }
 0x385   : > { %v5660_v12 = vcombine.high %v5603_v15, %v5619_v38  ;;  %v2419_v61 = vrot.slane %v2411_v36, %v10908_v63  ;;  %v12846_v7 = vrot.slane %v4827_v59, %v10934_v42  ;;  %v2403_v5 = vrot.slane %v2395_v53, %v10908_v63 }
 0x386   : > { %9547 = vrot.lane.b32.xlu1 %v9546_v40, %s10161_s25  ;;  %v2426_v14 = vrot.slane %v2412_v20, %v10908_v63  ;;  %v2410_v8 = vrot.slane %v2396_v51, %v10908_v63  ;;  %v2323_v15 = vcombine.low %v2267_v57, %v2283_v18  ;;  %v12854_v36 = vrot.slane %v2324_v9, %v10934_v42 }
 0x387   : > { %v12841_v49 = vpop.permute.xlu1 %7747  ;;  %v12843_v23 = vpop.permute.xlu0 %6923  ;;  %15978 = vst [vmem:[#allocation187_spill] sm:$0xff] %v12846_v7  ;;  %v12857_v40 = vrot.slane %v2340_v33, %v10934_v42  ;;  %v4866_v59 = vcombine.high %v15973_v13, %v12775_v43  ;;  %v5698_v53 = vcombine.high %v15969_v37, %v12754_v0  ;;  %v4864_v38 = vcombine.high %v12166_v62, %v12615_v46  ;;  %v15981_v0 = vld [vmem:[#allocation29_spill] sm:$0xff] }
 0x388   : > { %v5696_v20 = vcombine.high %v12295_v6, %v12653_v21  ;;  %v12868_v18 = vrot.slane %v4828_v17, %v10934_v42  ;;  %v12871_v9 = vrot.slane %v5659_v56, %v10934_v42  ;;  %v12874_v33 = vrot.slane %v5660_v12, %v10934_v42  ;;  %v15983_v56 = vld [vmem:[#allocation27_spill] sm:$0xff]  ;;  %v15997_v21 = vld [vmem:[#allocation82_spill] sm:$0xff] }
 0x389   : > { %v2459_v57 = vcombine.low %v2403_v5, %v2419_v61  ;;  %v2475_v37 = vcombine.low %v2410_v8, %v2426_v14  ;;  %v3107_v51 = vcombine.low %v15981_v0, %v12700_v29  ;;  %v9556_v3 = vpack.i.bf16 %v5698_v53, %v4866_v59  ;;  %v15984_v59 = vld [vmem:[#allocation24_spill] sm:$0xff]  ;;  %v15985_v53 = vld [vmem:[#allocation23_spill] sm:$0xff] }
 0x38a   : > { %15980 = vst [vmem:[#allocation190_spill] sm:$0xff] %v12871_v9  ;;  %v9536_v45 = vpack.i.bf16 %v5696_v20, %v4864_v38  ;;  %v12883_v17 = vrot.slane %v2323_v15, %v10934_v42  ;;  %v3091_v4 = vcombine.low %v15983_v56, %v12657_v31  ;;  %v3092_v12 = vcombine.high %v15983_v56, %v12657_v31 }
 0x38b   : > { %v12876_v43 = vpop.permute.xlu1 %4553  ;;  %v12878_v13 = vpop.permute.xlu0 %7755  ;;  %v3108_v10 = vcombine.high %v15981_v0, %v12700_v29  ;;  %v2339_v1 = vcombine.low %v12812_v39, %v12796_v24  ;;  %9557 = vrot.lane.b32.xlu1 %v9556_v3, %s10160_s15  ;;  %v2357_v15 = vcombine.low %v15984_v59, %v12854_v36  ;;  %v2361_v38 = vcombine.low %v15985_v53, %v12857_v40  ;;  %v15987_v29 = vld [vmem:[#allocation76_spill] sm:$0xff] }
 0x38c   : > { %15982 = vst [vmem:[#allocation189_spill] sm:$0xff] %v12883_v17  ;;  %9537 = vrot.lane.b32.xlu0 %v9536_v45, %s10159_s16  ;;  %v2460_v20 = vcombine.high %v2403_v5, %v2419_v61  ;;  %v12900_v32 = vrot.slane %v2459_v57, %v10934_v42  ;;  %v2476_v31 = vcombine.high %v2410_v8, %v2426_v14  ;;  %v15990_v57 = vld [vmem:[#allocation36_spill] sm:$0xff] }
 0x38d   : > { %v5692_v0 = vcombine.high %v15987_v29, %v12871_v9  ;;  %v12909_v24 = vrot.slane %v2475_v37, %v10934_v42  ;;  %v3115_v45 = vrot.slane %v3107_v51, %v10908_v63  ;;  %v9571_v3 = vpack.i.bf16 %v2361_v38, %v2357_v15  ;;  %v15992_v37 = vld [vmem:[#allocation121_spill] sm:$0xff] }
 0x38e   : > { %15986 = vst [vmem:[#allocation192_spill] sm:$0xff] %v12900_v32  ;;  %v4860_v5 = vcombine.high %v15989_v52, %v12846_v7  ;;  %v3099_v61 = vrot.slane %v3091_v4, %v10908_v63  ;;  %v3106_v14 = vrot.slane %v3092_v12, %v10908_v63  ;;  %v3122_v8 = vrot.slane %v3108_v10, %v10908_v63 }
 0x38f   : > { %v12904_v56 = vpop.permute.xlu1 %4561  ;;  %v12906_v39 = vpop.permute.xlu0 %5385  ;;  %15988 = vst [vmem:[#allocation191_spill] sm:$0xff] %v12909_v24  ;;  %v3243_v19 = vcombine.low %v15990_v57, %v12734_v22  ;;  %v12920_v28 = vrot.slane %v2339_v1, %v10934_v42  ;;  %v3227_v46 = vcombine.low %v15992_v37, %v12698_v47  ;;  %v3228_v51 = vcombine.high %v15992_v37, %v12698_v47  ;;  %v15993_v1 = vld [vmem:[#allocation39_spill] sm:$0xff]  ;;  %v15996_v37 = vld [vmem:[#allocation61_spill] sm:$0xff] }
 0x390   : > { %9572 = vrot.lane.b32.xlu1 %v9571_v3, %s10161_s25  ;;  %v9541_v15 = vpack.i.bf16 %v5692_v0, %v4860_v5  ;;  %v12928_v4 = vrot.slane %v2460_v20, %v10934_v42  ;;  %v12931_v10 = vrot.slane %v2476_v31, %v10934_v42  ;;  %v3244_v12 = vcombine.high %v15990_v57, %v12734_v22  ;;  %v15994_v20 = vld [vmem:[#allocation15_spill] sm:$0xff]  ;;  %v15995_v3 = vld [vmem:[#allocation20_spill] sm:$0xff] }
 0x391   : > { %15991 = vst [vmem:[#allocation198_spill] sm:$0xff] %v12920_v28  ;;  %v4627_v38 = vcombine.low %v15993_v1, %v12736_v60  ;;  %v3156_v47 = vcombine.high %v3099_v61, %v3115_v45  ;;  %v4628_v0 = vcombine.high %v15993_v1, %v12736_v60  ;;  %v2492_v31 = vcombine.high %v15994_v20, %v12900_v32 }
 0x392   : > { %9542 = vrot.lane.b32.xlu0 %v9541_v15, %s10159_s16  ;;  %v2496_v5 = vcombine.high %v15995_v3, %v12909_v24  ;;  %v3172_v22 = vcombine.high %v3106_v14, %v3122_v8  ;;  %v3251_v57 = vrot.slane %v3243_v19, %v10908_v63  ;;  %v4861_v9 = vcombine.low %v15996_v37, %v12868_v18 }
 0x393   : > { %v12937_v62 = vpop.permute.xlu1 %5393  ;;  %v12939_v29 = vpop.permute.xlu0 %6921  ;;  %v5693_v6 = vcombine.low %v15997_v21, %v12874_v33  ;;  %v3235_v52 = vrot.slane %v3227_v46, %v10908_v63  ;;  %v3242_v60 = vrot.slane %v3228_v51, %v10908_v63  ;;  %v3155_v15 = vcombine.low %v3099_v61, %v3115_v45  ;;  %v15998_v45 = vld [vmem:[#allocation28_spill] sm:$0xff] }
 0x394   : > { %v3171_v1 = vcombine.low %v3106_v14, %v3122_v8  ;;  %v3258_v20 = vrot.slane %v3244_v12, %v10908_v63  ;;  %v12957_v32 = vrot.slane %v4627_v38, %v10908_v63  ;;  %v9581_v3 = vpack.i.bf16 %v2496_v5, %v2492_v31  ;;  %v15999_v14 = vld [vmem:[#allocation26_spill] sm:$0xff] }
 0x395   : > { %v9551_v24 = vpack.i.bf16 %v5693_v6, %v4861_v9  ;;  %v12964_v55 = vrot.slane %v3156_v47, %v10934_v42  ;;  %v12967_v46 = vrot.slane %v4628_v0, %v10908_v63  ;;  %v2494_v61 = vcombine.high %v15998_v45, %v12928_v4  ;;  %v16000_v9 = vld [vmem:[#allocation43_spill] sm:$0xff] }
 0x396   : > { %v2498_v8 = vcombine.high %v15999_v14, %v12931_v10  ;;  %v12974_v51 = vrot.slane %v3172_v22, %v10934_v42  ;;  %v3291_v6 = vcombine.low %v3235_v52, %v3251_v57  ;;  %v4643_v12 = vcombine.low %v16000_v9, %v12783_v48  ;;  %9582 = vrot.lane.b32.xlu1 %v9581_v3, %s10159_s16 }
 0x397   : > { %v12959_v19 = vpop.permute.xlu1 %6929  ;;  %v12961_v7 = vpop.permute.xlu0 %7753  ;;  %9552 = vrot.lane.b32.xlu0 %v9551_v24, %s10161_s25  ;;  %v12981_v38 = vrot.slane %v3155_v15, %v10934_v42  ;;  %v12984_v47 = vrot.slane %v3171_v1, %v10934_v42  ;;  %v3292_v0 = vcombine.high %v3235_v52, %v3251_v57  ;;  %v4644_v31 = vcombine.high %v16000_v9, %v12783_v48  ;;  %v16004_v24 = vld [vmem:[#allocation31_spill] sm:$0xff] }
 0x398   : > { %v3307_v5 = vcombine.low %v3242_v60, %v3258_v20  ;;  %v3308_v22 = vcombine.high %v3242_v60, %v3258_v20  ;;  %v5475_v26 = vcombine.low %v16003_v50, %v12820_v16  ;;  %v9591_v27 = vpack.i.bf16 %v2498_v8, %v2494_v61  ;;  %v16006_v60 = vld [vmem:[#allocation136_spill] sm:$0xff]  ;;  %v16007_v8 = vld [vmem:[#allocation34_spill] sm:$0xff] }
 0x399   : > { %16001 = vst [vmem:[#allocation197_spill] sm:$0xff] %v12981_v38  ;;  %16002 = vst [vmem:[#allocation166_spill] sm:$0xff] %v12984_v47  ;;  %v5459_v15 = vcombine.low %v16004_v24, %v12781_v34  ;;  %v5460_v1 = vcombine.high %v16004_v24, %v12781_v34  ;;  %v4862_v52 = vcombine.high %v15996_v37, %v12868_v18 }
 0x39a   : > { %v5694_v48 = vcombine.high %v15997_v21, %v12874_v33  ;;  %v13003_v20 = vrot.slane %v3291_v6, %v10934_v42  ;;  %v4651_v57 = vrot.slane %v4643_v12, %v10908_v63  ;;  %9592 = vrot.lane.b32.xlu1 %v9591_v27, %s10160_s15  ;;  %v3189_v61 = vcombine.low %v16006_v60, %v12964_v55  ;;  %v16008_v21 = vld [vmem:[#allocation122_spill] sm:$0xff] }
 0x39b   : > { %v12990_v44 = vpop.permute.xlu1 %7761  ;;  %v12992_v3 = vpop.permute.xlu0 %2183  ;;  %v3193_v9 = vcombine.low %v16007_v8, %v12974_v51  ;;  %v4658_v34 = vrot.slane %v4644_v31, %v10908_v63  ;;  %v5476_v18 = vcombine.high %v16003_v50, %v12820_v16  ;;  %v2356_v33 = vcombine.high %v16008_v21, %v12883_v17  ;;  %v16009_v6 = vld [vmem:[#allocation46_spill] sm:$0xff] }
 0x39c   : > { %16005 = vst [vmem:[#allocation217_spill] sm:$0xff] %v13003_v20  ;;  %v9561_v37 = vpack.i.bf16 %v5694_v48, %v4862_v52  ;;  %v6995_v12 = vcombine.low %v16009_v6, %v12818_v30  ;;  %v5483_v27 = vrot.slane %v5475_v26, %v10908_v63  ;;  %v2360_v25 = vcombine.high %v16010_v35, %v12920_v28  ;;  %v16012_v28 = vld [vmem:[#allocation60_spill] sm:$0xff] }
 0x39d   : > { %v9601_v24 = vpack.i.bf16 %v3193_v9, %v3189_v61  ;;  %v13026_v31 = vrot.slane %v3292_v0, %v10934_v42  ;;  %v13029_v50 = vrot.slane %v3307_v5, %v10934_v42  ;;  %v13032_v16 = vrot.slane %v3308_v22, %v10934_v42 }
 0x39e   : > { %v5467_v52 = vrot.slane %v5459_v15, %v10908_v63  ;;  %9562 = vrot.lane.b32.xlu0 %v9561_v37, %s10160_s15  ;;  %v5474_v26 = vrot.slane %v5460_v1, %v10908_v63  ;;  %v4691_v48 = vcombine.low %v12957_v32, %v4651_v57  ;;  %v4692_v61 = vcombine.high %v12957_v32, %v4651_v57 }
 0x39f   : > { %v13021_v58 = vpop.permute.xlu1 %2185  ;;  %v13023_v41 = vpop.permute.xlu0 %2191  ;;  %16011 = vst [vmem:[#allocation18_spill] sm:$0xff] %v13029_v50  ;;  %v6996_v0 = vcombine.high %v16009_v6, %v12818_v30  ;;  %9602 = vrot.lane.b32.xlu1 %v9601_v24, %s10161_s25  ;;  %v4707_v5 = vcombine.low %v12967_v46, %v4658_v34  ;;  %v4708_v22 = vcombine.high %v12967_v46, %v4658_v34  ;;  %v16013_v6 = vld [vmem:[#allocation41_spill] sm:$0xff]  ;;  %v16016_v24 = vld [vmem:[#allocation48_spill] sm:$0xff] }
 0x3a0   : > { %v5490_v9 = vrot.slane %v5476_v18, %v10908_v63  ;;  %v9566_v15 = vpack.i.bf16 %v2360_v25, %v2356_v33  ;;  %v13046_v37 = vrot.slane %v6995_v12, %v10908_v63  ;;  %v5523_v1 = vcombine.low %v5467_v52, %v5483_v27  ;;  %v16014_v34 = vld [vmem:[#allocation45_spill] sm:$0xff] }
 0x3a1   : > { %v5524_v35 = vcombine.high %v5467_v52, %v5483_v27  ;;  %v7011_v32 = vcombine.low %v16012_v28, %v12843_v23  ;;  %v3324_v46 = vcombine.high %v16013_v6, %v13003_v20  ;;  %v3328_v25 = vcombine.high %v16014_v34, %v13029_v50 }
 0x3a2   : > { %9567 = vrot.lane.b32.xlu0 %v9566_v15, %s10159_s16  ;;  %v2358_v18 = vcombine.high %v15984_v59, %v12854_v36  ;;  %v2362_v33 = vcombine.high %v15985_v53, %v12857_v40  ;;  %v13064_v12 = vrot.slane %v4691_v48, %v10934_v42  ;;  %v7010_v27 = vrot.slane %v6996_v0, %v10908_v63 }
 0x3a3   : > { %v13050_v57 = vpop.permute.xlu1 %2193  ;;  %v13052_v30 = vpop.permute.xlu0 %3015  ;;  %v7827_v52 = vcombine.low %v16016_v24, %v12841_v49  ;;  %v7012_v15 = vcombine.high %v16012_v28, %v12843_v23  ;;  %v5539_v6 = vcombine.low %v5474_v26, %v5490_v9  ;;  %v5540_v20 = vcombine.high %v5474_v26, %v5490_v9  ;;  %v16021_v9 = vld [vmem:[#allocation37_spill] sm:$0xff] }
 0x3a4   : > { %16015 = vst [vmem:[#allocation64_spill] sm:$0xff] %v13064_v12  ;;  %v9611_v34 = vpack.i.bf16 %v3328_v25, %v3324_v46  ;;  %v9576_v50 = vpack.i.bf16 %v2362_v33, %v2358_v18  ;;  %v13072_v36 = vrot.slane %v4692_v61, %v10934_v42  ;;  %v13075_v40 = vrot.slane %v4707_v5, %v10934_v42  ;;  %v16020_v5 = vld [vmem:[#allocation33_spill] sm:$0xff]  ;;  %v16024_v25 = vld [vmem:[#allocation47_spill] sm:$0xff] }
 0x3a5   : > { %v13078_v59 = vrot.slane %v4708_v22, %v10934_v42  ;;  %v13081_v53 = vrot.slane %v5523_v1, %v10934_v42  ;;  %v13088_v28 = vrot.slane %v5524_v35, %v10934_v42  ;;  %v7828_v23 = vcombine.high %v16016_v24, %v12841_v49 }
 0x3a6   : > { %16017 = vst [vmem:[#allocation167_spill] sm:$0xff] %v13075_v40  ;;  %v7019_v26 = vrot.slane %v7011_v32, %v10908_v63  ;;  %9612 = vrot.lane.b32.xlu1 %v9611_v34, %s10159_s16  ;;  %9577 = vrot.lane.b32.xlu0 %v9576_v50, %s10160_s15  ;;  %v7026_v61 = vrot.slane %v7012_v15, %v10908_v63  ;;  %v16023_v50 = vld [vmem:[#allocation55_spill] sm:$0xff] }
 0x3a7   : > { %16018 = vst [vmem:[#allocation29_spill] sm:$0xff] %v13081_v53  ;;  %v13083_v48 = vpop.permute.xlu1 %3017  ;;  %v13085_v0 = vpop.permute.xlu0 %3023  ;;  %v3326_v22 = vcombine.high %v16020_v5, %v13026_v31  ;;  %v3330_v1 = vcombine.high %v16021_v9, %v13032_v16  ;;  %v2493_v35 = vcombine.low %v15998_v45, %v12928_v4  ;;  %v13103_v46 = vrot.slane %v5539_v6, %v10934_v42  ;;  %v16026_v15 = vld [vmem:[#allocation51_spill] sm:$0xff] }
 0x3a8   : > { %16019 = vst [vmem:[#allocation27_spill] sm:$0xff] %v13083_v48  ;;  %v13106_v49 = vrot.slane %v5540_v20, %v10934_v42  ;;  %v13109_v32 = vrot.slane %v7827_v52, %v10908_v63  ;;  %v5035_v34 = vcombine.low %v16023_v50, %v12876_v43  ;;  %v7843_v18 = vcombine.low %v16024_v25, %v12878_v13 }
 0x3a9   : > { %16022 = vst [vmem:[#allocation24_spill] sm:$0xff] %v13103_v46  ;;  %v7844_v33 = vcombine.high %v16024_v25, %v12878_v13  ;;  %v9621_v24 = vpack.i.bf16 %v3330_v1, %v3326_v22  ;;  %v2497_v4 = vcombine.low %v15999_v14, %v12931_v10  ;;  %v13124_v6 = vrot.slane %v7828_v23, %v10908_v63  ;;  %v16027_v23 = vld [vmem:[#allocation50_spill] sm:$0xff] }
 0x3aa   : > { %v5036_v52 = vcombine.high %v16023_v50, %v12876_v43  ;;  %v5051_v21 = vcombine.low %v16026_v15, %v12904_v56  ;;  %v5052_v13 = vcombine.high %v16026_v15, %v12904_v56  ;;  %v7059_v22 = vcombine.low %v13046_v37, %v7019_v26  ;;  %v16028_v43 = vld [vmem:[#allocation72_spill] sm:$0xff] }
 0x3ab   : > { %v13119_v45 = vpop.permute.xlu1 %3025  ;;  %v13121_v20 = vpop.permute.xlu0 %4551  ;;  %v7060_v10 = vcombine.high %v13046_v37, %v7019_v26  ;;  %v7075_v14 = vcombine.low %v7010_v27, %v7026_v61  ;;  %9622 = vrot.lane.b32.xlu1 %v9621_v24, %s10160_s15  ;;  %v9586_v1 = vpack.i.bf16 %v2497_v4, %v2493_v35  ;;  %v7076_v25 = vcombine.high %v7010_v27, %v7026_v61  ;;  %v16030_v27 = vld [vmem:[#allocation42_spill] sm:$0xff] }
 0x3ac   : > { %16025 = vst [vmem:[#allocation23_spill] sm:$0xff] %v13121_v20  ;;  %v4724_v17 = vcombine.high %v16027_v23, %v13064_v12  ;;  %v5556_v50 = vcombine.high %v16028_v43, %v13081_v53  ;;  %v16029_v20 = vld [vmem:[#allocation35_spill] sm:$0xff]  ;;  %v13142_v56 = vrot.slane %v5035_v34, %v10908_v63  ;;  %v13145_v15 = vrot.slane %v7843_v18, %v10908_v63 }
 0x3ad   : > { %v3188_v48 = vcombine.high %v16029_v20, %v12981_v38  ;;  %v13148_v37 = vrot.slane %v7844_v33, %v10908_v63  ;;  %9587 = vrot.lane.b32.xlu0 %v9586_v1, %s10161_s25  ;;  %v3192_v26 = vcombine.high %v16030_v27, %v12984_v47  ;;  %v5050_v24 = vrot.slane %v5036_v52, %v10908_v63  ;;  %v16032_v1 = vld [vmem:[#allocation62_spill] sm:$0xff] }
 0x3ae   : > { %v5059_v34 = vrot.slane %v5051_v21, %v10908_v63  ;;  %v5066_v4 = vrot.slane %v5052_v13, %v10908_v63  ;;  %v9631_v18 = vpack.i.bf16 %v5556_v50, %v4724_v17  ;;  %v13161_v20 = vrot.slane %v7059_v22, %v10934_v42  ;;  %v16034_v21 = vld [vmem:[#allocation58_spill] sm:$0xff] }
 0x3af   : > { %v13153_v61 = vpop.permute.xlu1 %6917  ;;  %v13155_v35 = vpop.permute.xlu0 %4559  ;;  %v13164_v33 = vrot.slane %v7060_v10, %v10934_v42  ;;  %v5883_v27 = vcombine.low %v16032_v1, %v12937_v62  ;;  %v9596_v47 = vpack.i.bf16 %v3192_v26, %v3188_v48  ;;  %v13169_v38 = vrot.slane %v7075_v14, %v10934_v42  ;;  %v16036_v10 = vld [vmem:[#allocation57_spill] sm:$0xff] }
 0x3b0   : > { %16031 = vst [vmem:[#allocation36_spill] sm:$0xff] %v13161_v20  ;;  %v13172_v52 = vrot.slane %v7076_v25, %v10934_v42  ;;  %v5867_v13 = vcombine.low %v16034_v21, %v12906_v39  ;;  %v5884_v17 = vcombine.high %v16032_v1, %v12937_v62  ;;  %9632 = vrot.lane.b32.xlu1 %v9631_v18, %s10159_s16 }
 0x3b1   : > { %16033 = vst [vmem:[#allocation121_spill] sm:$0xff] %v13169_v38  ;;  %v5868_v14 = vcombine.high %v16034_v21, %v12906_v39  ;;  %9597 = vrot.lane.b32.xlu0 %v9596_v47, %s10159_s16  ;;  %v5099_v26 = vcombine.low %v13142_v56, %v5059_v34  ;;  %v5100_v18 = vcombine.high %v13142_v56, %v5059_v34  ;;  %v16037_v47 = vld [vmem:[#allocation215_spill] sm:$0xff] }
 0x3b2   : > { %v5115_v1 = vcombine.low %v5050_v24, %v5066_v4  ;;  %v5116_v48 = vcombine.high %v5050_v24, %v5066_v4  ;;  %v5891_v22 = vrot.slane %v5883_v27, %v10908_v63  ;;  %v4725_v39 = vcombine.low %v16036_v10, %v13072_v36  ;;  %v16038_v27 = vld [vmem:[#allocation53_spill] sm:$0xff] }
 0x3b3   : > { %v13188_v25 = vpop.permute.xlu1 %7749  ;;  %v13190_v50 = vpop.permute.xlu0 %6925  ;;  %v5557_v21 = vcombine.low %v16037_v47, %v13088_v28  ;;  %v5875_v43 = vrot.slane %v5867_v13, %v10908_v63  ;;  %v5898_v53 = vrot.slane %v5884_v17, %v10908_v63  ;;  %v3190_v62 = vcombine.high %v16006_v60, %v12964_v55  ;;  %v16040_v55 = vld [vmem:[#allocation54_spill] sm:$0xff] }
 0x3b4   : > { %16035 = vst [vmem:[#allocation39_spill] sm:$0xff] %v13188_v25  ;;  %v3194_v56 = vcombine.high %v16007_v8, %v12974_v51  ;;  %v5882_v24 = vrot.slane %v5868_v14, %v10908_v63  ;;  %v7419_v34 = vcombine.low %v16038_v27, %v12959_v19  ;;  %v7420_v4 = vcombine.high %v16038_v27, %v12959_v19 }
 0x3b5   : > { %v9641_v23 = vpack.i.bf16 %v5557_v21, %v4725_v39  ;;  %v13217_v17 = vrot.slane %v5099_v26, %v10934_v42  ;;  %v7403_v60 = vcombine.low %v16040_v55, %v12939_v29  ;;  %v5558_v8 = vcombine.high %v16037_v47, %v13088_v28 }
 0x3b6   : > { %v9606_v51 = vpack.i.bf16 %v3194_v56, %v3190_v62  ;;  %v5931_v14 = vcombine.low %v5875_v43, %v5891_v22  ;;  %v7404_v25 = vcombine.high %v16040_v55, %v12939_v29  ;;  %v4726_v19 = vcombine.high %v16036_v10, %v13072_v36 }
 0x3b7   : > { %v13212_v12 = vpop.permute.xlu1 %5383  ;;  %v13214_v13 = vpop.permute.xlu0 %7757  ;;  %16039 = vst [vmem:[#allocation61_spill] sm:$0xff] %v13217_v17  ;;  %9642 = vrot.lane.b32.xlu1 %v9641_v23, %s10161_s25  ;;  %v3325_v26 = vcombine.low %v16020_v5, %v13026_v31  ;;  %v5932_v39 = vcombine.high %v5875_v43, %v5891_v22  ;;  %v5947_v21 = vcombine.low %v5882_v24, %v5898_v53  ;;  %v16041_v23 = vld [vmem:[#allocation160_spill] sm:$0xff] }
 0x3b8   : > { %v5948_v27 = vcombine.high %v5882_v24, %v5898_v53  ;;  %9607 = vrot.lane.b32.xlu0 %v9606_v51, %s10160_s15  ;;  %v3329_v28 = vcombine.low %v16021_v9, %v13032_v16  ;;  %v7427_v62 = vrot.slane %v7419_v34, %v10908_v63  ;;  %v7434_v29 = vrot.slane %v7420_v4, %v10908_v63  ;;  %v16045_v34 = vld [vmem:[#allocation67_spill] sm:$0xff] }
 0x3b9   : > { %v8235_v47 = vcombine.low %v16041_v23, %v12961_v7  ;;  %v9651_v56 = vpack.i.bf16 %v5558_v8, %v4726_v19  ;;  %v13242_v31 = vrot.slane %v5100_v18, %v10934_v42  ;;  %v13245_v53 = vrot.slane %v5115_v1, %v10934_v42 }
 0x3ba   : > { %v13248_v16 = vrot.slane %v5116_v48, %v10934_v42  ;;  %v9616_v5 = vpack.i.bf16 %v3329_v28, %v3325_v26  ;;  %v13251_v9 = vrot.slane %v5931_v14, %v10934_v42  ;;  %v7411_v43 = vrot.slane %v7403_v60, %v10908_v63  ;;  %v16047_v26 = vld [vmem:[#allocation71_spill] sm:$0xff] }
 0x3bb   : > { %v13237_v36 = vpop.permute.xlu1 %6927  ;;  %v13239_v10 = vpop.permute.xlu0 %5391  ;;  %16042 = vst [vmem:[#allocation82_spill] sm:$0xff] %v13245_v53  ;;  %v7418_v22 = vrot.slane %v7404_v25, %v10908_v63  ;;  %v8236_v24 = vcombine.high %v16041_v23, %v12961_v7  ;;  %9652 = vrot.lane.b32.xlu1 %v9651_v56, %s10160_s15  ;;  %v13259_v18 = vrot.slane %v5932_v39, %v10934_v42  ;;  %v16050_v23 = vld [vmem:[#allocation49_spill] sm:$0xff] }
 0x3bc   : > { %16043 = vst [vmem:[#allocation28_spill] sm:$0xff] %v13251_v9  ;;  %v13262_v1 = vrot.slane %v5947_v21, %v10934_v42  ;;  %v13265_v48 = vrot.slane %v5948_v27, %v10934_v42  ;;  %v8251_v4 = vcombine.low %v16045_v34, %v12990_v44  ;;  %9617 = vrot.lane.b32.xlu0 %v9616_v5, %s10161_s25  ;;  %v16048_v21 = vld [vmem:[#allocation220_spill] sm:$0xff] }
 0x3bd   : > { %v7467_v25 = vcombine.low %v7411_v43, %v7427_v62  ;;  %v7468_v55 = vcombine.high %v7411_v43, %v7427_v62  ;;  %v7483_v60 = vcombine.low %v7418_v22, %v7434_v29  ;;  %v13271_v7 = vrot.slane %v8235_v47, %v10908_v63  ;;  %v16052_v5 = vld [vmem:[#allocation212_spill] sm:$0xff] }
 0x3be   : > { %16044 = vst [vmem:[#allocation26_spill] sm:$0xff] %v13262_v1  ;;  %v7484_v14 = vcombine.high %v7418_v22, %v7434_v29  ;;  %v8252_v19 = vcombine.high %v16045_v34, %v12990_v44  ;;  %v2547_v39 = vcombine.low %v16047_v26, %v13023_v41  ;;  %v7096_v27 = vcombine.high %v16048_v21, %v13169_v38  ;;  %v16051_v29 = vld [vmem:[#allocation216_spill] sm:$0xff] }
 0x3bf   : > { %v13273_v51 = vpop.permute.xlu1 %7759  ;;  %v13275_v8 = vpop.permute.xlu0 %6919  ;;  %v13284_v28 = vrot.slane %v8236_v24, %v10908_v63  ;;  %v2548_v62 = vcombine.high %v16047_v26, %v13023_v41  ;;  %v4728_v47 = vcombine.high %v16050_v23, %v13075_v40  ;;  %v5560_v56 = vcombine.high %v16051_v29, %v13103_v46 }
 0x3c0   : > { %16046 = vst [vmem:[#allocation43_spill] sm:$0xff] %v13273_v51  ;;  %v13293_v44 = vrot.slane %v8251_v4, %v10908_v63  ;;  %v2531_v43 = vcombine.low %v16052_v5, %v12992_v3  ;;  %v2532_v22 = vcombine.high %v16052_v5, %v12992_v3  ;;  %v16053_v24 = vcombine.high %v15943_v54, %v11586_v2  ;;  %v16055_v4 = vld [vmem:[#allocation221_spill] sm:$0xff] }
 0x3c1   : > { %16049 = vst [vmem:[#allocation38_spill] sm:$0xff] %v13284_v28  ;;  %v13303_v41 = vrot.slane %v7467_v25, %v10934_v42  ;;  %v13306_v26 = vrot.slane %v7468_v55, %v10934_v42  ;;  %v9626_v29 = vpack.i.bf16 %v5560_v56, %v4728_v47  ;;  %v7097_v46 = vcombine.low %v16055_v4, %v13172_v52  ;;  %v16060_v55 = vld [vmem:[#allocation77_spill] sm:$0xff] }
 0x3c2   : > { %v9656_v34 = vpack.i.bf16 %v7096_v27, %v16053_v24  ;;  %v13315_v3 = vrot.slane %v7483_v60, %v10934_v42  ;;  %v13318_v5 = vrot.slane %v8252_v19, %v10908_v63  ;;  %v2555_v25 = vrot.slane %v2547_v39, %v10908_v63  ;;  %v16062_v24 = vld [vmem:[#allocation75_spill] sm:$0xff] }
 0x3c3   : > { %16054 = vst [vmem:[#allocation31_spill] sm:$0xff] %v13303_v41  ;;  %v13310_v23 = vpop.permute.xlu1 %9417  ;;  %v13312_v40 = vpop.permute.xlu0 %7751  ;;  %v5561_v27 = vcombine.low %v16060_v55, %v13106_v49  ;;  %v13325_v47 = vrot.slane %v7484_v14, %v10934_v42  ;;  %v2562_v56 = vrot.slane %v2548_v62, %v10908_v63  ;;  %v2683_v2 = vcombine.low %v16062_v24, %v13050_v57  ;;  %v16063_v60 = vld [vmem:[#allocation159_spill] sm:$0xff]  ;;  %v16066_v62 = vld [vmem:[#allocation73_spill] sm:$0xff] }
 0x3c4   : > { %16056 = vst [vmem:[#allocation136_spill] sm:$0xff] %v13310_v23  ;;  %16057 = vst [vmem:[#allocation34_spill] sm:$0xff] %v13312_v40  ;;  %9657 = vrot.lane.b32.xlu1 %v9656_v34, %s10159_s16  ;;  %9627 = vrot.lane.b32.xlu0 %v9626_v29, %s10159_s16  ;;  %v4729_v19 = vcombine.low %v16063_v60, %v13078_v59  ;;  %v2539_v34 = vrot.slane %v2531_v43, %v10908_v63  ;;  %v16064_v14 = vld [vmem:[#allocation171_spill] sm:$0xff] }
 0x3c5   : > { %16058 = vst [vmem:[#allocation46_spill] sm:$0xff] %v13315_v3  ;;  %16059 = vst [vmem:[#allocation60_spill] sm:$0xff] %v13318_v5  ;;  %v2546_v54 = vrot.slane %v2532_v22, %v10908_v63  ;;  %v16065_v21 = vcombine.low %v11773_v11, %v16064_v14  ;;  %v2667_v40 = vcombine.low %v16066_v62, %v13021_v58  ;;  %v16086_v5 = vld [vmem:[#allocation81_spill] sm:$0xff] }
 0x3c6   : > { %16061 = vst [vmem:[#allocation48_spill] sm:$0xff] %v13325_v47  ;;  %v2668_v29 = vcombine.high %v16066_v62, %v13021_v58  ;;  %v2684_v47 = vcombine.high %v16062_v24, %v13050_v57  ;;  %v9636_v23 = vpack.i.bf16 %v5561_v27, %v4729_v19  ;;  %v2596_v22 = vcombine.high %v2539_v34, %v2555_v25  ;;  %v16069_v19 = vld [vmem:[#allocation79_spill] sm:$0xff] }
 0x3c7   : > { %v9666_v38 = vpack.i.bf16 %v7097_v46, %v16065_v21  ;;  %v13346_v51 = vpop.permute.xlu1 %9427  ;;  %v13348_v39 = vpop.permute.xlu0 %9422  ;;  %v2595_v21 = vcombine.low %v2539_v34, %v2555_v25  ;;  %v2611_v62 = vcombine.low %v2546_v54, %v2562_v56  ;;  %v2691_v57 = vrot.slane %v2683_v2, %v10908_v63 }
 0x3c8   : > { %16067 = vst [vmem:[#allocation33_spill] sm:$0xff] %v13346_v51  ;;  %16068 = vst [vmem:[#allocation37_spill] sm:$0xff] %v13348_v39  ;;  %9637 = vrot.lane.b32.xlu0 %v9636_v23, %s10161_s25  ;;  %v7098_v27 = vcombine.high %v16055_v4, %v13172_v52  ;;  %v2612_v24 = vcombine.high %v2546_v54, %v2562_v56  ;;  %v3379_v43 = vcombine.low %v16069_v19, %v13085_v0  ;;  %v16070_v23 = vld [vmem:[#allocation78_spill] sm:$0xff] }
 0x3c9   : > { %9667 = vrot.lane.b32.xlu1 %v9666_v38, %s10161_s25  ;;  %v4730_v25 = vcombine.high %v16063_v60, %v13078_v59  ;;  %v5562_v38 = vcombine.high %v16060_v55, %v13106_v49  ;;  %v2675_v34 = vrot.slane %v2667_v40, %v10908_v63  ;;  %v2682_v58 = vrot.slane %v2668_v29, %v10908_v63 }
 0x3ca   : > { %v2698_v2 = vrot.slane %v2684_v47, %v10908_v63  ;;  %v3363_v46 = vcombine.low %v16070_v23, %v13052_v30  ;;  %v13377_v4 = vrot.slane %v2595_v21, %v10934_v42  ;;  %v13380_v59 = vrot.slane %v2596_v22, %v10934_v42 }
 0x3cb   : > { %v13372_v52 = vpop.permute.xlu1 %9437  ;;  %v13374_v54 = vpop.permute.xlu0 %9432  ;;  %v16072_v40 = vcombine.high %v11773_v11, %v16064_v14  ;;  %v9646_v55 = vpack.i.bf16 %v5562_v38, %v4730_v25  ;;  %v13386_v47 = vrot.slane %v2611_v62, %v10934_v42  ;;  %v2731_v56 = vcombine.low %v2675_v34, %v2691_v57  ;;  %v16074_v11 = vld [vmem:[#allocation219_spill] sm:$0xff] }
 0x3cc   : > { %16071 = vst [vmem:[#allocation55_spill] sm:$0xff] %v13377_v4  ;;  %v3364_v60 = vcombine.high %v16070_v23, %v13052_v30  ;;  %v3380_v29 = vcombine.high %v16069_v19, %v13085_v0  ;;  %v13393_v21 = vrot.slane %v2612_v24, %v10934_v42  ;;  %v3387_v22 = vrot.slane %v3379_v43, %v10908_v63  ;;  %v16075_v30 = vld [vmem:[#allocation218_spill] sm:$0xff] }
 0x3cd   : > { %v9676_v49 = vpack.i.bf16 %v7098_v27, %v16072_v40  ;;  %16073 = vst [vmem:[#allocation47_spill] sm:$0xff] %v13386_v47  ;;  %9647 = vrot.lane.b32.xlu0 %v9646_v55, %s10160_s15  ;;  %v7094_v14 = vcombine.high %v16074_v11, %v13164_v33  ;;  %v2732_v62 = vcombine.high %v2675_v34, %v2691_v57  ;;  %v16077_v43 = vld [vmem:[#allocation222_spill] sm:$0xff]  ;;  %v16079_v55 = vld [vmem:[#allocation151_spill] sm:$0xff]  ;;  %v16083_v47 = vld [vmem:[#allocation193_spill] sm:$0xff] }
 0x3ce   : > { %v2747_v27 = vcombine.low %v2682_v58, %v2698_v2  ;;  %v2748_v25 = vcombine.high %v2682_v58, %v2698_v2  ;;  %v7092_v38 = vcombine.high %v16075_v30, %v13161_v20  ;;  %v3371_v24 = vrot.slane %v3363_v46, %v10908_v63  ;;  %v16082_v20 = vld [vmem:[#allocation199_spill] sm:$0xff] }
 0x3cf   : > { %9677 = vrot.lane.b32.xlu1 %v9676_v49, %s10160_s15  ;;  %v13402_v23 = vpop.permute.xlu1 %9447  ;;  %v13404_v0 = vpop.permute.xlu0 %9442  ;;  %v3515_v19 = vcombine.low %v16077_v43, %v13119_v45  ;;  %v3516_v40 = vcombine.high %v16077_v43, %v13119_v45  ;;  %v16078_v49 = vld [vmem:[#allocation161_spill] sm:$0xff]  ;;  %v13415_v58 = vrot.slane %v2731_v56, %v10934_v42  ;;  %v3378_v2 = vrot.slane %v3364_v60, %v10908_v63 }
 0x3d0   : > { %16076 = vst [vmem:[#allocation51_spill] sm:$0xff] %v13404_v0  ;;  %v16080_v57 = vcombine.high %v16078_v49, %v16079_v55  ;;  %v3394_v30 = vrot.slane %v3380_v29, %v10908_v63  ;;  %v16084_v46 = vcombine.high %v16082_v20, %v16083_v47  ;;  %v16085_v0 = vld [vmem:[#allocation27_spill] sm:$0xff]  ;;  %v3427_v43 = vcombine.low %v3371_v24, %v3387_v22 }
 0x3d1   : > { %16081 = vst [vmem:[#allocation62_spill] sm:$0xff] %v13415_v58  ;;  %v3499_v28 = vcombine.low %v16086_v5, %v16085_v0  ;;  %v3500_v45 = vcombine.high %v16086_v5, %v16085_v0  ;;  %v16087_v56 = vcombine.low %v13124_v6, %v13148_v37  ;;  %v13434_v29 = vrot.slane %v2732_v62, %v10934_v42 }
 0x3d2   : > { %v9681_v34 = vpack.i.bf16 %v7094_v14, %v16080_v57  ;;  %v9661_v4 = vpack.i.bf16 %v7092_v38, %v16084_v46  ;;  %v13437_v14 = vrot.slane %v2747_v27, %v10934_v42  ;;  %v3428_v38 = vcombine.high %v3371_v24, %v3387_v22  ;;  %v16092_v27 = vld [vmem:[#allocation90_spill] sm:$0xff] }
 0x3d3   : > { %v13431_v60 = vrot.slane %v16087_v56, %v10934_v42  ;;  %v7093_v5 = vcombine.low %v16074_v11, %v13164_v33  ;;  %v13442_v0 = vpop.permute.xlu1 %9457  ;;  %v13444_v57 = vpop.permute.xlu0 %9452  ;;  %v3523_v46 = vrot.slane %v3515_v19, %v10908_v63  ;;  %v3530_v62 = vrot.slane %v3516_v40, %v10908_v63  ;;  %v16096_v40 = vld [vmem:[#allocation23_spill] sm:$0xff] }
 0x3d4   : > { %9682 = vrot.lane.b32.xlu1 %v9681_v34, %s10160_s15  ;;  %16089 = vst [vmem:[#allocation57_spill] sm:$0xff] %v13437_v14  ;;  %9662 = vrot.lane.b32.xlu0 %v9661_v4, %s10159_s16  ;;  %16090 = vst [vmem:[#allocation215_spill] sm:$0xff] %v13442_v0  ;;  %v13447_v34 = vrot.slane %v2748_v25, %v10934_v42  ;;  %v3443_v22 = vcombine.low %v3378_v2, %v3394_v30  ;;  %v16093_v4 = vld [vmem:[#allocation84_spill] sm:$0xff] }
 0x3d5   : > { %16088 = vst [vmem:[#allocation58_spill] sm:$0xff] %v13431_v60  ;;  %16091 = vst [vmem:[#allocation53_spill] sm:$0xff] %v13444_v57  ;;  %v7928_v56 = vcombine.high %v16092_v27, %v13431_v60  ;;  %v3444_v24 = vcombine.high %v3378_v2, %v3394_v30  ;;  %v4915_v47 = vcombine.low %v16093_v4, %v13155_v35  ;;  %v16097_v57 = vld [vmem:[#allocation223_spill] sm:$0xff] }
 0x3d6   : > { %v16094_v33 = vcombine.low %v16078_v49, %v16079_v55  ;;  %v3507_v20 = vrot.slane %v3499_v28, %v10908_v63  ;;  %v3514_v25 = vrot.slane %v3500_v45, %v10908_v63  ;;  %v13461_v19 = vrot.slane %v3427_v43, %v10934_v42 }
 0x3d7   : > { %v4899_v0 = vcombine.low %v16097_v57, %v16096_v40  ;;  %v13467_v30 = vrot.slane %v3428_v38, %v10934_v42  ;;  %v4900_v2 = vcombine.high %v16097_v57, %v16096_v40  ;;  %v4916_v49 = vcombine.high %v16093_v4, %v13155_v35  ;;  %v16103_v40 = vld [vmem:[#allocation88_spill] sm:$0xff] }
 0x3d8   : > { %v9671_v11 = vpack.i.bf16 %v7093_v5, %v16094_v33  ;;  %16095 = vst [vmem:[#allocation54_spill] sm:$0xff] %v13461_v19  ;;  %8352 = vrot.lane.b32.xlu1 %v7928_v56, %s10159_s16  ;;  %v16098_v28 = vcombine.low %v13109_v32, %v13145_v15  ;;  %v13480_v45 = vpop.permute.xlu1 %9467  ;;  %v13482_v43 = vpop.permute.xlu0 %9462  ;;  %v3563_v38 = vcombine.low %v3507_v20, %v3523_v46  ;;  %v16105_v19 = vld [vmem:[#allocation93_spill] sm:$0xff] }
 0x3d9   : > { %v3564_v5 = vcombine.high %v3507_v20, %v3523_v46  ;;  %v3579_v56 = vcombine.low %v3514_v25, %v3530_v62  ;;  %v16100_v57 = vcombine.high %v13124_v6, %v13148_v37  ;;  %v13489_v4 = vrot.slane %v3443_v22, %v10934_v42  ;;  %v16104_v46 = vld [vmem:[#allocation86_spill] sm:$0xff] }
 0x3da   : > { %9672 = vrot.lane.b32.xlu0 %v9671_v11, %s10161_s25  ;;  %v13478_v55 = vrot.slane %v16098_v28, %v10934_v42  ;;  %v13492_v33 = vrot.slane %v3444_v24, %v10934_v42  ;;  %v4923_v11 = vrot.slane %v4915_v47, %v10908_v63  ;;  %v3580_v27 = vcombine.high %v3514_v25, %v3530_v62  ;;  %v16106_v47 = vld [vmem:[#allocation127_spill] sm:$0xff] }
 0x3db   : > { %v7922_v35 = vrot.slane %v16100_v57, %v10934_v42  ;;  %16101 = vst [vmem:[#allocation67_spill] sm:$0xff] %v13489_v4  ;;  %v4907_v20 = vrot.slane %v4899_v0, %v10908_v63  ;;  %v7131_v60 = vcombine.low %v16104_v46, %v13153_v61  ;;  %v4914_v37 = vrot.slane %v4900_v2, %v10908_v63  ;;  %v16114_v4 = vld [vmem:[#allocation94_spill] sm:$0xff] }
 0x3dc   : > { %16099 = vst [vmem:[#allocation160_spill] sm:$0xff] %v13478_v55  ;;  %16102 = vst [vmem:[#allocation71_spill] sm:$0xff] %v13492_v33  ;;  %v7924_v28 = vcombine.high %v16103_v40, %v13478_v55  ;;  %v7132_v22 = vcombine.high %v16104_v46, %v13153_v61  ;;  %v4930_v24 = vrot.slane %v4916_v49, %v10908_v63  ;;  %v13508_v62 = vpop.permute.xlu1 %9477  ;;  %v16112_v46 = vld [vmem:[#allocation39_spill] sm:$0xff] }
 0x3dd   : > { %v7929_v6 = vcombine.low %v16105_v19, %v7922_v35  ;;  %v7147_v57 = vcombine.low %v16106_v47, %v13190_v50  ;;  %16107 = vst [vmem:[#allocation212_spill] sm:$0xff] %v13508_v62  ;;  %v13510_v0 = vpop.permute.xlu0 %9472  ;;  %v13513_v25 = vrot.slane %v3563_v38, %v10934_v42  ;;  %v13516_v40 = vrot.slane %v3564_v5, %v10934_v42  ;;  %v16113_v62 = vld [vmem:[#allocation91_spill] sm:$0xff] }
 0x3de   : > { %8340 = vrot.lane.b32.xlu1 %v7924_v28, %s10159_s16  ;;  %v13519_v2 = vrot.slane %v3579_v56, %v10934_v42  ;;  %v16111_v61 = vcombine.high %v13109_v32, %v13145_v15  ;;  %v4963_v28 = vcombine.low %v4907_v20, %v4923_v11  ;;  %v7963_v55 = vcombine.low %v16113_v62, %v16112_v46 }
 0x3df   : > { %16108 = vst [vmem:[#allocation221_spill] sm:$0xff] %v13513_v25  ;;  %16109 = vst [vmem:[#allocation77_spill] sm:$0xff] %v13516_v40  ;;  %8356 = vrot.lane.b32.xlu0 %v7929_v6, %s10161_s25  ;;  %v7964_v38 = vcombine.high %v16113_v62, %v16112_v46  ;;  %v7148_v5 = vcombine.high %v16106_v47, %v13190_v50  ;;  %v13533_v56 = vrot.slane %v3580_v27, %v10934_v42  ;;  %v16116_v50 = vld [vmem:[#allocation214_spill] sm:$0xff]  ;;  %v16122_v46 = vld [vmem:[#allocation99_spill] sm:$0xff] }
 0x3e0   : > { %16110 = vst [vmem:[#allocation75_spill] sm:$0xff] %v13519_v2  ;;  %v7906_v49 = vrot.slane %v16111_v61, %v10934_v42  ;;  %v7139_v6 = vrot.slane %v7131_v60, %v10908_v63  ;;  %v7930_v32 = vcombine.high %v16105_v19, %v7922_v35  ;;  %v7146_v15 = vrot.slane %v7132_v22, %v10908_v63  ;;  %v13540_v33 = vpop.permute.xlu1 %9487  ;;  %v16117_v27 = vld [vmem:[#allocation134_spill] sm:$0xff] }
 0x3e1   : > { %v4964_v61 = vcombine.high %v4907_v20, %v4923_v11  ;;  %v4979_v2 = vcombine.low %v4914_v37, %v4930_v24  ;;  %v7155_v25 = vrot.slane %v7147_v57, %v10908_v63  ;;  %16115 = vst [vmem:[#allocation159_spill] sm:$0xff] %v13540_v33  ;;  %v4980_v62 = vcombine.high %v4914_v37, %v4930_v24  ;;  %v13548_v19 = vpop.permute.xlu0 %9482  ;;  %v16121_v24 = vld [vmem:[#allocation102_spill] sm:$0xff] }
 0x3e2   : > { %v7925_v40 = vcombine.low %v16114_v4, %v7906_v49  ;;  %v5136_v60 = vcombine.high %v16116_v50, %v13245_v53  ;;  %v5968_v47 = vcombine.high %v16117_v27, %v13262_v1  ;;  %16118 = vst [vmem:[#allocation171_spill] sm:$0xff] %v13548_v19  ;;  %v13551_v35 = vrot.slane %v4963_v28, %v10934_v42  ;;  %v16132_v1 = vld [vmem:[#allocation131_spill] sm:$0xff] }
 0x3e3   : > { %8360 = vrot.lane.b32.xlu0 %v7930_v32, %s10160_s15  ;;  %v13554_v11 = vrot.slane %v7963_v55, %v10908_v63  ;;  %v13557_v20 = vrot.slane %v7964_v38, %v10908_v63  ;;  %v7926_v37 = vcombine.high %v16114_v4, %v7906_v49  ;;  %v5969_v57 = vcombine.low %v16121_v24, %v13265_v48  ;;  %v16124_v55 = vld [vmem:[#allocation92_spill] sm:$0xff]  ;;  %v16127_v49 = vld [vmem:[#allocation74_spill] sm:$0xff] }
 0x3e4   : > { %8344 = vrot.lane.b32.xlu1 %v7925_v40, %s10161_s25  ;;  %16119 = vst [vmem:[#allocation73_spill] sm:$0xff] %v13551_v35  ;;  %v7162_v40 = vrot.slane %v7148_v5, %v10908_v63  ;;  %v9686_v22 = vpack.i.bf16 %v5968_v47, %v5136_v60  ;;  %v5964_v32 = vcombine.high %v16122_v46, %v13251_v9  ;;  %v13572_v5 = vpop.permute.xlu1 %9497  ;;  %v16128_v60 = vld [vmem:[#allocation69_spill] sm:$0xff] }
 0x3e5   : > { %16120 = vst [vmem:[#allocation79_spill] sm:$0xff] %v13557_v20  ;;  %v13566_v28 = vrot.slane %v4964_v61, %v10934_v42  ;;  %v7195_v33 = vcombine.low %v7139_v6, %v7155_v25  ;;  %v5731_v19 = vcombine.low %v16124_v55, %v13212_v12  ;;  %v5732_v38 = vcombine.high %v16124_v55, %v13212_v12  ;;  %v13583_v46 = vpop.permute.xlu0 %9492  ;;  %v16171_v20 = vld [vmem:[#allocation163_spill] sm:$0xff] }
 0x3e6   : > { %16125 = vst [vmem:[#allocation219_spill] sm:$0xff] %v13572_v5  ;;  %v13575_v4 = vrot.slane %v4979_v2, %v10934_v42  ;;  %v5137_v61 = vcombine.low %v16127_v49, %v13248_v16  ;;  %v5132_v47 = vcombine.high %v16128_v60, %v13217_v17  ;;  %16129 = vst [vmem:[#allocation161_spill] sm:$0xff] %v13583_v46  ;;  %v16131_v2 = vld [vmem:[#allocation129_spill] sm:$0xff] }
 0x3e7   : > { %16123 = vst [vmem:[#allocation78_spill] sm:$0xff] %v13566_v28  ;;  %9687 = vrot.lane.b32.xlu0 %v9686_v22, %s10159_s16  ;;  %v13586_v9 = vrot.slane %v4980_v62, %v10934_v42  ;;  %v7196_v12 = vcombine.high %v7139_v6, %v7155_v25  ;;  %v7211_v55 = vcombine.low %v7146_v15, %v7162_v40  ;;  %v16134_v6 = vld [vmem:[#allocation101_spill] sm:$0xff]  ;;  %v16172_v28 = vld [vmem:[#allocation183_spill] sm:$0xff] }
 0x3e8   : > { %16126 = vst [vmem:[#allocation222_spill] sm:$0xff] %v13575_v4  ;;  %8348 = vrot.lane.b32.xlu1 %v7926_v37, %s10160_s15  ;;  %v7979_v5 = vcombine.low %v16131_v2, %v13214_v13  ;;  %v9696_v27 = vpack.i.bf16 %v5969_v57, %v5137_v61  ;;  %v9691_v37 = vpack.i.bf16 %v5964_v32, %v5132_v47  ;;  %v13609_v57 = vpop.permute.xlu1 %9507 }
 0x3e9   : > { %16130 = vst [vmem:[#allocation151_spill] sm:$0xff] %v13586_v9  ;;  %v5970_v22 = vcombine.high %v16121_v24, %v13265_v48  ;;  %v5965_v50 = vcombine.low %v16132_v1, %v13259_v18  ;;  %v13595_v60 = vrot.slane %v7195_v33, %v10934_v42  ;;  %v7212_v46 = vcombine.high %v7146_v15, %v7162_v40  ;;  %v16135_v24 = vld [vmem:[#allocation213_spill] sm:$0xff]  ;;  %v13611_v15 = vpop.permute.xlu0 %9502 }
 0x3ea   : > { %v5739_v62 = vrot.slane %v5731_v19, %v10908_v63  ;;  %v13599_v25 = vrot.slane %v5732_v38, %v10908_v63  ;;  %v5747_v17 = vcombine.low %v16134_v6, %v13239_v10  ;;  %v5138_v48 = vcombine.high %v16127_v49, %v13248_v16  ;;  %16136 = vst [vmem:[#allocation81_spill] sm:$0xff] %v13609_v57  ;;  %v16139_v49 = vld [vmem:[#allocation226_spill] sm:$0xff]  ;;  %v16151_v57 = vld [vmem:[#allocation100_spill] sm:$0xff] }
 0x3eb   : > { %16133 = vst [vmem:[#allocation27_spill] sm:$0xff] %v13595_v60  ;;  %9692 = vrot.lane.b32.xlu0 %v9691_v37, %s10159_s16  ;;  %v5133_v33 = vcombine.low %v16135_v24, %v13242_v31  ;;  %16137 = vst [vmem:[#allocation84_spill] sm:$0xff] %v13611_v15  ;;  %v13614_v19 = vrot.slane %v7196_v12, %v10934_v42  ;;  %v13617_v40 = vrot.slane %v7211_v55, %v10934_v42  ;;  %v16140_v55 = vld [vmem:[#allocation96_spill] sm:$0xff]  ;;  %v16150_v15 = vld [vmem:[#allocation43_spill] sm:$0xff] }
 0x3ec   : > { %9697 = vrot.lane.b32.xlu1 %v9696_v27, %s10161_s25  ;;  %v7980_v27 = vcombine.high %v16131_v2, %v13214_v13  ;;  %v13622_v32 = vrot.slane %v7979_v5, %v10908_v63  ;;  %v9706_v16 = vpack.i.bf16 %v5970_v22, %v5138_v48  ;;  %v7500_v61 = vcombine.high %v16139_v49, %v13303_v41  ;;  %v16141_v2 = vld [vmem:[#allocation137_spill] sm:$0xff]  ;;  %v16152_v49 = vld [vmem:[#allocation136_spill] sm:$0xff] }
 0x3ed   : > { %16138 = vst [vmem:[#allocation23_spill] sm:$0xff] %v13617_v40  ;;  %v9701_v38 = vpack.i.bf16 %v5965_v50, %v5133_v33  ;;  %v5966_v47 = vcombine.high %v16132_v1, %v13259_v18  ;;  %v13629_v12 = vrot.slane %v7212_v46, %v10934_v42  ;;  %v7283_v37 = vcombine.low %v16140_v55, %v13237_v36  ;;  %v16143_v46 = vld [vmem:[#allocation202_spill] sm:$0xff] }
 0x3ee   : > { %v7284_v13 = vcombine.high %v16140_v55, %v13237_v36  ;;  %v5748_v5 = vcombine.high %v16134_v6, %v13239_v10  ;;  %v5755_v50 = vrot.slane %v5747_v17, %v10908_v63  ;;  %v7267_v22 = vcombine.low %v16141_v2, %v13275_v8  ;;  %v16144_v6 = vld [vmem:[#allocation194_spill] sm:$0xff]  ;;  %v13660_v55 = vpop.permute.xlu1 %9517  ;;  %v13662_v36 = vpop.permute.xlu0 %9512 }
 0x3ef   : > { %9702 = vrot.lane.b32.xlu0 %v9701_v38, %s10161_s25  ;;  %v5134_v18 = vcombine.high %v16135_v24, %v13242_v31  ;;  %v13645_v1 = vrot.slane %v7980_v27, %v10908_v63  ;;  %v7268_v17 = vcombine.high %v16141_v2, %v13275_v8  ;;  %v16145_v48 = vcombine.high %v16143_v46, %v16144_v6  ;;  %v16146_v31 = vld [vmem:[#allocation107_spill] sm:$0xff]  ;;  %v16147_v27 = vld [vmem:[#allocation110_spill] sm:$0xff]  ;;  %v16162_v46 = vld [vmem:[#allocation108_spill] sm:$0xff] }
 0x3f0   : > { %9707 = vrot.lane.b32.xlu1 %v9706_v16, %s10160_s15  ;;  %v7501_v24 = vcombine.low %v16146_v31, %v13306_v26  ;;  %v7504_v38 = vcombine.high %v16147_v27, %v13315_v3  ;;  %16148 = vst [vmem:[#allocation86_spill] sm:$0xff] %v13660_v55  ;;  %16149 = vst [vmem:[#allocation93_spill] sm:$0xff] %v13662_v36  ;;  %v7291_v10 = vrot.slane %v7283_v37, %v10908_v63  ;;  %v16156_v27 = vld [vmem:[#allocation203_spill] sm:$0xff] }
 0x3f1   : > { %16142 = vst [vmem:[#allocation223_spill] sm:$0xff] %v13645_v1  ;;  %v9721_v33 = vpack.i.bf16 %v7500_v61, %v16145_v48  ;;  %v9711_v16 = vpack.i.bf16 %v5966_v47, %v5134_v18  ;;  %v7298_v8 = vrot.slane %v7284_v13, %v10908_v63  ;;  %v5762_v2 = vrot.slane %v5748_v5, %v10908_v63  ;;  %v16157_v3 = vld [vmem:[#allocation195_spill] sm:$0xff]  ;;  %v16161_v13 = vld [vmem:[#allocation48_spill] sm:$0xff] }
 0x3f2   : > { %v8115_v61 = vcombine.low %v16151_v57, %v16150_v15  ;;  %v5795_v47 = vcombine.low %v5739_v62, %v5755_v50  ;;  %v5796_v18 = vcombine.high %v5739_v62, %v5755_v50  ;;  %v7275_v48 = vrot.slane %v7267_v22, %v10908_v63  ;;  %v16153_v62 = vld [vmem:[#allocation165_spill] sm:$0xff]  ;;  %v16154_v50 = vld [vmem:[#allocation158_spill] sm:$0xff] }
 0x3f3   : > { %v9420_v41 = vunpack.i.h.bf16 %v16152_v49  ;;  %9712 = vrot.lane.b32.xlu0 %v9711_v16, %s10160_s15  ;;  %v8116_v5 = vcombine.high %v16151_v57, %v16150_v15  ;;  %v7282_v36 = vrot.slane %v7268_v17, %v10908_v63  ;;  %v16155_v22 = vcombine.low %v16153_v62, %v16154_v50 }
 0x3f4   : > { %9722 = vrot.lane.b32.xlu1 %v9721_v33, %s10159_s16  ;;  %v16158_v33 = vcombine.high %v16156_v27, %v16157_v3  ;;  %v16159_v16 = vcombine.low %v13271_v7, %v13293_v44  ;;  %v7505_v53 = vcombine.low %v16162_v46, %v16161_v13  ;;  %v5811_v57 = vcombine.low %v13599_v25, %v5762_v2 }
 0x3f5   : > { %v9731_v55 = vpack.i.bf16 %v7501_v24, %v16155_v22  ;;  %v5812_v15 = vcombine.high %v13599_v25, %v5762_v2  ;;  %v13697_v17 = vrot.slane %v8115_v61, %v10908_v63  ;;  %v16164_v24 = vld [vmem:[#allocation34_spill] sm:$0xff]  ;;  %v9419_v27 = vunpack.i.l.bf16 %v16152_v49  ;;  %v13710_v25 = vpop.permute.xlu1 %9527  ;;  %v13712_v2 = vpop.permute.xlu0 %9522 }
 0x3f6   : > { %v9716_v6 = vpack.i.bf16 %v7504_v38, %v16158_v33  ;;  %v13690_v37 = vrot.slane %v16159_v16, %v10934_v42  ;;  %v16165_v22 = vld [vmem:[#allocation106_spill] sm:$0xff]  ;;  %v13702_v38 = vrot.slane %v5795_v47, %v10934_v42  ;;  %v13705_v33 = vrot.slane %v5796_v18, %v10934_v42  ;;  %16167 = vst [vmem:[#allocation94_spill] sm:$0xff] %v13710_v25 }
 0x3f7   : > { %16163 = vst [vmem:[#allocation39_spill] sm:$0xff] %v13697_v17  ;;  %v8099_v3 = vcombine.low %v16165_v22, %v16164_v24  ;;  %v7331_v16 = vcombine.low %v7275_v48, %v7291_v10  ;;  %16168 = vst [vmem:[#allocation102_spill] sm:$0xff] %v13712_v2  ;;  %v13715_v61 = vrot.slane %v8116_v5, %v10908_v63  ;;  %v16170_v18 = vld [vmem:[#allocation150_spill] sm:$0xff]  ;;  %v9434_v25 = vunpack.i.l.bf16 %v13374_v54 }
 0x3f8   : > { %16160 = vst [vmem:[#allocation127_spill] sm:$0xff] %v13690_v37  ;;  %16166 = vst [vmem:[#allocation91_spill] sm:$0xff] %v13705_v33  ;;  %9732 = vrot.lane.b32.xlu1 %v9731_v55, %s10161_s25  ;;  %9717 = vrot.lane.b32.xlu0 %v9716_v6, %s10159_s16  ;;  %v7332_v9 = vcombine.high %v7275_v48, %v7291_v10  ;;  %v7347_v47 = vcombine.low %v7282_v36, %v7298_v8  ;;  %v16207_v17 = vld [vmem:[#allocation114_spill] sm:$0xff] }
 0x3f9   : > { %16169 = vst [vmem:[#allocation92_spill] sm:$0xff] %v13715_v61  ;;  %v7348_v4 = vcombine.high %v7282_v36, %v7298_v8  ;;  %v8332_v1 = vcombine.high %v16170_v18, %v13690_v37  ;;  %v16173_v49 = vcombine.low %v16171_v20, %v16172_v28  ;;  %v16174_v6 = vcombine.high %v13271_v7, %v13293_v44  ;;  %v16180_v7 = vld [vmem:[#allocation112_spill] sm:$0xff]  ;;  %v16181_v44 = vld [vmem:[#allocation125_spill] sm:$0xff] }
 0x3fa   : > { %v7506_v5 = vcombine.high %v16162_v46, %v16161_v13  ;;  %v13731_v10 = vrot.slane %v5811_v57, %v10934_v42  ;;  %v13734_v36 = vrot.slane %v5812_v15, %v10934_v42  ;;  %v8100_v8 = vcombine.high %v16165_v22, %v16164_v24  ;;  %v16184_v13 = vld [vmem:[#allocation111_spill] sm:$0xff]  ;;  %v16185_v57 = vld [vmem:[#allocation124_spill] sm:$0xff]  ;;  %v16188_v22 = vld [vmem:[#allocation30_spill] sm:$0xff] }
 0x3fb   : > { %v9726_v33 = vpack.i.bf16 %v7505_v53, %v16173_v49  ;;  %v13726_v55 = vrot.slane %v16174_v6, %v10934_v42  ;;  %v13739_v53 = vrot.slane %v8099_v3, %v10908_v63  ;;  %v13742_v48 = vrot.slane %v7331_v16, %v10934_v42  ;;  %v16189_v16 = vld [vmem:[#allocation25_spill] sm:$0xff] }
 0x3fc   : > { %16176 = vst [vmem:[#allocation129_spill] sm:$0xff] %v13731_v10  ;;  %16177 = vst [vmem:[#allocation131_spill] sm:$0xff] %v13734_v36  ;;  %v16182_v49 = vcombine.low %v16180_v7, %v16181_v44  ;;  %v16186_v6 = vcombine.low %v16184_v13, %v16185_v57  ;;  %8412 = vrot.lane.b32.xlu1 %v8332_v1, %s10159_s16  ;;  %v13757_v3 = vrot.slane %v7332_v9, %v10934_v42  ;;  %v16191_v1 = vld [vmem:[#allocation147_spill] sm:$0xff]  ;;  %v13778_v13 = vpop.permute.xlu0 %9532  ;;  %v16222_v61 = vld [vmem:[#allocation53_spill] sm:$0xff] }
 0x3fd   : > { %16175 = vst [vmem:[#allocation74_spill] sm:$0xff] %v13726_v55  ;;  %16178 = vst [vmem:[#allocation101_spill] sm:$0xff] %v13739_v53  ;;  %9727 = vrot.lane.b32.xlu0 %v9726_v33, %s10161_s25  ;;  %v13760_v24 = vrot.slane %v7347_v47, %v10934_v42  ;;  %v2633_v7 = vcombine.low %v16189_v16, %v13393_v21  ;;  %v13767_v44 = vrot.slane %v7348_v4, %v10934_v42  ;;  %v16208_v53 = vld [vmem:[#allocation128_spill] sm:$0xff]  ;;  %v16236_v10 = vld [vmem:[#allocation75_spill] sm:$0xff] }
 0x3fe   : > { %16179 = vst [vmem:[#allocation213_spill] sm:$0xff] %v13742_v48  ;;  %v13748_v46 = vsel %vm2032_vm4, %v16182_v49, %v9420_v41  ;;  %v4409_v15 = vsel %vm2032_vm4, %v16186_v6, %v9419_v27  ;;  %16187 = vst [vmem:[#allocation137_spill] sm:$0xff] %v13757_v3  ;;  %v2629_v41 = vcombine.low %v16188_v22, %v13380_v59  ;;  %v13776_v49 = vpop.permute.xlu1 %9547  ;;  %v9424_v6 = vunpack.i.l.bf16 %v13348_v39  ;;  %v16235_v3 = vld [vmem:[#allocation210_spill] sm:$0xff] }
 0x3ff   : > { %16183 = vst [vmem:[#allocation96_spill] sm:$0xff] %v13748_v46  ;;  %16190 = vst [vmem:[#allocation107_spill] sm:$0xff] %v13767_v44  ;;  %v8333_v27 = vcombine.low %v16191_v1, %v13726_v55  ;;  %v16192_v9 = vcombine.high %v16171_v20, %v16172_v28  ;;  %v7502_v47 = vcombine.high %v16146_v31, %v13306_v26  ;;  %v9435_v26 = vunpack.i.h.bf16 %v13374_v54  ;;  %v16196_v28 = vld [vmem:[#allocation17_spill] sm:$0xff]  ;;  %v16233_v1 = vld [vmem:[#allocation22_spill] sm:$0xff] }
 0x400   : > { %16193 = vst [vmem:[#allocation43_spill] sm:$0xff] %v13778_v13  ;;  %v13781_v57 = vrot.slane %v8100_v8, %v10908_v63  ;;  %v9450_v31 = vunpack.i.h.bf16 %v13402_v23  ;;  %v9449_v8 = vunpack.i.l.bf16 %v13402_v23  ;;  %v16195_v4 = vcombine.high %v16153_v62, %v16154_v50  ;;  %v16197_v13 = vld [vmem:[#allocation40_spill] sm:$0xff]  ;;  %v16203_v62 = vld [vmem:[#allocation113_spill] sm:$0xff]  ;;  %v16204_v50 = vld [vmem:[#allocation126_spill] sm:$0xff] }
 0x401   : > { %v9736_v33 = vpack.i.bf16 %v7506_v5, %v16192_v9  ;;  %8416 = vrot.lane.b32.xlu1 %v8333_v27, %s10161_s25  ;;  %v9439_v5 = vunpack.i.l.bf16 %v13372_v52  ;;  %v9751_v9 = vpack.i.bf16 %v2633_v7, %v2629_v41  ;;  %v2764_v54 = vcombine.high %v16196_v28, %v13415_v58  ;;  %v16198_v27 = vld [vmem:[#allocation38_spill] sm:$0xff]  ;;  %v16211_v23 = vld [vmem:[#allocation133_spill] sm:$0xff] }
 0x402   : > { %16194 = vst [vmem:[#allocation100_spill] sm:$0xff] %v13781_v57  ;;  %v9741_v20 = vpack.i.bf16 %v7502_v47, %v16195_v4  ;;  %v2768_v2 = vcombine.high %v16197_v13, %v13437_v14  ;;  %v13812_v41 = vsel %vm2034_vm5, %v4409_v15, %v9424_v6  ;;  %v16205_v7 = vcombine.low %v16203_v62, %v16204_v50  ;;  %v16206_v4 = vld [vmem:[#allocation51_spill] sm:$0xff]  ;;  %v16210_v14 = vld [vmem:[#allocation116_spill] sm:$0xff]  ;;  %v13837_v62 = vpop.permute.xlu0 %9537  ;;  %v16228_v57 = vld [vmem:[#allocation209_spill] sm:$0xff] }
 0x403   : > { %9737 = vrot.lane.b32.xlu0 %v9736_v33, %s10160_s15  ;;  %v16199_v33 = vld [vmem:[#allocation60_spill] sm:$0xff]  ;;  %16202 = vst [vmem:[#allocation165_spill] sm:$0xff] %v13812_v41  ;;  %v9444_v37 = vunpack.i.l.bf16 %v16206_v4  ;;  %v16209_v13 = vcombine.low %v16207_v17, %v16208_v53  ;;  %v16212_v28 = vcombine.low %v16210_v14, %v16211_v23  ;;  %v9464_v6 = vunpack.i.l.bf16 %v13482_v43  ;;  %v16213_v17 = vld [vmem:[#allocation115_spill] sm:$0xff]  ;;  %v16234_v55 = vld [vmem:[#allocation221_spill] sm:$0xff] }
 0x404   : > { %v16200_v18 = vcombine.low %v16198_v27, %v16199_v33  ;;  %v2033_v47 = vsel %vm2032_vm4, %v16205_v7, %v9434_v25  ;;  %v13835_v25 = vpop.permute.xlu1 %9557  ;;  %v16214_v53 = vld [vmem:[#allocation132_spill] sm:$0xff]  ;;  %v16227_v14 = vld [vmem:[#allocation71_spill] sm:$0xff]  ;;  %v2630_v46 = vcombine.high %v16188_v22, %v13380_v59  ;;  %v2634_v39 = vcombine.high %v16189_v16, %v13393_v21  ;;  %v16241_v22 = vld [vmem:[#allocation118_spill] sm:$0xff] }
 0x405   : > { %v13830_v15 = vsel %vm2032_vm4, %v16212_v28, %v9450_v31  ;;  %9752 = vrot.lane.b32.xlu1 %v9751_v9, %s10161_s25  ;;  %v16216_v28 = vld [vmem:[#allocation123_spill] sm:$0xff]  ;;  %v16217_v23 = vld [vmem:[#allocation32_spill] sm:$0xff]  ;;  %v2035_v9 = vsel %vm2034_vm5, %v2033_v47, %v9439_v5  ;;  %v9469_v5 = vunpack.i.l.bf16 %v13480_v45  ;;  %v16223_v47 = vld [vmem:[#allocation117_spill] sm:$0xff] }
 0x406   : > { %v13807_v63 = vrot.slane %v16200_v18, %v10934_v42  ;;  %v13824_v18 = vsel %vm2032_vm4, %v16209_v13, %v9435_v26  ;;  %v16215_v13 = vcombine.low %v16213_v17, %v16214_v53  ;;  %v2766_v31 = vcombine.high %v16216_v28, %v13434_v29  ;;  %v16218_v7 = vld [vmem:[#allocation152_spill] sm:$0xff]  ;;  %v16242_v16 = vld [vmem:[#allocation143_spill] sm:$0xff] }
 0x407   : > { %9742 = vrot.lane.b32.xlu0 %v9741_v20, %s10160_s15  ;;  %v2770_v50 = vcombine.high %v16217_v23, %v13447_v34  ;;  %v9761_v20 = vpack.i.bf16 %v2768_v2, %v2764_v54  ;;  %v16219_v17 = vcombine.high %v16198_v27, %v16199_v33  ;;  %v9454_v2 = vunpack.i.l.bf16 %v16222_v61  ;;  %v16237_v41 = vld [vmem:[#allocation140_spill] sm:$0xff] }
 0x408   : > { %16201 = vst [vmem:[#allocation136_spill] sm:$0xff] %v13807_v63  ;;  %v2041_v26 = vsel %vm2032_vm4, %v16215_v13, %v9449_v8  ;;  %v8336_v48 = vcombine.high %v16218_v7, %v13807_v63  ;;  %v13858_v8 = vsel %vm2036_vm6, %v2035_v9, %v9444_v37  ;;  %v16221_v13 = vld [vmem:[#allocation215_spill] sm:$0xff]  ;;  %v9465_v54 = vunpack.i.h.bf16 %v13482_v43  ;;  %v13877_v36 = vpop.permute.xlu1 %9572  ;;  %v16229_v43 = vld [vmem:[#allocation177_spill] sm:$0xff] }
 0x409   : > { %v13855_v53 = vrot.slane %v16219_v17, %v10934_v42  ;;  %v16224_v7 = vld [vmem:[#allocation139_spill] sm:$0xff]  ;;  %9762 = vrot.lane.b32.xlu1 %v9761_v20, %s10159_s16  ;;  %v9474_v37 = vunpack.i.l.bf16 %v13510_v0  ;;  %v9771_v9 = vpack.i.bf16 %v2770_v50, %v2766_v31  ;;  %v16226_v17 = vld [vmem:[#allocation56_spill] sm:$0xff]  ;;  %v3465_v63 = vcombine.low %v16228_v57, %v16227_v14  ;;  %v9543_v50 = vpop.permute.xlu0 %9542 }
 0x40a   : > { %v16225_v27 = vcombine.low %v16223_v47, %v16224_v7  ;;  %v3461_v58 = vcombine.low %v16226_v17, %v13467_v30  ;;  %v16230_v47 = vld [vmem:[#allocation55_spill] sm:$0xff]  ;;  %v3596_v31 = vcombine.high %v16235_v3, %v16234_v55  ;;  %v3600_v51 = vcombine.high %v16237_v41, %v16236_v10 }
 0x40b   : > { %16220 = vst [vmem:[#allocation158_spill] sm:$0xff] %v13855_v53  ;;  %8424 = vrot.lane.b32.xlu0 %v8336_v48, %s10159_s16  ;;  %v8337_v7 = vcombine.low %v16229_v43, %v13855_v53  ;;  %v16232_v20 = vld [vmem:[#allocation47_spill] sm:$0xff]  ;;  %v16238_v43 = vld [vmem:[#allocation77_spill] sm:$0xff]  ;;  %v2765_v41 = vcombine.low %v16216_v28, %v13434_v29  ;;  %v2769_v59 = vcombine.low %v16217_v23, %v13447_v34 }
 0x40c   : > { %v4403_v33 = vsel %vm2032_vm4, %v16225_v27, %v9464_v6  ;;  %v16231_v6 = vld [vmem:[#allocation19_spill] sm:$0xff]  ;;  %v2632_v48 = vcombine.high %v16233_v1, %v16232_v20  ;;  %v13905_v21 = vsel %vm2034_vm5, %v2041_v26, %v9454_v2  ;;  %v16243_v10 = vcombine.low %v16241_v22, %v16242_v16  ;;  %v13921_v16 = vpop.permute.xlu1 %9582  ;;  %v16272_v20 = vld [vmem:[#allocation185_spill] sm:$0xff] }
 0x40d   : > { %v2628_v27 = vcombine.high %v16231_v6, %v16230_v47  ;;  %v16239_v53 = vld [vmem:[#allocation211_spill] sm:$0xff]  ;;  %9772 = vrot.lane.b32.xlu1 %v9771_v9, %s10160_s15  ;;  %v4404_v9 = vsel %vm2034_vm5, %v4403_v33, %v9469_v5  ;;  %v9781_v29 = vpack.i.bf16 %v3465_v63, %v3461_v58  ;;  %v9791_v23 = vpack.i.bf16 %v3600_v51, %v3596_v31  ;;  %v16247_v63 = vld [vmem:[#allocation144_spill] sm:$0xff]  ;;  %v16252_v31 = vld [vmem:[#allocation54_spill] sm:$0xff] }
 0x40e   : > { %v3598_v44 = vcombine.high %v16239_v53, %v16238_v43  ;;  %v16240_v3 = vld [vmem:[#allocation59_spill] sm:$0xff]  ;;  %v13911_v6 = vsel %vm2032_vm4, %v16243_v10, %v9465_v54  ;;  %v13916_v1 = vsel %vm2036_vm6, %v4404_v9, %v9474_v37  ;;  %v9756_v2 = vpack.i.bf16 %v2634_v39, %v2630_v46  ;;  %v13928_v37 = vpop.permute.xlu0 %9552  ;;  %v16249_v51 = vld [vmem:[#allocation172_spill] sm:$0xff]  ;;  %v16253_v9 = vld [vmem:[#allocation138_spill] sm:$0xff] }
 0x40f   : > { %8428 = vrot.lane.b32.xlu0 %v8337_v7, %s10161_s25  ;;  %v3602_v55 = vcombine.high %v16240_v3, %v13533_v56  ;;  %16244 = vst [vmem:[#allocation48_spill] sm:$0xff] %v13911_v6  ;;  %v9540_v7 = vunpack.i.h.bf16 %v13837_v62  ;;  %16245 = vst [vmem:[#allocation108_spill] sm:$0xff] %v13916_v1  ;;  %v9746_v28 = vpack.i.bf16 %v2632_v48, %v2628_v27  ;;  %v9539_v22 = vunpack.i.l.bf16 %v13837_v62  ;;  %v16246_v58 = vld [vmem:[#allocation187_spill] sm:$0xff]  ;;  %v16248_v27 = vld [vmem:[#allocation80_spill] sm:$0xff] }
 0x410   : > { %v9766_v54 = vpack.i.bf16 %v2769_v59, %v2765_v41  ;;  %v4859_v33 = vcombine.low %v16247_v63, %v16246_v58  ;;  %v16250_v39 = vcombine.low %v16248_v27, %v16249_v51  ;;  %v16251_v62 = vld [vmem:[#allocation85_spill] sm:$0xff]  ;;  %v16256_v41 = vld [vmem:[#allocation190_spill] sm:$0xff]  ;;  %v16257_v59 = vld [vmem:[#allocation76_spill] sm:$0xff]  ;;  %v3462_v27 = vcombine.high %v16226_v17, %v13467_v30 }
 0x411   : > { %9782 = vrot.lane.b32.xlu1 %v9781_v29, %s10161_s25  ;;  %v9801_v5 = vpack.i.bf16 %v3602_v55, %v3598_v44  ;;  %v7228_v48 = vcombine.high %v16251_v62, %v13595_v60  ;;  %v3460_v29 = vcombine.high %v16253_v9, %v16252_v31  ;;  %v16255_v55 = vld [vmem:[#allocation52_spill] sm:$0xff]  ;;  %v5691_v58 = vcombine.low %v16257_v59, %v16256_v41  ;;  %v16258_v63 = vld [vmem:[#allocation83_spill] sm:$0xff]  ;;  %v16259_v51 = vld [vmem:[#allocation66_spill] sm:$0xff] }
 0x412   : > { %v13934_v46 = vsel %vm2032_vm4, %v16250_v39, %v9540_v7  ;;  %v7229_v10 = vcombine.low %v16258_v63, %v13614_v19  ;;  %v3466_v7 = vcombine.high %v16228_v57, %v16227_v14  ;;  %v16260_v39 = vld [vmem:[#allocation170_spill] sm:$0xff]  ;;  %v9545_v9 = vunpack.i.h.bf16 %v9543_v50  ;;  %v16264_v57 = vld [vmem:[#allocation192_spill] sm:$0xff]  ;;  %v16265_v14 = vld [vmem:[#allocation15_spill] sm:$0xff]  ;;  %v13982_v1 = vpop.permute.xlu0 %9562 }
 0x413   : > { %9747 = vrot.lane.b32.xlu0 %v9746_v28, %s10159_s16  ;;  %v16254_v28 = vld [vmem:[#allocation67_spill] sm:$0xff]  ;;  %v16261_v34 = vcombine.low %v16259_v51, %v16260_v39  ;;  %v16262_v41 = vcombine.low %v13554_v11, %v13622_v32  ;;  %v2491_v17 = vcombine.low %v16265_v14, %v16264_v57  ;;  %v16266_v51 = vld [vmem:[#allocation204_spill] sm:$0xff] }
 0x414   : > { %v3464_v44 = vcombine.high %v16255_v55, %v16254_v28  ;;  %v9544_v55 = vunpack.i.l.bf16 %v9543_v50  ;;  %v13956_v28 = vpop.permute.xlu1 %9592  ;;  %v3597_v50 = vcombine.low %v16239_v53, %v16238_v43  ;;  %v16267_v39 = vld [vmem:[#allocation196_spill] sm:$0xff]  ;;  %v16269_v62 = vld [vmem:[#allocation191_spill] sm:$0xff]  ;;  %v9786_v14 = vpack.i.bf16 %v3466_v7, %v3462_v27  ;;  %v16275_v53 = vld [vmem:[#allocation89_spill] sm:$0xff] }
 0x415   : > { %v13954_v26 = vsel %vm2032_vm4, %v16261_v34, %v9539_v22  ;;  %v13962_v59 = vrot.slane %v16262_v41, %v10934_v42  ;;  %9792 = vrot.lane.b32.xlu1 %v9791_v23, %s10159_s16  ;;  %v3601_v34 = vcombine.low %v16240_v3, %v13533_v56  ;;  %v9575_v22 = vunpack.i.h.bf16 %v13877_v36  ;;  %v16271_v30 = vld [vmem:[#allocation164_spill] sm:$0xff] }
 0x416   : > { %v16268_v41 = vcombine.high %v16266_v51, %v16267_v39  ;;  %v9776_v23 = vpack.i.bf16 %v3464_v44, %v3460_v29  ;;  %v16273_v47 = vcombine.low %v16271_v30, %v16272_v20  ;;  %v16274_v56 = vcombine.high %v13554_v11, %v13622_v32  ;;  %v16276_v29 = vld [vmem:[#allocation135_spill] sm:$0xff] }
 0x417   : > { %16263 = vst [vmem:[#allocation34_spill] sm:$0xff] %v13962_v59  ;;  %9757 = vrot.lane.b32.xlu0 %v9756_v2, %s10160_s15  ;;  %v16270_v2 = vld [vmem:[#allocation20_spill] sm:$0xff]  ;;  %v7232_v43 = vcombine.high %v16275_v53, %v13617_v40  ;;  %v8060_v44 = vcombine.high %v16276_v29, %v13962_v59  ;;  %v9585_v11 = vunpack.i.h.bf16 %v13921_v16  ;;  %v9796_v32 = vpack.i.bf16 %v3601_v34, %v3597_v50  ;;  %v9568_v40 = vpop.permute.xlu0 %9567  ;;  %v16288_v29 = vld [vmem:[#allocation205_spill] sm:$0xff] }
 0x418   : > { %v9811_v31 = vpack.i.bf16 %v7228_v48, %v16268_v41  ;;  %v2495_v60 = vcombine.low %v16270_v2, %v16269_v62  ;;  %v9821_v57 = vpack.i.bf16 %v7229_v10, %v16273_v47  ;;  %v13988_v3 = vrot.slane %v16274_v56, %v10934_v42  ;;  %v16277_v47 = vld [vmem:[#allocation189_spill] sm:$0xff]  ;;  %v16278_v10 = vld [vmem:[#allocation122_spill] sm:$0xff]  ;;  %v14001_v7 = vpop.permute.xlu1 %9602  ;;  %v16280_v2 = vld [vmem:[#allocation16_spill] sm:$0xff] }
 0x419   : > { %v6073_v48 = vsel %vm2032_vm4, %v5691_v58, %v9545_v9  ;;  %v5241_v62 = vsel %vm2032_vm4, %v4859_v33, %v9544_v55  ;;  %v2355_v27 = vcombine.low %v16278_v10, %v16277_v47  ;;  %9802 = vrot.lane.b32.xlu1 %v9801_v5, %s10160_s15  ;;  %v16279_v41 = vld [vmem:[#allocation198_spill] sm:$0xff]  ;;  %v16281_v33 = vld [vmem:[#allocation87_spill] sm:$0xff]  ;;  %v9584_v58 = vunpack.i.l.bf16 %v13921_v16  ;;  %v16285_v5 = vld [vmem:[#allocation45_spill] sm:$0xff] }
 0x41a   : > { %v2359_v9 = vcombine.low %v16280_v2, %v16279_v41  ;;  %v7233_v55 = vcombine.low %v16281_v33, %v13629_v12  ;;  %v16284_v10 = vld [vmem:[#allocation18_spill] sm:$0xff]  ;;  %v9555_v50 = vunpack.i.h.bf16 %v13928_v37  ;;  %v9554_v34 = vunpack.i.l.bf16 %v13928_v37  ;;  %v16287_v41 = vld [vmem:[#allocation224_spill] sm:$0xff] }
 0x41b   : > { %9767 = vrot.lane.b32.xlu0 %v9766_v54, %s10161_s25  ;;  %v16286_v54 = vld [vmem:[#allocation65_spill] sm:$0xff]  ;;  %v16289_v59 = vld [vmem:[#allocation200_spill] sm:$0xff]  ;;  %v9570_v47 = vunpack.i.h.bf16 %v9568_v40  ;;  %v9569_v56 = vunpack.i.l.bf16 %v9568_v40  ;;  %v9574_v39 = vunpack.i.l.bf16 %v13877_v36  ;;  %v2876_v37 = vsel %vm2032_vm4, %v2495_v60, %v9585_v11 }
 0x41c   : > { %v4996_v53 = vcombine.high %v16286_v54, %v13551_v35  ;;  %v16290_v16 = vcombine.high %v16288_v29, %v16289_v59  ;;  %v16291_v54 = vld [vmem:[#allocation130_spill] sm:$0xff]  ;;  %v16292_v2 = vld [vmem:[#allocation168_spill] sm:$0xff]  ;;  %v7234_v40 = vcombine.high %v16281_v33, %v13629_v12  ;;  %v2873_v51 = vsel %vm2032_vm4, %v2491_v17, %v9584_v58 }
 0x41d   : > { %v5828_v35 = vcombine.high %v16291_v54, %v13702_v38  ;;  %9812 = vrot.lane.b32.xlu1 %v9811_v31, %s10159_s16  ;;  %v16293_v59 = vld [vmem:[#allocation184_spill] sm:$0xff]  ;;  %v2870_v29 = vsel %vm2032_vm4, %v2359_v9, %v9570_v47  ;;  %v2867_v36 = vsel %vm2032_vm4, %v2355_v27, %v9569_v56  ;;  %v16295_v31 = vunpack.i.h.bf16 %v13372_v52  ;;  %v16298_v9 = vld [vmem:[#allocation50_spill] sm:$0xff]  ;;  %v16299_v47 = vld [vmem:[#allocation29_spill] sm:$0xff] }
 0x41e   : > { %v14021_v6 = vpack.i.bf16 %v7232_v43, %v16290_v16  ;;  %v16294_v43 = vcombine.low %v16292_v2, %v16293_v59  ;;  %v5242_v60 = vsel %vm2034_vm5, %v5241_v62, %v9554_v34  ;;  %v6074_v11 = vsel %vm2034_vm5, %v6073_v48, %v9555_v50  ;;  %v16297_v33 = vld [vmem:[#allocation64_spill] sm:$0xff] }
 0x41f   : > { %9777 = vrot.lane.b32.xlu0 %v9776_v23, %s10159_s16  ;;  %v2039_v23 = vsel %vm2034_vm5, %v13824_v18, %v16295_v31  ;;  %v16296_v12 = vunpack.i.h.bf16 %v16206_v4  ;;  %v14054_v52 = vpack.i.bf16 %v5828_v35, %v4996_v53  ;;  %v16300_v18 = vld [vmem:[#allocation72_spill] sm:$0xff]  ;;  %v9595_v48 = vunpack.i.h.bf16 %v13956_v28 }
 0x420   : > { %v14034_v16 = vpack.i.bf16 %v7233_v55, %v16294_v43  ;;  %v14047_v55 = vpop.permute.xlu1 %9612  ;;  %v9578_v43 = vpop.permute.xlu0 %9577  ;;  %v2868_v4 = vsel %vm2034_vm5, %v2867_v36, %v9574_v39  ;;  %v16301_v62 = vcombine.high %v16292_v2, %v16293_v59  ;;  %v2871_v34 = vsel %vm2034_vm5, %v2870_v29, %v9575_v22 }
 0x421   : > { %v2040_v17 = vsel %vm2036_vm6, %v2039_v23, %v16296_v12  ;;  %v9580_v27 = vunpack.i.h.bf16 %v9578_v43  ;;  %v9579_v56 = vunpack.i.l.bf16 %v9578_v43  ;;  %9822 = vrot.lane.b32.xlu1 %v9821_v57, %s10161_s25  ;;  %v16302_v23 = vld [vmem:[#allocation197_spill] sm:$0xff]  ;;  %v16303_v43 = vld [vmem:[#allocation35_spill] sm:$0xff]  ;;  %v7230_v59 = vcombine.high %v16258_v63, %v13614_v19 }
 0x422   : > { %v14065_v50 = vpack.i.bf16 %v7234_v40, %v16301_v62  ;;  %v3187_v57 = vcombine.low %v16303_v43, %v16302_v23  ;;  %v16304_v12 = vld [vmem:[#allocation91_spill] sm:$0xff]  ;;  %v16306_v2 = vunpack.i.h.bf16 %v16222_v61  ;;  %v9565_v29 = vunpack.i.h.bf16 %v13982_v1  ;;  %v16314_v62 = vld [vmem:[#allocation42_spill] sm:$0xff] }
 0x423   : > { %9787 = vrot.lane.b32.xlu0 %v9786_v14, %s10160_s15  ;;  %v2869_v35 = vsel %vm2036_vm6, %v2868_v4, %v9579_v56  ;;  %v2872_v53 = vsel %vm2036_vm6, %v2871_v34, %v9580_v27  ;;  %v16305_v14 = vld [vmem:[#allocation97_spill] sm:$0xff]  ;;  %v9564_v40 = vunpack.i.l.bf16 %v13982_v1  ;;  %v16307_v27 = vunpack.i.l.bf16 %v13776_v49  ;;  %v16310_v1 = vld [vmem:[#allocation63_spill] sm:$0xff] }
 0x424   : > { %v5829_v58 = vcombine.low %v16305_v14, %v16304_v12  ;;  %v9291_v31 = vpack.c.bf16 %v2869_v35, %v13858_v8  ;;  %v9289_v39 = vpack.c.bf16 %v2872_v53, %v2040_v17  ;;  %v2045_v22 = vsel %vm2034_vm5, %v13830_v15, %v16306_v2  ;;  %v14083_v36 = vpop.permute.xlu1 %9622  ;;  %v16309_v15 = vld [vmem:[#allocation78_spill] sm:$0xff] }
 0x425   : > { %v5245_v8 = vsel %vm2034_vm5, %v13954_v26, %v16307_v27  ;;  %v16308_v17 = vunpack.i.h.bf16 %v13776_v49  ;;  %v9594_v61 = vunpack.i.l.bf16 %v13956_v28  ;;  %8364 = vrot.lane.b32.xlu1 %v8060_v44, %s10159_s16  ;;  %v4997_v63 = vcombine.low %v16310_v1, %v16309_v15  ;;  %v16313_v28 = vld [vmem:[#allocation166_spill] sm:$0xff] }
 0x426   : > { %v16311_v56 = vunpack.i.l.bf16 %v13835_v25  ;;  %v16312_v26 = vunpack.i.h.bf16 %v13835_v25  ;;  %9290 = vmatprep.subr.bf16.mxu0 %v9289_v39  ;;  %v3191_v44 = vcombine.low %v16314_v62, %v16313_v28  ;;  %v16316_v35 = vunpack.i.l.bf16 %v16221_v13 }
 0x427   : > { %v6077_v19 = vsel %vm2034_vm5, %v13934_v46, %v16308_v17  ;;  %9797 = vrot.lane.b32.xlu0 %v9796_v32, %s10161_s25  ;;  %v9588_v46 = vpop.permute.xlu0 %9587  ;;  %v16315_v32 = vunpack.i.h.bf16 %v16221_v13  ;;  %9292 = vmatpush1.bf16.msra.mxu0 %v9291_v31  ;;  %v5830_v39 = vcombine.high %v16305_v14, %v16304_v12  ;;  %v14124_v17 = vsel %vm2036_vm6, %v5242_v60, %v9564_v40 }
 0x428   : > { %v14101_v4 = vsel %vm2036_vm6, %v5245_v8, %v16311_v56  ;;  %v14106_v49 = vsel %vm2036_vm6, %v6077_v19, %v16312_v26  ;;  %v2043_v53 = vsel %vm2036_vm6, %v13905_v21, %v16316_v35  ;;  %v9590_v2 = vunpack.i.h.bf16 %v9588_v46 }
 0x429   : > { %v2046_v34 = vsel %vm2036_vm6, %v2045_v22, %v16315_v32  ;;  %v9589_v27 = vunpack.i.l.bf16 %v9588_v46  ;;  %v14119_v8 = vpack.i.bf16 %v5829_v58, %v4997_v63  ;;  %v14127_v22 = vsel %vm2036_vm6, %v6074_v11, %v9565_v29 }
 0x42a   : > { %v16317_v13 = vcombine.high %v16271_v30, %v16272_v20  ;;  %v4998_v19 = vcombine.high %v16310_v1, %v16309_v15  ;;  %v9475_v58 = vunpack.i.h.bf16 %v13510_v0  ;;  %v16318_v31 = vcombine.low %v16287_v41, %v13988_v3  ;;  %v16319_v20 = vld [vmem:[#allocation79_spill] sm:$0xff]  ;;  %v16322_v15 = vld [vmem:[#allocation104_spill] sm:$0xff] }
 0x42b   : > { %9807 = vrot.lane.b32.xlu0 %v14021_v6, %s10159_s16  ;;  %v2877_v60 = vsel %vm2034_vm5, %v2876_v37, %v9590_v2  ;;  %v2874_v11 = vsel %vm2034_vm5, %v2873_v51, %v9589_v27  ;;  %v16320_v30 = vld [vmem:[#allocation223_spill] sm:$0xff]  ;;  %v9598_v0 = vpop.permute.xlu0 %9597  ;;  %v7368_v6 = vcombine.high %v16322_v15, %v13760_v24  ;;  %v9605_v62 = vunpack.i.h.bf16 %v14001_v7  ;;  %v16327_v2 = vld [vmem:[#allocation48_spill] sm:$0xff] }
 0x42c   : > { %v14132_v21 = vpack.i.bf16 %v7230_v59, %v16317_v13  ;;  %8368 = vrot.lane.b32.xlu1 %v16318_v31, %s10161_s25  ;;  %v16321_v12 = vcombine.low %v16319_v20, %v16320_v30  ;;  %v14151_v59 = vpop.permute.xlu1 %9632  ;;  %v2878_v29 = vsel %vm2036_vm6, %v2877_v60, %v9595_v48  ;;  %v2875_v40 = vsel %vm2036_vm6, %v2874_v11, %v9594_v61  ;;  %v16328_v27 = vld [vmem:[#allocation107_spill] sm:$0xff]  ;;  %v16331_v31 = vld [vmem:[#allocation201_spill] sm:$0xff] }
 0x42d   : > { %v16323_v51 = vcombine.high %v16319_v20, %v16320_v30  ;;  %v9305_v63 = vpack.c.bf16 %v2878_v29, %v2046_v34  ;;  %v9307_v56 = vpack.c.bf16 %v2875_v40, %v2043_v53  ;;  %v14165_v26 = vpack.i.bf16 %v5830_v39, %v4998_v19  ;;  %v16325_v34 = vld [vmem:[#allocation105_spill] sm:$0xff]  ;;  %v16330_v19 = vld [vmem:[#allocation206_spill] sm:$0xff]  ;;  %v16338_v29 = vld [vmem:[#allocation220_spill] sm:$0xff] }
 0x42e   : > { %v14149_v14 = vrot.slane %v16321_v12, %v10934_v42  ;;  %v9615_v48 = vunpack.i.h.bf16 %v14047_v55  ;;  %v9614_v61 = vunpack.i.l.bf16 %v14047_v55  ;;  %v9600_v46 = vunpack.i.h.bf16 %v9598_v0  ;;  %v16329_v39 = vld [vmem:[#allocation225_spill] sm:$0xff] }
 0x42f   : > { %v14161_v37 = vrot.slane %v16323_v51, %v10934_v42  ;;  %v9599_v28 = vunpack.i.l.bf16 %v9598_v0  ;;  %v16324_v32 = vcombine.high %v16287_v41, %v13988_v3  ;;  %9817 = vrot.lane.b32.xlu0 %v14034_v16, %s10161_s25  ;;  %v16326_v53 = vunpack.i.h.bf16 %v13480_v45  ;;  %9306 = vmatprep.subr.bf16.mxu1 %v9305_v63  ;;  %v16333_v41 = vld [vmem:[#allocation103_spill] sm:$0xff]  ;;  %v16334_v20 = vld [vmem:[#allocation37_spill] sm:$0xff]  ;;  %v16336_v45 = vld [vmem:[#allocation96_spill] sm:$0xff] }
 0x430   : > { %v8064_v35 = vcombine.high %v16325_v34, %v14149_v14  ;;  %v7369_v13 = vcombine.low %v16329_v39, %v16328_v27  ;;  %v16332_v60 = vcombine.high %v16330_v19, %v16331_v31  ;;  %v16335_v30 = vunpack.i.h.bf16 %v16334_v20  ;;  %9308 = vmatpush1.bf16.msra.mxu1 %v9307_v56  ;;  %v16337_v0 = vld [vmem:[#allocation121_spill] sm:$0xff]  ;;  %v16339_v51 = vld [vmem:[#allocation167_spill] sm:$0xff] }
 0x431   : > { %8372 = vrot.lane.b32.xlu1 %v16324_v32, %s10160_s15  ;;  %v4407_v55 = vsel %vm2034_vm5, %v16327_v2, %v16326_v53  ;;  %v16340_v63 = vld [vmem:[#allocation49_spill] sm:$0xff]  ;;  %v3702_v40 = vsel %vm2032_vm4, %v3191_v44, %v9600_v46  ;;  %v3699_v2 = vsel %vm2032_vm4, %v3187_v57, %v9599_v28  ;;  %v14217_v32 = vpop.permute.xlu1 %9642  ;;  %v9604_v1 = vunpack.i.l.bf16 %v14001_v7  ;;  %v16368_v16 = vld [vmem:[#allocation131_spill] sm:$0xff] }
 0x432   : > { %v14187_v3 = vpack.i.bf16 %v7368_v6, %v16332_v60  ;;  %v4408_v11 = vsel %vm2036_vm6, %v4407_v55, %v9475_v58  ;;  %v4413_v12 = vsel %vm2034_vm5, %v16336_v45, %v16335_v30  ;;  %v16342_v6 = vld [vmem:[#allocation216_spill] sm:$0xff]  ;;  %v16343_v58 = vcombine.low %v16285_v5, %v16284_v10  ;;  %v16344_v20 = vld [vmem:[#allocation41_spill] sm:$0xff]  ;;  %v9608_v10 = vpop.permute.xlu0 %9607  ;;  %v16357_v60 = vld [vmem:[#allocation142_spill] sm:$0xff] }
 0x433   : > { %v16345_v30 = vld [vmem:[#allocation217_spill] sm:$0xff]  ;;  %9827 = vrot.lane.b32.xlu0 %v14065_v50, %s10160_s15  ;;  %v7370_v50 = vcombine.high %v16329_v39, %v16328_v27  ;;  %v9635_v27 = vunpack.i.h.bf16 %v14151_v59 }
 0x434   : > { %v3708_v55 = vsel %vm2032_vm4, %v16343_v58, %v9615_v48  ;;  %v16346_v56 = vcombine.low %v16344_v20, %v16345_v30  ;;  %v16347_v5 = vld [vmem:[#allocation21_spill] sm:$0xff]  ;;  %v16348_v48 = vld [vmem:[#allocation162_spill] sm:$0xff]  ;;  %v9610_v58 = vunpack.i.h.bf16 %v9608_v10  ;;  %v9609_v20 = vunpack.i.l.bf16 %v9608_v10 }
 0x435   : > { %9842 = vrot.lane.b32.xlu1 %v14054_v52, %s10159_s16  ;;  %v16350_v46 = vld [vmem:[#allocation33_spill] sm:$0xff]  ;;  %v9625_v52 = vunpack.i.h.bf16 %v14083_v36  ;;  %v9624_v30 = vunpack.i.l.bf16 %v14083_v36  ;;  %v16360_v36 = vld [vmem:[#allocation108_spill] sm:$0xff]  ;;  %v16363_v19 = vcombine.high %v16347_v5, %v16348_v48 }
 0x436   : > { %v3705_v45 = vsel %vm2032_vm4, %v16346_v56, %v9614_v61  ;;  %v16349_v61 = vcombine.low %v16347_v5, %v16348_v48  ;;  %v16351_v23 = vunpack.i.h.bf16 %v16350_v46  ;;  %v16352_v57 = vunpack.i.l.bf16 %v16350_v46  ;;  %v16353_v28 = vld [vmem:[#allocation165_spill] sm:$0xff]  ;;  %v9618_v39 = vpop.permute.xlu0 %9617  ;;  %v16372_v5 = vld [vmem:[#allocation44_spill] sm:$0xff] }
 0x437   : > { %v3703_v56 = vsel %vm2034_vm5, %v3702_v40, %v9605_v62  ;;  %9832 = vrot.lane.b32.xlu0 %v14132_v21, %s10160_s15  ;;  %v14256_v62 = vpop.permute.xlu1 %9652  ;;  %v9619_v31 = vunpack.i.l.bf16 %v9618_v39 }
 0x438   : > { %v14227_v44 = vpack.i.bf16 %v7369_v13, %v16349_v61  ;;  %v4414_v43 = vsel %vm2036_vm6, %v4413_v12, %v16351_v23  ;;  %v4411_v7 = vsel %vm2036_vm6, %v16353_v28, %v16352_v57  ;;  %v3700_v13 = vsel %vm2034_vm5, %v3699_v2, %v9604_v1  ;;  %v16354_v61 = vld [vmem:[#allocation129_spill] sm:$0xff]  ;;  %v16355_v12 = vld [vmem:[#allocation95_spill] sm:$0xff]  ;;  %v16361_v2 = vld [vmem:[#allocation222_spill] sm:$0xff] }
 0x439   : > { %v5832_v23 = vcombine.high %v16355_v12, %v16354_v61  ;;  %v3701_v46 = vsel %vm2036_vm6, %v3700_v13, %v9609_v20  ;;  %v3704_v57 = vsel %vm2036_vm6, %v3703_v56, %v9610_v58  ;;  %v16356_v28 = vld [vmem:[#allocation137_spill] sm:$0xff]  ;;  %9852 = vrot.lane.b32.xlu1 %v14119_v8, %s10161_s25  ;;  %v16362_v58 = vld [vmem:[#allocation70_spill] sm:$0xff]  ;;  %v9634_v13 = vunpack.i.l.bf16 %v14151_v59 }
 0x43a   : > { %v7366_v25 = vcombine.high %v16357_v60, %v16356_v28  ;;  %v9295_v1 = vpack.c.bf16 %v16360_v36, %v3701_v46  ;;  %v9293_v40 = vpack.c.bf16 %v4408_v11, %v3704_v57  ;;  %v5000_v20 = vcombine.high %v16362_v58, %v16361_v2  ;;  %v16366_v46 = vld [vmem:[#allocation151_spill] sm:$0xff]  ;;  %v16367_v36 = vld [vmem:[#allocation68_spill] sm:$0xff]  ;;  %v16369_v11 = vld [vmem:[#allocation98_spill] sm:$0xff] }
 0x43b   : > { %v9620_v56 = vunpack.i.h.bf16 %v9618_v39  ;;  %v14264_v8 = vpack.i.bf16 %v7370_v50, %v16363_v19  ;;  %v5001_v10 = vcombine.low %v16367_v36, %v16366_v46  ;;  %v5833_v57 = vcombine.low %v16369_v11, %v16368_v16  ;;  %v16373_v19 = vld [vmem:[#allocation188_spill] sm:$0xff]  ;;  %8376 = vrot.lane.b32.xlu0 %v8064_v35, %s10159_s16 }
 0x43c   : > { %9294 = vmatprep.subr.bf16.mxu0 %v9293_v40  ;;  %v14266_v21 = vpack.i.bf16 %v5832_v23, %v5000_v20  ;;  %v3706_v39 = vsel %vm2034_vm5, %v3705_v45, %v9619_v31  ;;  %v16374_v48 = vcombine.high %v16372_v5, %v16373_v19  ;;  %v16375_v23 = vld [vmem:[#allocation100_spill] sm:$0xff]  ;;  %v16390_v5 = vld [vmem:[#allocation22_spill] sm:$0xff] }
 0x43d   : > { %16364 = vst [vmem:[#allocation106_spill] sm:$0xff] %v14264_v8  ;;  %v3709_v59 = vsel %vm2034_vm5, %v3708_v55, %v9620_v56  ;;  %9296 = vmatpush1.bf16.msra.mxu0 %v9295_v1  ;;  %v16376_v40 = vld [vmem:[#allocation92_spill] sm:$0xff]  ;;  %v16379_v8 = vcombine.low %v16300_v18, %v16299_v47  ;;  %9862 = vrot.lane.b32.xlu1 %v14165_v26, %s10160_s15  ;;  %v16407_v47 = vld [vmem:[#allocation34_spill] sm:$0xff] }
 0x43e   : > { %16365 = vst [vmem:[#allocation163_spill] sm:$0xff] %v14266_v21  ;;  %v14279_v50 = vpack.i.bf16 %v7366_v25, %v16374_v48  ;;  %v16377_v20 = vcombine.low %v16375_v23, %v16376_v40  ;;  %v3710_v31 = vsel %vm2036_vm6, %v3709_v59, %v9625_v52  ;;  %v3707_v25 = vsel %vm2036_vm6, %v3706_v39, %v9624_v30  ;;  %v16385_v60 = vld [vmem:[#allocation136_spill] sm:$0xff]  ;;  %v16388_v59 = vld [vmem:[#allocation19_spill] sm:$0xff] }
 0x43f   : > { %v6067_v53 = vsel %vm2032_vm4, %v16379_v8, %v9635_v27  ;;  %v16380_v55 = vcombine.low %v16298_v9, %v16297_v33  ;;  %v9309_v1 = vpack.c.bf16 %v4414_v43, %v3710_v31  ;;  %v9311_v56 = vpack.c.bf16 %v4411_v7, %v3707_v25  ;;  %v9658_v27 = vpop.permute.xlu1 %9657  ;;  %v16386_v35 = vld [vmem:[#allocation152_spill] sm:$0xff]  ;;  %v16389_v39 = vld [vmem:[#allocation47_spill] sm:$0xff]  ;;  %v9628_v7 = vpop.permute.xlu0 %9627 }
 0x440   : > { %v14285_v21 = vrot.slane %v16377_v20, %v10934_v42  ;;  %v9645_v9 = vunpack.i.h.bf16 %v14217_v32  ;;  %v9644_v43 = vunpack.i.l.bf16 %v14217_v32  ;;  %v16395_v30 = vcombine.low %v16333_v41, %v14161_v37  ;;  %v16402_v48 = vld [vmem:[#allocation39_spill] sm:$0xff] }
 0x441   : > { %v5235_v45 = vsel %vm2032_vm4, %v16380_v55, %v9634_v13  ;;  %9310 = vmatprep.subr.bf16.mxu1 %v9309_v1  ;;  %9867 = vrot.lane.b32.xlu1 %v14187_v3, %s10159_s16  ;;  %v9846_v33 = vpack.i.bf16 %v5833_v57, %v5001_v10  ;;  %v9655_v25 = vunpack.i.h.bf16 %v14256_v62  ;;  %v9654_v13 = vunpack.i.l.bf16 %v14256_v62  ;;  %v16401_v57 = vld [vmem:[#allocation101_spill] sm:$0xff]  ;;  %v16405_v62 = vld [vmem:[#allocation67_spill] sm:$0xff] }
 0x442   : > { %16378 = vst [vmem:[#allocation183_spill] sm:$0xff] %v14285_v21  ;;  %8380 = vrot.lane.b32.xlu0 %v16395_v30, %s10161_s25  ;;  %9312 = vmatpush1.bf16.msra.mxu1 %v9311_v56  ;;  %v5834_v3 = vcombine.high %v16369_v11, %v16368_v16  ;;  %v9660_v18 = vunpack.i.h.bf16 %v9658_v27  ;;  %v16400_v10 = vpack.c.bf16 %v14106_v49, %v14101_v4  ;;  %v16406_v56 = vld [vmem:[#allocation52_spill] sm:$0xff]  ;;  %v16408_v16 = vld [vmem:[#allocation135_spill] sm:$0xff]  ;;  %v9629_v31 = vunpack.i.l.bf16 %v9628_v7  ;;  %v16410_v49 = vld [vmem:[#allocation89_spill] sm:$0xff] }
 0x443   : > { %v9668_v30 = vpop.permute.xlu1 %9667  ;;  %v16403_v32 = vcombine.low %v16401_v57, %v16402_v48  ;;  %v5236_v55 = vsel %vm2034_vm5, %v5235_v45, %v9644_v43  ;;  %v6068_v26 = vsel %vm2034_vm5, %v6067_v53, %v9645_v9  ;;  %v9638_v8 = vpop.permute.xlu0 %9637  ;;  %v16409_v4 = vld [vmem:[#allocation23_spill] sm:$0xff]  ;;  %v9659_v20 = vunpack.i.l.bf16 %v9658_v27  ;;  %v16412_v1 = vld [vmem:[#allocation73_spill] sm:$0xff] }
 0x444   : > { %9314 = vmatprep.subr.bf16.mxu1 %v16400_v10  ;;  %v9630_v52 = vunpack.i.h.bf16 %v9628_v7  ;;  %v9639_v11 = vunpack.i.l.bf16 %v9638_v8  ;;  %v16413_v45 = vld [vmem:[#allocation65_spill] sm:$0xff]  ;;  %v5237_v53 = vsel %vm2036_vm6, %v5236_v55, %v9654_v13  ;;  %v6069_v9 = vsel %vm2036_vm6, %v6068_v26, %v9655_v25 }
 0x445   : > { %v14339_v28 = vrot.slane %v16403_v32, %v10934_v42  ;;  %9877 = vrot.lane.b32.xlu1 %v14227_v44, %s10161_s25  ;;  %v16411_v32 = vcombine.high %v16333_v41, %v14161_v37  ;;  %v16414_v27 = vpack.c.bf16 %v14127_v22, %v14124_v17  ;;  %v16415_v37 = vcombine.low %v16338_v29, %v16337_v0  ;;  %v16417_v0 = vld [vmem:[#allocation176_spill] sm:$0xff]  ;;  %v16418_v29 = vld [vmem:[#allocation186_spill] sm:$0xff] }
 0x446   : > { %v16416_v17 = vcombine.low %v16340_v63, %v16339_v51  ;;  %v9670_v25 = vunpack.i.h.bf16 %v9668_v30  ;;  %v9669_v55 = vunpack.i.l.bf16 %v9668_v30  ;;  %v16422_v51 = vld [vmem:[#allocation106_spill] sm:$0xff]  ;;  %v16423_v63 = vld [vmem:[#allocation163_spill] sm:$0xff] }
 0x447   : > { %16404 = vst [vmem:[#allocation112_spill] sm:$0xff] %v14339_v28  ;;  %8384 = vrot.lane.b32.xlu0 %v16411_v32, %s10160_s15  ;;  %9316 = vmatpush1.bf16.msra.mxu1 %v16414_v27  ;;  %v7606_v41 = vsel %vm2032_vm4, %v16415_v37, %v9660_v18  ;;  %v9640_v32 = vunpack.i.h.bf16 %v9638_v8  ;;  %v16419_v18 = vcombine.low %v16417_v0, %v16418_v29  ;;  %v16420_v37 = vld [vmem:[#allocation24_spill] sm:$0xff]  ;;  %v9648_v30 = vpop.permute.xlu0 %9647 }
 0x448   : > { %v5238_v22 = vsel %vm2032_vm4, %v16416_v17, %v9629_v31  ;;  %v16421_v13 = vcombine.low %v16342_v6, %v16420_v37  ;;  %v9678_v31 = vpop.permute.xlu1 %9677  ;;  %v9650_v0 = vunpack.i.h.bf16 %v9648_v30  ;;  %v9649_v29 = vunpack.i.l.bf16 %v9648_v30  ;;  %v16424_v6 = vld [vmem:[#allocation179_spill] sm:$0xff] }
 0x449   : > { %v6774_v8 = vsel %vm2032_vm4, %v16419_v18, %v9659_v20  ;;  %v5239_v7 = vsel %vm2034_vm5, %v5238_v22, %v9639_v11  ;;  %9887 = vrot.lane.b32.xlu1 %v16422_v51, %s10160_s15  ;;  %v9680_v17 = vunpack.i.h.bf16 %v9678_v31  ;;  %v9679_v27 = vunpack.i.l.bf16 %v9678_v31  ;;  %v16427_v22 = vld [vmem:[#allocation141_spill] sm:$0xff] }
 0x44a   : > { %v6070_v26 = vsel %vm2032_vm4, %v16421_v13, %v9630_v52  ;;  %v16425_v52 = vld [vmem:[#allocation157_spill] sm:$0xff]  ;;  %v6775_v51 = vsel %vm2034_vm5, %v6774_v8, %v9669_v55  ;;  %v5240_v43 = vsel %vm2036_vm6, %v5239_v7, %v9649_v29  ;;  %v8164_v55 = vcombine.high %v16401_v57, %v16402_v48  ;;  %v16430_v29 = vld [vmem:[#allocation146_spill] sm:$0xff] }
 0x44b   : > { %9837 = vrot.lane.b32.xlu0 %v16423_v63, %s10159_s16  ;;  %v6071_v20 = vsel %vm2034_vm5, %v6070_v26, %v9640_v32  ;;  %v16426_v13 = vld [vmem:[#allocation213_spill] sm:$0xff]  ;;  %v7607_v63 = vsel %vm2034_vm5, %v7606_v41, %v9670_v25  ;;  %v6776_v30 = vsel %vm2036_vm6, %v6775_v51, %v9679_v27  ;;  %v9299_v8 = vpack.c.bf16 %v6069_v9, %v5237_v53  ;;  %v9663_v41 = vpop.permute.xlu0 %9662  ;;  %v16431_v53 = vld [vmem:[#allocation208_spill] sm:$0xff]  ;;  %v16432_v9 = vld [vmem:[#allocation207_spill] sm:$0xff] }
 0x44c   : > { %v6072_v31 = vsel %vm2036_vm6, %v6071_v20, %v9650_v0  ;;  %v9683_v32 = vpop.permute.xlu1 %9682  ;;  %v7608_v11 = vsel %vm2036_vm6, %v7607_v63, %v9680_v17  ;;  %v8200_v7 = vcombine.high %v16424_v6, %v14285_v21  ;;  %v16428_v25 = vcombine.high %v16367_v36, %v16366_v46  ;;  %v16429_v0 = vld [vmem:[#allocation227_spill] sm:$0xff]  ;;  %v16433_v36 = vld [vmem:[#allocation145_spill] sm:$0xff] }
 0x44d   : > { %9892 = vrot.lane.b32.xlu1 %v14279_v50, %s10160_s15  ;;  %v9297_v26 = vpack.c.bf16 %v6072_v31, %v5240_v43  ;;  %v9665_v43 = vunpack.i.h.bf16 %v9663_v41  ;;  %v9664_v27 = vunpack.i.l.bf16 %v9663_v41  ;;  %v9301_v17 = vpack.c.bf16 %v7608_v11, %v6776_v30  ;;  %v16436_v11 = vld [vmem:[#allocation36_spill] sm:$0xff]  ;;  %v16437_v31 = vld [vmem:[#allocation218_spill] sm:$0xff]  ;;  %v16438_v41 = vld [vmem:[#allocation137_spill] sm:$0xff] }
 0x44e   : > { %v9856_v50 = vpack.i.bf16 %v5834_v3, %v16428_v25  ;;  %v8148_v48 = vcombine.high %v16430_v29, %v16429_v0  ;;  %v6532_v46 = vcombine.high %v16432_v9, %v16431_v53  ;;  %v16434_v3 = vld [vmem:[#allocation109_spill] sm:$0xff]  ;;  %v8180_v63 = vcombine.high %v16375_v23, %v16376_v40  ;;  %v16440_v40 = vld [vmem:[#allocation199_spill] sm:$0xff] }
 0x44f   : > { %9847 = vrot.lane.b32.xlu0 %v9846_v33, %s10161_s25  ;;  %9298 = vmatprep.subr.bf16.mxu0 %v9297_v26  ;;  %v7364_v33 = vcombine.high %v16427_v22, %v16426_v13  ;;  %v16435_v20 = vcombine.high %v16433_v36, %v16434_v3  ;;  %v7091_v26 = vcombine.low %v16437_v31, %v16436_v11  ;;  %v9673_v30 = vpop.permute.xlu0 %9672  ;;  %v9685_v3 = vunpack.i.h.bf16 %v9683_v32  ;;  %v16441_v18 = vld [vmem:[#allocation193_spill] sm:$0xff] }
 0x450   : > { %9300 = vmatpush1.bf16.msra.mxu0 %v9299_v8  ;;  %v8353_v57 = vpop.permute.xlu1 %8352  ;;  %v8178_v8 = vrot.slane %v8164_v55, %v10934_v42  ;;  %v9674_v0 = vunpack.i.l.bf16 %v9673_v30  ;;  %v8196_v29 = vcombine.high %v16425_v52, %v14339_v28  ;;  %v16442_v11 = vcombine.low %v16440_v40, %v16441_v18  ;;  %v16487_v28 = vld [vmem:[#allocation156_spill] sm:$0xff]  ;;  %v16492_v53 = vld [vmem:[#allocation169_spill] sm:$0xff] }
 0x451   : > { %8400 = vrot.lane.b32.xlu1 %v8200_v7, %s10159_s16  ;;  %v8146_v51 = vrot.slane %v16435_v20, %v10934_v42  ;;  %9302 = vmatprep.subr.bf16.mxu0 %v9301_v17  ;;  %v16439_v7 = vld [vmem:[#allocation142_spill] sm:$0xff]  ;;  %v9871_v36 = vpack.i.bf16 %v7364_v33, %v6532_v46  ;;  %v9684_v20 = vunpack.i.l.bf16 %v9683_v32  ;;  %v7603_v23 = vsel %vm2032_vm4, %v7091_v26, %v9665_v43 }
 0x452   : > { %v7365_v25 = vcombine.low %v16439_v7, %v16438_v41  ;;  %v6771_v17 = vsel %vm2032_vm4, %v16442_v11, %v9664_v27  ;;  %v8194_v7 = vrot.slane %v8180_v63, %v10934_v42  ;;  %v16446_v11 = vld [vmem:[#allocation160_spill] sm:$0xff] }
 0x453   : > { %9857 = vrot.lane.b32.xlu0 %v9856_v50, %s10160_s15  ;;  %v9675_v50 = vunpack.i.h.bf16 %v9673_v30  ;;  %v6772_v55 = vsel %vm2034_vm5, %v6771_v17, %v9674_v0  ;;  %v16443_v30 = vld [vmem:[#allocation44_spill] sm:$0xff]  ;;  %v8357_v26 = vpop.permute.xlu0 %8356  ;;  %v8197_v18 = vcombine.low %v8146_v51, %v8178_v8  ;;  %v16444_v0 = vld [vmem:[#allocation58_spill] sm:$0xff] }
 0x454   : > { %v6533_v33 = vcombine.low %v16443_v30, %v16373_v19  ;;  %v8341_v46 = vpop.permute.xlu1 %8340  ;;  %v6773_v32 = vsel %vm2036_vm6, %v6772_v55, %v9684_v20  ;;  %v8162_v19 = vrot.slane %v8148_v48, %v10934_v42  ;;  %v16447_v63 = vld [vmem:[#allocation88_spill] sm:$0xff] }
 0x455   : > { %v7604_v31 = vsel %vm2034_vm5, %v7603_v23, %v9675_v50  ;;  %8388 = vrot.lane.b32.xlu1 %v8196_v29, %s10159_s16  ;;  %v16445_v50 = vld [vmem:[#allocation90_spill] sm:$0xff]  ;;  %v7923_v17 = vcombine.low %v16447_v63, %v16446_v11 }
 0x456   : > { %v7605_v43 = vsel %vm2036_vm6, %v7604_v31, %v9685_v3  ;;  %v9881_v41 = vpack.i.bf16 %v7365_v25, %v6533_v33  ;;  %v7927_v23 = vcombine.low %v16445_v50, %v16444_v0  ;;  %v8198_v25 = vcombine.high %v8146_v51, %v8178_v8  ;;  %v14469_v33 = vld [vmem:[%s14948_s4] sm:$0xf]  ;;  %v16453_v0 = vld [vmem:[#allocation26_spill] sm:$0xff] }
 0x457   : > { %9872 = vrot.lane.b32.xlu0 %v9871_v36, %s10159_s16  ;;  %v9303_v27 = vpack.c.bf16 %v7605_v43, %v6773_v32  ;;  %v8361_v20 = vpop.permute.xlu0 %8360  ;;  %v8201_v40 = vcombine.low %v8162_v19, %v8194_v7  ;;  %v10162_v31 = vmov 0   ;;  %v8435_v42 = vsel %vm2032_vm4, %v7923_v17, %v8341_v46  ;;  %v16454_v50 = vld [vmem:[#allocation134_spill] sm:$0xff]  ;;  %v16456_v17 = vld [vmem:[#allocation177_spill] sm:$0xff]  ;;  %s10077_s16 = scalar_lea.vmem %s8924_s19, 512 }
 0x458   : > { %v8438_v29 = vsel %vm2032_vm4, %v7927_v23, %v8353_v57  ;;  %v8345_v3 = vpop.permute.xlu1 %8344  ;;  %9896 = vset.pattern.permute.xlu0 %v10162_v31  ;;  %v8202_v51 = vcombine.high %v8162_v19, %v8194_v7  ;;  %v5967_v23 = vcombine.low %v16454_v50, %v16453_v0  ;;  %p10078_p13 = scmp.ne.s32.totalorder %s8924_s19, %s10077_s16 }
 0x459   : > { %8392 = vrot.lane.b32.xlu1 %v8197_v18, %s10161_s25  ;;  %9304 = vmatpush1.bf16.msra.mxu0 %v9303_v27  ;;  %v8439_v36 = vsel %vm2034_vm5, %v8438_v29, %v8357_v26  ;;  %v8436_v48 = vsel %vm2034_vm5, %v8435_v42, %v8345_v3  ;;  %v16448_v26 = vld [vmem:[#allocation147_spill] sm:$0xff]  ;;  %v16449_v18 = vld [vmem:[#allocation74_spill] sm:$0xff] }
 0x45a   : > { %v8440_v55 = vsel %vm2036_vm6, %v8439_v36, %v8361_v20  ;;  %v16450_v46 = vcombine.high %v16448_v26, %v16449_v18  ;;  %v16452_v27 = vld [vmem:[#allocation214_spill] sm:$0xff]  ;;  %v16455_v20 = vmov 0.0   ;;  %p10079_p12 = pnand %p10078_p13, %p16572_p1 }
 0x45b   : > { %9882 = vrot.lane.b32.xlu0 %v9881_v41, %s10161_s25  ;;  %8566 = vmatprep.subr.mxu0 %v8440_v55  ;;  %v9688_v30 = vpop.permute.xlu0 %9687  ;;  %v16451_v41 = vld [vmem:[#allocation82_spill] sm:$0xff] }
 0x45c   : > { %v8349_v57 = vpop.permute.xlu1 %8348  ;;  %v9690_v32 = vunpack.i.h.bf16 %v9688_v30  ;;  %v9689_v43 = vunpack.i.l.bf16 %v9688_v30  ;;  %v5135_v7 = vcombine.low %v16452_v27, %v16451_v41  ;;  %v16457_v55 = vld [vmem:[#allocation158_spill] sm:$0xff]  ;;  %v16459_v30 = vld [vmem:[#allocation61_spill] sm:$0xff]  ;;  %p10080_p10 = pneg %p10079_p12 }
 0x45d   : > { %8396 = vrot.lane.b32.xlu1 %v8198_v25, %s10160_s15  ;;  %v8437_v8 = vsel %vm2036_vm6, %v8436_v48, %v8349_v57  ;;  %v16458_v31 = vcombine.high %v16456_v17, %v16457_v55  ;;  %v8540_v57 = vld [vmem:[%s14949_s5] sm:$0xf] }
 0x45e   : > { %8567 = vmatpush1.msra.mxu0 %v8437_v8  ;;  %v6088_v25 = vsel %vm2032_vm4, %v5967_v23, %v9690_v32  ;;  %v16461_v32 = vld [vmem:[#allocation28_spill] sm:$0xff] }
 0x45f   : > { %8404 = vrot.lane.b32.xlu0 %v8201_v40, %s10161_s25  ;;  %v9693_v29 = vpop.permute.xlu0 %9692  ;;  %9117 = vmatmul.mubr.msk.f32.vlgmr.msra.gmra.mrb[16].mxu0 %vm8546_vm7, %v14469_v33  ;;  %v5256_v40 = vsel %vm2032_vm4, %v5135_v7, %v9689_v43  ;;  %v16462_v43 = vld [vmem:[#allocation99_spill] sm:$0xff] }
 0x460   : > { %v9698_v19 = vpop.permute.xlu1 %9697  ;;  %8756 = vmatprep.mubr.f32.mxu0 %v16455_v20  ;;  %v9695_v11 = vunpack.i.h.bf16 %v9693_v29  ;;  %v9694_v63 = vunpack.i.l.bf16 %v9693_v29  ;;  %v5963_v26 = vcombine.low %v16462_v43, %v16461_v32  ;;  %v16466_v32 = vld [vmem:[#allocation31_spill] sm:$0xff]  ;;  %v16467_v43 = vld [vmem:[#allocation226_spill] sm:$0xff] }
 0x461   : > { %8420 = vrot.lane.b32.xlu1 %v16450_v46, %s10160_s15  ;;  %v9700_v36 = vunpack.i.h.bf16 %v9698_v19  ;;  %v9699_v3 = vunpack.i.l.bf16 %v9698_v19 }
 0x462   : > { %v6085_v50 = vsel %vm2032_vm4, %v5963_v26, %v9695_v11  ;;  %v7499_v26 = vcombine.low %v16467_v43, %v16466_v32 }
 0x463   : > { %8408 = vrot.lane.b32.xlu0 %v8202_v51, %s10160_s15  ;;  %v5257_v42 = vsel %vm2034_vm5, %v5256_v40, %v9699_v3  ;;  %v6089_v48 = vsel %vm2034_vm5, %v6088_v25, %v9700_v36  ;;  %v16460_v51 = vld [vmem:[#allocation69_spill] sm:$0xff]  ;;  %v9703_v46 = vpop.permute.xlu0 %9702 }
 0x464   : > { %v5131_v8 = vcombine.low %v16460_v51, %v16459_v30  ;;  %v9708_v18 = vpop.permute.xlu1 %9707  ;;  %v9705_v7 = vunpack.i.h.bf16 %v9703_v46  ;;  %v9704_v0 = vunpack.i.l.bf16 %v9703_v46  ;;  %v16464_v30 = vld [vmem:[#allocation194_spill] sm:$0xff] }
 0x465   : > { %v9710_v41 = vunpack.i.h.bf16 %v9708_v18  ;;  %v9709_v27 = vunpack.i.l.bf16 %v9708_v18  ;;  %v16485_v18 = vld [vmem:[#allocation212_spill] sm:$0xff] }
 0x466   : > { %v5253_v23 = vsel %vm2032_vm4, %v5131_v8, %v9694_v63  ;;  %v6086_v29 = vsel %vm2034_vm5, %v6085_v50, %v9705_v7  ;;  %v9480_v17 = vunpack.i.h.bf16 %v16485_v18 }
 0x467   : > { %8432 = vrot.lane.b32.xlu0 %v16458_v31, %s10160_s15  ;;  %v5254_v19 = vsel %vm2034_vm5, %v5253_v23, %v9704_v0  ;;  %v14503_v36 = vsel %vm2036_vm6, %v5257_v42, %v9709_v27  ;;  %v14506_v3 = vsel %vm2036_vm6, %v6089_v48, %v9710_v41  ;;  %v9713_v40 = vpop.permute.xlu0 %9712  ;;  %s10163_s15 = smov [#allocation9]  }
 0x468   : > { %v9723_v25 = vpop.permute.xlu1 %9722  ;;  %v9715_v11 = vunpack.i.h.bf16 %v9713_v40  ;;  %v9714_v31 = vunpack.i.l.bf16 %v9713_v40  ;;  %v16469_v40 = vld [vmem:[#allocation195_spill] sm:$0xff]  ;;  %s10081_s25 = sshll.u32 %s10163_s15, 4  ;;  %s10082_s25 = int_to_ptr.vmem [resolvable:$false] %s10081_s25 }
 0x469   : > { %v9724_v55 = vunpack.i.l.bf16 %v9723_v25  ;;  %v9725_v63 = vunpack.i.h.bf16 %v9723_v25  ;;  %s10083_s22 = scalar_lea.vmem %s10082_s25, 1024  ;;  %p10084_p5 = scmp.lt.s32.totalorder %s8924_s19, %s10082_s25 }
 0x46a   : > { %v14515_v42 = vsel %vm2036_vm6, %v5254_v19, %v9714_v31  ;;  %v14518_v48 = vsel %vm2036_vm6, %v6086_v29, %v9715_v11  ;;  %v16468_v29 = vld [vmem:[#allocation203_spill] sm:$0xff]  ;;  %v16471_v31 = vld [vmem:[#allocation46_spill] sm:$0xff]  ;;  %p10085_p7 = scmp.lt.s32.totalorder %s10083_s22, %s10077_s16 }
 0x46b   : > { %8543 = vperm.xlu0 %9896, %v8540_v57   ;;  %v16463_v57 = vld [vmem:[#allocation202_spill] sm:$0xff]  ;;  %v9718_v41 = vpop.permute.xlu0 %9717  ;;  %v7621_v50 = vsel %vm2032_vm4, %v7499_v26, %v9725_v63  ;;  %v16473_v63 = vld [vmem:[#allocation127_spill] sm:$0xff] }
 0x46c   : > { %v16465_v51 = vcombine.low %v16463_v57, %v16464_v30  ;;  %v9733_v46 = vpop.permute.xlu1 %9732  ;;  %v9719_v0 = vunpack.i.l.bf16 %v9718_v41  ;;  %v9720_v23 = vunpack.i.h.bf16 %v9718_v41  ;;  %v16472_v57 = vld [vmem:[#allocation110_spill] sm:$0xff]  ;;  %p10086_p9 = por %p10085_p7, %p10084_p5 }
 0x46d   : > { %v9735_v27 = vunpack.i.h.bf16 %v9733_v46  ;;  %v9734_v7 = vunpack.i.l.bf16 %v9733_v46  ;;  %v7503_v30 = vcombine.low %v16472_v57, %v16471_v31  ;;  %v16474_v26 = vld [vmem:[#allocation150_spill] sm:$0xff] }
 0x46e   : > { %v6789_v8 = vsel %vm2032_vm4, %v16465_v51, %v9724_v55  ;;  %v16470_v55 = vcombine.low %v16468_v29, %v16469_v40  ;;  %v8331_v41 = vcombine.low %v16474_v26, %v16473_v63  ;;  %p10087_p11 = pnand %p10086_p9, %p10080_p10 }
 0x46f   : > { %v6790_v19 = vsel %vm2034_vm5, %v6789_v8, %v9734_v7  ;;  %v7622_v25 = vsel %vm2034_vm5, %v7621_v50, %v9735_v27  ;;  %v9728_v32 = vpop.permute.xlu0 %9727  ;;  %v7624_v37 = vsel %vm2032_vm4, %v7503_v30, %v9720_v23 }
 0x470   : > { %v6792_v11 = vsel %vm2032_vm4, %v16470_v55, %v9719_v0  ;;  %v8413_v51 = vpop.permute.xlu1 %8412  ;;  %v9730_v43 = vunpack.i.h.bf16 %v9728_v32  ;;  %v9729_v46 = vunpack.i.l.bf16 %v9728_v32 }
 0x471   : > { %v8453_v7 = vsel %vm2032_vm4, %v8331_v41, %v8413_v51  ;;  %v16476_v41 = vcombine.low %v16386_v35, %v16385_v60 }
 0x472   : > { %v6793_v8 = vsel %vm2034_vm5, %v6792_v11, %v9729_v46  ;;  %v7625_v27 = vsel %vm2034_vm5, %v7624_v37, %v9730_v43  ;;  %v16482_v46 = vld [vmem:[#allocation155_spill] sm:$0xff] }
 0x474   : > { %v8417_v50 = vpop.permute.xlu1 %8416 }
 0x475   : > { %v9738_v0 = vpop.permute.xlu0 %9737  ;;  %v14540_v29 = vsel %vm2034_vm5, %v8453_v7, %v8417_v50 }
 0x476   : > { %16475 = vst [vmem:[#allocation125_spill] sm:$0xff] %v14540_v29  ;;  %v9740_v40 = vunpack.i.h.bf16 %v9738_v0  ;;  %v9739_v55 = vunpack.i.l.bf16 %v9738_v0 }
 0x478   : > { %v14543_v31 = vsel %vm2036_vm6, %v6793_v8, %v9739_v55  ;;  %v14546_v23 = vsel %vm2036_vm6, %v7625_v27, %v9740_v40  ;;  %v9753_v57 = vpop.permute.xlu1 %9752  ;;  %v16477_v27 = vld [vmem:[#allocation161_spill] sm:$0xff] }
 0x479   : > { %v9743_v30 = vpop.permute.xlu0 %9742  ;;  %v9494_v7 = vunpack.i.l.bf16 %v16477_v27  ;;  %v9495_v55 = vunpack.i.h.bf16 %v16477_v27 }
 0x47a   : > { %v9745_v11 = vunpack.i.h.bf16 %v9743_v30  ;;  %v9744_v51 = vunpack.i.l.bf16 %v9743_v30  ;;  %v16480_v30 = vld [vmem:[#allocation81_spill] sm:$0xff] }
 0x47b   : > { %v9509_v35 = vunpack.i.l.bf16 %v16480_v30 }
 0x47c   : > { %v14551_v32 = vsel %vm2036_vm6, %v7622_v25, %v9745_v11  ;;  %v14554_v43 = vsel %vm2036_vm6, %v6790_v19, %v9744_v51  ;;  %v9763_v63 = vpop.permute.xlu1 %9762  ;;  %v16479_v19 = vld [vmem:[#allocation219_spill] sm:$0xff]  ;;  %v9510_v11 = vunpack.i.h.bf16 %v16480_v30  ;;  %v16481_v51 = vld [vmem:[#allocation153_spill] sm:$0xff]  ;;  %v16490_v30 = vld [vmem:[#allocation180_spill] sm:$0xff] }
 0x47d   : > { %v8425_v26 = vpop.permute.xlu0 %8424  ;;  %v9499_v40 = vunpack.i.l.bf16 %v16479_v19  ;;  %v16483_v37 = vcombine.low %v16481_v51, %v16482_v46  ;;  %v9500_v27 = vunpack.i.h.bf16 %v16479_v19 }
 0x47e   : > { %v8456_v8 = vsel %vm2032_vm4, %v16476_v41, %v8425_v26  ;;  %v16484_v26 = vld [vmem:[#allocation84_spill] sm:$0xff] }
 0x47f   : > { %v2047_v60 = vsel %vm2032_vm4, %v16483_v37, %v9494_v7  ;;  %v9504_v41 = vunpack.i.l.bf16 %v16484_v26  ;;  %v16489_v7 = vld [vmem:[#allocation173_spill] sm:$0xff]  ;;  %v9505_v21 = vunpack.i.h.bf16 %v16484_v26  ;;  %v16498_v26 = vld [vmem:[#allocation86_spill] sm:$0xff] }
 0x480   : > { %v14563_v50 = vpop.permute.xlu1 %9772  ;;  %v16491_v51 = vcombine.low %v16489_v7, %v16490_v30  ;;  %v2048_v6 = vsel %vm2034_vm5, %v2047_v60, %v9499_v40  ;;  %v9520_v7 = vunpack.i.h.bf16 %v16498_v26  ;;  %v16499_v40 = vld [vmem:[#allocation93_spill] sm:$0xff]  ;;  %v9755_v30 = vunpack.i.h.bf16 %v9753_v57 }
 0x481   : > { %v8429_v0 = vpop.permute.xlu0 %8428  ;;  %v9514_v60 = vunpack.i.l.bf16 %v16499_v40 }
 0x482   : > { %v14566_v25 = vsel %vm2034_vm5, %v8456_v8, %v8429_v0  ;;  %v9479_v0 = vunpack.i.l.bf16 %v16485_v18  ;;  %v2056_v52 = vsel %vm2032_vm4, %v16491_v51, %v9510_v11  ;;  %v16493_v18 = vld [vmem:[#allocation178_spill] sm:$0xff] }
 0x483   : > { %16478 = vst [vmem:[#allocation111_spill] sm:$0xff] %v14566_v25  ;;  %v16486_v25 = vld [vmem:[#allocation154_spill] sm:$0xff]  ;;  %v16494_v9 = vcombine.low %v16492_v53, %v16493_v18  ;;  %v9754_v53 = vunpack.i.l.bf16 %v9753_v57  ;;  %v9519_v18 = vunpack.i.l.bf16 %v16498_v26 }
 0x484   : > { %v14578_v44 = vpop.permute.xlu1 %9782  ;;  %v16488_v46 = vcombine.low %v16486_v25, %v16487_v28  ;;  %v16495_v28 = vcombine.low %v16390_v5, %v16389_v39 }
 0x485   : > { %v9748_v8 = vpop.permute.xlu0 %9747  ;;  %v2053_v19 = vsel %vm2032_vm4, %v16494_v9, %v9509_v35 }
 0x486   : > { %v9750_v10 = vunpack.i.h.bf16 %v9748_v8  ;;  %v9749_v29 = vunpack.i.l.bf16 %v9748_v8  ;;  %v2050_v37 = vsel %vm2032_vm4, %v16488_v46, %v9495_v55  ;;  %v2049_v8 = vsel %vm2036_vm6, %v2048_v6, %v9504_v41  ;;  %v16496_v55 = vld [vmem:[#allocation55_spill] sm:$0xff] }
 0x487   : > { %v16497_v46 = vcombine.low %v16388_v59, %v16496_v55  ;;  %v9515_v6 = vunpack.i.h.bf16 %v16499_v40  ;;  %v2051_v39 = vsel %vm2034_vm5, %v2050_v37, %v9500_v27  ;;  %v9764_v41 = vunpack.i.l.bf16 %v9763_v63  ;;  %v16500_v40 = vld [vmem:[#allocation102_spill] sm:$0xff] }
 0x488   : > { %v2882_v25 = vsel %vm2032_vm4, %v16495_v28, %v9750_v10  ;;  %v14607_v51 = vpop.permute.xlu1 %9792  ;;  %v9765_v10 = vunpack.i.h.bf16 %v9763_v63  ;;  %v2052_v57 = vsel %vm2036_vm6, %v2051_v39, %v9505_v21  ;;  %v16504_v39 = vld [vmem:[#allocation17_spill] sm:$0xff] }
 0x489   : > { %v2879_v11 = vsel %vm2032_vm4, %v16497_v46, %v9749_v29  ;;  %v9758_v9 = vpop.permute.xlu0 %9757  ;;  %v2883_v29 = vsel %vm2034_vm5, %v2882_v25, %v9755_v30  ;;  %v2054_v46 = vsel %vm2034_vm5, %v2053_v19, %v9514_v60  ;;  %v2057_v26 = vsel %vm2034_vm5, %v2056_v52, %v9515_v6  ;;  %v16505_v19 = vld [vmem:[#allocation62_spill] sm:$0xff]  ;;  %v16510_v6 = vld [vmem:[#allocation119_spill] sm:$0xff] }
 0x48a   : > { %v9760_v35 = vunpack.i.h.bf16 %v9758_v9  ;;  %v9759_v5 = vunpack.i.l.bf16 %v9758_v9  ;;  %v2880_v59 = vsel %vm2034_vm5, %v2879_v11, %v9754_v53  ;;  %v9525_v9 = vunpack.i.h.bf16 %v16500_v40  ;;  %v16501_v53 = vld [vmem:[#allocation40_spill] sm:$0xff] }
 0x48b   : > { %v9524_v11 = vunpack.i.l.bf16 %v16500_v40  ;;  %v16506_v60 = vcombine.low %v16504_v39, %v16505_v19  ;;  %v16511_v40 = vld [vmem:[#allocation148_spill] sm:$0xff] }
 0x48c   : > { %v2881_v28 = vsel %vm2036_vm6, %v2880_v59, %v9759_v5  ;;  %v2884_v55 = vsel %vm2036_vm6, %v2883_v29, %v9760_v35  ;;  %v14619_v27 = vpop.permute.xlu1 %9802  ;;  %v16502_v5 = vld [vmem:[#allocation57_spill] sm:$0xff]  ;;  %v9775_v59 = vunpack.i.h.bf16 %v14563_v50  ;;  %v9774_v29 = vunpack.i.l.bf16 %v14563_v50 }
 0x48d   : > { %v9323_v13 = vpack.c.bf16 %v2881_v28, %v2049_v8  ;;  %v9768_v63 = vpop.permute.xlu0 %9767  ;;  %v9321_v37 = vpack.c.bf16 %v2884_v55, %v2052_v57  ;;  %v16503_v21 = vcombine.low %v16501_v53, %v16502_v5  ;;  %v2885_v8 = vsel %vm2032_vm4, %v16506_v60, %v9764_v41  ;;  %v16507_v28 = vld [vmem:[#allocation120_spill] sm:$0xff]  ;;  %v16508_v57 = vld [vmem:[#allocation149_spill] sm:$0xff]  ;;  %v16513_v41 = vld [vmem:[#allocation94_spill] sm:$0xff] }
 0x48e   : > { %v9770_v25 = vunpack.i.h.bf16 %v9768_v63  ;;  %v9769_v30 = vunpack.i.l.bf16 %v9768_v63  ;;  %v16509_v55 = vcombine.low %v16507_v28, %v16508_v57  ;;  %v16512_v63 = vcombine.low %v16510_v6, %v16511_v40  ;;  %v16517_v57 = vld [vmem:[#allocation174_spill] sm:$0xff] }
 0x48f   : > { %v2888_v35 = vsel %vm2032_vm4, %v16503_v21, %v9765_v10  ;;  %9322 = vmatprep.subr.bf16.mxu0 %v9321_v37  ;;  %v9530_v21 = vunpack.i.h.bf16 %v16513_v41  ;;  %v9529_v50 = vunpack.i.l.bf16 %v16513_v41  ;;  %v16525_v41 = vld [vmem:[#allocation171_spill] sm:$0xff] }
 0x490   : > { %v4424_v52 = vsel %vm2032_vm4, %v16509_v55, %v9480_v17  ;;  %v4421_v10 = vsel %vm2032_vm4, %v16512_v63, %v9479_v0  ;;  %v2889_v53 = vsel %vm2034_vm5, %v2888_v35, %v9770_v25  ;;  %v2886_v5 = vsel %vm2034_vm5, %v2885_v8, %v9769_v30  ;;  %9324 = vmatpush1.bf16.msra.mxu0 %v9323_v13  ;;  %v14645_v37 = vpop.permute.xlu1 %9812  ;;  %v16514_v30 = vld [vmem:[#allocation175_spill] sm:$0xff]  ;;  %v16515_v35 = vld [vmem:[#allocation182_spill] sm:$0xff]  ;;  %v16518_v55 = vld [vmem:[#allocation181_spill] sm:$0xff] }
 0x491   : > { %v9778_v39 = vpop.permute.xlu0 %9777  ;;  %v14648_v19 = vsel %vm2036_vm6, %v2889_v53, %v9775_v59  ;;  %v14651_v17 = vsel %vm2036_vm6, %v2886_v5, %v9774_v29  ;;  %v14654_v25 = vsel %vm2036_vm6, %v2057_v26, %v9520_v7  ;;  %v14657_v13 = vsel %vm2036_vm6, %v2054_v46, %v9519_v18  ;;  %v16520_v26 = vld [vmem:[#allocation43_spill] sm:$0xff]  ;;  %v16522_v63 = vld [vmem:[#allocation138_spill] sm:$0xff] }
 0x492   : > { %v9780_v60 = vunpack.i.h.bf16 %v9778_v39  ;;  %v9779_v0 = vunpack.i.l.bf16 %v9778_v39  ;;  %v16516_v8 = vcombine.low %v16514_v30, %v16515_v35  ;;  %v16519_v59 = vcombine.low %v16517_v57, %v16518_v55  ;;  %v16523_v53 = vld [vmem:[#allocation54_spill] sm:$0xff] }
 0x493   : > { %v9337_v29 = vpack.c.bf16 %v14648_v19, %v14654_v25  ;;  %v9535_v40 = vunpack.i.h.bf16 %v16520_v26  ;;  %v9534_v18 = vunpack.i.l.bf16 %v16520_v26  ;;  %v16521_v46 = vcombine.low %v16406_v56, %v16405_v62 }
 0x494   : > { %v4418_v28 = vsel %vm2032_vm4, %v16516_v8, %v9525_v9  ;;  %v4415_v6 = vsel %vm2032_vm4, %v16519_v59, %v9524_v11  ;;  %v16524_v5 = vcombine.low %v16522_v63, %v16523_v53  ;;  %v9485_v39 = vunpack.i.h.bf16 %v16525_v41  ;;  %v14685_v57 = vpop.permute.xlu1 %9822 }
 0x495   : > { %v3714_v9 = vsel %vm2032_vm4, %v16521_v46, %v9780_v60  ;;  %v9484_v30 = vunpack.i.l.bf16 %v16525_v41  ;;  %v9785_v35 = vunpack.i.h.bf16 %v14578_v44  ;;  %v9784_v8 = vunpack.i.l.bf16 %v14578_v44  ;;  %v9788_v55 = vpop.permute.xlu0 %9787 }
 0x496   : > { %v3711_v11 = vsel %vm2032_vm4, %v16524_v5, %v9779_v0  ;;  %v4416_v62 = vsel %vm2034_vm5, %v4415_v6, %v9529_v50  ;;  %v9790_v56 = vunpack.i.h.bf16 %v9788_v55  ;;  %v9789_v60 = vunpack.i.l.bf16 %v9788_v55  ;;  %v16526_v6 = vld [vmem:[#allocation159_spill] sm:$0xff] }
 0x497   : > { %v4419_v59 = vsel %vm2034_vm5, %v4418_v28, %v9530_v21  ;;  %v9795_v26 = vunpack.i.h.bf16 %v14607_v51  ;;  %v9794_v0 = vunpack.i.l.bf16 %v14607_v51  ;;  %v3712_v46 = vsel %vm2034_vm5, %v3711_v11, %v9784_v8  ;;  %v16527_v8 = vld [vmem:[#allocation140_spill] sm:$0xff] }
 0x498   : > { %v3715_v63 = vsel %vm2034_vm5, %v3714_v9, %v9785_v35  ;;  %v4417_v53 = vsel %vm2036_vm6, %v4416_v62, %v9534_v18  ;;  %v3713_v44 = vsel %vm2036_vm6, %v3712_v46, %v9789_v60  ;;  %v4420_v50 = vsel %vm2036_vm6, %v4419_v59, %v9535_v40  ;;  %v14699_v55 = vpop.permute.xlu1 %8364  ;;  %v16528_v62 = vld [vmem:[#allocation75_spill] sm:$0xff]  ;;  %v16530_v60 = vld [vmem:[#allocation210_spill] sm:$0xff]  ;;  %v16531_v59 = vld [vmem:[#allocation221_spill] sm:$0xff] }
 0x499   : > { %v3716_v5 = vsel %vm2036_vm6, %v3715_v63, %v9790_v56  ;;  %v9490_v41 = vunpack.i.h.bf16 %v16526_v6  ;;  %v9489_v21 = vunpack.i.l.bf16 %v16526_v6  ;;  %v9327_v28 = vpack.c.bf16 %v4417_v53, %v3713_v44  ;;  %v9798_v51 = vpop.permute.xlu0 %9797 }
 0x49a   : > { %v9325_v7 = vpack.c.bf16 %v4420_v50, %v3716_v5  ;;  %v4422_v11 = vsel %vm2034_vm5, %v4421_v10, %v9484_v30  ;;  %v9800_v9 = vunpack.i.h.bf16 %v9798_v51  ;;  %v9799_v35 = vunpack.i.l.bf16 %v9798_v51 }
 0x49b   : > { %v4425_v18 = vsel %vm2034_vm5, %v4424_v52, %v9485_v39  ;;  %v16529_v56 = vcombine.low %v16527_v8, %v16528_v62  ;;  %v16532_v46 = vcombine.low %v16530_v60, %v16531_v59  ;;  %v9805_v53 = vunpack.i.h.bf16 %v14619_v27  ;;  %v16535_v60 = vld [vmem:[#allocation200_spill] sm:$0xff] }
 0x49c   : > { %v9804_v44 = vunpack.i.l.bf16 %v14619_v27  ;;  %9326 = vmatprep.subr.bf16.mxu0 %v9325_v7  ;;  %v14721_v5 = vsel %vm2036_vm6, %v4425_v18, %v9490_v41  ;;  %v14729_v7 = vsel %vm2036_vm6, %v4422_v11, %v9489_v21  ;;  %v9815_v41 = vunpack.i.h.bf16 %v14645_v37  ;;  %v16534_v11 = vld [vmem:[#allocation205_spill] sm:$0xff] }
 0x49d   : > { %v3720_v40 = vsel %vm2032_vm4, %v16529_v56, %v9795_v26  ;;  %v3717_v63 = vsel %vm2032_vm4, %v16532_v46, %v9794_v0  ;;  %9328 = vmatpush1.bf16.msra.mxu0 %v9327_v28  ;;  %v9808_v39 = vpop.permute.xlu0 %9807  ;;  %v9814_v18 = vunpack.i.l.bf16 %v14645_v37  ;;  %v16536_v59 = vcombine.low %v16534_v11, %v16535_v60  ;;  %v16541_v11 = vld [vmem:[#allocation196_spill] sm:$0xff] }
 0x49e   : > { %v3721_v10 = vsel %vm2034_vm5, %v3720_v40, %v9800_v9  ;;  %v3718_v30 = vsel %vm2034_vm5, %v3717_v63, %v9799_v35  ;;  %v14715_v52 = vpop.permute.xlu1 %8368  ;;  %v9810_v51 = vunpack.i.h.bf16 %v9808_v39  ;;  %v9809_v9 = vunpack.i.l.bf16 %v9808_v39 }
 0x49f   : > { %v14718_v26 = vsel %vm2036_vm6, %v3721_v10, %v9805_v53  ;;  %v14724_v0 = vsel %vm2036_vm6, %v3718_v30, %v9804_v44  ;;  %v16533_v40 = vcombine.low %v16410_v49, %v16409_v4  ;;  %v9825_v44 = vunpack.i.h.bf16 %v14685_v57  ;;  %v16537_v49 = vld [vmem:[#allocation85_spill] sm:$0xff] }
 0x4a0   : > { %v9341_v27 = vpack.c.bf16 %v14721_v5, %v14718_v26  ;;  %v6780_v46 = vsel %vm2032_vm4, %v16536_v59, %v9809_v9  ;;  %v9824_v10 = vunpack.i.l.bf16 %v14685_v57  ;;  %v16540_v9 = vld [vmem:[#allocation204_spill] sm:$0xff] }
 0x4a1   : > { %v9818_v28 = vpop.permute.xlu0 %9817  ;;  %v7612_v21 = vsel %vm2032_vm4, %v16533_v40, %v9810_v51 }
 0x4a2   : > { %v9820_v35 = vunpack.i.h.bf16 %v9818_v28  ;;  %v9819_v8 = vunpack.i.l.bf16 %v9818_v28  ;;  %v16538_v28 = vld [vmem:[#allocation27_spill] sm:$0xff] }
 0x4a3   : > { %v8373_v6 = vpop.permute.xlu1 %8372  ;;  %v16539_v51 = vcombine.low %v16537_v49, %v16538_v28 }
 0x4a4   : > { %v6781_v37 = vsel %vm2034_vm5, %v6780_v46, %v9819_v8  ;;  %v7613_v30 = vsel %vm2034_vm5, %v7612_v21, %v9820_v35 }
 0x4a5   : > { %v9828_v56 = vpop.permute.xlu0 %9827  ;;  %v7609_v40 = vsel %vm2032_vm4, %v16539_v51, %v9815_v41 }
 0x4a6   : > { %v9830_v63 = vunpack.i.h.bf16 %v9828_v56  ;;  %v9829_v53 = vunpack.i.l.bf16 %v9828_v56  ;;  %v16542_v56 = vcombine.low %v16540_v9, %v16541_v11 }
 0x4a7   : > { %v9843_v62 = vpop.permute.xlu1 %9842 }
 0x4a8   : > { %v6782_v39 = vsel %vm2036_vm6, %v6781_v37, %v9829_v53  ;;  %v7614_v4 = vsel %vm2036_vm6, %v7613_v30, %v9830_v63  ;;  %v6777_v60 = vsel %vm2032_vm4, %v16542_v56, %v9814_v18  ;;  %v9845_v8 = vunpack.i.h.bf16 %v9843_v62 }
 0x4a9   : > { %v9833_v57 = vpop.permute.xlu0 %9832  ;;  %v9317_v50 = vpack.c.bf16 %v7614_v4, %v6782_v39  ;;  %v9844_v46 = vunpack.i.l.bf16 %v9843_v62  ;;  %v6778_v53 = vsel %vm2034_vm5, %v6777_v60, %v9824_v10  ;;  %v7610_v63 = vsel %vm2034_vm5, %v7609_v40, %v9825_v44 }
 0x4aa   : > { %v9835_v35 = vunpack.i.h.bf16 %v9833_v57  ;;  %v9834_v21 = vunpack.i.l.bf16 %v9833_v57  ;;  %v16543_v39 = vcombine.low %v16291_v54, %v13702_v38  ;;  %v16544_v10 = vcombine.low %v16413_v45, %v16412_v1 }
 0x4ab   : > { %v9853_v59 = vpop.permute.xlu1 %9852  ;;  %9318 = vmatprep.subr.bf16.mxu1 %v9317_v50  ;;  %v16546_v45 = vcombine.low %v16408_v16, %v16407_v47 }
 0x4ac   : > { %v9855_v37 = vunpack.i.h.bf16 %v9853_v59  ;;  %v9854_v30 = vunpack.i.l.bf16 %v9853_v59  ;;  %v7611_v41 = vsel %vm2036_vm6, %v7610_v63, %v9835_v35  ;;  %v6779_v49 = vsel %vm2036_vm6, %v6778_v53, %v9834_v21 }
 0x4ad   : > { %v9319_v28 = vpack.c.bf16 %v7611_v41, %v6779_v49  ;;  %v8377_v51 = vpop.permute.xlu0 %8376  ;;  %v6079_v62 = vsel %vm2032_vm4, %v16543_v39, %v9845_v8  ;;  %v5247_v44 = vsel %vm2032_vm4, %v16544_v10, %v9844_v46  ;;  %v16545_v59 = vcombine.low %v16325_v34, %v14149_v14  ;;  %v16548_v41 = vld [vmem:[#allocation206_spill] sm:$0xff] }
 0x4ae   : > { %v5248_v50 = vsel %vm2034_vm5, %v5247_v44, %v9854_v30  ;;  %v6080_v9 = vsel %vm2034_vm5, %v6079_v62, %v9855_v37  ;;  %v8441_v57 = vsel %vm2032_vm4, %v16546_v45, %v14699_v55  ;;  %v16547_v55 = vcombine.low %v16322_v15, %v13760_v24 }
 0x4af   : > { %v9863_v18 = vpop.permute.xlu1 %9862  ;;  %9320 = vmatpush1.bf16.msra.mxu1 %v9319_v28  ;;  %v8444_v1 = vsel %vm2032_vm4, %v16545_v59, %v8377_v51  ;;  %v8442_v21 = vsel %vm2034_vm5, %v8441_v57, %v14715_v52  ;;  %v16551_v39 = vpack.c.bf16 %v14651_v17, %v14657_v13  ;;  %v16558_v59 = vpack.c.bf16 %v14551_v32, %v14554_v43 }
 0x4b0   : > { %v9865_v4 = vunpack.i.h.bf16 %v9863_v18  ;;  %v9864_v40 = vunpack.i.l.bf16 %v9863_v18  ;;  %v8443_v14 = vsel %vm2036_vm6, %v8442_v21, %v8373_v6  ;;  %v16549_v6 = vld [vmem:[#allocation201_spill] sm:$0xff] }
 0x4b1   : > { %v16550_v49 = vcombine.low %v16548_v41, %v16549_v6  ;;  %v16567_v6 = vld [vmem:[#allocation157_spill] sm:$0xff] }
 0x4b2   : > { %v5249_v11 = vsel %vm2036_vm6, %v5248_v50, %v9864_v40  ;;  %v6081_v56 = vsel %vm2036_vm6, %v6080_v9, %v9865_v4  ;;  %v16553_v40 = vpack.c.bf16 %v14506_v3, %v14503_v36  ;;  %v16555_v9 = vcombine.low %v16362_v58, %v16361_v2 }
 0x4b3   : > { %v9331_v60 = vpack.c.bf16 %v6081_v56, %v5249_v11  ;;  %v9868_v38 = vpop.permute.xlu1 %9867  ;;  %v16556_v56 = vpack.c.bf16 %v14518_v48, %v14515_v42 }
 0x4b4   : > { %v8381_v54 = vpop.permute.xlu0 %8380  ;;  %v9870_v53 = vunpack.i.h.bf16 %v9868_v38  ;;  %v9869_v63 = vunpack.i.l.bf16 %v9868_v38 }
 0x4b5   : > { %v8445_v8 = vsel %vm2034_vm5, %v8444_v1, %v8381_v54 }
 0x4b6   : > { %v7618_v52 = vsel %vm2032_vm4, %v16547_v55, %v9870_v53  ;;  %v6786_v28 = vsel %vm2032_vm4, %v16550_v49, %v9869_v63  ;;  %v16561_v53 = vld [vmem:[#allocation207_spill] sm:$0xff]  ;;  %v16562_v63 = vld [vmem:[#allocation208_spill] sm:$0xff] }
 0x4b7   : > { %v9878_v46 = vpop.permute.xlu1 %9877  ;;  %v16563_v32 = vcombine.low %v16561_v53, %v16562_v63  ;;  %v16564_v55 = vld [vmem:[#allocation179_spill] sm:$0xff]  ;;  %v16568_v49 = vld [vmem:[#allocation112_spill] sm:$0xff] }
 0x4b8   : > { %v9880_v34 = vunpack.i.h.bf16 %v9878_v46  ;;  %v9879_v30 = vunpack.i.l.bf16 %v9878_v46  ;;  %v16559_v46 = vld [vmem:[#allocation213_spill] sm:$0xff] }
 0x4b9   : > { %v8385_v35 = vpop.permute.xlu0 %8384 }
 0x4ba   : > { %v8446_v37 = vsel %vm2036_vm6, %v8445_v8, %v8385_v35  ;;  %v6787_v19 = vsel %vm2034_vm5, %v6786_v28, %v9879_v30  ;;  %v7619_v25 = vsel %vm2034_vm5, %v7618_v52, %v9880_v34  ;;  %v16560_v35 = vcombine.low %v16427_v22, %v16559_v46  ;;  %v16565_v22 = vld [vmem:[#allocation183_spill] sm:$0xff] }
 0x4bb   : > { %8637 = vmatprep.subr.mxu1 %v8446_v37  ;;  %v9888_v47 = vpop.permute.xlu1 %9887  ;;  %v16566_v52 = vcombine.low %v16564_v55, %v16565_v22  ;;  %v16569_v28 = vcombine.low %v16567_v6, %v16568_v49 }
 0x4bc   : > { %8638 = vmatpush1.msra.mxu1 %v8443_v14  ;;  %v9890_v18 = vunpack.i.h.bf16 %v9888_v47  ;;  %v9889_v51 = vunpack.i.l.bf16 %v9888_v47 }
 0x4bd   : > { %v9838_v16 = vpop.permute.xlu0 %9837  ;;  %9338 = vmatprep.subr.bf16.mxu1 %v9337_v29  ;;  %9118 = vmatmul.mubr.msk.f32.vlgmr.msra.gmra.mrb[16].mxu1 %vm8546_vm7, %v14469_v33 }
 0x4be   : > { %9340 = vmatpush1.bf16.msra.mxu1 %v16551_v39  ;;  %8827 = vmatprep.mubr.f32.mxu1 %v16455_v20  ;;  %v6788_v24 = vsel %vm2036_vm6, %v6787_v19, %v9889_v51  ;;  %v7620_v15 = vsel %vm2036_vm6, %v7619_v25, %v9890_v18  ;;  %v9840_v44 = vunpack.i.h.bf16 %v9838_v16  ;;  %v9839_v17 = vunpack.i.l.bf16 %v9838_v16 }
 0x4bf   : > { %9342 = vmatprep.subr.bf16.mxu1 %v9341_v27  ;;  %v9893_v29 = vpop.permute.xlu1 %9892  ;;  %v9333_v10 = vpack.c.bf16 %v7620_v15, %v6788_v24  ;;  %v16552_v20 = vpack.c.bf16 %v14729_v7, %v14724_v0  ;;  %v16554_v27 = vcombine.low %v16355_v12, %v16354_v61  ;;  %v16557_v61 = vpack.c.bf16 %v14546_v23, %v14543_v31 }
 0x4c0   : > { %v5250_v11 = vsel %vm2032_vm4, %v16555_v9, %v9839_v17  ;;  %v9895_v57 = vunpack.i.h.bf16 %v9893_v29  ;;  %v9894_v8 = vunpack.i.l.bf16 %v9893_v29 }
 0x4c1   : > { %v9848_v62 = vpop.permute.xlu0 %9847  ;;  %v6082_v50 = vsel %vm2032_vm4, %v16554_v27, %v9840_v44  ;;  %v16571_v44 = vld [vmem:[#allocation125_spill] sm:$0xff] }
 0x4c2   : > { %9344 = vmatpush1.bf16.msra.mxu1 %v16552_v20  ;;  %v9850_v13 = vunpack.i.h.bf16 %v9848_v62  ;;  %v9849_v4 = vunpack.i.l.bf16 %v9848_v62  ;;  %v16570_v62 = vld [vmem:[#allocation111_spill] sm:$0xff] }
 0x4c3   : > { %9346 = vmatprep.subr.bf16.mxu1 %v16553_v40  ;;  %v8401_v26 = vpop.permute.xlu1 %8400 }
 0x4c4   : > { %v5251_v36 = vsel %vm2034_vm5, %v5250_v11, %v9849_v4  ;;  %v6083_v3 = vsel %vm2034_vm5, %v6082_v50, %v9850_v13  ;;  %v8450_v41 = vsel %vm2032_vm4, %v16566_v52, %v8401_v26 }
 0x4c5   : > { %v9858_v5 = vpop.permute.xlu0 %9857 }
 0x4c6   : > { %v9860_v0 = vunpack.i.h.bf16 %v9858_v5  ;;  %v9859_v7 = vunpack.i.l.bf16 %v9858_v5  ;;  %9348 = vmatpush1.bf16.msra.mxu1 %v16556_v56 }
 0x4c7   : > { %9350 = vmatprep.subr.bf16.mxu1 %v16557_v61  ;;  %v8389_v58 = vpop.permute.xlu1 %8388 }
 0x4c8   : > { %v5252_v12 = vsel %vm2036_vm6, %v5251_v36, %v9859_v7  ;;  %v6084_v2 = vsel %vm2036_vm6, %v6083_v3, %v9860_v0  ;;  %v8447_v18 = vsel %vm2032_vm4, %v16569_v28, %v8389_v58 }
 0x4c9   : > { %v9873_v38 = vpop.permute.xlu0 %9872  ;;  %v9329_v54 = vpack.c.bf16 %v6084_v2, %v5252_v12 }
 0x4ca   : > { %9352 = vmatpush1.bf16.msra.mxu1 %v16558_v59  ;;  %v9875_v42 = vunpack.i.h.bf16 %v9873_v38  ;;  %v9874_v48 = vunpack.i.l.bf16 %v9873_v38 }
 0x4cb   : > { %9330 = vmatprep.subr.bf16.mxu0 %v9329_v54  ;;  %v8393_v1 = vpop.permute.xlu1 %8392 }
 0x4cc   : > { %9332 = vmatpush1.bf16.msra.mxu0 %v9331_v60  ;;  %v7615_v21 = vsel %vm2032_vm4, %v16560_v35, %v9875_v42  ;;  %v6783_v43 = vsel %vm2032_vm4, %v16563_v32, %v9874_v48  ;;  %v8448_v19 = vsel %vm2034_vm5, %v8447_v18, %v8393_v1 }
 0x4cd   : > { %v9883_v45 = vpop.permute.xlu0 %9882  ;;  %9334 = vmatprep.subr.bf16.mxu0 %v9333_v10 }
 0x4ce   : > { %v9885_v31 = vunpack.i.h.bf16 %v9883_v45  ;;  %v9884_v23 = vunpack.i.l.bf16 %v9883_v45 }
 0x4cf   : > { %v8397_v47 = vpop.permute.xlu1 %8396 }
 0x4d0   : > { %v6784_v37 = vsel %vm2034_vm5, %v6783_v43, %v9884_v23  ;;  %v7616_v60 = vsel %vm2034_vm5, %v7615_v21, %v9885_v31  ;;  %v8449_v24 = vsel %vm2036_vm6, %v8448_v19, %v8397_v47 }
 0x4d1   : > { %v8405_v14 = vpop.permute.xlu0 %8404  ;;  %v6785_v34 = vsel %vm2036_vm6, %v6784_v37, %v9894_v8  ;;  %v7617_v30 = vsel %vm2036_vm6, %v7616_v60, %v9895_v57 }
 0x4d2   : > { %v9335_v16 = vpack.c.bf16 %v7617_v30, %v6785_v34  ;;  %v8451_v51 = vsel %vm2034_vm5, %v8450_v41, %v8405_v14 }
 0x4d3   : > { %v8421_v15 = vpop.permute.xlu1 %8420 }
 0x4d4   : > { %9336 = vmatpush1.bf16.msra.mxu0 %v9335_v16  ;;  %v8455_v17 = vsel %vm2036_vm6, %v16571_v44, %v8421_v15 }
 0x4d5   : > { %v8409_v39 = vpop.permute.xlu0 %8408 }
 0x4d6   : > { %v8452_v25 = vsel %vm2036_vm6, %v8451_v51, %v8409_v39 }
 0x4d7   : > { %8708 = vmatprep.subr.mxu0 %v8452_v25 }
 0x4d8   : > { %8709 = vmatpush1.msra.mxu0 %v8449_v24 }
 0x4d9   : > { %v8433_v29 = vpop.permute.xlu0 %8432  ;;  %9119 = vmatmul.mubr.msk.f32.vlgmr.msra.gmra.mrb[18].mxu0 %vm8546_vm7, %v14469_v33 }
 0x4da   : > { %v8458_v10 = vsel %vm2036_vm6, %v16570_v62, %v8433_v29 }
 0x4db   : > { %8779 = vmatprep.subr.mxu1 %v8458_v10 }
 0x4dc   : > { %8780 = vmatpush1.msra.mxu1 %v8455_v17 }
 0x4dd   : > { %9120 = vmatmul.mubr.msk.f32.vlgmr.msra.gmra.mrb[18].mxu1 %vm8546_vm7, %v14469_v33 }
 0x4ea   : > { %v8544_v20 = vpop.permute.xlu0 %8543 }
 0x532   : > { %v8616_v13 = vpop.f32.mrb[16].mxu0 }
 0x533   : > { %v8617_v4 = vadd.f32 %v8616_v13, %v8544_v20  ;;  %v8618_v40 = vpop.f32.mrb[17].mxu0 }
 0x534   : > { %v8619_v26 = vadd.f32 %v8618_v40, %v8544_v20 }
 0x535   : > { %v8855_v5 = vsel %vm8854_vm8, %v8617_v4, 0.0  ;;  %v8874_v27 = vmul.f32 %v8617_v4, %v8617_v4 }
 0x536   : > { %v8842_v50 = vcombine.low %v8617_v4, %v8619_v26  ;;  %v8856_v9 = vsel %vm8854_vm8, %v8619_v26, 0.0  ;;  %v8875_v11 = vmul.f32 %v8619_v26, %v8619_v26 }
 0x537   : > { %v8857_v0 = vadd.f32 %v8856_v9, %v8855_v5  ;;  %v8882_v7 = vsel %vm8854_vm8, %v8874_v27, 0.0 }
 0x538   : > { %8850 = vst [vmem:[%s14874_s0] sm:$0xff] %v8842_v50  ;;  %v8883_v33 = vsel %vm8854_vm8, %v8875_v11, 0.0 }
 0x539   : > { %v8884_v56 = vadd.f32 %v8883_v33, %v8882_v7 }
 0x590   : > { %v8687_v36 = vpop.f32.mrb[16].mxu1 }
 0x591   : > { %v8688_v3 = vadd.f32 %v8687_v36, %v8544_v20  ;;  %v8689_v61 = vpop.f32.mrb[17].mxu1 }
 0x592   : > { %v8690_v12 = vadd.f32 %v8689_v61, %v8544_v20 }
 0x593   : > { %v8858_v2 = vsel %vm8854_vm8, %v8688_v3, 0.0  ;;  %v8876_v58 = vmul.f32 %v8688_v3, %v8688_v3 }
 0x594   : > { %v8859_v38 = vadd.f32 %v8858_v2, %v8857_v0  ;;  %v8843_v54 = vcombine.low %v8688_v3, %v8690_v12  ;;  %v8860_v59 = vsel %vm8854_vm8, %v8690_v12, 0.0  ;;  %v8877_v42 = vmul.f32 %v8690_v12, %v8690_v12 }
 0x595   : > { %v8885_v48 = vsel %vm8854_vm8, %v8876_v58, 0.0 }
 0x596   : > { %v8886_v1 = vadd.f32 %v8885_v48, %v8884_v56  ;;  %8851 = vst [vmem:[%s14874_s0 + $0x8] sm:$0xff] %v8843_v54  ;;  %v8861_v45 = vadd.f32 %v8860_v59, %v8859_v38  ;;  %v8887_v31 = vsel %vm8854_vm8, %v8877_v42, 0.0 }
 0x598   : > { %v8888_v23 = vadd.f32 %v8887_v31, %v8886_v1 }
 0x5ac   : > { %v8758_v57 = vpop.f32.mrb[18].mxu0 }
 0x5ad   : > { %v8759_v8 = vadd.f32 %v8758_v57, %v8544_v20  ;;  %v8760_v46 = vpop.f32.mrb[19].mxu0 }
 0x5ae   : > { %v8761_v35 = vadd.f32 %v8760_v46, %v8544_v20 }
 0x5af   : > { %v8862_v21 = vsel %vm8854_vm8, %v8759_v8, 0.0  ;;  %v8878_v53 = vmul.f32 %v8759_v8, %v8759_v8 }
 0x5b0   : > { %v8863_v63 = vadd.f32 %v8862_v21, %v8861_v45  ;;  %v8844_v32 = vcombine.low %v8759_v8, %v8761_v35  ;;  %v8864_v43 = vsel %vm8854_vm8, %v8761_v35, 0.0  ;;  %v8879_v37 = vmul.f32 %v8761_v35, %v8761_v35  ;;  %v8829_v60 = vpop.f32.mrb[18].mxu1 }
 0x5b1   : > { %v8889_v14 = vsel %vm8854_vm8, %v8878_v53, 0.0  ;;  %v8830_v34 = vadd.f32 %v8829_v60, %v8544_v20  ;;  %v8831_v30 = vpop.f32.mrb[19].mxu1 }
 0x5b2   : > { %v8890_v47 = vadd.f32 %v8889_v14, %v8888_v23  ;;  %8852 = vst [vmem:[%s14874_s0 + $0x10] sm:$0xff] %v8844_v32  ;;  %v8865_v16 = vadd.f32 %v8864_v43, %v8863_v63  ;;  %v8891_v55 = vsel %vm8854_vm8, %v8879_v37, 0.0  ;;  %v8832_v22 = vadd.f32 %v8831_v30, %v8544_v20 }
 0x5b3   : > { %v8866_v52 = vsel %vm8854_vm8, %v8830_v34, 0.0  ;;  %v8880_v41 = vmul.f32 %v8830_v34, %v8830_v34 }
 0x5b4   : > { %v8845_v6 = vcombine.low %v8830_v34, %v8832_v22  ;;  %v8881_v49 = vmul.f32 %v8832_v22, %v8832_v22  ;;  %v8867_v28 = vadd.f32 %v8866_v52, %v8865_v16  ;;  %v8868_v18 = vsel %vm8854_vm8, %v8832_v22, 0.0 }
 0x5b5   : > { %v8892_v51 = vadd.f32 %v8891_v55, %v8890_v47  ;;  %v8893_v39 = vsel %vm8854_vm8, %v8880_v41, 0.0 }
 0x5b6   : > { %8853 = vst [vmem:[%s14874_s0 + $0x18] sm:$0xff] %v8845_v6  ;;  %v8869_v19 = vadd.f32 %v8868_v18, %v8867_v28  ;;  %v8895_v25 = vsel %vm8854_vm8, %v8881_v49, 0.0 }
 0x5b7   : > { %v8894_v24 = vadd.f32 %v8893_v39, %v8892_v51 }
 0x5b8   : > { %8870 = vadd.xlane.f32.xlu1 %v8869_v19 }
 0x5b9   : > { %v8896_v15 = vadd.f32 %v8895_v25, %v8894_v24 }
 0x5bb   : > { %8897 = vadd.xlane.f32.xlu0 %v8896_v15 }
 0x5bc   : > { %10090 = shalt.err (!%p10087_p11)
}
 0x5bd   : > { %s10091_s26 = scalar_lea.hbm %s14897_s29, 512  ;;  %s10095_s12 = scalar_lea.hbm %s14950_s6, 1024 }
 0x5be   : > { %p10092_p3 = scmp.ne.s32.totalorder %s14897_s29, %s10091_s26  ;;  %p10096_p2 = scmp.lt.u32.totalorder %s14897_s29, %s14950_s6 }
 0x5bf   : > { %p10097_p4 = scmp.lt.u32.totalorder %s10095_s12, %s10091_s26  ;;  %p10099_p13 = scmp.lt.u32.totalorder %s10091_s26, %s14897_s29 }
 0x5c0   : > { %p10093_p8 = pnand %p10092_p3, %p16572_p1 }
 0x5c1   : > { %p10098_p6 = por %p10097_p4, %p10096_p2 }
 0x5c2   : > { %p10094_p0 = pneg %p10093_p8 }
 0x5c3   : > { %p10100_p12 = por %p10099_p13, %p10098_p6 }
 0x5c5   : > { %p10101_p10 = pnand %p10100_p12, %p10094_p0 }
 0x5c7   : > { %10104 = shalt.err (!%p10101_p10)
}
 0x5c8   : > { %9357 = dma.vmem_to_hbm [thread:$0]  (%p16572_p1), %s8924_s19, 512, %s14897_s29, %s8901_s13   ;;  %vm8872_vm9 = vcmask 3072  }
 0x5c9   : > { %p377_p5 = scmp.lt.s32.totalorder %s10230_s9, 1 }
 0x5cb   : > { %s16582_s9 = smov (!%p377_p5, %s10230_s9), 1 }
 0x5cc   : > { %s9083_s21 = sshll.u32 %s16582_s9, 2 }
 0x5cd   : > { %s380_s16 = scalar_lea.vmem %s14951_s7, %s9083_s21  ;;  %s384_s22 = scalar_lea.vmem %s14952_s8, %s9083_s21 }
 0x645   : > { %v8871_v29 = vpop.xlane.xlu1 %8870 }
 0x646   : > { %8873 = vst.msk [vmem:[%s380_s16] sm:$0xf] %vm8872_vm9, %v8871_v29 }
 0x648   : > { %v8898_v62 = vpop.xlane.xlu0 %8897 }
 0x649   : > { %8899 = vst.msk [vmem:[%s384_s22] sm:$0xf] %vm8872_vm9, %v8898_v62 }
 0x64a PF: > { %s8941_s17 = sand.u32 1, %s10135_s27   ;;  %p16573_p1 = scmp.ne.s32.totalorder %s15449_s18, 0 }
 0x64b   : > { %p16574_p7 = scmp.ge.s32.totalorder %s10147_s30, 2  ;;  %s8942_s9 = scalar_lea.sflag [#allocation6], %s8941_s17 }
 0x64d   : > { %p9367_p9 = pnand %p16574_p7, %p16573_p1 }
 0x64f   : > { %10130 = dma.done.wait (!%p9367_p9), %s8942_s9, 512  }
 0x650   : > { %10132 = vsyncadd (!%p9367_p9), %s8942_s9, 4294966784  ;;  %s16575_s29 = sld [smem:[#allocation13_spill]]  ;;  %s16576_s19 = sld [smem:[#allocation14_spill]] }
 0x651   : > { %p25_p11 = scmp.ge.s32.totalorder %s10234_s11, 4   ;;  %s16577_s27 = smov %s10139_s28 }
 0x652   : > { %s16580_s30 = smov %s10234_s11 }
 0x653   :  { %27 = sbr.rel (!%p25_p11) target bundleno = 9 (0x9), region = 127 }
 0x656   : > { %s16578_s28 = smov %s16575_s29  ;;  %s16579_s29 = smov %s16576_s19 }
 0x65a   :  { %8961 = vsyncpa [#allocation5], 1 }
 0x65b   :  { %8963 = vsyncpa [#allocation5 + $0x1], 1 }
 0x65c   :  { %8964 = vsyncpa [#allocation8], 1 }
 0x65d   :  { %8966 = vsyncpa [#allocation8 + $0x1], 1 }
 0x65e   :  { %8967 = vsyncpa [#allocation6], 1 }
 0x65f   :  { %8969 = vsyncpa [#allocation6 + $0x1], 1 }

</bundles_post_ra>
